<compile_context>
chip_gen: v7x
topology: tpu7x:2x2x1
jax: 0.10.0
libtpu: 0.0.40
codegen_flags: <defaults>
</compile_context>

<pallas_src>
import functools

import jax
import jax.numpy as jnp
from jax import lax
from jax.experimental import pallas as pl
from jax.experimental.pallas import tpu as pltpu


def _ca_block_kernel(x_ref, w1_ref, w2_ref, alpha_ref, mask_ref, o_ref,
                     *, C, b1, Wp):
    # x_ref    : (1, C, Lpad)  VMEM  flat zero-padded input planes (lane-dense)
    # w1_ref   : (9*C*b1,)     SMEM  conv1 weights, flat index (k*C + ci)*b1 + co
    # w2_ref   : (9*b1*b1,)    SMEM  conv2 weights
    # alpha_ref: (1,)          SMEM  PReLU slope
    # mask_ref : (1, Lpad)     VMEM  1.0 at interior pixels, 0.0 on border/tail
    # o_ref    : (1, C, Lpad)  VMEM  padded-plane output (wrapper crops interior)
    x = x_ref[0]                       # (C, Lpad) f32, channels in sublanes
    mask = mask_ref[...]               # (1, Lpad)
    alpha = alpha_ref[0]               # scalar

    # 3x3 tap offsets on the flat padded plane.
    offs = tuple((kh - 1) * Wp + (kw - 1) for kh in range(3) for kw in range(3))

    def conv3x3_vpu(planes, cin, cout, w_ref):
        # planes: (cin, Lpad). Returns (cout, Lpad); only interior pixels valid.
        rows = [None] * cout
        for k, off in enumerate(offs):
            # Circular shift so that shifted[:, i] == planes[:, i + off] for
            # every interior i (the wrap never reaches an interior read).
            # This is two static lane slices + a concat on a ~3-vreg value,
            # fully in registers; pltpu.roll is the XLU-slot equivalent.
            shifted = planes if off == 0 else jnp.roll(planes, -off, axis=1)
            for ci in range(cin):
                row = shifted[ci:ci + 1, :]            # (1, Lpad)
                base = (k * cin + ci) * cout
                for co in range(cout):
                    term = w_ref[base + co] * row      # VPU scalar-broadcast FMA
                    rows[co] = term if rows[co] is None else rows[co] + term
        return jnp.concatenate(rows, axis=0)           # (cout, Lpad)

    # conv1 -> PReLU -> border mask (re-creates zero padding for conv2).
    y1 = conv3x3_vpu(x, C, b1, w1_ref)
    y1 = jnp.where(y1 > 0, y1, alpha * y1)
    y1 = y1 * mask

    # conv2; MaxPool2d(kernel_size=1, stride=1) is the identity -> nothing to do.
    y2 = conv3x3_vpu(y1, b1, b1, w2_ref)

    # residual add + gating multiply: x3 = x0 * (x0 + x1). Valid on the
    # interior; border/tail garbage is cropped by the wrapper.  Full-block,
    # lane-dense, unmasked store.
    o_ref[0] = (x * (x + y2)).astype(o_ref.dtype)


def ca_block(x, w1, alpha, w2):
    """x: (B, C, H, W) NCHW; w1: (b1, C, 3, 3); w2: (b1, b1, 3, 3); alpha scalar."""
    B, C, H, W = x.shape
    b1 = w1.shape[0]
    assert w1.shape == (b1, C, 3, 3) and w2.shape == (b1, b1, 3, 3)
    assert b1 == C, "the residual add x0 + x1 requires conv channels == in channels"

    Hp, Wp = H + 2, W + 2
    L = Hp * Wp
    Lpad = max(128, ((L + 127) // 128) * 128)          # lane-dense flat length

    f32 = jnp.float32
    # NCHW -> zero-padded channel planes, spatial flattened into the lane dim.
    xpad = jnp.pad(x.astype(f32), ((0, 0), (0, 0), (1, 1), (1, 1)))
    xflat = jnp.pad(xpad.reshape(B, C, L), ((0, 0), (0, 0), (0, Lpad - L)))

    # (Cout, Cin, kh, kw) -> flat (k, ci, co) scalar tables for SMEM (casts
    # hoisted out of the kernel).
    w1_s = jnp.transpose(w1.astype(f32), (2, 3, 1, 0)).reshape(-1)   # (9*C*b1,)
    w2_s = jnp.transpose(w2.astype(f32), (2, 3, 1, 0)).reshape(-1)   # (9*b1*b1,)
    alpha_s = jnp.asarray(alpha, f32).reshape(1)

    # Interior mask over the flat padded plane (1 inside H x W, 0 on the
    # 1-pixel border and on the lane-padding tail).
    hh = jnp.arange(Hp)[:, None]
    ww = jnp.arange(Wp)[None, :]
    m2d = ((hh >= 1) & (hh <= H) & (ww >= 1) & (ww <= W)).astype(f32)
    mask = jnp.pad(m2d.reshape(1, L), ((0, 0), (0, Lpad - L)))        # (1, Lpad)

    kernel = functools.partial(_ca_block_kernel, C=C, b1=b1, Wp=Wp)

    flops = B * H * W * (2 * 9 * C * b1 + 2 * 9 * b1 * b1 + 2 * b1 + 2 * C)
    bytes_accessed = 4 * (xflat.size + w1_s.size + w2_s.size + alpha_s.size
                          + mask.size + B * C * Lpad)

    out_flat = pl.pallas_call(
        kernel,
        out_shape=jax.ShapeDtypeStruct((B, C, Lpad), f32),
        grid_spec=pltpu.PrefetchScalarGridSpec(
            num_scalar_prefetch=0,
            grid=(B,),
            in_specs=[
                pl.BlockSpec((1, C, Lpad), lambda b: (b, 0, 0)),       # x planes
                pl.BlockSpec(memory_space=pltpu.MemorySpace.SMEM),     # w1 scalars
                pl.BlockSpec(memory_space=pltpu.MemorySpace.SMEM),     # w2 scalars
                pl.BlockSpec(memory_space=pltpu.MemorySpace.SMEM),     # alpha
                pl.BlockSpec((1, Lpad), lambda b: (0, 0)),             # border mask
            ],
            out_specs=pl.BlockSpec((1, C, Lpad), lambda b: (b, 0, 0)),
        ),
        compiler_params=pltpu.CompilerParams(
            dimension_semantics=("parallel",),
            vmem_limit_bytes=32 * 1024 * 1024),
        cost_estimate=pl.CostEstimate(flops=flops, transcendentals=0,
                                      bytes_accessed=bytes_accessed),
    )(xflat, w1_s, w2_s, alpha_s, mask)

    # Crop the interior and restore NCHW (pure layout plumbing).
    out = out_flat[:, :, :L].reshape(B, C, Hp, Wp)[:, :, 1:H + 1, 1:W + 1]
    return out.astype(x.dtype)


def ca_block_reference(x, w1, alpha, w2):
    dn = lax.conv_dimension_numbers(x.shape, w1.shape, ("NCHW", "OIHW", "NCHW"))
    y = lax.conv_general_dilated(x, w1, (1, 1), ((1, 1), (1, 1)),
                                 dimension_numbers=dn,
                                 precision=lax.Precision.HIGHEST)
    y = jnp.where(y > 0, y, alpha * y)
    y = lax.conv_general_dilated(y, w2, (1, 1), ((1, 1), (1, 1)),
                                 dimension_numbers=dn,
                                 precision=lax.Precision.HIGHEST)
    # MaxPool2d(kernel_size=1, stride=1) is the identity.
    return x * (x + y)


if __name__ == "__main__":
    B, C, H, W = 2, 4, 16, 16
    b1 = C  # the module's residual add requires out channels == in channels

    key = jax.random.PRNGKey(0)
    kx, k1, k2 = jax.random.split(key, 3)
    x = jax.random.normal(kx, (B, C, H, W), dtype=jnp.float32)
    w1 = jax.random.normal(k1, (b1, C, 3, 3), dtype=jnp.float32) * 0.1
    w2 = jax.random.normal(k2, (b1, b1, 3, 3), dtype=jnp.float32) * 0.1
    alpha = 0.25  # nn.PReLU() default init

    out = ca_block(x, w1, alpha, w2)
    jax.block_until_ready(out)

    ref = ca_block_reference(x, w1, alpha, w2)
    assert out.shape == ref.shape
    assert jnp.allclose(out, ref, atol=1e-3, rtol=1e-3), "mismatch vs reference"

    print("KERNEL_OK")
</pallas_src>

<mosaic_0001>
module attributes {stable_mosaic.version = 11 : i64} {
  func.func @_ca_block_kernel(%arg0: i32, %arg1: memref<1x4x384xf32, #tpu.memory_space<vmem>>, %arg2: memref<144xf32, #tpu.memory_space<smem>>, %arg3: memref<144xf32, #tpu.memory_space<smem>>, %arg4: memref<1xf32, #tpu.memory_space<smem>>, %arg5: memref<1x384xf32, #tpu.memory_space<vmem>>, %arg6: memref<1x4x384xf32, #tpu.memory_space<vmem>>) attributes {dimension_semantics = [#tpu.dimension_semantics<parallel>], iteration_bounds = array<i64: 2>, scalar_prefetch = 0 : i64, scratch_operands = 0 : i64, tpu.core_type = #tpu.core_type<tc>, window_params = [{transform_indices = @transform_0, window_bounds = array<i64: 1, 4, 384>}, {transform_indices = @transform_1, window_bounds = array<i64: 144>}, {transform_indices = @transform_2, window_bounds = array<i64: 144>}, {transform_indices = @transform_3, window_bounds = array<i64: 1>}, {pipeline_mode = #tpu.pipeline_mode<synchronous>, transform_indices = @transform_4, window_bounds = array<i64: 1, 384>}, {transform_indices = @transform_5, window_bounds = array<i64: 1, 4, 384>}]} {
    %c0 = arith.constant 0 : index
    %c0_0 = arith.constant 0 : index
    %c0_1 = arith.constant 0 : index
    %0 = vector.load %arg1[%c0, %c0_0, %c0_1] : memref<1x4x384xf32, #tpu.memory_space<vmem>>, vector<1x4x384xf32>
    %1 = vector.shape_cast %0 : vector<1x4x384xf32> to vector<4x384xf32>
    %c0_2 = arith.constant 0 : index
    %c0_3 = arith.constant 0 : index
    %2 = vector.load %arg5[%c0_2, %c0_3] : memref<1x384xf32, #tpu.memory_space<vmem>>, vector<1x384xf32>
    %c0_4 = arith.constant 0 : index
    %3 = memref.load %arg4[%c0_4] : memref<1xf32, #tpu.memory_space<smem>>
    %4 = vector.extract_strided_slice %1 {offsets = [0, 365], sizes = [4, 19], strides = [1, 1]} : vector<4x384xf32> to vector<4x19xf32>
    %5 = vector.extract_strided_slice %1 {offsets = [0, 0], sizes = [4, 365], strides = [1, 1]} : vector<4x384xf32> to vector<4x365xf32>
    %6 = tpu.concatenate %4, %5 in 1 : vector<4x19xf32>, vector<4x365xf32> -> vector<4x384xf32>
    %7 = vector.extract_strided_slice %6 {offsets = [0, 0], sizes = [1, 384], strides = [1, 1]} : vector<4x384xf32> to vector<1x384xf32>
    %c0_5 = arith.constant 0 : index
    %8 = memref.load %arg2[%c0_5] : memref<144xf32, #tpu.memory_space<smem>>
    %9 = vector.broadcast %8 : f32 to vector<1x384xf32>
    %10 = arith.mulf %9, %7 : vector<1x384xf32>
    %c1 = arith.constant 1 : index
    %11 = memref.load %arg2[%c1] : memref<144xf32, #tpu.memory_space<smem>>
    %12 = vector.broadcast %11 : f32 to vector<1x384xf32>
    %13 = arith.mulf %12, %7 : vector<1x384xf32>
    %c2 = arith.constant 2 : index
    %14 = memref.load %arg2[%c2] : memref<144xf32, #tpu.memory_space<smem>>
    %15 = vector.broadcast %14 : f32 to vector<1x384xf32>
    %16 = arith.mulf %15, %7 : vector<1x384xf32>
    %c3 = arith.constant 3 : index
    %17 = memref.load %arg2[%c3] : memref<144xf32, #tpu.memory_space<smem>>
    %18 = vector.broadcast %17 : f32 to vector<1x384xf32>
    %19 = arith.mulf %18, %7 : vector<1x384xf32>
    %20 = vector.extract_strided_slice %6 {offsets = [1, 0], sizes = [1, 384], strides = [1, 1]} : vector<4x384xf32> to vector<1x384xf32>
    %c4 = arith.constant 4 : index
    %21 = memref.load %arg2[%c4] : memref<144xf32, #tpu.memory_space<smem>>
    %22 = vector.broadcast %21 : f32 to vector<1x384xf32>
    %23 = arith.mulf %22, %20 : vector<1x384xf32>
    %24 = arith.addf %10, %23 : vector<1x384xf32>
    %c5 = arith.constant 5 : index
    %25 = memref.load %arg2[%c5] : memref<144xf32, #tpu.memory_space<smem>>
    %26 = vector.broadcast %25 : f32 to vector<1x384xf32>
    %27 = arith.mulf %26, %20 : vector<1x384xf32>
    %28 = arith.addf %13, %27 : vector<1x384xf32>
    %c6 = arith.constant 6 : index
    %29 = memref.load %arg2[%c6] : memref<144xf32, #tpu.memory_space<smem>>
    %30 = vector.broadcast %29 : f32 to vector<1x384xf32>
    %31 = arith.mulf %30, %20 : vector<1x384xf32>
    %32 = arith.addf %16, %31 : vector<1x384xf32>
    %c7 = arith.constant 7 : index
    %33 = memref.load %arg2[%c7] : memref<144xf32, #tpu.memory_space<smem>>
    %34 = vector.broadcast %33 : f32 to vector<1x384xf32>
    %35 = arith.mulf %34, %20 : vector<1x384xf32>
    %36 = arith.addf %19, %35 : vector<1x384xf32>
    %37 = vector.extract_strided_slice %6 {offsets = [2, 0], sizes = [1, 384], strides = [1, 1]} : vector<4x384xf32> to vector<1x384xf32>
    %c8 = arith.constant 8 : index
    %38 = memref.load %arg2[%c8] : memref<144xf32, #tpu.memory_space<smem>>
    %39 = vector.broadcast %38 : f32 to vector<1x384xf32>
    %40 = arith.mulf %39, %37 : vector<1x384xf32>
    %41 = arith.addf %24, %40 : vector<1x384xf32>
    %c9 = arith.constant 9 : index
    %42 = memref.load %arg2[%c9] : memref<144xf32, #tpu.memory_space<smem>>
    %43 = vector.broadcast %42 : f32 to vector<1x384xf32>
    %44 = arith.mulf %43, %37 : vector<1x384xf32>
    %45 = arith.addf %28, %44 : vector<1x384xf32>
    %c10 = arith.constant 10 : index
    %46 = memref.load %arg2[%c10] : memref<144xf32, #tpu.memory_space<smem>>
    %47 = vector.broadcast %46 : f32 to vector<1x384xf32>
    %48 = arith.mulf %47, %37 : vector<1x384xf32>
    %49 = arith.addf %32, %48 : vector<1x384xf32>
    %c11 = arith.constant 11 : index
    %50 = memref.load %arg2[%c11] : memref<144xf32, #tpu.memory_space<smem>>
    %51 = vector.broadcast %50 : f32 to vector<1x384xf32>
    %52 = arith.mulf %51, %37 : vector<1x384xf32>
    %53 = arith.addf %36, %52 : vector<1x384xf32>
    %54 = vector.extract_strided_slice %6 {offsets = [3, 0], sizes = [1, 384], strides = [1, 1]} : vector<4x384xf32> to vector<1x384xf32>
    %c12 = arith.constant 12 : index
    %55 = memref.load %arg2[%c12] : memref<144xf32, #tpu.memory_space<smem>>
    %56 = vector.broadcast %55 : f32 to vector<1x384xf32>
    %57 = arith.mulf %56, %54 : vector<1x384xf32>
    %58 = arith.addf %41, %57 : vector<1x384xf32>
    %c13 = arith.constant 13 : index
    %59 = memref.load %arg2[%c13] : memref<144xf32, #tpu.memory_space<smem>>
    %60 = vector.broadcast %59 : f32 to vector<1x384xf32>
    %61 = arith.mulf %60, %54 : vector<1x384xf32>
    %62 = arith.addf %45, %61 : vector<1x384xf32>
    %c14 = arith.constant 14 : index
    %63 = memref.load %arg2[%c14] : memref<144xf32, #tpu.memory_space<smem>>
    %64 = vector.broadcast %63 : f32 to vector<1x384xf32>
    %65 = arith.mulf %64, %54 : vector<1x384xf32>
    %66 = arith.addf %49, %65 : vector<1x384xf32>
    %c15 = arith.constant 15 : index
    %67 = memref.load %arg2[%c15] : memref<144xf32, #tpu.memory_space<smem>>
    %68 = vector.broadcast %67 : f32 to vector<1x384xf32>
    %69 = arith.mulf %68, %54 : vector<1x384xf32>
    %70 = arith.addf %53, %69 : vector<1x384xf32>
    %71 = vector.extract_strided_slice %1 {offsets = [0, 366], sizes = [4, 18], strides = [1, 1]} : vector<4x384xf32> to vector<4x18xf32>
    %72 = vector.extract_strided_slice %1 {offsets = [0, 0], sizes = [4, 366], strides = [1, 1]} : vector<4x384xf32> to vector<4x366xf32>
    %73 = tpu.concatenate %71, %72 in 1 : vector<4x18xf32>, vector<4x366xf32> -> vector<4x384xf32>
    %74 = vector.extract_strided_slice %73 {offsets = [0, 0], sizes = [1, 384], strides = [1, 1]} : vector<4x384xf32> to vector<1x384xf32>
    %c16 = arith.constant 16 : index
    %75 = memref.load %arg2[%c16] : memref<144xf32, #tpu.memory_space<smem>>
    %76 = vector.broadcast %75 : f32 to vector<1x384xf32>
    %77 = arith.mulf %76, %74 : vector<1x384xf32>
    %78 = arith.addf %58, %77 : vector<1x384xf32>
    %c17 = arith.constant 17 : index
    %79 = memref.load %arg2[%c17] : memref<144xf32, #tpu.memory_space<smem>>
    %80 = vector.broadcast %79 : f32 to vector<1x384xf32>
    %81 = arith.mulf %80, %74 : vector<1x384xf32>
    %82 = arith.addf %62, %81 : vector<1x384xf32>
    %c18 = arith.constant 18 : index
    %83 = memref.load %arg2[%c18] : memref<144xf32, #tpu.memory_space<smem>>
    %84 = vector.broadcast %83 : f32 to vector<1x384xf32>
    %85 = arith.mulf %84, %74 : vector<1x384xf32>
    %86 = arith.addf %66, %85 : vector<1x384xf32>
    %c19 = arith.constant 19 : index
    %87 = memref.load %arg2[%c19] : memref<144xf32, #tpu.memory_space<smem>>
    %88 = vector.broadcast %87 : f32 to vector<1x384xf32>
    %89 = arith.mulf %88, %74 : vector<1x384xf32>
    %90 = arith.addf %70, %89 : vector<1x384xf32>
    %91 = vector.extract_strided_slice %73 {offsets = [1, 0], sizes = [1, 384], strides = [1, 1]} : vector<4x384xf32> to vector<1x384xf32>
    %c20 = arith.constant 20 : index
    %92 = memref.load %arg2[%c20] : memref<144xf32, #tpu.memory_space<smem>>
    %93 = vector.broadcast %92 : f32 to vector<1x384xf32>
    %94 = arith.mulf %93, %91 : vector<1x384xf32>
    %95 = arith.addf %78, %94 : vector<1x384xf32>
    %c21 = arith.constant 21 : index
    %96 = memref.load %arg2[%c21] : memref<144xf32, #tpu.memory_space<smem>>
    %97 = vector.broadcast %96 : f32 to vector<1x384xf32>
    %98 = arith.mulf %97, %91 : vector<1x384xf32>
    %99 = arith.addf %82, %98 : vector<1x384xf32>
    %c22 = arith.constant 22 : index
    %100 = memref.load %arg2[%c22] : memref<144xf32, #tpu.memory_space<smem>>
    %101 = vector.broadcast %100 : f32 to vector<1x384xf32>
    %102 = arith.mulf %101, %91 : vector<1x384xf32>
    %103 = arith.addf %86, %102 : vector<1x384xf32>
    %c23 = arith.constant 23 : index
    %104 = memref.load %arg2[%c23] : memref<144xf32, #tpu.memory_space<smem>>
    %105 = vector.broadcast %104 : f32 to vector<1x384xf32>
    %106 = arith.mulf %105, %91 : vector<1x384xf32>
    %107 = arith.addf %90, %106 : vector<1x384xf32>
    %108 = vector.extract_strided_slice %73 {offsets = [2, 0], sizes = [1, 384], strides = [1, 1]} : vector<4x384xf32> to vector<1x384xf32>
    %c24 = arith.constant 24 : index
    %109 = memref.load %arg2[%c24] : memref<144xf32, #tpu.memory_space<smem>>
    %110 = vector.broadcast %109 : f32 to vector<1x384xf32>
    %111 = arith.mulf %110, %108 : vector<1x384xf32>
    %112 = arith.addf %95, %111 : vector<1x384xf32>
    %c25 = arith.constant 25 : index
    %113 = memref.load %arg2[%c25] : memref<144xf32, #tpu.memory_space<smem>>
    %114 = vector.broadcast %113 : f32 to vector<1x384xf32>
    %115 = arith.mulf %114, %108 : vector<1x384xf32>
    %116 = arith.addf %99, %115 : vector<1x384xf32>
    %c26 = arith.constant 26 : index
    %117 = memref.load %arg2[%c26] : memref<144xf32, #tpu.memory_space<smem>>
    %118 = vector.broadcast %117 : f32 to vector<1x384xf32>
    %119 = arith.mulf %118, %108 : vector<1x384xf32>
    %120 = arith.addf %103, %119 : vector<1x384xf32>
    %c27 = arith.constant 27 : index
    %121 = memref.load %arg2[%c27] : memref<144xf32, #tpu.memory_space<smem>>
    %122 = vector.broadcast %121 : f32 to vector<1x384xf32>
    %123 = arith.mulf %122, %108 : vector<1x384xf32>
    %124 = arith.addf %107, %123 : vector<1x384xf32>
    %125 = vector.extract_strided_slice %73 {offsets = [3, 0], sizes = [1, 384], strides = [1, 1]} : vector<4x384xf32> to vector<1x384xf32>
    %c28 = arith.constant 28 : index
    %126 = memref.load %arg2[%c28] : memref<144xf32, #tpu.memory_space<smem>>
    %127 = vector.broadcast %126 : f32 to vector<1x384xf32>
    %128 = arith.mulf %127, %125 : vector<1x384xf32>
    %129 = arith.addf %112, %128 : vector<1x384xf32>
    %c29 = arith.constant 29 : index
    %130 = memref.load %arg2[%c29] : memref<144xf32, #tpu.memory_space<smem>>
    %131 = vector.broadcast %130 : f32 to vector<1x384xf32>
    %132 = arith.mulf %131, %125 : vector<1x384xf32>
    %133 = arith.addf %116, %132 : vector<1x384xf32>
    %c30 = arith.constant 30 : index
    %134 = memref.load %arg2[%c30] : memref<144xf32, #tpu.memory_space<smem>>
    %135 = vector.broadcast %134 : f32 to vector<1x384xf32>
    %136 = arith.mulf %135, %125 : vector<1x384xf32>
    %137 = arith.addf %120, %136 : vector<1x384xf32>
    %c31 = arith.constant 31 : index
    %138 = memref.load %arg2[%c31] : memref<144xf32, #tpu.memory_space<smem>>
    %139 = vector.broadcast %138 : f32 to vector<1x384xf32>
    %140 = arith.mulf %139, %125 : vector<1x384xf32>
    %141 = arith.addf %124, %140 : vector<1x384xf32>
    %142 = vector.extract_strided_slice %1 {offsets = [0, 367], sizes = [4, 17], strides = [1, 1]} : vector<4x384xf32> to vector<4x17xf32>
    %143 = vector.extract_strided_slice %1 {offsets = [0, 0], sizes = [4, 367], strides = [1, 1]} : vector<4x384xf32> to vector<4x367xf32>
    %144 = tpu.concatenate %142, %143 in 1 : vector<4x17xf32>, vector<4x367xf32> -> vector<4x384xf32>
    %145 = vector.extract_strided_slice %144 {offsets = [0, 0], sizes = [1, 384], strides = [1, 1]} : vector<4x384xf32> to vector<1x384xf32>
    %c32 = arith.constant 32 : index
    %146 = memref.load %arg2[%c32] : memref<144xf32, #tpu.memory_space<smem>>
    %147 = vector.broadcast %146 : f32 to vector<1x384xf32>
    %148 = arith.mulf %147, %145 : vector<1x384xf32>
    %149 = arith.addf %129, %148 : vector<1x384xf32>
    %c33 = arith.constant 33 : index
    %150 = memref.load %arg2[%c33] : memref<144xf32, #tpu.memory_space<smem>>
    %151 = vector.broadcast %150 : f32 to vector<1x384xf32>
    %152 = arith.mulf %151, %145 : vector<1x384xf32>
    %153 = arith.addf %133, %152 : vector<1x384xf32>
    %c34 = arith.constant 34 : index
    %154 = memref.load %arg2[%c34] : memref<144xf32, #tpu.memory_space<smem>>
    %155 = vector.broadcast %154 : f32 to vector<1x384xf32>
    %156 = arith.mulf %155, %145 : vector<1x384xf32>
    %157 = arith.addf %137, %156 : vector<1x384xf32>
    %c35 = arith.constant 35 : index
    %158 = memref.load %arg2[%c35] : memref<144xf32, #tpu.memory_space<smem>>
    %159 = vector.broadcast %158 : f32 to vector<1x384xf32>
    %160 = arith.mulf %159, %145 : vector<1x384xf32>
    %161 = arith.addf %141, %160 : vector<1x384xf32>
    %162 = vector.extract_strided_slice %144 {offsets = [1, 0], sizes = [1, 384], strides = [1, 1]} : vector<4x384xf32> to vector<1x384xf32>
    %c36 = arith.constant 36 : index
    %163 = memref.load %arg2[%c36] : memref<144xf32, #tpu.memory_space<smem>>
    %164 = vector.broadcast %163 : f32 to vector<1x384xf32>
    %165 = arith.mulf %164, %162 : vector<1x384xf32>
    %166 = arith.addf %149, %165 : vector<1x384xf32>
    %c37 = arith.constant 37 : index
    %167 = memref.load %arg2[%c37] : memref<144xf32, #tpu.memory_space<smem>>
    %168 = vector.broadcast %167 : f32 to vector<1x384xf32>
    %169 = arith.mulf %168, %162 : vector<1x384xf32>
    %170 = arith.addf %153, %169 : vector<1x384xf32>
    %c38 = arith.constant 38 : index
    %171 = memref.load %arg2[%c38] : memref<144xf32, #tpu.memory_space<smem>>
    %172 = vector.broadcast %171 : f32 to vector<1x384xf32>
    %173 = arith.mulf %172, %162 : vector<1x384xf32>
    %174 = arith.addf %157, %173 : vector<1x384xf32>
    %c39 = arith.constant 39 : index
    %175 = memref.load %arg2[%c39] : memref<144xf32, #tpu.memory_space<smem>>
    %176 = vector.broadcast %175 : f32 to vector<1x384xf32>
    %177 = arith.mulf %176, %162 : vector<1x384xf32>
    %178 = arith.addf %161, %177 : vector<1x384xf32>
    %179 = vector.extract_strided_slice %144 {offsets = [2, 0], sizes = [1, 384], strides = [1, 1]} : vector<4x384xf32> to vector<1x384xf32>
    %c40 = arith.constant 40 : index
    %180 = memref.load %arg2[%c40] : memref<144xf32, #tpu.memory_space<smem>>
    %181 = vector.broadcast %180 : f32 to vector<1x384xf32>
    %182 = arith.mulf %181, %179 : vector<1x384xf32>
    %183 = arith.addf %166, %182 : vector<1x384xf32>
    %c41 = arith.constant 41 : index
    %184 = memref.load %arg2[%c41] : memref<144xf32, #tpu.memory_space<smem>>
    %185 = vector.broadcast %184 : f32 to vector<1x384xf32>
    %186 = arith.mulf %185, %179 : vector<1x384xf32>
    %187 = arith.addf %170, %186 : vector<1x384xf32>
    %c42 = arith.constant 42 : index
    %188 = memref.load %arg2[%c42] : memref<144xf32, #tpu.memory_space<smem>>
    %189 = vector.broadcast %188 : f32 to vector<1x384xf32>
    %190 = arith.mulf %189, %179 : vector<1x384xf32>
    %191 = arith.addf %174, %190 : vector<1x384xf32>
    %c43 = arith.constant 43 : index
    %192 = memref.load %arg2[%c43] : memref<144xf32, #tpu.memory_space<smem>>
    %193 = vector.broadcast %192 : f32 to vector<1x384xf32>
    %194 = arith.mulf %193, %179 : vector<1x384xf32>
    %195 = arith.addf %178, %194 : vector<1x384xf32>
    %196 = vector.extract_strided_slice %144 {offsets = [3, 0], sizes = [1, 384], strides = [1, 1]} : vector<4x384xf32> to vector<1x384xf32>
    %c44 = arith.constant 44 : index
    %197 = memref.load %arg2[%c44] : memref<144xf32, #tpu.memory_space<smem>>
    %198 = vector.broadcast %197 : f32 to vector<1x384xf32>
    %199 = arith.mulf %198, %196 : vector<1x384xf32>
    %200 = arith.addf %183, %199 : vector<1x384xf32>
    %c45 = arith.constant 45 : index
    %201 = memref.load %arg2[%c45] : memref<144xf32, #tpu.memory_space<smem>>
    %202 = vector.broadcast %201 : f32 to vector<1x384xf32>
    %203 = arith.mulf %202, %196 : vector<1x384xf32>
    %204 = arith.addf %187, %203 : vector<1x384xf32>
    %c46 = arith.constant 46 : index
    %205 = memref.load %arg2[%c46] : memref<144xf32, #tpu.memory_space<smem>>
    %206 = vector.broadcast %205 : f32 to vector<1x384xf32>
    %207 = arith.mulf %206, %196 : vector<1x384xf32>
    %208 = arith.addf %191, %207 : vector<1x384xf32>
    %c47 = arith.constant 47 : index
    %209 = memref.load %arg2[%c47] : memref<144xf32, #tpu.memory_space<smem>>
    %210 = vector.broadcast %209 : f32 to vector<1x384xf32>
    %211 = arith.mulf %210, %196 : vector<1x384xf32>
    %212 = arith.addf %195, %211 : vector<1x384xf32>
    %213 = vector.extract_strided_slice %1 {offsets = [0, 383], sizes = [4, 1], strides = [1, 1]} : vector<4x384xf32> to vector<4x1xf32>
    %214 = vector.extract_strided_slice %1 {offsets = [0, 0], sizes = [4, 383], strides = [1, 1]} : vector<4x384xf32> to vector<4x383xf32>
    %215 = tpu.concatenate %213, %214 in 1 : vector<4x1xf32>, vector<4x383xf32> -> vector<4x384xf32>
    %216 = vector.extract_strided_slice %215 {offsets = [0, 0], sizes = [1, 384], strides = [1, 1]} : vector<4x384xf32> to vector<1x384xf32>
    %c48 = arith.constant 48 : index
    %217 = memref.load %arg2[%c48] : memref<144xf32, #tpu.memory_space<smem>>
    %218 = vector.broadcast %217 : f32 to vector<1x384xf32>
    %219 = arith.mulf %218, %216 : vector<1x384xf32>
    %220 = arith.addf %200, %219 : vector<1x384xf32>
    %c49 = arith.constant 49 : index
    %221 = memref.load %arg2[%c49] : memref<144xf32, #tpu.memory_space<smem>>
    %222 = vector.broadcast %221 : f32 to vector<1x384xf32>
    %223 = arith.mulf %222, %216 : vector<1x384xf32>
    %224 = arith.addf %204, %223 : vector<1x384xf32>
    %c50 = arith.constant 50 : index
    %225 = memref.load %arg2[%c50] : memref<144xf32, #tpu.memory_space<smem>>
    %226 = vector.broadcast %225 : f32 to vector<1x384xf32>
    %227 = arith.mulf %226, %216 : vector<1x384xf32>
    %228 = arith.addf %208, %227 : vector<1x384xf32>
    %c51 = arith.constant 51 : index
    %229 = memref.load %arg2[%c51] : memref<144xf32, #tpu.memory_space<smem>>
    %230 = vector.broadcast %229 : f32 to vector<1x384xf32>
    %231 = arith.mulf %230, %216 : vector<1x384xf32>
    %232 = arith.addf %212, %231 : vector<1x384xf32>
    %233 = vector.extract_strided_slice %215 {offsets = [1, 0], sizes = [1, 384], strides = [1, 1]} : vector<4x384xf32> to vector<1x384xf32>
    %c52 = arith.constant 52 : index
    %234 = memref.load %arg2[%c52] : memref<144xf32, #tpu.memory_space<smem>>
    %235 = vector.broadcast %234 : f32 to vector<1x384xf32>
    %236 = arith.mulf %235, %233 : vector<1x384xf32>
    %237 = arith.addf %220, %236 : vector<1x384xf32>
    %c53 = arith.constant 53 : index
    %238 = memref.load %arg2[%c53] : memref<144xf32, #tpu.memory_space<smem>>
    %239 = vector.broadcast %238 : f32 to vector<1x384xf32>
    %240 = arith.mulf %239, %233 : vector<1x384xf32>
    %241 = arith.addf %224, %240 : vector<1x384xf32>
    %c54 = arith.constant 54 : index
    %242 = memref.load %arg2[%c54] : memref<144xf32, #tpu.memory_space<smem>>
    %243 = vector.broadcast %242 : f32 to vector<1x384xf32>
    %244 = arith.mulf %243, %233 : vector<1x384xf32>
    %245 = arith.addf %228, %244 : vector<1x384xf32>
    %c55 = arith.constant 55 : index
    %246 = memref.load %arg2[%c55] : memref<144xf32, #tpu.memory_space<smem>>
    %247 = vector.broadcast %246 : f32 to vector<1x384xf32>
    %248 = arith.mulf %247, %233 : vector<1x384xf32>
    %249 = arith.addf %232, %248 : vector<1x384xf32>
    %250 = vector.extract_strided_slice %215 {offsets = [2, 0], sizes = [1, 384], strides = [1, 1]} : vector<4x384xf32> to vector<1x384xf32>
    %c56 = arith.constant 56 : index
    %251 = memref.load %arg2[%c56] : memref<144xf32, #tpu.memory_space<smem>>
    %252 = vector.broadcast %251 : f32 to vector<1x384xf32>
    %253 = arith.mulf %252, %250 : vector<1x384xf32>
    %254 = arith.addf %237, %253 : vector<1x384xf32>
    %c57 = arith.constant 57 : index
    %255 = memref.load %arg2[%c57] : memref<144xf32, #tpu.memory_space<smem>>
    %256 = vector.broadcast %255 : f32 to vector<1x384xf32>
    %257 = arith.mulf %256, %250 : vector<1x384xf32>
    %258 = arith.addf %241, %257 : vector<1x384xf32>
    %c58 = arith.constant 58 : index
    %259 = memref.load %arg2[%c58] : memref<144xf32, #tpu.memory_space<smem>>
    %260 = vector.broadcast %259 : f32 to vector<1x384xf32>
    %261 = arith.mulf %260, %250 : vector<1x384xf32>
    %262 = arith.addf %245, %261 : vector<1x384xf32>
    %c59 = arith.constant 59 : index
    %263 = memref.load %arg2[%c59] : memref<144xf32, #tpu.memory_space<smem>>
    %264 = vector.broadcast %263 : f32 to vector<1x384xf32>
    %265 = arith.mulf %264, %250 : vector<1x384xf32>
    %266 = arith.addf %249, %265 : vector<1x384xf32>
    %267 = vector.extract_strided_slice %215 {offsets = [3, 0], sizes = [1, 384], strides = [1, 1]} : vector<4x384xf32> to vector<1x384xf32>
    %c60 = arith.constant 60 : index
    %268 = memref.load %arg2[%c60] : memref<144xf32, #tpu.memory_space<smem>>
    %269 = vector.broadcast %268 : f32 to vector<1x384xf32>
    %270 = arith.mulf %269, %267 : vector<1x384xf32>
    %271 = arith.addf %254, %270 : vector<1x384xf32>
    %c61 = arith.constant 61 : index
    %272 = memref.load %arg2[%c61] : memref<144xf32, #tpu.memory_space<smem>>
    %273 = vector.broadcast %272 : f32 to vector<1x384xf32>
    %274 = arith.mulf %273, %267 : vector<1x384xf32>
    %275 = arith.addf %258, %274 : vector<1x384xf32>
    %c62 = arith.constant 62 : index
    %276 = memref.load %arg2[%c62] : memref<144xf32, #tpu.memory_space<smem>>
    %277 = vector.broadcast %276 : f32 to vector<1x384xf32>
    %278 = arith.mulf %277, %267 : vector<1x384xf32>
    %279 = arith.addf %262, %278 : vector<1x384xf32>
    %c63 = arith.constant 63 : index
    %280 = memref.load %arg2[%c63] : memref<144xf32, #tpu.memory_space<smem>>
    %281 = vector.broadcast %280 : f32 to vector<1x384xf32>
    %282 = arith.mulf %281, %267 : vector<1x384xf32>
    %283 = arith.addf %266, %282 : vector<1x384xf32>
    %284 = vector.extract_strided_slice %1 {offsets = [0, 0], sizes = [1, 384], strides = [1, 1]} : vector<4x384xf32> to vector<1x384xf32>
    %c64 = arith.constant 64 : index
    %285 = memref.load %arg2[%c64] : memref<144xf32, #tpu.memory_space<smem>>
    %286 = vector.broadcast %285 : f32 to vector<1x384xf32>
    %287 = arith.mulf %286, %284 : vector<1x384xf32>
    %288 = arith.addf %271, %287 : vector<1x384xf32>
    %c65 = arith.constant 65 : index
    %289 = memref.load %arg2[%c65] : memref<144xf32, #tpu.memory_space<smem>>
    %290 = vector.broadcast %289 : f32 to vector<1x384xf32>
    %291 = arith.mulf %290, %284 : vector<1x384xf32>
    %292 = arith.addf %275, %291 : vector<1x384xf32>
    %c66 = arith.constant 66 : index
    %293 = memref.load %arg2[%c66] : memref<144xf32, #tpu.memory_space<smem>>
    %294 = vector.broadcast %293 : f32 to vector<1x384xf32>
    %295 = arith.mulf %294, %284 : vector<1x384xf32>
    %296 = arith.addf %279, %295 : vector<1x384xf32>
    %c67 = arith.constant 67 : index
    %297 = memref.load %arg2[%c67] : memref<144xf32, #tpu.memory_space<smem>>
    %298 = vector.broadcast %297 : f32 to vector<1x384xf32>
    %299 = arith.mulf %298, %284 : vector<1x384xf32>
    %300 = arith.addf %283, %299 : vector<1x384xf32>
    %301 = vector.extract_strided_slice %1 {offsets = [1, 0], sizes = [1, 384], strides = [1, 1]} : vector<4x384xf32> to vector<1x384xf32>
    %c68 = arith.constant 68 : index
    %302 = memref.load %arg2[%c68] : memref<144xf32, #tpu.memory_space<smem>>
    %303 = vector.broadcast %302 : f32 to vector<1x384xf32>
    %304 = arith.mulf %303, %301 : vector<1x384xf32>
    %305 = arith.addf %288, %304 : vector<1x384xf32>
    %c69 = arith.constant 69 : index
    %306 = memref.load %arg2[%c69] : memref<144xf32, #tpu.memory_space<smem>>
    %307 = vector.broadcast %306 : f32 to vector<1x384xf32>
    %308 = arith.mulf %307, %301 : vector<1x384xf32>
    %309 = arith.addf %292, %308 : vector<1x384xf32>
    %c70 = arith.constant 70 : index
    %310 = memref.load %arg2[%c70] : memref<144xf32, #tpu.memory_space<smem>>
    %311 = vector.broadcast %310 : f32 to vector<1x384xf32>
    %312 = arith.mulf %311, %301 : vector<1x384xf32>
    %313 = arith.addf %296, %312 : vector<1x384xf32>
    %c71 = arith.constant 71 : index
    %314 = memref.load %arg2[%c71] : memref<144xf32, #tpu.memory_space<smem>>
    %315 = vector.broadcast %314 : f32 to vector<1x384xf32>
    %316 = arith.mulf %315, %301 : vector<1x384xf32>
    %317 = arith.addf %300, %316 : vector<1x384xf32>
    %318 = vector.extract_strided_slice %1 {offsets = [2, 0], sizes = [1, 384], strides = [1, 1]} : vector<4x384xf32> to vector<1x384xf32>
    %c72 = arith.constant 72 : index
    %319 = memref.load %arg2[%c72] : memref<144xf32, #tpu.memory_space<smem>>
    %320 = vector.broadcast %319 : f32 to vector<1x384xf32>
    %321 = arith.mulf %320, %318 : vector<1x384xf32>
    %322 = arith.addf %305, %321 : vector<1x384xf32>
    %c73 = arith.constant 73 : index
    %323 = memref.load %arg2[%c73] : memref<144xf32, #tpu.memory_space<smem>>
    %324 = vector.broadcast %323 : f32 to vector<1x384xf32>
    %325 = arith.mulf %324, %318 : vector<1x384xf32>
    %326 = arith.addf %309, %325 : vector<1x384xf32>
    %c74 = arith.constant 74 : index
    %327 = memref.load %arg2[%c74] : memref<144xf32, #tpu.memory_space<smem>>
    %328 = vector.broadcast %327 : f32 to vector<1x384xf32>
    %329 = arith.mulf %328, %318 : vector<1x384xf32>
    %330 = arith.addf %313, %329 : vector<1x384xf32>
    %c75 = arith.constant 75 : index
    %331 = memref.load %arg2[%c75] : memref<144xf32, #tpu.memory_space<smem>>
    %332 = vector.broadcast %331 : f32 to vector<1x384xf32>
    %333 = arith.mulf %332, %318 : vector<1x384xf32>
    %334 = arith.addf %317, %333 : vector<1x384xf32>
    %335 = vector.extract_strided_slice %1 {offsets = [3, 0], sizes = [1, 384], strides = [1, 1]} : vector<4x384xf32> to vector<1x384xf32>
    %c76 = arith.constant 76 : index
    %336 = memref.load %arg2[%c76] : memref<144xf32, #tpu.memory_space<smem>>
    %337 = vector.broadcast %336 : f32 to vector<1x384xf32>
    %338 = arith.mulf %337, %335 : vector<1x384xf32>
    %339 = arith.addf %322, %338 : vector<1x384xf32>
    %c77 = arith.constant 77 : index
    %340 = memref.load %arg2[%c77] : memref<144xf32, #tpu.memory_space<smem>>
    %341 = vector.broadcast %340 : f32 to vector<1x384xf32>
    %342 = arith.mulf %341, %335 : vector<1x384xf32>
    %343 = arith.addf %326, %342 : vector<1x384xf32>
    %c78 = arith.constant 78 : index
    %344 = memref.load %arg2[%c78] : memref<144xf32, #tpu.memory_space<smem>>
    %345 = vector.broadcast %344 : f32 to vector<1x384xf32>
    %346 = arith.mulf %345, %335 : vector<1x384xf32>
    %347 = arith.addf %330, %346 : vector<1x384xf32>
    %c79 = arith.constant 79 : index
    %348 = memref.load %arg2[%c79] : memref<144xf32, #tpu.memory_space<smem>>
    %349 = vector.broadcast %348 : f32 to vector<1x384xf32>
    %350 = arith.mulf %349, %335 : vector<1x384xf32>
    %351 = arith.addf %334, %350 : vector<1x384xf32>
    %352 = vector.extract_strided_slice %1 {offsets = [0, 1], sizes = [4, 383], strides = [1, 1]} : vector<4x384xf32> to vector<4x383xf32>
    %353 = vector.extract_strided_slice %1 {offsets = [0, 0], sizes = [4, 1], strides = [1, 1]} : vector<4x384xf32> to vector<4x1xf32>
    %354 = tpu.concatenate %352, %353 in 1 : vector<4x383xf32>, vector<4x1xf32> -> vector<4x384xf32>
    %355 = vector.extract_strided_slice %354 {offsets = [0, 0], sizes = [1, 384], strides = [1, 1]} : vector<4x384xf32> to vector<1x384xf32>
    %c80 = arith.constant 80 : index
    %356 = memref.load %arg2[%c80] : memref<144xf32, #tpu.memory_space<smem>>
    %357 = vector.broadcast %356 : f32 to vector<1x384xf32>
    %358 = arith.mulf %357, %355 : vector<1x384xf32>
    %359 = arith.addf %339, %358 : vector<1x384xf32>
    %c81 = arith.constant 81 : index
    %360 = memref.load %arg2[%c81] : memref<144xf32, #tpu.memory_space<smem>>
    %361 = vector.broadcast %360 : f32 to vector<1x384xf32>
    %362 = arith.mulf %361, %355 : vector<1x384xf32>
    %363 = arith.addf %343, %362 : vector<1x384xf32>
    %c82 = arith.constant 82 : index
    %364 = memref.load %arg2[%c82] : memref<144xf32, #tpu.memory_space<smem>>
    %365 = vector.broadcast %364 : f32 to vector<1x384xf32>
    %366 = arith.mulf %365, %355 : vector<1x384xf32>
    %367 = arith.addf %347, %366 : vector<1x384xf32>
    %c83 = arith.constant 83 : index
    %368 = memref.load %arg2[%c83] : memref<144xf32, #tpu.memory_space<smem>>
    %369 = vector.broadcast %368 : f32 to vector<1x384xf32>
    %370 = arith.mulf %369, %355 : vector<1x384xf32>
    %371 = arith.addf %351, %370 : vector<1x384xf32>
    %372 = vector.extract_strided_slice %354 {offsets = [1, 0], sizes = [1, 384], strides = [1, 1]} : vector<4x384xf32> to vector<1x384xf32>
    %c84 = arith.constant 84 : index
    %373 = memref.load %arg2[%c84] : memref<144xf32, #tpu.memory_space<smem>>
    %374 = vector.broadcast %373 : f32 to vector<1x384xf32>
    %375 = arith.mulf %374, %372 : vector<1x384xf32>
    %376 = arith.addf %359, %375 : vector<1x384xf32>
    %c85 = arith.constant 85 : index
    %377 = memref.load %arg2[%c85] : memref<144xf32, #tpu.memory_space<smem>>
    %378 = vector.broadcast %377 : f32 to vector<1x384xf32>
    %379 = arith.mulf %378, %372 : vector<1x384xf32>
    %380 = arith.addf %363, %379 : vector<1x384xf32>
    %c86 = arith.constant 86 : index
    %381 = memref.load %arg2[%c86] : memref<144xf32, #tpu.memory_space<smem>>
    %382 = vector.broadcast %381 : f32 to vector<1x384xf32>
    %383 = arith.mulf %382, %372 : vector<1x384xf32>
    %384 = arith.addf %367, %383 : vector<1x384xf32>
    %c87 = arith.constant 87 : index
    %385 = memref.load %arg2[%c87] : memref<144xf32, #tpu.memory_space<smem>>
    %386 = vector.broadcast %385 : f32 to vector<1x384xf32>
    %387 = arith.mulf %386, %372 : vector<1x384xf32>
    %388 = arith.addf %371, %387 : vector<1x384xf32>
    %389 = vector.extract_strided_slice %354 {offsets = [2, 0], sizes = [1, 384], strides = [1, 1]} : vector<4x384xf32> to vector<1x384xf32>
    %c88 = arith.constant 88 : index
    %390 = memref.load %arg2[%c88] : memref<144xf32, #tpu.memory_space<smem>>
    %391 = vector.broadcast %390 : f32 to vector<1x384xf32>
    %392 = arith.mulf %391, %389 : vector<1x384xf32>
    %393 = arith.addf %376, %392 : vector<1x384xf32>
    %c89 = arith.constant 89 : index
    %394 = memref.load %arg2[%c89] : memref<144xf32, #tpu.memory_space<smem>>
    %395 = vector.broadcast %394 : f32 to vector<1x384xf32>
    %396 = arith.mulf %395, %389 : vector<1x384xf32>
    %397 = arith.addf %380, %396 : vector<1x384xf32>
    %c90 = arith.constant 90 : index
    %398 = memref.load %arg2[%c90] : memref<144xf32, #tpu.memory_space<smem>>
    %399 = vector.broadcast %398 : f32 to vector<1x384xf32>
    %400 = arith.mulf %399, %389 : vector<1x384xf32>
    %401 = arith.addf %384, %400 : vector<1x384xf32>
    %c91 = arith.constant 91 : index
    %402 = memref.load %arg2[%c91] : memref<144xf32, #tpu.memory_space<smem>>
    %403 = vector.broadcast %402 : f32 to vector<1x384xf32>
    %404 = arith.mulf %403, %389 : vector<1x384xf32>
    %405 = arith.addf %388, %404 : vector<1x384xf32>
    %406 = vector.extract_strided_slice %354 {offsets = [3, 0], sizes = [1, 384], strides = [1, 1]} : vector<4x384xf32> to vector<1x384xf32>
    %c92 = arith.constant 92 : index
    %407 = memref.load %arg2[%c92] : memref<144xf32, #tpu.memory_space<smem>>
    %408 = vector.broadcast %407 : f32 to vector<1x384xf32>
    %409 = arith.mulf %408, %406 : vector<1x384xf32>
    %410 = arith.addf %393, %409 : vector<1x384xf32>
    %c93 = arith.constant 93 : index
    %411 = memref.load %arg2[%c93] : memref<144xf32, #tpu.memory_space<smem>>
    %412 = vector.broadcast %411 : f32 to vector<1x384xf32>
    %413 = arith.mulf %412, %406 : vector<1x384xf32>
    %414 = arith.addf %397, %413 : vector<1x384xf32>
    %c94 = arith.constant 94 : index
    %415 = memref.load %arg2[%c94] : memref<144xf32, #tpu.memory_space<smem>>
    %416 = vector.broadcast %415 : f32 to vector<1x384xf32>
    %417 = arith.mulf %416, %406 : vector<1x384xf32>
    %418 = arith.addf %401, %417 : vector<1x384xf32>
    %c95 = arith.constant 95 : index
    %419 = memref.load %arg2[%c95] : memref<144xf32, #tpu.memory_space<smem>>
    %420 = vector.broadcast %419 : f32 to vector<1x384xf32>
    %421 = arith.mulf %420, %406 : vector<1x384xf32>
    %422 = arith.addf %405, %421 : vector<1x384xf32>
    %423 = vector.extract_strided_slice %1 {offsets = [0, 17], sizes = [4, 367], strides = [1, 1]} : vector<4x384xf32> to vector<4x367xf32>
    %424 = vector.extract_strided_slice %1 {offsets = [0, 0], sizes = [4, 17], strides = [1, 1]} : vector<4x384xf32> to vector<4x17xf32>
    %425 = tpu.concatenate %423, %424 in 1 : vector<4x367xf32>, vector<4x17xf32> -> vector<4x384xf32>
    %426 = vector.extract_strided_slice %425 {offsets = [0, 0], sizes = [1, 384], strides = [1, 1]} : vector<4x384xf32> to vector<1x384xf32>
    %c96 = arith.constant 96 : index
    %427 = memref.load %arg2[%c96] : memref<144xf32, #tpu.memory_space<smem>>
    %428 = vector.broadcast %427 : f32 to vector<1x384xf32>
    %429 = arith.mulf %428, %426 : vector<1x384xf32>
    %430 = arith.addf %410, %429 : vector<1x384xf32>
    %c97 = arith.constant 97 : index
    %431 = memref.load %arg2[%c97] : memref<144xf32, #tpu.memory_space<smem>>
    %432 = vector.broadcast %431 : f32 to vector<1x384xf32>
    %433 = arith.mulf %432, %426 : vector<1x384xf32>
    %434 = arith.addf %414, %433 : vector<1x384xf32>
    %c98 = arith.constant 98 : index
    %435 = memref.load %arg2[%c98] : memref<144xf32, #tpu.memory_space<smem>>
    %436 = vector.broadcast %435 : f32 to vector<1x384xf32>
    %437 = arith.mulf %436, %426 : vector<1x384xf32>
    %438 = arith.addf %418, %437 : vector<1x384xf32>
    %c99 = arith.constant 99 : index
    %439 = memref.load %arg2[%c99] : memref<144xf32, #tpu.memory_space<smem>>
    %440 = vector.broadcast %439 : f32 to vector<1x384xf32>
    %441 = arith.mulf %440, %426 : vector<1x384xf32>
    %442 = arith.addf %422, %441 : vector<1x384xf32>
    %443 = vector.extract_strided_slice %425 {offsets = [1, 0], sizes = [1, 384], strides = [1, 1]} : vector<4x384xf32> to vector<1x384xf32>
    %c100 = arith.constant 100 : index
    %444 = memref.load %arg2[%c100] : memref<144xf32, #tpu.memory_space<smem>>
    %445 = vector.broadcast %444 : f32 to vector<1x384xf32>
    %446 = arith.mulf %445, %443 : vector<1x384xf32>
    %447 = arith.addf %430, %446 : vector<1x384xf32>
    %c101 = arith.constant 101 : index
    %448 = memref.load %arg2[%c101] : memref<144xf32, #tpu.memory_space<smem>>
    %449 = vector.broadcast %448 : f32 to vector<1x384xf32>
    %450 = arith.mulf %449, %443 : vector<1x384xf32>
    %451 = arith.addf %434, %450 : vector<1x384xf32>
    %c102 = arith.constant 102 : index
    %452 = memref.load %arg2[%c102] : memref<144xf32, #tpu.memory_space<smem>>
    %453 = vector.broadcast %452 : f32 to vector<1x384xf32>
    %454 = arith.mulf %453, %443 : vector<1x384xf32>
    %455 = arith.addf %438, %454 : vector<1x384xf32>
    %c103 = arith.constant 103 : index
    %456 = memref.load %arg2[%c103] : memref<144xf32, #tpu.memory_space<smem>>
    %457 = vector.broadcast %456 : f32 to vector<1x384xf32>
    %458 = arith.mulf %457, %443 : vector<1x384xf32>
    %459 = arith.addf %442, %458 : vector<1x384xf32>
    %460 = vector.extract_strided_slice %425 {offsets = [2, 0], sizes = [1, 384], strides = [1, 1]} : vector<4x384xf32> to vector<1x384xf32>
    %c104 = arith.constant 104 : index
    %461 = memref.load %arg2[%c104] : memref<144xf32, #tpu.memory_space<smem>>
    %462 = vector.broadcast %461 : f32 to vector<1x384xf32>
    %463 = arith.mulf %462, %460 : vector<1x384xf32>
    %464 = arith.addf %447, %463 : vector<1x384xf32>
    %c105 = arith.constant 105 : index
    %465 = memref.load %arg2[%c105] : memref<144xf32, #tpu.memory_space<smem>>
    %466 = vector.broadcast %465 : f32 to vector<1x384xf32>
    %467 = arith.mulf %466, %460 : vector<1x384xf32>
    %468 = arith.addf %451, %467 : vector<1x384xf32>
    %c106 = arith.constant 106 : index
    %469 = memref.load %arg2[%c106] : memref<144xf32, #tpu.memory_space<smem>>
    %470 = vector.broadcast %469 : f32 to vector<1x384xf32>
    %471 = arith.mulf %470, %460 : vector<1x384xf32>
    %472 = arith.addf %455, %471 : vector<1x384xf32>
    %c107 = arith.constant 107 : index
    %473 = memref.load %arg2[%c107] : memref<144xf32, #tpu.memory_space<smem>>
    %474 = vector.broadcast %473 : f32 to vector<1x384xf32>
    %475 = arith.mulf %474, %460 : vector<1x384xf32>
    %476 = arith.addf %459, %475 : vector<1x384xf32>
    %477 = vector.extract_strided_slice %425 {offsets = [3, 0], sizes = [1, 384], strides = [1, 1]} : vector<4x384xf32> to vector<1x384xf32>
    %c108 = arith.constant 108 : index
    %478 = memref.load %arg2[%c108] : memref<144xf32, #tpu.memory_space<smem>>
    %479 = vector.broadcast %478 : f32 to vector<1x384xf32>
    %480 = arith.mulf %479, %477 : vector<1x384xf32>
    %481 = arith.addf %464, %480 : vector<1x384xf32>
    %c109 = arith.constant 109 : index
    %482 = memref.load %arg2[%c109] : memref<144xf32, #tpu.memory_space<smem>>
    %483 = vector.broadcast %482 : f32 to vector<1x384xf32>
    %484 = arith.mulf %483, %477 : vector<1x384xf32>
    %485 = arith.addf %468, %484 : vector<1x384xf32>
    %c110 = arith.constant 110 : index
    %486 = memref.load %arg2[%c110] : memref<144xf32, #tpu.memory_space<smem>>
    %487 = vector.broadcast %486 : f32 to vector<1x384xf32>
    %488 = arith.mulf %487, %477 : vector<1x384xf32>
    %489 = arith.addf %472, %488 : vector<1x384xf32>
    %c111 = arith.constant 111 : index
    %490 = memref.load %arg2[%c111] : memref<144xf32, #tpu.memory_space<smem>>
    %491 = vector.broadcast %490 : f32 to vector<1x384xf32>
    %492 = arith.mulf %491, %477 : vector<1x384xf32>
    %493 = arith.addf %476, %492 : vector<1x384xf32>
    %494 = vector.extract_strided_slice %1 {offsets = [0, 18], sizes = [4, 366], strides = [1, 1]} : vector<4x384xf32> to vector<4x366xf32>
    %495 = vector.extract_strided_slice %1 {offsets = [0, 0], sizes = [4, 18], strides = [1, 1]} : vector<4x384xf32> to vector<4x18xf32>
    %496 = tpu.concatenate %494, %495 in 1 : vector<4x366xf32>, vector<4x18xf32> -> vector<4x384xf32>
    %497 = vector.extract_strided_slice %496 {offsets = [0, 0], sizes = [1, 384], strides = [1, 1]} : vector<4x384xf32> to vector<1x384xf32>
    %c112 = arith.constant 112 : index
    %498 = memref.load %arg2[%c112] : memref<144xf32, #tpu.memory_space<smem>>
    %499 = vector.broadcast %498 : f32 to vector<1x384xf32>
    %500 = arith.mulf %499, %497 : vector<1x384xf32>
    %501 = arith.addf %481, %500 : vector<1x384xf32>
    %c113 = arith.constant 113 : index
    %502 = memref.load %arg2[%c113] : memref<144xf32, #tpu.memory_space<smem>>
    %503 = vector.broadcast %502 : f32 to vector<1x384xf32>
    %504 = arith.mulf %503, %497 : vector<1x384xf32>
    %505 = arith.addf %485, %504 : vector<1x384xf32>
    %c114 = arith.constant 114 : index
    %506 = memref.load %arg2[%c114] : memref<144xf32, #tpu.memory_space<smem>>
    %507 = vector.broadcast %506 : f32 to vector<1x384xf32>
    %508 = arith.mulf %507, %497 : vector<1x384xf32>
    %509 = arith.addf %489, %508 : vector<1x384xf32>
    %c115 = arith.constant 115 : index
    %510 = memref.load %arg2[%c115] : memref<144xf32, #tpu.memory_space<smem>>
    %511 = vector.broadcast %510 : f32 to vector<1x384xf32>
    %512 = arith.mulf %511, %497 : vector<1x384xf32>
    %513 = arith.addf %493, %512 : vector<1x384xf32>
    %514 = vector.extract_strided_slice %496 {offsets = [1, 0], sizes = [1, 384], strides = [1, 1]} : vector<4x384xf32> to vector<1x384xf32>
    %c116 = arith.constant 116 : index
    %515 = memref.load %arg2[%c116] : memref<144xf32, #tpu.memory_space<smem>>
    %516 = vector.broadcast %515 : f32 to vector<1x384xf32>
    %517 = arith.mulf %516, %514 : vector<1x384xf32>
    %518 = arith.addf %501, %517 : vector<1x384xf32>
    %c117 = arith.constant 117 : index
    %519 = memref.load %arg2[%c117] : memref<144xf32, #tpu.memory_space<smem>>
    %520 = vector.broadcast %519 : f32 to vector<1x384xf32>
    %521 = arith.mulf %520, %514 : vector<1x384xf32>
    %522 = arith.addf %505, %521 : vector<1x384xf32>
    %c118 = arith.constant 118 : index
    %523 = memref.load %arg2[%c118] : memref<144xf32, #tpu.memory_space<smem>>
    %524 = vector.broadcast %523 : f32 to vector<1x384xf32>
    %525 = arith.mulf %524, %514 : vector<1x384xf32>
    %526 = arith.addf %509, %525 : vector<1x384xf32>
    %c119 = arith.constant 119 : index
    %527 = memref.load %arg2[%c119] : memref<144xf32, #tpu.memory_space<smem>>
    %528 = vector.broadcast %527 : f32 to vector<1x384xf32>
    %529 = arith.mulf %528, %514 : vector<1x384xf32>
    %530 = arith.addf %513, %529 : vector<1x384xf32>
    %531 = vector.extract_strided_slice %496 {offsets = [2, 0], sizes = [1, 384], strides = [1, 1]} : vector<4x384xf32> to vector<1x384xf32>
    %c120 = arith.constant 120 : index
    %532 = memref.load %arg2[%c120] : memref<144xf32, #tpu.memory_space<smem>>
    %533 = vector.broadcast %532 : f32 to vector<1x384xf32>
    %534 = arith.mulf %533, %531 : vector<1x384xf32>
    %535 = arith.addf %518, %534 : vector<1x384xf32>
    %c121 = arith.constant 121 : index
    %536 = memref.load %arg2[%c121] : memref<144xf32, #tpu.memory_space<smem>>
    %537 = vector.broadcast %536 : f32 to vector<1x384xf32>
    %538 = arith.mulf %537, %531 : vector<1x384xf32>
    %539 = arith.addf %522, %538 : vector<1x384xf32>
    %c122 = arith.constant 122 : index
    %540 = memref.load %arg2[%c122] : memref<144xf32, #tpu.memory_space<smem>>
    %541 = vector.broadcast %540 : f32 to vector<1x384xf32>
    %542 = arith.mulf %541, %531 : vector<1x384xf32>
    %543 = arith.addf %526, %542 : vector<1x384xf32>
    %c123 = arith.constant 123 : index
    %544 = memref.load %arg2[%c123] : memref<144xf32, #tpu.memory_space<smem>>
    %545 = vector.broadcast %544 : f32 to vector<1x384xf32>
    %546 = arith.mulf %545, %531 : vector<1x384xf32>
    %547 = arith.addf %530, %546 : vector<1x384xf32>
    %548 = vector.extract_strided_slice %496 {offsets = [3, 0], sizes = [1, 384], strides = [1, 1]} : vector<4x384xf32> to vector<1x384xf32>
    %c124 = arith.constant 124 : index
    %549 = memref.load %arg2[%c124] : memref<144xf32, #tpu.memory_space<smem>>
    %550 = vector.broadcast %549 : f32 to vector<1x384xf32>
    %551 = arith.mulf %550, %548 : vector<1x384xf32>
    %552 = arith.addf %535, %551 : vector<1x384xf32>
    %c125 = arith.constant 125 : index
    %553 = memref.load %arg2[%c125] : memref<144xf32, #tpu.memory_space<smem>>
    %554 = vector.broadcast %553 : f32 to vector<1x384xf32>
    %555 = arith.mulf %554, %548 : vector<1x384xf32>
    %556 = arith.addf %539, %555 : vector<1x384xf32>
    %c126 = arith.constant 126 : index
    %557 = memref.load %arg2[%c126] : memref<144xf32, #tpu.memory_space<smem>>
    %558 = vector.broadcast %557 : f32 to vector<1x384xf32>
    %559 = arith.mulf %558, %548 : vector<1x384xf32>
    %560 = arith.addf %543, %559 : vector<1x384xf32>
    %c127 = arith.constant 127 : index
    %561 = memref.load %arg2[%c127] : memref<144xf32, #tpu.memory_space<smem>>
    %562 = vector.broadcast %561 : f32 to vector<1x384xf32>
    %563 = arith.mulf %562, %548 : vector<1x384xf32>
    %564 = arith.addf %547, %563 : vector<1x384xf32>
    %565 = vector.extract_strided_slice %1 {offsets = [0, 19], sizes = [4, 365], strides = [1, 1]} : vector<4x384xf32> to vector<4x365xf32>
    %566 = vector.extract_strided_slice %1 {offsets = [0, 0], sizes = [4, 19], strides = [1, 1]} : vector<4x384xf32> to vector<4x19xf32>
    %567 = tpu.concatenate %565, %566 in 1 : vector<4x365xf32>, vector<4x19xf32> -> vector<4x384xf32>
    %568 = vector.extract_strided_slice %567 {offsets = [0, 0], sizes = [1, 384], strides = [1, 1]} : vector<4x384xf32> to vector<1x384xf32>
    %c128 = arith.constant 128 : index
    %569 = memref.load %arg2[%c128] : memref<144xf32, #tpu.memory_space<smem>>
    %570 = vector.broadcast %569 : f32 to vector<1x384xf32>
    %571 = arith.mulf %570, %568 : vector<1x384xf32>
    %572 = arith.addf %552, %571 : vector<1x384xf32>
    %c129 = arith.constant 129 : index
    %573 = memref.load %arg2[%c129] : memref<144xf32, #tpu.memory_space<smem>>
    %574 = vector.broadcast %573 : f32 to vector<1x384xf32>
    %575 = arith.mulf %574, %568 : vector<1x384xf32>
    %576 = arith.addf %556, %575 : vector<1x384xf32>
    %c130 = arith.constant 130 : index
    %577 = memref.load %arg2[%c130] : memref<144xf32, #tpu.memory_space<smem>>
    %578 = vector.broadcast %577 : f32 to vector<1x384xf32>
    %579 = arith.mulf %578, %568 : vector<1x384xf32>
    %580 = arith.addf %560, %579 : vector<1x384xf32>
    %c131 = arith.constant 131 : index
    %581 = memref.load %arg2[%c131] : memref<144xf32, #tpu.memory_space<smem>>
    %582 = vector.broadcast %581 : f32 to vector<1x384xf32>
    %583 = arith.mulf %582, %568 : vector<1x384xf32>
    %584 = arith.addf %564, %583 : vector<1x384xf32>
    %585 = vector.extract_strided_slice %567 {offsets = [1, 0], sizes = [1, 384], strides = [1, 1]} : vector<4x384xf32> to vector<1x384xf32>
    %c132 = arith.constant 132 : index
    %586 = memref.load %arg2[%c132] : memref<144xf32, #tpu.memory_space<smem>>
    %587 = vector.broadcast %586 : f32 to vector<1x384xf32>
    %588 = arith.mulf %587, %585 : vector<1x384xf32>
    %589 = arith.addf %572, %588 : vector<1x384xf32>
    %c133 = arith.constant 133 : index
    %590 = memref.load %arg2[%c133] : memref<144xf32, #tpu.memory_space<smem>>
    %591 = vector.broadcast %590 : f32 to vector<1x384xf32>
    %592 = arith.mulf %591, %585 : vector<1x384xf32>
    %593 = arith.addf %576, %592 : vector<1x384xf32>
    %c134 = arith.constant 134 : index
    %594 = memref.load %arg2[%c134] : memref<144xf32, #tpu.memory_space<smem>>
    %595 = vector.broadcast %594 : f32 to vector<1x384xf32>
    %596 = arith.mulf %595, %585 : vector<1x384xf32>
    %597 = arith.addf %580, %596 : vector<1x384xf32>
    %c135 = arith.constant 135 : index
    %598 = memref.load %arg2[%c135] : memref<144xf32, #tpu.memory_space<smem>>
    %599 = vector.broadcast %598 : f32 to vector<1x384xf32>
    %600 = arith.mulf %599, %585 : vector<1x384xf32>
    %601 = arith.addf %584, %600 : vector<1x384xf32>
    %602 = vector.extract_strided_slice %567 {offsets = [2, 0], sizes = [1, 384], strides = [1, 1]} : vector<4x384xf32> to vector<1x384xf32>
    %c136 = arith.constant 136 : index
    %603 = memref.load %arg2[%c136] : memref<144xf32, #tpu.memory_space<smem>>
    %604 = vector.broadcast %603 : f32 to vector<1x384xf32>
    %605 = arith.mulf %604, %602 : vector<1x384xf32>
    %606 = arith.addf %589, %605 : vector<1x384xf32>
    %c137 = arith.constant 137 : index
    %607 = memref.load %arg2[%c137] : memref<144xf32, #tpu.memory_space<smem>>
    %608 = vector.broadcast %607 : f32 to vector<1x384xf32>
    %609 = arith.mulf %608, %602 : vector<1x384xf32>
    %610 = arith.addf %593, %609 : vector<1x384xf32>
    %c138 = arith.constant 138 : index
    %611 = memref.load %arg2[%c138] : memref<144xf32, #tpu.memory_space<smem>>
    %612 = vector.broadcast %611 : f32 to vector<1x384xf32>
    %613 = arith.mulf %612, %602 : vector<1x384xf32>
    %614 = arith.addf %597, %613 : vector<1x384xf32>
    %c139 = arith.constant 139 : index
    %615 = memref.load %arg2[%c139] : memref<144xf32, #tpu.memory_space<smem>>
    %616 = vector.broadcast %615 : f32 to vector<1x384xf32>
    %617 = arith.mulf %616, %602 : vector<1x384xf32>
    %618 = arith.addf %601, %617 : vector<1x384xf32>
    %619 = vector.extract_strided_slice %567 {offsets = [3, 0], sizes = [1, 384], strides = [1, 1]} : vector<4x384xf32> to vector<1x384xf32>
    %c140 = arith.constant 140 : index
    %620 = memref.load %arg2[%c140] : memref<144xf32, #tpu.memory_space<smem>>
    %621 = vector.broadcast %620 : f32 to vector<1x384xf32>
    %622 = arith.mulf %621, %619 : vector<1x384xf32>
    %623 = arith.addf %606, %622 : vector<1x384xf32>
    %c141 = arith.constant 141 : index
    %624 = memref.load %arg2[%c141] : memref<144xf32, #tpu.memory_space<smem>>
    %625 = vector.broadcast %624 : f32 to vector<1x384xf32>
    %626 = arith.mulf %625, %619 : vector<1x384xf32>
    %627 = arith.addf %610, %626 : vector<1x384xf32>
    %c142 = arith.constant 142 : index
    %628 = memref.load %arg2[%c142] : memref<144xf32, #tpu.memory_space<smem>>
    %629 = vector.broadcast %628 : f32 to vector<1x384xf32>
    %630 = arith.mulf %629, %619 : vector<1x384xf32>
    %631 = arith.addf %614, %630 : vector<1x384xf32>
    %c143 = arith.constant 143 : index
    %632 = memref.load %arg2[%c143] : memref<144xf32, #tpu.memory_space<smem>>
    %633 = vector.broadcast %632 : f32 to vector<1x384xf32>
    %634 = arith.mulf %633, %619 : vector<1x384xf32>
    %635 = arith.addf %618, %634 : vector<1x384xf32>
    %636 = tpu.concatenate %623, %627, %631, %635 in 0 : vector<1x384xf32>, vector<1x384xf32>, vector<1x384xf32>, vector<1x384xf32> -> vector<4x384xf32>
    %cst = arith.constant 0.000000e+00 : f32
    %637 = vector.broadcast %cst : f32 to vector<4x384xf32>
    %638 = arith.cmpf ogt, %636, %637 : vector<4x384xf32>
    %639 = vector.broadcast %3 : f32 to vector<4x384xf32>
    %640 = arith.mulf %639, %636 : vector<4x384xf32>
    %641 = arith.select %638, %636, %640 : vector<4x384xi1>, vector<4x384xf32>
    %642 = vector.broadcast %2 : vector<1x384xf32> to vector<4x384xf32>
    %643 = arith.mulf %641, %642 : vector<4x384xf32>
    %644 = vector.extract_strided_slice %643 {offsets = [0, 365], sizes = [4, 19], strides = [1, 1]} : vector<4x384xf32> to vector<4x19xf32>
    %645 = vector.extract_strided_slice %643 {offsets = [0, 0], sizes = [4, 365], strides = [1, 1]} : vector<4x384xf32> to vector<4x365xf32>
    %646 = tpu.concatenate %644, %645 in 1 : vector<4x19xf32>, vector<4x365xf32> -> vector<4x384xf32>
    %647 = vector.extract_strided_slice %646 {offsets = [0, 0], sizes = [1, 384], strides = [1, 1]} : vector<4x384xf32> to vector<1x384xf32>
    %c0_6 = arith.constant 0 : index
    %648 = memref.load %arg3[%c0_6] : memref<144xf32, #tpu.memory_space<smem>>
    %649 = vector.broadcast %648 : f32 to vector<1x384xf32>
    %650 = arith.mulf %649, %647 : vector<1x384xf32>
    %c1_7 = arith.constant 1 : index
    %651 = memref.load %arg3[%c1_7] : memref<144xf32, #tpu.memory_space<smem>>
    %652 = vector.broadcast %651 : f32 to vector<1x384xf32>
    %653 = arith.mulf %652, %647 : vector<1x384xf32>
    %c2_8 = arith.constant 2 : index
    %654 = memref.load %arg3[%c2_8] : memref<144xf32, #tpu.memory_space<smem>>
    %655 = vector.broadcast %654 : f32 to vector<1x384xf32>
    %656 = arith.mulf %655, %647 : vector<1x384xf32>
    %c3_9 = arith.constant 3 : index
    %657 = memref.load %arg3[%c3_9] : memref<144xf32, #tpu.memory_space<smem>>
    %658 = vector.broadcast %657 : f32 to vector<1x384xf32>
    %659 = arith.mulf %658, %647 : vector<1x384xf32>
    %660 = vector.extract_strided_slice %646 {offsets = [1, 0], sizes = [1, 384], strides = [1, 1]} : vector<4x384xf32> to vector<1x384xf32>
    %c4_10 = arith.constant 4 : index
    %661 = memref.load %arg3[%c4_10] : memref<144xf32, #tpu.memory_space<smem>>
    %662 = vector.broadcast %661 : f32 to vector<1x384xf32>
    %663 = arith.mulf %662, %660 : vector<1x384xf32>
    %664 = arith.addf %650, %663 : vector<1x384xf32>
    %c5_11 = arith.constant 5 : index
    %665 = memref.load %arg3[%c5_11] : memref<144xf32, #tpu.memory_space<smem>>
    %666 = vector.broadcast %665 : f32 to vector<1x384xf32>
    %667 = arith.mulf %666, %660 : vector<1x384xf32>
    %668 = arith.addf %653, %667 : vector<1x384xf32>
    %c6_12 = arith.constant 6 : index
    %669 = memref.load %arg3[%c6_12] : memref<144xf32, #tpu.memory_space<smem>>
    %670 = vector.broadcast %669 : f32 to vector<1x384xf32>
    %671 = arith.mulf %670, %660 : vector<1x384xf32>
    %672 = arith.addf %656, %671 : vector<1x384xf32>
    %c7_13 = arith.constant 7 : index
    %673 = memref.load %arg3[%c7_13] : memref<144xf32, #tpu.memory_space<smem>>
    %674 = vector.broadcast %673 : f32 to vector<1x384xf32>
    %675 = arith.mulf %674, %660 : vector<1x384xf32>
    %676 = arith.addf %659, %675 : vector<1x384xf32>
    %677 = vector.extract_strided_slice %646 {offsets = [2, 0], sizes = [1, 384], strides = [1, 1]} : vector<4x384xf32> to vector<1x384xf32>
    %c8_14 = arith.constant 8 : index
    %678 = memref.load %arg3[%c8_14] : memref<144xf32, #tpu.memory_space<smem>>
    %679 = vector.broadcast %678 : f32 to vector<1x384xf32>
    %680 = arith.mulf %679, %677 : vector<1x384xf32>
    %681 = arith.addf %664, %680 : vector<1x384xf32>
    %c9_15 = arith.constant 9 : index
    %682 = memref.load %arg3[%c9_15] : memref<144xf32, #tpu.memory_space<smem>>
    %683 = vector.broadcast %682 : f32 to vector<1x384xf32>
    %684 = arith.mulf %683, %677 : vector<1x384xf32>
    %685 = arith.addf %668, %684 : vector<1x384xf32>
    %c10_16 = arith.constant 10 : index
    %686 = memref.load %arg3[%c10_16] : memref<144xf32, #tpu.memory_space<smem>>
    %687 = vector.broadcast %686 : f32 to vector<1x384xf32>
    %688 = arith.mulf %687, %677 : vector<1x384xf32>
    %689 = arith.addf %672, %688 : vector<1x384xf32>
    %c11_17 = arith.constant 11 : index
    %690 = memref.load %arg3[%c11_17] : memref<144xf32, #tpu.memory_space<smem>>
    %691 = vector.broadcast %690 : f32 to vector<1x384xf32>
    %692 = arith.mulf %691, %677 : vector<1x384xf32>
    %693 = arith.addf %676, %692 : vector<1x384xf32>
    %694 = vector.extract_strided_slice %646 {offsets = [3, 0], sizes = [1, 384], strides = [1, 1]} : vector<4x384xf32> to vector<1x384xf32>
    %c12_18 = arith.constant 12 : index
    %695 = memref.load %arg3[%c12_18] : memref<144xf32, #tpu.memory_space<smem>>
    %696 = vector.broadcast %695 : f32 to vector<1x384xf32>
    %697 = arith.mulf %696, %694 : vector<1x384xf32>
    %698 = arith.addf %681, %697 : vector<1x384xf32>
    %c13_19 = arith.constant 13 : index
    %699 = memref.load %arg3[%c13_19] : memref<144xf32, #tpu.memory_space<smem>>
    %700 = vector.broadcast %699 : f32 to vector<1x384xf32>
    %701 = arith.mulf %700, %694 : vector<1x384xf32>
    %702 = arith.addf %685, %701 : vector<1x384xf32>
    %c14_20 = arith.constant 14 : index
    %703 = memref.load %arg3[%c14_20] : memref<144xf32, #tpu.memory_space<smem>>
    %704 = vector.broadcast %703 : f32 to vector<1x384xf32>
    %705 = arith.mulf %704, %694 : vector<1x384xf32>
    %706 = arith.addf %689, %705 : vector<1x384xf32>
    %c15_21 = arith.constant 15 : index
    %707 = memref.load %arg3[%c15_21] : memref<144xf32, #tpu.memory_space<smem>>
    %708 = vector.broadcast %707 : f32 to vector<1x384xf32>
    %709 = arith.mulf %708, %694 : vector<1x384xf32>
    %710 = arith.addf %693, %709 : vector<1x384xf32>
    %711 = vector.extract_strided_slice %643 {offsets = [0, 366], sizes = [4, 18], strides = [1, 1]} : vector<4x384xf32> to vector<4x18xf32>
    %712 = vector.extract_strided_slice %643 {offsets = [0, 0], sizes = [4, 366], strides = [1, 1]} : vector<4x384xf32> to vector<4x366xf32>
    %713 = tpu.concatenate %711, %712 in 1 : vector<4x18xf32>, vector<4x366xf32> -> vector<4x384xf32>
    %714 = vector.extract_strided_slice %713 {offsets = [0, 0], sizes = [1, 384], strides = [1, 1]} : vector<4x384xf32> to vector<1x384xf32>
    %c16_22 = arith.constant 16 : index
    %715 = memref.load %arg3[%c16_22] : memref<144xf32, #tpu.memory_space<smem>>
    %716 = vector.broadcast %715 : f32 to vector<1x384xf32>
    %717 = arith.mulf %716, %714 : vector<1x384xf32>
    %718 = arith.addf %698, %717 : vector<1x384xf32>
    %c17_23 = arith.constant 17 : index
    %719 = memref.load %arg3[%c17_23] : memref<144xf32, #tpu.memory_space<smem>>
    %720 = vector.broadcast %719 : f32 to vector<1x384xf32>
    %721 = arith.mulf %720, %714 : vector<1x384xf32>
    %722 = arith.addf %702, %721 : vector<1x384xf32>
    %c18_24 = arith.constant 18 : index
    %723 = memref.load %arg3[%c18_24] : memref<144xf32, #tpu.memory_space<smem>>
    %724 = vector.broadcast %723 : f32 to vector<1x384xf32>
    %725 = arith.mulf %724, %714 : vector<1x384xf32>
    %726 = arith.addf %706, %725 : vector<1x384xf32>
    %c19_25 = arith.constant 19 : index
    %727 = memref.load %arg3[%c19_25] : memref<144xf32, #tpu.memory_space<smem>>
    %728 = vector.broadcast %727 : f32 to vector<1x384xf32>
    %729 = arith.mulf %728, %714 : vector<1x384xf32>
    %730 = arith.addf %710, %729 : vector<1x384xf32>
    %731 = vector.extract_strided_slice %713 {offsets = [1, 0], sizes = [1, 384], strides = [1, 1]} : vector<4x384xf32> to vector<1x384xf32>
    %c20_26 = arith.constant 20 : index
    %732 = memref.load %arg3[%c20_26] : memref<144xf32, #tpu.memory_space<smem>>
    %733 = vector.broadcast %732 : f32 to vector<1x384xf32>
    %734 = arith.mulf %733, %731 : vector<1x384xf32>
    %735 = arith.addf %718, %734 : vector<1x384xf32>
    %c21_27 = arith.constant 21 : index
    %736 = memref.load %arg3[%c21_27] : memref<144xf32, #tpu.memory_space<smem>>
    %737 = vector.broadcast %736 : f32 to vector<1x384xf32>
    %738 = arith.mulf %737, %731 : vector<1x384xf32>
    %739 = arith.addf %722, %738 : vector<1x384xf32>
    %c22_28 = arith.constant 22 : index
    %740 = memref.load %arg3[%c22_28] : memref<144xf32, #tpu.memory_space<smem>>
    %741 = vector.broadcast %740 : f32 to vector<1x384xf32>
    %742 = arith.mulf %741, %731 : vector<1x384xf32>
    %743 = arith.addf %726, %742 : vector<1x384xf32>
    %c23_29 = arith.constant 23 : index
    %744 = memref.load %arg3[%c23_29] : memref<144xf32, #tpu.memory_space<smem>>
    %745 = vector.broadcast %744 : f32 to vector<1x384xf32>
    %746 = arith.mulf %745, %731 : vector<1x384xf32>
    %747 = arith.addf %730, %746 : vector<1x384xf32>
    %748 = vector.extract_strided_slice %713 {offsets = [2, 0], sizes = [1, 384], strides = [1, 1]} : vector<4x384xf32> to vector<1x384xf32>
    %c24_30 = arith.constant 24 : index
    %749 = memref.load %arg3[%c24_30] : memref<144xf32, #tpu.memory_space<smem>>
    %750 = vector.broadcast %749 : f32 to vector<1x384xf32>
    %751 = arith.mulf %750, %748 : vector<1x384xf32>
    %752 = arith.addf %735, %751 : vector<1x384xf32>
    %c25_31 = arith.constant 25 : index
    %753 = memref.load %arg3[%c25_31] : memref<144xf32, #tpu.memory_space<smem>>
    %754 = vector.broadcast %753 : f32 to vector<1x384xf32>
    %755 = arith.mulf %754, %748 : vector<1x384xf32>
    %756 = arith.addf %739, %755 : vector<1x384xf32>
    %c26_32 = arith.constant 26 : index
    %757 = memref.load %arg3[%c26_32] : memref<144xf32, #tpu.memory_space<smem>>
    %758 = vector.broadcast %757 : f32 to vector<1x384xf32>
    %759 = arith.mulf %758, %748 : vector<1x384xf32>
    %760 = arith.addf %743, %759 : vector<1x384xf32>
    %c27_33 = arith.constant 27 : index
    %761 = memref.load %arg3[%c27_33] : memref<144xf32, #tpu.memory_space<smem>>
    %762 = vector.broadcast %761 : f32 to vector<1x384xf32>
    %763 = arith.mulf %762, %748 : vector<1x384xf32>
    %764 = arith.addf %747, %763 : vector<1x384xf32>
    %765 = vector.extract_strided_slice %713 {offsets = [3, 0], sizes = [1, 384], strides = [1, 1]} : vector<4x384xf32> to vector<1x384xf32>
    %c28_34 = arith.constant 28 : index
    %766 = memref.load %arg3[%c28_34] : memref<144xf32, #tpu.memory_space<smem>>
    %767 = vector.broadcast %766 : f32 to vector<1x384xf32>
    %768 = arith.mulf %767, %765 : vector<1x384xf32>
    %769 = arith.addf %752, %768 : vector<1x384xf32>
    %c29_35 = arith.constant 29 : index
    %770 = memref.load %arg3[%c29_35] : memref<144xf32, #tpu.memory_space<smem>>
    %771 = vector.broadcast %770 : f32 to vector<1x384xf32>
    %772 = arith.mulf %771, %765 : vector<1x384xf32>
    %773 = arith.addf %756, %772 : vector<1x384xf32>
    %c30_36 = arith.constant 30 : index
    %774 = memref.load %arg3[%c30_36] : memref<144xf32, #tpu.memory_space<smem>>
    %775 = vector.broadcast %774 : f32 to vector<1x384xf32>
    %776 = arith.mulf %775, %765 : vector<1x384xf32>
    %777 = arith.addf %760, %776 : vector<1x384xf32>
    %c31_37 = arith.constant 31 : index
    %778 = memref.load %arg3[%c31_37] : memref<144xf32, #tpu.memory_space<smem>>
    %779 = vector.broadcast %778 : f32 to vector<1x384xf32>
    %780 = arith.mulf %779, %765 : vector<1x384xf32>
    %781 = arith.addf %764, %780 : vector<1x384xf32>
    %782 = vector.extract_strided_slice %643 {offsets = [0, 367], sizes = [4, 17], strides = [1, 1]} : vector<4x384xf32> to vector<4x17xf32>
    %783 = vector.extract_strided_slice %643 {offsets = [0, 0], sizes = [4, 367], strides = [1, 1]} : vector<4x384xf32> to vector<4x367xf32>
    %784 = tpu.concatenate %782, %783 in 1 : vector<4x17xf32>, vector<4x367xf32> -> vector<4x384xf32>
    %785 = vector.extract_strided_slice %784 {offsets = [0, 0], sizes = [1, 384], strides = [1, 1]} : vector<4x384xf32> to vector<1x384xf32>
    %c32_38 = arith.constant 32 : index
    %786 = memref.load %arg3[%c32_38] : memref<144xf32, #tpu.memory_space<smem>>
    %787 = vector.broadcast %786 : f32 to vector<1x384xf32>
    %788 = arith.mulf %787, %785 : vector<1x384xf32>
    %789 = arith.addf %769, %788 : vector<1x384xf32>
    %c33_39 = arith.constant 33 : index
    %790 = memref.load %arg3[%c33_39] : memref<144xf32, #tpu.memory_space<smem>>
    %791 = vector.broadcast %790 : f32 to vector<1x384xf32>
    %792 = arith.mulf %791, %785 : vector<1x384xf32>
    %793 = arith.addf %773, %792 : vector<1x384xf32>
    %c34_40 = arith.constant 34 : index
    %794 = memref.load %arg3[%c34_40] : memref<144xf32, #tpu.memory_space<smem>>
    %795 = vector.broadcast %794 : f32 to vector<1x384xf32>
    %796 = arith.mulf %795, %785 : vector<1x384xf32>
    %797 = arith.addf %777, %796 : vector<1x384xf32>
    %c35_41 = arith.constant 35 : index
    %798 = memref.load %arg3[%c35_41] : memref<144xf32, #tpu.memory_space<smem>>
    %799 = vector.broadcast %798 : f32 to vector<1x384xf32>
    %800 = arith.mulf %799, %785 : vector<1x384xf32>
    %801 = arith.addf %781, %800 : vector<1x384xf32>
    %802 = vector.extract_strided_slice %784 {offsets = [1, 0], sizes = [1, 384], strides = [1, 1]} : vector<4x384xf32> to vector<1x384xf32>
    %c36_42 = arith.constant 36 : index
    %803 = memref.load %arg3[%c36_42] : memref<144xf32, #tpu.memory_space<smem>>
    %804 = vector.broadcast %803 : f32 to vector<1x384xf32>
    %805 = arith.mulf %804, %802 : vector<1x384xf32>
    %806 = arith.addf %789, %805 : vector<1x384xf32>
    %c37_43 = arith.constant 37 : index
    %807 = memref.load %arg3[%c37_43] : memref<144xf32, #tpu.memory_space<smem>>
    %808 = vector.broadcast %807 : f32 to vector<1x384xf32>
    %809 = arith.mulf %808, %802 : vector<1x384xf32>
    %810 = arith.addf %793, %809 : vector<1x384xf32>
    %c38_44 = arith.constant 38 : index
    %811 = memref.load %arg3[%c38_44] : memref<144xf32, #tpu.memory_space<smem>>
    %812 = vector.broadcast %811 : f32 to vector<1x384xf32>
    %813 = arith.mulf %812, %802 : vector<1x384xf32>
    %814 = arith.addf %797, %813 : vector<1x384xf32>
    %c39_45 = arith.constant 39 : index
    %815 = memref.load %arg3[%c39_45] : memref<144xf32, #tpu.memory_space<smem>>
    %816 = vector.broadcast %815 : f32 to vector<1x384xf32>
    %817 = arith.mulf %816, %802 : vector<1x384xf32>
    %818 = arith.addf %801, %817 : vector<1x384xf32>
    %819 = vector.extract_strided_slice %784 {offsets = [2, 0], sizes = [1, 384], strides = [1, 1]} : vector<4x384xf32> to vector<1x384xf32>
    %c40_46 = arith.constant 40 : index
    %820 = memref.load %arg3[%c40_46] : memref<144xf32, #tpu.memory_space<smem>>
    %821 = vector.broadcast %820 : f32 to vector<1x384xf32>
    %822 = arith.mulf %821, %819 : vector<1x384xf32>
    %823 = arith.addf %806, %822 : vector<1x384xf32>
    %c41_47 = arith.constant 41 : index
    %824 = memref.load %arg3[%c41_47] : memref<144xf32, #tpu.memory_space<smem>>
    %825 = vector.broadcast %824 : f32 to vector<1x384xf32>
    %826 = arith.mulf %825, %819 : vector<1x384xf32>
    %827 = arith.addf %810, %826 : vector<1x384xf32>
    %c42_48 = arith.constant 42 : index
    %828 = memref.load %arg3[%c42_48] : memref<144xf32, #tpu.memory_space<smem>>
    %829 = vector.broadcast %828 : f32 to vector<1x384xf32>
    %830 = arith.mulf %829, %819 : vector<1x384xf32>
    %831 = arith.addf %814, %830 : vector<1x384xf32>
    %c43_49 = arith.constant 43 : index
    %832 = memref.load %arg3[%c43_49] : memref<144xf32, #tpu.memory_space<smem>>
    %833 = vector.broadcast %832 : f32 to vector<1x384xf32>
    %834 = arith.mulf %833, %819 : vector<1x384xf32>
    %835 = arith.addf %818, %834 : vector<1x384xf32>
    %836 = vector.extract_strided_slice %784 {offsets = [3, 0], sizes = [1, 384], strides = [1, 1]} : vector<4x384xf32> to vector<1x384xf32>
    %c44_50 = arith.constant 44 : index
    %837 = memref.load %arg3[%c44_50] : memref<144xf32, #tpu.memory_space<smem>>
    %838 = vector.broadcast %837 : f32 to vector<1x384xf32>
    %839 = arith.mulf %838, %836 : vector<1x384xf32>
    %840 = arith.addf %823, %839 : vector<1x384xf32>
    %c45_51 = arith.constant 45 : index
    %841 = memref.load %arg3[%c45_51] : memref<144xf32, #tpu.memory_space<smem>>
    %842 = vector.broadcast %841 : f32 to vector<1x384xf32>
    %843 = arith.mulf %842, %836 : vector<1x384xf32>
    %844 = arith.addf %827, %843 : vector<1x384xf32>
    %c46_52 = arith.constant 46 : index
    %845 = memref.load %arg3[%c46_52] : memref<144xf32, #tpu.memory_space<smem>>
    %846 = vector.broadcast %845 : f32 to vector<1x384xf32>
    %847 = arith.mulf %846, %836 : vector<1x384xf32>
    %848 = arith.addf %831, %847 : vector<1x384xf32>
    %c47_53 = arith.constant 47 : index
    %849 = memref.load %arg3[%c47_53] : memref<144xf32, #tpu.memory_space<smem>>
    %850 = vector.broadcast %849 : f32 to vector<1x384xf32>
    %851 = arith.mulf %850, %836 : vector<1x384xf32>
    %852 = arith.addf %835, %851 : vector<1x384xf32>
    %853 = vector.extract_strided_slice %643 {offsets = [0, 383], sizes = [4, 1], strides = [1, 1]} : vector<4x384xf32> to vector<4x1xf32>
    %854 = vector.extract_strided_slice %643 {offsets = [0, 0], sizes = [4, 383], strides = [1, 1]} : vector<4x384xf32> to vector<4x383xf32>
    %855 = tpu.concatenate %853, %854 in 1 : vector<4x1xf32>, vector<4x383xf32> -> vector<4x384xf32>
    %856 = vector.extract_strided_slice %855 {offsets = [0, 0], sizes = [1, 384], strides = [1, 1]} : vector<4x384xf32> to vector<1x384xf32>
    %c48_54 = arith.constant 48 : index
    %857 = memref.load %arg3[%c48_54] : memref<144xf32, #tpu.memory_space<smem>>
    %858 = vector.broadcast %857 : f32 to vector<1x384xf32>
    %859 = arith.mulf %858, %856 : vector<1x384xf32>
    %860 = arith.addf %840, %859 : vector<1x384xf32>
    %c49_55 = arith.constant 49 : index
    %861 = memref.load %arg3[%c49_55] : memref<144xf32, #tpu.memory_space<smem>>
    %862 = vector.broadcast %861 : f32 to vector<1x384xf32>
    %863 = arith.mulf %862, %856 : vector<1x384xf32>
    %864 = arith.addf %844, %863 : vector<1x384xf32>
    %c50_56 = arith.constant 50 : index
    %865 = memref.load %arg3[%c50_56] : memref<144xf32, #tpu.memory_space<smem>>
    %866 = vector.broadcast %865 : f32 to vector<1x384xf32>
    %867 = arith.mulf %866, %856 : vector<1x384xf32>
    %868 = arith.addf %848, %867 : vector<1x384xf32>
    %c51_57 = arith.constant 51 : index
    %869 = memref.load %arg3[%c51_57] : memref<144xf32, #tpu.memory_space<smem>>
    %870 = vector.broadcast %869 : f32 to vector<1x384xf32>
    %871 = arith.mulf %870, %856 : vector<1x384xf32>
    %872 = arith.addf %852, %871 : vector<1x384xf32>
    %873 = vector.extract_strided_slice %855 {offsets = [1, 0], sizes = [1, 384], strides = [1, 1]} : vector<4x384xf32> to vector<1x384xf32>
    %c52_58 = arith.constant 52 : index
    %874 = memref.load %arg3[%c52_58] : memref<144xf32, #tpu.memory_space<smem>>
    %875 = vector.broadcast %874 : f32 to vector<1x384xf32>
    %876 = arith.mulf %875, %873 : vector<1x384xf32>
    %877 = arith.addf %860, %876 : vector<1x384xf32>
    %c53_59 = arith.constant 53 : index
    %878 = memref.load %arg3[%c53_59] : memref<144xf32, #tpu.memory_space<smem>>
    %879 = vector.broadcast %878 : f32 to vector<1x384xf32>
    %880 = arith.mulf %879, %873 : vector<1x384xf32>
    %881 = arith.addf %864, %880 : vector<1x384xf32>
    %c54_60 = arith.constant 54 : index
    %882 = memref.load %arg3[%c54_60] : memref<144xf32, #tpu.memory_space<smem>>
    %883 = vector.broadcast %882 : f32 to vector<1x384xf32>
    %884 = arith.mulf %883, %873 : vector<1x384xf32>
    %885 = arith.addf %868, %884 : vector<1x384xf32>
    %c55_61 = arith.constant 55 : index
    %886 = memref.load %arg3[%c55_61] : memref<144xf32, #tpu.memory_space<smem>>
    %887 = vector.broadcast %886 : f32 to vector<1x384xf32>
    %888 = arith.mulf %887, %873 : vector<1x384xf32>
    %889 = arith.addf %872, %888 : vector<1x384xf32>
    %890 = vector.extract_strided_slice %855 {offsets = [2, 0], sizes = [1, 384], strides = [1, 1]} : vector<4x384xf32> to vector<1x384xf32>
    %c56_62 = arith.constant 56 : index
    %891 = memref.load %arg3[%c56_62] : memref<144xf32, #tpu.memory_space<smem>>
    %892 = vector.broadcast %891 : f32 to vector<1x384xf32>
    %893 = arith.mulf %892, %890 : vector<1x384xf32>
    %894 = arith.addf %877, %893 : vector<1x384xf32>
    %c57_63 = arith.constant 57 : index
    %895 = memref.load %arg3[%c57_63] : memref<144xf32, #tpu.memory_space<smem>>
    %896 = vector.broadcast %895 : f32 to vector<1x384xf32>
    %897 = arith.mulf %896, %890 : vector<1x384xf32>
    %898 = arith.addf %881, %897 : vector<1x384xf32>
    %c58_64 = arith.constant 58 : index
    %899 = memref.load %arg3[%c58_64] : memref<144xf32, #tpu.memory_space<smem>>
    %900 = vector.broadcast %899 : f32 to vector<1x384xf32>
    %901 = arith.mulf %900, %890 : vector<1x384xf32>
    %902 = arith.addf %885, %901 : vector<1x384xf32>
    %c59_65 = arith.constant 59 : index
    %903 = memref.load %arg3[%c59_65] : memref<144xf32, #tpu.memory_space<smem>>
    %904 = vector.broadcast %903 : f32 to vector<1x384xf32>
    %905 = arith.mulf %904, %890 : vector<1x384xf32>
    %906 = arith.addf %889, %905 : vector<1x384xf32>
    %907 = vector.extract_strided_slice %855 {offsets = [3, 0], sizes = [1, 384], strides = [1, 1]} : vector<4x384xf32> to vector<1x384xf32>
    %c60_66 = arith.constant 60 : index
    %908 = memref.load %arg3[%c60_66] : memref<144xf32, #tpu.memory_space<smem>>
    %909 = vector.broadcast %908 : f32 to vector<1x384xf32>
    %910 = arith.mulf %909, %907 : vector<1x384xf32>
    %911 = arith.addf %894, %910 : vector<1x384xf32>
    %c61_67 = arith.constant 61 : index
    %912 = memref.load %arg3[%c61_67] : memref<144xf32, #tpu.memory_space<smem>>
    %913 = vector.broadcast %912 : f32 to vector<1x384xf32>
    %914 = arith.mulf %913, %907 : vector<1x384xf32>
    %915 = arith.addf %898, %914 : vector<1x384xf32>
    %c62_68 = arith.constant 62 : index
    %916 = memref.load %arg3[%c62_68] : memref<144xf32, #tpu.memory_space<smem>>
    %917 = vector.broadcast %916 : f32 to vector<1x384xf32>
    %918 = arith.mulf %917, %907 : vector<1x384xf32>
    %919 = arith.addf %902, %918 : vector<1x384xf32>
    %c63_69 = arith.constant 63 : index
    %920 = memref.load %arg3[%c63_69] : memref<144xf32, #tpu.memory_space<smem>>
    %921 = vector.broadcast %920 : f32 to vector<1x384xf32>
    %922 = arith.mulf %921, %907 : vector<1x384xf32>
    %923 = arith.addf %906, %922 : vector<1x384xf32>
    %924 = vector.extract_strided_slice %643 {offsets = [0, 0], sizes = [1, 384], strides = [1, 1]} : vector<4x384xf32> to vector<1x384xf32>
    %c64_70 = arith.constant 64 : index
    %925 = memref.load %arg3[%c64_70] : memref<144xf32, #tpu.memory_space<smem>>
    %926 = vector.broadcast %925 : f32 to vector<1x384xf32>
    %927 = arith.mulf %926, %924 : vector<1x384xf32>
    %928 = arith.addf %911, %927 : vector<1x384xf32>
    %c65_71 = arith.constant 65 : index
    %929 = memref.load %arg3[%c65_71] : memref<144xf32, #tpu.memory_space<smem>>
    %930 = vector.broadcast %929 : f32 to vector<1x384xf32>
    %931 = arith.mulf %930, %924 : vector<1x384xf32>
    %932 = arith.addf %915, %931 : vector<1x384xf32>
    %c66_72 = arith.constant 66 : index
    %933 = memref.load %arg3[%c66_72] : memref<144xf32, #tpu.memory_space<smem>>
    %934 = vector.broadcast %933 : f32 to vector<1x384xf32>
    %935 = arith.mulf %934, %924 : vector<1x384xf32>
    %936 = arith.addf %919, %935 : vector<1x384xf32>
    %c67_73 = arith.constant 67 : index
    %937 = memref.load %arg3[%c67_73] : memref<144xf32, #tpu.memory_space<smem>>
    %938 = vector.broadcast %937 : f32 to vector<1x384xf32>
    %939 = arith.mulf %938, %924 : vector<1x384xf32>
    %940 = arith.addf %923, %939 : vector<1x384xf32>
    %941 = vector.extract_strided_slice %643 {offsets = [1, 0], sizes = [1, 384], strides = [1, 1]} : vector<4x384xf32> to vector<1x384xf32>
    %c68_74 = arith.constant 68 : index
    %942 = memref.load %arg3[%c68_74] : memref<144xf32, #tpu.memory_space<smem>>
    %943 = vector.broadcast %942 : f32 to vector<1x384xf32>
    %944 = arith.mulf %943, %941 : vector<1x384xf32>
    %945 = arith.addf %928, %944 : vector<1x384xf32>
    %c69_75 = arith.constant 69 : index
    %946 = memref.load %arg3[%c69_75] : memref<144xf32, #tpu.memory_space<smem>>
    %947 = vector.broadcast %946 : f32 to vector<1x384xf32>
    %948 = arith.mulf %947, %941 : vector<1x384xf32>
    %949 = arith.addf %932, %948 : vector<1x384xf32>
    %c70_76 = arith.constant 70 : index
    %950 = memref.load %arg3[%c70_76] : memref<144xf32, #tpu.memory_space<smem>>
    %951 = vector.broadcast %950 : f32 to vector<1x384xf32>
    %952 = arith.mulf %951, %941 : vector<1x384xf32>
    %953 = arith.addf %936, %952 : vector<1x384xf32>
    %c71_77 = arith.constant 71 : index
    %954 = memref.load %arg3[%c71_77] : memref<144xf32, #tpu.memory_space<smem>>
    %955 = vector.broadcast %954 : f32 to vector<1x384xf32>
    %956 = arith.mulf %955, %941 : vector<1x384xf32>
    %957 = arith.addf %940, %956 : vector<1x384xf32>
    %958 = vector.extract_strided_slice %643 {offsets = [2, 0], sizes = [1, 384], strides = [1, 1]} : vector<4x384xf32> to vector<1x384xf32>
    %c72_78 = arith.constant 72 : index
    %959 = memref.load %arg3[%c72_78] : memref<144xf32, #tpu.memory_space<smem>>
    %960 = vector.broadcast %959 : f32 to vector<1x384xf32>
    %961 = arith.mulf %960, %958 : vector<1x384xf32>
    %962 = arith.addf %945, %961 : vector<1x384xf32>
    %c73_79 = arith.constant 73 : index
    %963 = memref.load %arg3[%c73_79] : memref<144xf32, #tpu.memory_space<smem>>
    %964 = vector.broadcast %963 : f32 to vector<1x384xf32>
    %965 = arith.mulf %964, %958 : vector<1x384xf32>
    %966 = arith.addf %949, %965 : vector<1x384xf32>
    %c74_80 = arith.constant 74 : index
    %967 = memref.load %arg3[%c74_80] : memref<144xf32, #tpu.memory_space<smem>>
    %968 = vector.broadcast %967 : f32 to vector<1x384xf32>
    %969 = arith.mulf %968, %958 : vector<1x384xf32>
    %970 = arith.addf %953, %969 : vector<1x384xf32>
    %c75_81 = arith.constant 75 : index
    %971 = memref.load %arg3[%c75_81] : memref<144xf32, #tpu.memory_space<smem>>
    %972 = vector.broadcast %971 : f32 to vector<1x384xf32>
    %973 = arith.mulf %972, %958 : vector<1x384xf32>
    %974 = arith.addf %957, %973 : vector<1x384xf32>
    %975 = vector.extract_strided_slice %643 {offsets = [3, 0], sizes = [1, 384], strides = [1, 1]} : vector<4x384xf32> to vector<1x384xf32>
    %c76_82 = arith.constant 76 : index
    %976 = memref.load %arg3[%c76_82] : memref<144xf32, #tpu.memory_space<smem>>
    %977 = vector.broadcast %976 : f32 to vector<1x384xf32>
    %978 = arith.mulf %977, %975 : vector<1x384xf32>
    %979 = arith.addf %962, %978 : vector<1x384xf32>
    %c77_83 = arith.constant 77 : index
    %980 = memref.load %arg3[%c77_83] : memref<144xf32, #tpu.memory_space<smem>>
    %981 = vector.broadcast %980 : f32 to vector<1x384xf32>
    %982 = arith.mulf %981, %975 : vector<1x384xf32>
    %983 = arith.addf %966, %982 : vector<1x384xf32>
    %c78_84 = arith.constant 78 : index
    %984 = memref.load %arg3[%c78_84] : memref<144xf32, #tpu.memory_space<smem>>
    %985 = vector.broadcast %984 : f32 to vector<1x384xf32>
    %986 = arith.mulf %985, %975 : vector<1x384xf32>
    %987 = arith.addf %970, %986 : vector<1x384xf32>
    %c79_85 = arith.constant 79 : index
    %988 = memref.load %arg3[%c79_85] : memref<144xf32, #tpu.memory_space<smem>>
    %989 = vector.broadcast %988 : f32 to vector<1x384xf32>
    %990 = arith.mulf %989, %975 : vector<1x384xf32>
    %991 = arith.addf %974, %990 : vector<1x384xf32>
    %992 = vector.extract_strided_slice %643 {offsets = [0, 1], sizes = [4, 383], strides = [1, 1]} : vector<4x384xf32> to vector<4x383xf32>
    %993 = vector.extract_strided_slice %643 {offsets = [0, 0], sizes = [4, 1], strides = [1, 1]} : vector<4x384xf32> to vector<4x1xf32>
    %994 = tpu.concatenate %992, %993 in 1 : vector<4x383xf32>, vector<4x1xf32> -> vector<4x384xf32>
    %995 = vector.extract_strided_slice %994 {offsets = [0, 0], sizes = [1, 384], strides = [1, 1]} : vector<4x384xf32> to vector<1x384xf32>
    %c80_86 = arith.constant 80 : index
    %996 = memref.load %arg3[%c80_86] : memref<144xf32, #tpu.memory_space<smem>>
    %997 = vector.broadcast %996 : f32 to vector<1x384xf32>
    %998 = arith.mulf %997, %995 : vector<1x384xf32>
    %999 = arith.addf %979, %998 : vector<1x384xf32>
    %c81_87 = arith.constant 81 : index
    %1000 = memref.load %arg3[%c81_87] : memref<144xf32, #tpu.memory_space<smem>>
    %1001 = vector.broadcast %1000 : f32 to vector<1x384xf32>
    %1002 = arith.mulf %1001, %995 : vector<1x384xf32>
    %1003 = arith.addf %983, %1002 : vector<1x384xf32>
    %c82_88 = arith.constant 82 : index
    %1004 = memref.load %arg3[%c82_88] : memref<144xf32, #tpu.memory_space<smem>>
    %1005 = vector.broadcast %1004 : f32 to vector<1x384xf32>
    %1006 = arith.mulf %1005, %995 : vector<1x384xf32>
    %1007 = arith.addf %987, %1006 : vector<1x384xf32>
    %c83_89 = arith.constant 83 : index
    %1008 = memref.load %arg3[%c83_89] : memref<144xf32, #tpu.memory_space<smem>>
    %1009 = vector.broadcast %1008 : f32 to vector<1x384xf32>
    %1010 = arith.mulf %1009, %995 : vector<1x384xf32>
    %1011 = arith.addf %991, %1010 : vector<1x384xf32>
    %1012 = vector.extract_strided_slice %994 {offsets = [1, 0], sizes = [1, 384], strides = [1, 1]} : vector<4x384xf32> to vector<1x384xf32>
    %c84_90 = arith.constant 84 : index
    %1013 = memref.load %arg3[%c84_90] : memref<144xf32, #tpu.memory_space<smem>>
    %1014 = vector.broadcast %1013 : f32 to vector<1x384xf32>
    %1015 = arith.mulf %1014, %1012 : vector<1x384xf32>
    %1016 = arith.addf %999, %1015 : vector<1x384xf32>
    %c85_91 = arith.constant 85 : index
    %1017 = memref.load %arg3[%c85_91] : memref<144xf32, #tpu.memory_space<smem>>
    %1018 = vector.broadcast %1017 : f32 to vector<1x384xf32>
    %1019 = arith.mulf %1018, %1012 : vector<1x384xf32>
    %1020 = arith.addf %1003, %1019 : vector<1x384xf32>
    %c86_92 = arith.constant 86 : index
    %1021 = memref.load %arg3[%c86_92] : memref<144xf32, #tpu.memory_space<smem>>
    %1022 = vector.broadcast %1021 : f32 to vector<1x384xf32>
    %1023 = arith.mulf %1022, %1012 : vector<1x384xf32>
    %1024 = arith.addf %1007, %1023 : vector<1x384xf32>
    %c87_93 = arith.constant 87 : index
    %1025 = memref.load %arg3[%c87_93] : memref<144xf32, #tpu.memory_space<smem>>
    %1026 = vector.broadcast %1025 : f32 to vector<1x384xf32>
    %1027 = arith.mulf %1026, %1012 : vector<1x384xf32>
    %1028 = arith.addf %1011, %1027 : vector<1x384xf32>
    %1029 = vector.extract_strided_slice %994 {offsets = [2, 0], sizes = [1, 384], strides = [1, 1]} : vector<4x384xf32> to vector<1x384xf32>
    %c88_94 = arith.constant 88 : index
    %1030 = memref.load %arg3[%c88_94] : memref<144xf32, #tpu.memory_space<smem>>
    %1031 = vector.broadcast %1030 : f32 to vector<1x384xf32>
    %1032 = arith.mulf %1031, %1029 : vector<1x384xf32>
    %1033 = arith.addf %1016, %1032 : vector<1x384xf32>
    %c89_95 = arith.constant 89 : index
    %1034 = memref.load %arg3[%c89_95] : memref<144xf32, #tpu.memory_space<smem>>
    %1035 = vector.broadcast %1034 : f32 to vector<1x384xf32>
    %1036 = arith.mulf %1035, %1029 : vector<1x384xf32>
    %1037 = arith.addf %1020, %1036 : vector<1x384xf32>
    %c90_96 = arith.constant 90 : index
    %1038 = memref.load %arg3[%c90_96] : memref<144xf32, #tpu.memory_space<smem>>
    %1039 = vector.broadcast %1038 : f32 to vector<1x384xf32>
    %1040 = arith.mulf %1039, %1029 : vector<1x384xf32>
    %1041 = arith.addf %1024, %1040 : vector<1x384xf32>
    %c91_97 = arith.constant 91 : index
    %1042 = memref.load %arg3[%c91_97] : memref<144xf32, #tpu.memory_space<smem>>
    %1043 = vector.broadcast %1042 : f32 to vector<1x384xf32>
    %1044 = arith.mulf %1043, %1029 : vector<1x384xf32>
    %1045 = arith.addf %1028, %1044 : vector<1x384xf32>
    %1046 = vector.extract_strided_slice %994 {offsets = [3, 0], sizes = [1, 384], strides = [1, 1]} : vector<4x384xf32> to vector<1x384xf32>
    %c92_98 = arith.constant 92 : index
    %1047 = memref.load %arg3[%c92_98] : memref<144xf32, #tpu.memory_space<smem>>
    %1048 = vector.broadcast %1047 : f32 to vector<1x384xf32>
    %1049 = arith.mulf %1048, %1046 : vector<1x384xf32>
    %1050 = arith.addf %1033, %1049 : vector<1x384xf32>
    %c93_99 = arith.constant 93 : index
    %1051 = memref.load %arg3[%c93_99] : memref<144xf32, #tpu.memory_space<smem>>
    %1052 = vector.broadcast %1051 : f32 to vector<1x384xf32>
    %1053 = arith.mulf %1052, %1046 : vector<1x384xf32>
    %1054 = arith.addf %1037, %1053 : vector<1x384xf32>
    %c94_100 = arith.constant 94 : index
    %1055 = memref.load %arg3[%c94_100] : memref<144xf32, #tpu.memory_space<smem>>
    %1056 = vector.broadcast %1055 : f32 to vector<1x384xf32>
    %1057 = arith.mulf %1056, %1046 : vector<1x384xf32>
    %1058 = arith.addf %1041, %1057 : vector<1x384xf32>
    %c95_101 = arith.constant 95 : index
    %1059 = memref.load %arg3[%c95_101] : memref<144xf32, #tpu.memory_space<smem>>
    %1060 = vector.broadcast %1059 : f32 to vector<1x384xf32>
    %1061 = arith.mulf %1060, %1046 : vector<1x384xf32>
    %1062 = arith.addf %1045, %1061 : vector<1x384xf32>
    %1063 = vector.extract_strided_slice %643 {offsets = [0, 17], sizes = [4, 367], strides = [1, 1]} : vector<4x384xf32> to vector<4x367xf32>
    %1064 = vector.extract_strided_slice %643 {offsets = [0, 0], sizes = [4, 17], strides = [1, 1]} : vector<4x384xf32> to vector<4x17xf32>
    %1065 = tpu.concatenate %1063, %1064 in 1 : vector<4x367xf32>, vector<4x17xf32> -> vector<4x384xf32>
    %1066 = vector.extract_strided_slice %1065 {offsets = [0, 0], sizes = [1, 384], strides = [1, 1]} : vector<4x384xf32> to vector<1x384xf32>
    %c96_102 = arith.constant 96 : index
    %1067 = memref.load %arg3[%c96_102] : memref<144xf32, #tpu.memory_space<smem>>
    %1068 = vector.broadcast %1067 : f32 to vector<1x384xf32>
    %1069 = arith.mulf %1068, %1066 : vector<1x384xf32>
    %1070 = arith.addf %1050, %1069 : vector<1x384xf32>
    %c97_103 = arith.constant 97 : index
    %1071 = memref.load %arg3[%c97_103] : memref<144xf32, #tpu.memory_space<smem>>
    %1072 = vector.broadcast %1071 : f32 to vector<1x384xf32>
    %1073 = arith.mulf %1072, %1066 : vector<1x384xf32>
    %1074 = arith.addf %1054, %1073 : vector<1x384xf32>
    %c98_104 = arith.constant 98 : index
    %1075 = memref.load %arg3[%c98_104] : memref<144xf32, #tpu.memory_space<smem>>
    %1076 = vector.broadcast %1075 : f32 to vector<1x384xf32>
    %1077 = arith.mulf %1076, %1066 : vector<1x384xf32>
    %1078 = arith.addf %1058, %1077 : vector<1x384xf32>
    %c99_105 = arith.constant 99 : index
    %1079 = memref.load %arg3[%c99_105] : memref<144xf32, #tpu.memory_space<smem>>
    %1080 = vector.broadcast %1079 : f32 to vector<1x384xf32>
    %1081 = arith.mulf %1080, %1066 : vector<1x384xf32>
    %1082 = arith.addf %1062, %1081 : vector<1x384xf32>
    %1083 = vector.extract_strided_slice %1065 {offsets = [1, 0], sizes = [1, 384], strides = [1, 1]} : vector<4x384xf32> to vector<1x384xf32>
    %c100_106 = arith.constant 100 : index
    %1084 = memref.load %arg3[%c100_106] : memref<144xf32, #tpu.memory_space<smem>>
    %1085 = vector.broadcast %1084 : f32 to vector<1x384xf32>
    %1086 = arith.mulf %1085, %1083 : vector<1x384xf32>
    %1087 = arith.addf %1070, %1086 : vector<1x384xf32>
    %c101_107 = arith.constant 101 : index
    %1088 = memref.load %arg3[%c101_107] : memref<144xf32, #tpu.memory_space<smem>>
    %1089 = vector.broadcast %1088 : f32 to vector<1x384xf32>
    %1090 = arith.mulf %1089, %1083 : vector<1x384xf32>
    %1091 = arith.addf %1074, %1090 : vector<1x384xf32>
    %c102_108 = arith.constant 102 : index
    %1092 = memref.load %arg3[%c102_108] : memref<144xf32, #tpu.memory_space<smem>>
    %1093 = vector.broadcast %1092 : f32 to vector<1x384xf32>
    %1094 = arith.mulf %1093, %1083 : vector<1x384xf32>
    %1095 = arith.addf %1078, %1094 : vector<1x384xf32>
    %c103_109 = arith.constant 103 : index
    %1096 = memref.load %arg3[%c103_109] : memref<144xf32, #tpu.memory_space<smem>>
    %1097 = vector.broadcast %1096 : f32 to vector<1x384xf32>
    %1098 = arith.mulf %1097, %1083 : vector<1x384xf32>
    %1099 = arith.addf %1082, %1098 : vector<1x384xf32>
    %1100 = vector.extract_strided_slice %1065 {offsets = [2, 0], sizes = [1, 384], strides = [1, 1]} : vector<4x384xf32> to vector<1x384xf32>
    %c104_110 = arith.constant 104 : index
    %1101 = memref.load %arg3[%c104_110] : memref<144xf32, #tpu.memory_space<smem>>
    %1102 = vector.broadcast %1101 : f32 to vector<1x384xf32>
    %1103 = arith.mulf %1102, %1100 : vector<1x384xf32>
    %1104 = arith.addf %1087, %1103 : vector<1x384xf32>
    %c105_111 = arith.constant 105 : index
    %1105 = memref.load %arg3[%c105_111] : memref<144xf32, #tpu.memory_space<smem>>
    %1106 = vector.broadcast %1105 : f32 to vector<1x384xf32>
    %1107 = arith.mulf %1106, %1100 : vector<1x384xf32>
    %1108 = arith.addf %1091, %1107 : vector<1x384xf32>
    %c106_112 = arith.constant 106 : index
    %1109 = memref.load %arg3[%c106_112] : memref<144xf32, #tpu.memory_space<smem>>
    %1110 = vector.broadcast %1109 : f32 to vector<1x384xf32>
    %1111 = arith.mulf %1110, %1100 : vector<1x384xf32>
    %1112 = arith.addf %1095, %1111 : vector<1x384xf32>
    %c107_113 = arith.constant 107 : index
    %1113 = memref.load %arg3[%c107_113] : memref<144xf32, #tpu.memory_space<smem>>
    %1114 = vector.broadcast %1113 : f32 to vector<1x384xf32>
    %1115 = arith.mulf %1114, %1100 : vector<1x384xf32>
    %1116 = arith.addf %1099, %1115 : vector<1x384xf32>
    %1117 = vector.extract_strided_slice %1065 {offsets = [3, 0], sizes = [1, 384], strides = [1, 1]} : vector<4x384xf32> to vector<1x384xf32>
    %c108_114 = arith.constant 108 : index
    %1118 = memref.load %arg3[%c108_114] : memref<144xf32, #tpu.memory_space<smem>>
    %1119 = vector.broadcast %1118 : f32 to vector<1x384xf32>
    %1120 = arith.mulf %1119, %1117 : vector<1x384xf32>
    %1121 = arith.addf %1104, %1120 : vector<1x384xf32>
    %c109_115 = arith.constant 109 : index
    %1122 = memref.load %arg3[%c109_115] : memref<144xf32, #tpu.memory_space<smem>>
    %1123 = vector.broadcast %1122 : f32 to vector<1x384xf32>
    %1124 = arith.mulf %1123, %1117 : vector<1x384xf32>
    %1125 = arith.addf %1108, %1124 : vector<1x384xf32>
    %c110_116 = arith.constant 110 : index
    %1126 = memref.load %arg3[%c110_116] : memref<144xf32, #tpu.memory_space<smem>>
    %1127 = vector.broadcast %1126 : f32 to vector<1x384xf32>
    %1128 = arith.mulf %1127, %1117 : vector<1x384xf32>
    %1129 = arith.addf %1112, %1128 : vector<1x384xf32>
    %c111_117 = arith.constant 111 : index
    %1130 = memref.load %arg3[%c111_117] : memref<144xf32, #tpu.memory_space<smem>>
    %1131 = vector.broadcast %1130 : f32 to vector<1x384xf32>
    %1132 = arith.mulf %1131, %1117 : vector<1x384xf32>
    %1133 = arith.addf %1116, %1132 : vector<1x384xf32>
    %1134 = vector.extract_strided_slice %643 {offsets = [0, 18], sizes = [4, 366], strides = [1, 1]} : vector<4x384xf32> to vector<4x366xf32>
    %1135 = vector.extract_strided_slice %643 {offsets = [0, 0], sizes = [4, 18], strides = [1, 1]} : vector<4x384xf32> to vector<4x18xf32>
    %1136 = tpu.concatenate %1134, %1135 in 1 : vector<4x366xf32>, vector<4x18xf32> -> vector<4x384xf32>
    %1137 = vector.extract_strided_slice %1136 {offsets = [0, 0], sizes = [1, 384], strides = [1, 1]} : vector<4x384xf32> to vector<1x384xf32>
    %c112_118 = arith.constant 112 : index
    %1138 = memref.load %arg3[%c112_118] : memref<144xf32, #tpu.memory_space<smem>>
    %1139 = vector.broadcast %1138 : f32 to vector<1x384xf32>
    %1140 = arith.mulf %1139, %1137 : vector<1x384xf32>
    %1141 = arith.addf %1121, %1140 : vector<1x384xf32>
    %c113_119 = arith.constant 113 : index
    %1142 = memref.load %arg3[%c113_119] : memref<144xf32, #tpu.memory_space<smem>>
    %1143 = vector.broadcast %1142 : f32 to vector<1x384xf32>
    %1144 = arith.mulf %1143, %1137 : vector<1x384xf32>
    %1145 = arith.addf %1125, %1144 : vector<1x384xf32>
    %c114_120 = arith.constant 114 : index
    %1146 = memref.load %arg3[%c114_120] : memref<144xf32, #tpu.memory_space<smem>>
    %1147 = vector.broadcast %1146 : f32 to vector<1x384xf32>
    %1148 = arith.mulf %1147, %1137 : vector<1x384xf32>
    %1149 = arith.addf %1129, %1148 : vector<1x384xf32>
    %c115_121 = arith.constant 115 : index
    %1150 = memref.load %arg3[%c115_121] : memref<144xf32, #tpu.memory_space<smem>>
    %1151 = vector.broadcast %1150 : f32 to vector<1x384xf32>
    %1152 = arith.mulf %1151, %1137 : vector<1x384xf32>
    %1153 = arith.addf %1133, %1152 : vector<1x384xf32>
    %1154 = vector.extract_strided_slice %1136 {offsets = [1, 0], sizes = [1, 384], strides = [1, 1]} : vector<4x384xf32> to vector<1x384xf32>
    %c116_122 = arith.constant 116 : index
    %1155 = memref.load %arg3[%c116_122] : memref<144xf32, #tpu.memory_space<smem>>
    %1156 = vector.broadcast %1155 : f32 to vector<1x384xf32>
    %1157 = arith.mulf %1156, %1154 : vector<1x384xf32>
    %1158 = arith.addf %1141, %1157 : vector<1x384xf32>
    %c117_123 = arith.constant 117 : index
    %1159 = memref.load %arg3[%c117_123] : memref<144xf32, #tpu.memory_space<smem>>
    %1160 = vector.broadcast %1159 : f32 to vector<1x384xf32>
    %1161 = arith.mulf %1160, %1154 : vector<1x384xf32>
    %1162 = arith.addf %1145, %1161 : vector<1x384xf32>
    %c118_124 = arith.constant 118 : index
    %1163 = memref.load %arg3[%c118_124] : memref<144xf32, #tpu.memory_space<smem>>
    %1164 = vector.broadcast %1163 : f32 to vector<1x384xf32>
    %1165 = arith.mulf %1164, %1154 : vector<1x384xf32>
    %1166 = arith.addf %1149, %1165 : vector<1x384xf32>
    %c119_125 = arith.constant 119 : index
    %1167 = memref.load %arg3[%c119_125] : memref<144xf32, #tpu.memory_space<smem>>
    %1168 = vector.broadcast %1167 : f32 to vector<1x384xf32>
    %1169 = arith.mulf %1168, %1154 : vector<1x384xf32>
    %1170 = arith.addf %1153, %1169 : vector<1x384xf32>
    %1171 = vector.extract_strided_slice %1136 {offsets = [2, 0], sizes = [1, 384], strides = [1, 1]} : vector<4x384xf32> to vector<1x384xf32>
    %c120_126 = arith.constant 120 : index
    %1172 = memref.load %arg3[%c120_126] : memref<144xf32, #tpu.memory_space<smem>>
    %1173 = vector.broadcast %1172 : f32 to vector<1x384xf32>
    %1174 = arith.mulf %1173, %1171 : vector<1x384xf32>
    %1175 = arith.addf %1158, %1174 : vector<1x384xf32>
    %c121_127 = arith.constant 121 : index
    %1176 = memref.load %arg3[%c121_127] : memref<144xf32, #tpu.memory_space<smem>>
    %1177 = vector.broadcast %1176 : f32 to vector<1x384xf32>
    %1178 = arith.mulf %1177, %1171 : vector<1x384xf32>
    %1179 = arith.addf %1162, %1178 : vector<1x384xf32>
    %c122_128 = arith.constant 122 : index
    %1180 = memref.load %arg3[%c122_128] : memref<144xf32, #tpu.memory_space<smem>>
    %1181 = vector.broadcast %1180 : f32 to vector<1x384xf32>
    %1182 = arith.mulf %1181, %1171 : vector<1x384xf32>
    %1183 = arith.addf %1166, %1182 : vector<1x384xf32>
    %c123_129 = arith.constant 123 : index
    %1184 = memref.load %arg3[%c123_129] : memref<144xf32, #tpu.memory_space<smem>>
    %1185 = vector.broadcast %1184 : f32 to vector<1x384xf32>
    %1186 = arith.mulf %1185, %1171 : vector<1x384xf32>
    %1187 = arith.addf %1170, %1186 : vector<1x384xf32>
    %1188 = vector.extract_strided_slice %1136 {offsets = [3, 0], sizes = [1, 384], strides = [1, 1]} : vector<4x384xf32> to vector<1x384xf32>
    %c124_130 = arith.constant 124 : index
    %1189 = memref.load %arg3[%c124_130] : memref<144xf32, #tpu.memory_space<smem>>
    %1190 = vector.broadcast %1189 : f32 to vector<1x384xf32>
    %1191 = arith.mulf %1190, %1188 : vector<1x384xf32>
    %1192 = arith.addf %1175, %1191 : vector<1x384xf32>
    %c125_131 = arith.constant 125 : index
    %1193 = memref.load %arg3[%c125_131] : memref<144xf32, #tpu.memory_space<smem>>
    %1194 = vector.broadcast %1193 : f32 to vector<1x384xf32>
    %1195 = arith.mulf %1194, %1188 : vector<1x384xf32>
    %1196 = arith.addf %1179, %1195 : vector<1x384xf32>
    %c126_132 = arith.constant 126 : index
    %1197 = memref.load %arg3[%c126_132] : memref<144xf32, #tpu.memory_space<smem>>
    %1198 = vector.broadcast %1197 : f32 to vector<1x384xf32>
    %1199 = arith.mulf %1198, %1188 : vector<1x384xf32>
    %1200 = arith.addf %1183, %1199 : vector<1x384xf32>
    %c127_133 = arith.constant 127 : index
    %1201 = memref.load %arg3[%c127_133] : memref<144xf32, #tpu.memory_space<smem>>
    %1202 = vector.broadcast %1201 : f32 to vector<1x384xf32>
    %1203 = arith.mulf %1202, %1188 : vector<1x384xf32>
    %1204 = arith.addf %1187, %1203 : vector<1x384xf32>
    %1205 = vector.extract_strided_slice %643 {offsets = [0, 19], sizes = [4, 365], strides = [1, 1]} : vector<4x384xf32> to vector<4x365xf32>
    %1206 = vector.extract_strided_slice %643 {offsets = [0, 0], sizes = [4, 19], strides = [1, 1]} : vector<4x384xf32> to vector<4x19xf32>
    %1207 = tpu.concatenate %1205, %1206 in 1 : vector<4x365xf32>, vector<4x19xf32> -> vector<4x384xf32>
    %1208 = vector.extract_strided_slice %1207 {offsets = [0, 0], sizes = [1, 384], strides = [1, 1]} : vector<4x384xf32> to vector<1x384xf32>
    %c128_134 = arith.constant 128 : index
    %1209 = memref.load %arg3[%c128_134] : memref<144xf32, #tpu.memory_space<smem>>
    %1210 = vector.broadcast %1209 : f32 to vector<1x384xf32>
    %1211 = arith.mulf %1210, %1208 : vector<1x384xf32>
    %1212 = arith.addf %1192, %1211 : vector<1x384xf32>
    %c129_135 = arith.constant 129 : index
    %1213 = memref.load %arg3[%c129_135] : memref<144xf32, #tpu.memory_space<smem>>
    %1214 = vector.broadcast %1213 : f32 to vector<1x384xf32>
    %1215 = arith.mulf %1214, %1208 : vector<1x384xf32>
    %1216 = arith.addf %1196, %1215 : vector<1x384xf32>
    %c130_136 = arith.constant 130 : index
    %1217 = memref.load %arg3[%c130_136] : memref<144xf32, #tpu.memory_space<smem>>
    %1218 = vector.broadcast %1217 : f32 to vector<1x384xf32>
    %1219 = arith.mulf %1218, %1208 : vector<1x384xf32>
    %1220 = arith.addf %1200, %1219 : vector<1x384xf32>
    %c131_137 = arith.constant 131 : index
    %1221 = memref.load %arg3[%c131_137] : memref<144xf32, #tpu.memory_space<smem>>
    %1222 = vector.broadcast %1221 : f32 to vector<1x384xf32>
    %1223 = arith.mulf %1222, %1208 : vector<1x384xf32>
    %1224 = arith.addf %1204, %1223 : vector<1x384xf32>
    %1225 = vector.extract_strided_slice %1207 {offsets = [1, 0], sizes = [1, 384], strides = [1, 1]} : vector<4x384xf32> to vector<1x384xf32>
    %c132_138 = arith.constant 132 : index
    %1226 = memref.load %arg3[%c132_138] : memref<144xf32, #tpu.memory_space<smem>>
    %1227 = vector.broadcast %1226 : f32 to vector<1x384xf32>
    %1228 = arith.mulf %1227, %1225 : vector<1x384xf32>
    %1229 = arith.addf %1212, %1228 : vector<1x384xf32>
    %c133_139 = arith.constant 133 : index
    %1230 = memref.load %arg3[%c133_139] : memref<144xf32, #tpu.memory_space<smem>>
    %1231 = vector.broadcast %1230 : f32 to vector<1x384xf32>
    %1232 = arith.mulf %1231, %1225 : vector<1x384xf32>
    %1233 = arith.addf %1216, %1232 : vector<1x384xf32>
    %c134_140 = arith.constant 134 : index
    %1234 = memref.load %arg3[%c134_140] : memref<144xf32, #tpu.memory_space<smem>>
    %1235 = vector.broadcast %1234 : f32 to vector<1x384xf32>
    %1236 = arith.mulf %1235, %1225 : vector<1x384xf32>
    %1237 = arith.addf %1220, %1236 : vector<1x384xf32>
    %c135_141 = arith.constant 135 : index
    %1238 = memref.load %arg3[%c135_141] : memref<144xf32, #tpu.memory_space<smem>>
    %1239 = vector.broadcast %1238 : f32 to vector<1x384xf32>
    %1240 = arith.mulf %1239, %1225 : vector<1x384xf32>
    %1241 = arith.addf %1224, %1240 : vector<1x384xf32>
    %1242 = vector.extract_strided_slice %1207 {offsets = [2, 0], sizes = [1, 384], strides = [1, 1]} : vector<4x384xf32> to vector<1x384xf32>
    %c136_142 = arith.constant 136 : index
    %1243 = memref.load %arg3[%c136_142] : memref<144xf32, #tpu.memory_space<smem>>
    %1244 = vector.broadcast %1243 : f32 to vector<1x384xf32>
    %1245 = arith.mulf %1244, %1242 : vector<1x384xf32>
    %1246 = arith.addf %1229, %1245 : vector<1x384xf32>
    %c137_143 = arith.constant 137 : index
    %1247 = memref.load %arg3[%c137_143] : memref<144xf32, #tpu.memory_space<smem>>
    %1248 = vector.broadcast %1247 : f32 to vector<1x384xf32>
    %1249 = arith.mulf %1248, %1242 : vector<1x384xf32>
    %1250 = arith.addf %1233, %1249 : vector<1x384xf32>
    %c138_144 = arith.constant 138 : index
    %1251 = memref.load %arg3[%c138_144] : memref<144xf32, #tpu.memory_space<smem>>
    %1252 = vector.broadcast %1251 : f32 to vector<1x384xf32>
    %1253 = arith.mulf %1252, %1242 : vector<1x384xf32>
    %1254 = arith.addf %1237, %1253 : vector<1x384xf32>
    %c139_145 = arith.constant 139 : index
    %1255 = memref.load %arg3[%c139_145] : memref<144xf32, #tpu.memory_space<smem>>
    %1256 = vector.broadcast %1255 : f32 to vector<1x384xf32>
    %1257 = arith.mulf %1256, %1242 : vector<1x384xf32>
    %1258 = arith.addf %1241, %1257 : vector<1x384xf32>
    %1259 = vector.extract_strided_slice %1207 {offsets = [3, 0], sizes = [1, 384], strides = [1, 1]} : vector<4x384xf32> to vector<1x384xf32>
    %c140_146 = arith.constant 140 : index
    %1260 = memref.load %arg3[%c140_146] : memref<144xf32, #tpu.memory_space<smem>>
    %1261 = vector.broadcast %1260 : f32 to vector<1x384xf32>
    %1262 = arith.mulf %1261, %1259 : vector<1x384xf32>
    %1263 = arith.addf %1246, %1262 : vector<1x384xf32>
    %c141_147 = arith.constant 141 : index
    %1264 = memref.load %arg3[%c141_147] : memref<144xf32, #tpu.memory_space<smem>>
    %1265 = vector.broadcast %1264 : f32 to vector<1x384xf32>
    %1266 = arith.mulf %1265, %1259 : vector<1x384xf32>
    %1267 = arith.addf %1250, %1266 : vector<1x384xf32>
    %c142_148 = arith.constant 142 : index
    %1268 = memref.load %arg3[%c142_148] : memref<144xf32, #tpu.memory_space<smem>>
    %1269 = vector.broadcast %1268 : f32 to vector<1x384xf32>
    %1270 = arith.mulf %1269, %1259 : vector<1x384xf32>
    %1271 = arith.addf %1254, %1270 : vector<1x384xf32>
    %c143_149 = arith.constant 143 : index
    %1272 = memref.load %arg3[%c143_149] : memref<144xf32, #tpu.memory_space<smem>>
    %1273 = vector.broadcast %1272 : f32 to vector<1x384xf32>
    %1274 = arith.mulf %1273, %1259 : vector<1x384xf32>
    %1275 = arith.addf %1258, %1274 : vector<1x384xf32>
    %1276 = tpu.concatenate %1263, %1267, %1271, %1275 in 0 : vector<1x384xf32>, vector<1x384xf32>, vector<1x384xf32>, vector<1x384xf32> -> vector<4x384xf32>
    %1277 = arith.addf %1, %1276 : vector<4x384xf32>
    %1278 = arith.mulf %1, %1277 : vector<4x384xf32>
    %c0_150 = arith.constant 0 : index
    %c0_151 = arith.constant 0 : index
    %c0_152 = arith.constant 0 : index
    %1279 = vector.load %arg6[%c0_150, %c0_151, %c0_152] : memref<1x4x384xf32, #tpu.memory_space<vmem>>, vector<1x4x384xf32>
    %1280 = vector.shape_cast %1279 : vector<1x4x384xf32> to vector<4x384xf32>
    %1281 = vector.shape_cast %1278 : vector<4x384xf32> to vector<1x4x384xf32>
    tpu.vector_store %arg6[%c0_150, %c0_151, %c0_152], %1281 {strides = array<i32>} : memref<1x4x384xf32, #tpu.memory_space<vmem>>, vector<1x4x384xf32>,
    return
  }
  func.func @transform_0(%arg0: i32) -> (i32, i32, i32) {
    %c0_i32 = arith.constant 0 : i32
    %c0_i32_0 = arith.constant 0 : i32
    %c0_i32_1 = arith.constant 0 : i32
    return %arg0, %c0_i32, %c0_i32_0 : i32, i32, i32
  }
  func.func @transform_1(%arg0: i32) -> i32 {
    %c0_i32 = arith.constant 0 : i32
    %c0_i32_0 = arith.constant 0 : i32
    return %c0_i32 : i32
  }
  func.func @transform_2(%arg0: i32) -> i32 {
    %c0_i32 = arith.constant 0 : i32
    %c0_i32_0 = arith.constant 0 : i32
    return %c0_i32 : i32
  }
  func.func @transform_3(%arg0: i32) -> i32 {
    %c0_i32 = arith.constant 0 : i32
    %c0_i32_0 = arith.constant 0 : i32
    return %c0_i32 : i32
  }
  func.func @transform_4(%arg0: i32) -> (i32, i32) {
    %c0_i32 = arith.constant 0 : i32
    %c0_i32_0 = arith.constant 0 : i32
    %c0_i32_1 = arith.constant 0 : i32
    return %c0_i32, %c0_i32_0 : i32, i32
  }
  func.func @transform_5(%arg0: i32) -> (i32, i32, i32) {
    %c0_i32 = arith.constant 0 : i32
    %c0_i32_0 = arith.constant 0 : i32
    %c0_i32_1 = arith.constant 0 : i32
    return %arg0, %c0_i32, %c0_i32_0 : i32, i32, i32
  }
}

</mosaic_0001>

<bundles_post_ra>
// kernel: tpu_custom_call.1
= control target key start
LH: loop header
LB: loop body
LE: loop exit
PB: predicated region body
PF: predicated region fallthrough
CT: control target
= control target key end

     0   :  { %s9483_s0 = inlined_call_operand.hbm [shape: f32[2,4,384], index: 0, kind: input, shape index: {}]   ;;  %s9484_s1 = inlined_call_operand.vmem [shape: f32[144], index: 1, kind: input, shape index: {}]   ;;  %s9485_s2 = inlined_call_operand.vmem [shape: f32[144], index: 2, kind: input, shape index: {}]   ;;  %s9486_s3 = inlined_call_operand.<no memory space> [shape: f32[1], index: 3, kind: input, shape index: {}]   ;;  %s9487_s4 = inlined_call_operand.vmem [shape: f32[1,384], index: 4, kind: input, shape index: {}]   ;;  %s9488_s5 = inlined_call_operand.hbm [shape: f32[2,4,384], index: 5, kind: output, shape index: {}]  }
   0x1   :  { %9674 = sst [smem:[#allocation128_spill]] %s9483_s0 }
   0x2   :  { %9675 = sst [smem:[#allocation129_spill]] %s9484_s1 }
   0x3   :  { %9676 = sst [smem:[#allocation130_spill]] %s9485_s2 }
   0x4   :  { %9677 = sst [smem:[#allocation131_spill]] %s9487_s4 }
   0x5   :  { %9678 = sst [smem:[#allocation132_spill]] %s9488_s5 }
   0x6   :  { %10 = sst [smem:[#allocation2]] %s9486_s3 }
   0x7   :  { %11 = vsyncpa [#allocation4], 0 }
   0x8   :  { %13 = vsyncpa [#allocation4 + $0x1], 0 }
   0x9   :  { %14 = vsyncpa [#allocation6], 0 }
   0xa   :  { %15 = vsyncpa [#allocation9], 0 }
   0xb   :  { %16 = vsyncpa [#allocation5], 0 }
   0xc   :  { %18 = vsyncpa [#allocation5 + $0x1], 0  ;;  %s5651_s20 = smov 0   ;;  %s5653_s21 = smov 0  }
   0xd   :  { %s5655_s22 = smov 0   ;;  %s5657_s23 = smov 0  }
   0xe LB: > { %9679 = sst [smem:[#allocation15_spill]] %s5592_s20  ;;  %s5672_s3 = sadd.s32 4294967295, %s5604_s23   ;;  %s5604_s23 = sphi %s5657_s23, %s10143_s23   ;;  %s5600_s22 = sphi %s5655_s22, %s10146_s22   ;;  %s5596_s21 = sphi %s5653_s21, %s10145_s21   ;;  %s5592_s20 = sphi %s5651_s20, %s10144_s20  }
   0xf   : > { %9680 = sst [smem:[#allocation16_spill]] %s5596_s21  ;;  %s5088_s24 = sadd.s32 4294967294, %s5604_s23  }
  0x10   : > { %9681 = sst [smem:[#allocation17_spill]] %s5600_s22  ;;  %p44_p0 = scmp.ne.s32.totalorder %s5596_s21, %s5592_s20 }
  0x11   : > { %9682 = sst [smem:[#allocation18_spill]] %s5604_s23  ;;  %p9489_p1 = scmp.eq.s32.totalorder %s5672_s3, 0 }
  0x12   : > { %9683 = sst [smem:[#allocation19_spill]] %s5672_s3  ;;  %p158_p3 = scmp.eq.s32.totalorder %s5088_s24, 1 }
  0x13   : > { %p5681_p4 = por %p9489_p1, %p44_p0  ;;  %p5089_p5 = scmp.ge.s32.totalorder %s5604_s23, 1 }
  0x14   : > { %p5686_p6 = por %p158_p3, %p44_p0  ;;  %p165_p7 = scmp.lt.s32.totalorder %s5604_s23, 3 }
  0x15   : > { %s9684_s25 = scalar_select %p5681_p4, 1, 0 }
  0x16   : > { %s9685_s26 = scalar_select %p5686_p6, 1, 0 }
  0x17   : > { %s9687_s1 = sld [smem:[#allocation129_spill]]  ;;  %p5694_p8 = pnand %p5089_p5, %p165_p7 }
  0x18   : > { %9686 = sst [smem:[#allocation20_spill]] %s9685_s26  ;;  %s9689_s2 = sld [smem:[#allocation130_spill]] }
  0x19   : > { %s9688_s30 = scalar_select %p5694_p8, 1, 0 }
  0x1a   : > { %p5402_p10 = pneg %p5694_p8  ;;  %s5711_s10 = sadd.s32 1, %s5604_s23  }
  0x1b   : > { %9691 = sst [smem:[#allocation21_spill]] %s5711_s10  ;;  %s28_s11 = ssub.s32 %s5604_s23, %s5711_s10 }
  0x1c   : > { %p5706_p11 = pnand %p5402_p10, %p9489_p1 }
  0x1d   : > { %s178_s29 = sshll.u32 %s9687_s1, 4  ;;  %s179_s29 = int_to_ptr.vmem [resolvable:$true] %s178_s29 }
  0x1e   : > { %s189_s8 = sshll.u32 %s9689_s2, 4  ;;  %s5470_s12 = scalar_lea.vmem %s179_s29, 32  ;;  %s190_s8 = int_to_ptr.vmem [resolvable:$true] %s189_s8 }
  0x1f   : > { %p5471_p12 = scmp.ne.s32.totalorder %s179_s29, %s5470_s12  ;;  %p5472_p13 = pneg %p5706_p11 }
  0x20   : > { %p5478_p5 = scmp.lt.s32.totalorder %s179_s29, %s179_s29  ;;  %p5479_p7 = scmp.lt.s32.totalorder %s5470_s12, %s5470_s12 }
  0x21   : > { %p5473_p0 = pnand %p5472_p13, %p5471_p12 }
  0x22   : > { %p5480_p9 = por %p5479_p7, %p5478_p5 }
  0x23   : > { %p5474_p3 = pneg %p5473_p0 }
  0x25   : > { %p5481_p2 = pnand %p5480_p9, %p5474_p3 }
  0x27   : > { %5484 = shalt.err (!%p5481_p2)
}
  0x28   : > { %s5606_s13 = smov [#allocation7]   ;;  %s5485_s14 = scalar_lea.vmem %s190_s8, 32 }
  0x29   : > { %5405 = dma.vmem_to_smem (!%p5706_p11), %s179_s29, 32, %s5606_s13, [#allocation6]  }
  0x2a   : > { %p5486_p10 = scmp.ne.s32.totalorder %s190_s8, %s5485_s14  ;;  %p5493_p4 = scmp.lt.s32.totalorder %s190_s8, %s190_s8 }
  0x2b   : > { %p5494_p8 = scmp.lt.s32.totalorder %s5485_s14, %s5485_s14 }
  0x2c   : > { %p5488_p1 = pnand %p5486_p10, %p5472_p13 }
  0x2d   : > { %p5495_p12 = por %p5494_p8, %p5493_p4 }
  0x2e   : > { %p5489_p6 = pneg %p5488_p1 }
  0x30   : > { %p5496_p0 = pnand %p5495_p12, %p5489_p6 }
  0x32   : > { %5499 = shalt.err (!%p5496_p0)
}
  0x33   : > { %s5607_s15 = smov [#allocation8]   ;;  %p29_p2 = scmp.eq.s32.totalorder %s28_s11, 0 }
  0x34   : > { %5408 = dma.vmem_to_smem (!%p5706_p11), %s190_s8, 32, %s5607_s15, [#allocation9]  }
  0x35   : > { %s31_s16 = sadd.s32 1, %s5600_s22  ;;  %p38_p1 = scmp.ne.s32.totalorder %s5600_s22, %s5596_s21 }
  0x36   : > { %p39_p9 = scmp.eq.s32.totalorder %s5604_s23, 0  ;;  %p9693_p6 = scmp.eq.s32.totalorder %s5672_s3, 1 }
  0x37   : > { %s5726_s17 = scalar_select %p29_p2, %s5600_s22, %s31_s16  }
  0x38   : > { %p40_p4 = por %p39_p9, %p38_p1  ;;  %p5730_p8 = por %p9693_p6, %p38_p1 }
  0x39   : > { %9692 = sst [smem:[#allocation22_spill]] %s5726_s17  ;;  %p5419_p13 = scmp.lt.s32.totalorder %s5604_s23, 2 }
  0x3a   : > { %s9694_s18 = scalar_select %p5730_p8, 1, 0 }
  0x3b   : > { %s206_s19 = sand.u32 1, %s5600_s22   ;;  %s5387_s27 = smul.u32 192, %s5604_s23 }
  0x3c   : > { %9695 = sst [smem:[#allocation23_spill]] %s9694_s18  ;;  %s5386_s24 = smul.u32 12, %s206_s19 }
  0x3d   : > { %p5737_p3 = pnand %p5419_p13, %p40_p4  ;;  %s9697_s0 = sld [smem:[#allocation128_spill]] }
  0x3e   : > { %s210_s8 = scalar_lea.vmem [#allocation3], %s5386_s24  ;;  %s207_s11 = scalar_lea.sflag [#allocation4], %s206_s19 }
  0x3f   : > { %s218_s9 = sshll.u32 %s210_s8, 4  ;;  %p5502_p5 = pneg %p5737_p3  ;;  %s5746_s9 = int_to_ptr.vmem [resolvable:$true] %s218_s9 }
  0x43   : > { %s5744_s7 = scalar_lea.hbm %s9697_s0, %s5387_s27  ;;  %s5505_s15 = scalar_lea.hbm %s9697_s0, 384 }
  0x44   : > { %s5500_s12 = scalar_lea.hbm %s5744_s7, 192  ;;  %p5506_p12 = scmp.lt.u32.totalorder %s5744_s7, %s9697_s0 }
  0x45   : > { %p5501_p11 = scmp.ne.s32.totalorder %s5744_s7, %s5500_s12  ;;  %p5507_p0 = scmp.lt.u32.totalorder %s5505_s15, %s5500_s12 }
  0x46   : > { %p5509_p1 = scmp.lt.u32.totalorder %s5500_s12, %s5744_s7 }
  0x47   : > { %p5503_p7 = pnand %p5502_p5, %p5501_p11  ;;  %p5508_p2 = por %p5507_p0, %p5506_p12 }
  0x49   : > { %p5504_p10 = pneg %p5503_p7  ;;  %p5510_p9 = por %p5509_p1, %p5508_p2 }
  0x4b   : > { %p5511_p4 = pnand %p5510_p9, %p5504_p10 }
  0x4d   : > { %5514 = shalt.err (!%p5511_p4)
}
  0x4e   : > { %s5515_s19 = scalar_lea.vmem %s5746_s9, 192  ;;  %s5608_s24 = smov [#allocation3]  }
  0x4f   : > { %p5516_p6 = scmp.ne.s32.totalorder %s5746_s9, %s5515_s19  ;;  %s5520_s29 = sshll.u32 %s5608_s24, 4  ;;  %s5521_s29 = int_to_ptr.vmem [resolvable:$false] %s5520_s29 }
  0x50   : > { %s5522_s6 = scalar_lea.vmem %s5521_s29, 384  ;;  %p5523_p7 = scmp.lt.s32.totalorder %s5746_s9, %s5521_s29 }
  0x51   : > { %p5518_p13 = pnand %p5516_p6, %p5502_p5  ;;  %p5524_p12 = scmp.lt.s32.totalorder %s5522_s6, %s5515_s19 }
  0x53   : > { %p5519_p11 = pneg %p5518_p13  ;;  %p5525_p0 = por %p5524_p12, %p5523_p7 }
  0x55   : > { %p5526_p2 = pnand %p5525_p0, %p5519_p11 }
  0x57   : > { %5529 = shalt.err (!%p5526_p2)
}
  0x58   : > { %5412 = dma.hbm_to_vmem [thread:$0]  (!%p5737_p3), %s5744_s7, 192, %s5746_s9, %s207_s11  }
  0x59   : > { %p9698_p10 = scmp.ne.s32.totalorder %s9688_s30, 0 }
  0x5b   : > { %227 = sbr.rel (%p9698_p10) target bundleno = 1006 (0x3ee), region = 40 }
  0x62   : > { %s5776_s8 = sand.u32 1, %s5596_s21   ;;  %p9701_p5 = scmp.ne.s32.totalorder %s9684_s25, 0 }
  0x63   : > { %9699 = sst [smem:[#allocation24_spill]] %s5776_s8  ;;  %s9492_s12 = smul.u32 12, %s5776_s8 }
  0x64   : > { %s230_s13 = scalar_lea.sflag [#allocation4], %s5776_s8 }
  0x65   : > { %s5782_s14 = scalar_lea.vmem [#allocation3], %s9492_s12 }
  0x66   : > { %9700 = sst [smem:[#allocation25_spill]] %s5782_s14 }
  0x67   : > { %5575 = dma.done.wait (%p9701_p5), %s230_s13, 192  }
  0x68   : > { %5577 = vsyncadd (%p9701_p5), %s230_s13, 4294967104  ;;  %p9702_p3 = scmp.eq.s32.totalorder %s5672_s3, 0 }
  0x6a   : > { %5579 = dma.done.wait (%p9702_p3), [#allocation6], 32   ;;  %p9703_p1 = pmov %p9702_p3 }
  0x6c   : > { %5581 = vsyncadd (%p9703_p1), [#allocation6], 4294967264  ;;  %p9704_p9 = pmov %p9703_p1 }
  0x6d   : > { %p9705_p4 = pmov %p9703_p1 }
  0x6e   : > { %5583 = dma.done.wait (%p9704_p9), [#allocation9], 32  }
  0x6f   : > { %5585 = vsyncadd (%p9705_p4), [#allocation9], 4294967264 }
  0x70   : > { %246 = sfence }
  0x71   : > { %v5797_v0 = vld [vmem:[%s5782_s14 + $0x8] sm:$0xf]  ;;  %v5800_v1 = vld [vmem:[%s5782_s14] sm:$0xff]  ;;  %s9507_s25 = smov 19   ;;  %s9505_s30 = smov 18   ;;  %v1270_v32 = vlaneseq  ;;  %vm283_vm0 = vcmask 154624  }
  0x72   : > { %274 = vrot.lane.b32.xlu0 %v5797_v0, %s9507_s25  ;;  %v278_v2 = vcombine.high %v5800_v1, %v5800_v1  ;;  %s9503_s28 = smov 17   ;;  %s9501_s7 = smov 1   ;;  %vm521_vm1 = vcmask 146432   ;;  %vm771_vm2 = vcmask 138240   ;;  %vm1021_vm3 = vcmask 7168  }
  0x73   : > { %s9497_s9 = smov 127   ;;  %s9495_s11 = smov 111   ;;  %v6112_v48 = vshrl.u32 %v1270_v32, 7  ;;  %vm1654_vm4 = vcmask 1039360   ;;  %vm1904_vm5 = vcmask 908288   ;;  %vm2154_vm6 = vcmask 900096  }
  0x74   : > { %281 = vrot.lane.b32.xlu1 %v278_v2, %s9507_s25  ;;  %s9493_s15 = smov 110   ;;  %s9499_s16 = smov 109   ;;  %vm2404_vm7 = vcmask 891904   ;;  %vm2675_vm8 = vcmask 1040384   ;;  %vm2679_vm9 = vcmask 1041408   ;;  %vm2683_vm10 = vcmask 1042432  }
  0x75   : > { %s5844_s27 = sld [smem:[#allocation7]]  ;;  %s5846_s19 = sld [smem:[#allocation7 + $0x1]]  ;;  %9764 = vst [vmem:[#allocation62_spill] sm:$0xff] %v6112_v48  ;;  %v6165_v63 = vsub.s32 0, %v6112_v48 }
  0x76   : > { %279 = vrot.lane.b32.xlu0 %v5800_v1, %s9507_s25  ;;  %s5848_s24 = sld [smem:[#allocation7 + $0x2]]  ;;  %s5850_s29 = sld [smem:[#allocation7 + $0x3]] }
  0x77   : > { %s5852_s6 = sld [smem:[#allocation7 + $0x4]]  ;;  %s5854_s13 = sld [smem:[#allocation7 + $0x5]]  ;;  %9781 = vst [vmem:[#allocation77_spill] sm:$0xff] %v6165_v63 }
  0x78   : > { %514 = vrot.lane.b32.xlu1 %v5797_v0, %s9505_s30  ;;  %s5856_s12 = sld [smem:[#allocation7 + $0x6]]  ;;  %s5874_s0 = sld [smem:[#allocation7 + $0xf]] }
  0x79   : > { %s5872_s25 = sld [smem:[#allocation7 + $0xe]]  ;;  %s5876_s1 = sld [smem:[#allocation7 + $0x10]] }
  0x7a   : > { %517 = vrot.lane.b32.xlu0 %v5800_v1, %s9505_s30  ;;  %s5878_s2 = sld [smem:[#allocation7 + $0x11]]  ;;  %s5880_s17 = sld [smem:[#allocation7 + $0x12]] }
  0x7b   : > { %s5882_s22 = sld [smem:[#allocation7 + $0x13]]  ;;  %s5884_s21 = sld [smem:[#allocation7 + $0x14]]  ;;  %v5937_v3 = vstv %s5844_s27  ;;  %v5940_v4 = vstv %s5846_s19 }
  0x7c   : > { %519 = vrot.lane.b32.xlu1 %v278_v2, %s9505_s30  ;;  %s5870_s30 = sld [smem:[#allocation7 + $0xd]]  ;;  %s5888_s23 = sld [smem:[#allocation7 + $0x16]]  ;;  %v5947_v5 = vstv %s5848_s24  ;;  %v5950_v6 = vstv %s5850_s29 }
  0x7d   : > { %s5886_s10 = sld [smem:[#allocation7 + $0x15]]  ;;  %s5890_s26 = sld [smem:[#allocation7 + $0x17]]  ;;  %v5953_v7 = vstv %s5852_s6  ;;  %v5956_v8 = vstv %s5854_s13 }
  0x7e   : > { %764 = vrot.lane.b32.xlu0 %v5797_v0, %s9503_s28  ;;  %s5892_s20 = sld [smem:[#allocation7 + $0x18]]  ;;  %s5894_s5 = sld [smem:[#allocation7 + $0x19]]  ;;  %v5963_v9 = vstv %s5856_s12  ;;  %v5998_v18 = vstv %s5874_s0 }
  0x7f   : > { %s5896_s18 = sld [smem:[#allocation7 + $0x1a]]  ;;  %s5898_s8 = sld [smem:[#allocation7 + $0x1b]]  ;;  %v5995_v17 = vstv %s5872_s25  ;;  %v6001_v19 = vstv %s5876_s1 }
  0x80   : > { %767 = vrot.lane.b32.xlu1 %v5800_v1, %s9503_s28  ;;  %s5900_s3 = sld [smem:[#allocation7 + $0x1c]]  ;;  %s5902_s4 = sld [smem:[#allocation7 + $0x1d]]  ;;  %v6004_v20 = vstv %s5878_s2  ;;  %v6011_v21 = vstv %s5880_s17 }
  0x81   : > { %s5904_s14 = sld [smem:[#allocation7 + $0x1e]]  ;;  %s5958_s27 = sld [smem:[#allocation7 + $0x30]]  ;;  %v6014_v22 = vstv %s5882_s22  ;;  %v6017_v23 = vstv %s5884_s21 }
  0x82   : > { %769 = vrot.lane.b32.xlu0 %v278_v2, %s9503_s28  ;;  %s5868_s28 = sld [smem:[#allocation7 + $0xc]]  ;;  %s5960_s19 = sld [smem:[#allocation7 + $0x31]]  ;;  %v5988_v16 = vstv %s5870_s30 }
  0x83   : > { %9706 = sst [smem:[#allocation26_spill]] %s5886_s10  ;;  %s5906_s10 = sld [smem:[#allocation7 + $0x1f]] }
  0x84   : > { %1014 = vrot.lane.b32.xlu1 %v5797_v0, %s9501_s7  ;;  %9707 = sst [smem:[#allocation27_spill]] %s5888_s23  ;;  %s5908_s23 = sld [smem:[#allocation7 + $0x20]]  ;;  %v6036_v28 = vstv %s5894_s5 }
  0x85   : > { %9708 = sst [smem:[#allocation28_spill]] %s5890_s26  ;;  %s5910_s26 = sld [smem:[#allocation7 + $0x21]] }
  0x86   : > { %1017 = vrot.lane.b32.xlu0 %v5800_v1, %s9501_s7  ;;  %9709 = sst [smem:[#allocation29_spill]] %s5892_s20  ;;  %s5912_s20 = sld [smem:[#allocation7 + $0x22]] }
  0x87   : > { %9710 = sst [smem:[#allocation30_spill]] %s5896_s18  ;;  %s5914_s18 = sld [smem:[#allocation7 + $0x23]]  ;;  %v6131_v53 = vstv %s5958_s27 }
  0x88   : > { %1019 = vrot.lane.b32.xlu1 %v278_v2, %s9501_s7  ;;  %s5866_s7 = sld [smem:[#allocation7 + $0xb]]  ;;  %9711 = sst [smem:[#allocation31_spill]] %s5898_s8  ;;  %v5985_v15 = vstv %s5868_s28  ;;  %9771 = vst [vmem:[#allocation67_spill] sm:$0xff] %v6131_v53  ;;  %v6134_v54 = vstv %s5960_s19 }
  0x89   : > { %9712 = sst [smem:[#allocation32_spill]] %s5900_s3  ;;  %s5916_s8 = sld [smem:[#allocation7 + $0x24]]  ;;  %9772 = vst [vmem:[#allocation68_spill] sm:$0xff] %v6134_v54 }
  0x8a   : > { %1648 = vrot.lane.b32.xlu0 %v5800_v1, %s9497_s9  ;;  %9713 = sst [smem:[#allocation33_spill]] %s5902_s4  ;;  %s5918_s4 = sld [smem:[#allocation7 + $0x25]]  ;;  %v6065_v36 = vstv %s5908_s23 }
  0x8b   : > { %9714 = sst [smem:[#allocation34_spill]] %s5904_s14  ;;  %s5920_s14 = sld [smem:[#allocation7 + $0x26]]  ;;  %9750 = vst [vmem:[#allocation50_spill] sm:$0xff] %v6065_v36 }
  0x8c   : > { %1650 = vrot.lane.b32.xlu1 %v278_v2, %s9497_s9  ;;  %9715 = sst [smem:[#allocation35_spill]] %s5906_s10  ;;  %s5922_s10 = sld [smem:[#allocation7 + $0x27]] }
  0x8d   : > { %9716 = sst [smem:[#allocation36_spill]] %s5910_s26  ;;  %s5924_s3 = sld [smem:[#allocation7 + $0x28]] }
  0x8e   : > { %1652 = vrot.lane.b32.xlu0 %v5797_v0, %s9497_s9  ;;  %s5862_s9 = sld [smem:[#allocation7 + $0x9]]  ;;  %9717 = sst [smem:[#allocation37_spill]] %s5912_s20  ;;  %v5982_v14 = vstv %s5866_s7 }
  0x8f   : > { %9718 = sst [smem:[#allocation38_spill]] %s5914_s18  ;;  %s5926_s26 = sld [smem:[#allocation7 + $0x29]] }
  0x90   : > { %1898 = vrot.lane.b32.xlu1 %v5800_v1, %s9495_s11  ;;  %9719 = sst [smem:[#allocation39_spill]] %s5916_s8  ;;  %s5928_s20 = sld [smem:[#allocation7 + $0x2a]] }
  0x91   : > { %9720 = sst [smem:[#allocation40_spill]] %s5918_s4  ;;  %s5930_s18 = sld [smem:[#allocation7 + $0x2b]]  ;;  %v6091_v42 = vstv %s5920_s14 }
  0x92   : > { %1900 = vrot.lane.b32.xlu0 %v278_v2, %s9495_s11  ;;  %s5932_s8 = sld [smem:[#allocation7 + $0x2c]]  ;;  %s5934_s4 = sld [smem:[#allocation7 + $0x2d]]  ;;  %9756 = vst [vmem:[#allocation56_spill] sm:$0xff] %v6091_v42  ;;  %v6094_v43 = vstv %s5922_s10 }
  0x93   : > { %9721 = sst [smem:[#allocation41_spill]] %s5924_s3  ;;  %s5942_s3 = sld [smem:[#allocation7 + $0x2e]]  ;;  %9757 = vst [vmem:[#allocation57_spill] sm:$0xff] %v6094_v43  ;;  %v6228_v43 = vsub.s32 4, %v6112_v48 }
  0x94   : > { %1902 = vrot.lane.b32.xlu1 %v5797_v0, %s9495_s11  ;;  %s5860_s11 = sld [smem:[#allocation7 + $0x8]]  ;;  %v5972_v12 = vstv %s5862_s9  ;;  %s5974_s24 = sld [smem:[#allocation7 + $0x32]] }
  0x95   : > { %9722 = sst [smem:[#allocation42_spill]] %s5926_s26  ;;  %s5944_s26 = sld [smem:[#allocation7 + $0x2f]]  ;;  %9798 = vst [vmem:[#allocation94_spill] sm:$0xff] %v6228_v43 }
  0x96   : > { %2148 = vrot.lane.b32.xlu0 %v5800_v1, %s9493_s15  ;;  %s5976_s29 = sld [smem:[#allocation7 + $0x33]]  ;;  %s9725_s12 = sld [smem:[#allocation27_spill]]  ;;  %v6107_v46 = vstv %s5928_s20 }
  0x97   : > { %s9724_s6 = sld [smem:[#allocation26_spill]]  ;;  %s9727_s9 = sld [smem:[#allocation29_spill]]  ;;  %9761 = vst [vmem:[#allocation60_spill] sm:$0xff] %v6107_v46  ;;  %v6110_v47 = vstv %s5930_s18 }
  0x98   : > { %2150 = vrot.lane.b32.xlu1 %v278_v2, %s9493_s15  ;;  %s5992_s13 = sld [smem:[#allocation7 + $0x35]]  ;;  %s9729_s7 = sld [smem:[#allocation30_spill]]  ;;  %9763 = vst [vmem:[#allocation61_spill] sm:$0xff] %v6110_v47  ;;  %v6119_v49 = vstv %s5932_s8  ;;  %v6122_v50 = vstv %s5934_s4 }
  0x99   : > { %s9730_s28 = sld [smem:[#allocation31_spill]]  ;;  %s9731_s30 = sld [smem:[#allocation32_spill]]  ;;  %9767 = vst [vmem:[#allocation63_spill] sm:$0xff] %v6119_v49  ;;  %9768 = vst [vmem:[#allocation64_spill] sm:$0xff] %v6122_v50  ;;  %v6125_v51 = vstv %s5942_s3 }
  0x9a   : > { %2152 = vrot.lane.b32.xlu0 %v5797_v0, %s9493_s15  ;;  %s5858_s15 = sld [smem:[#allocation7 + $0x7]]  ;;  %v5969_v11 = vstv %s5860_s11  ;;  %s9726_s11 = sld [smem:[#allocation28_spill]]  ;;  %9769 = vst [vmem:[#allocation65_spill] sm:$0xff] %v6125_v51  ;;  %v6137_v55 = vstv %s5974_s24 }
  0x9b   : > { %s9733_s25 = sld [smem:[#allocation33_spill]]  ;;  %s9734_s0 = sld [smem:[#allocation34_spill]]  ;;  %v6128_v52 = vstv %s5944_s26  ;;  %9773 = vst [vmem:[#allocation69_spill] sm:$0xff] %v6137_v55 }
  0x9c   : > { %2398 = vrot.lane.b32.xlu1 %v5800_v1, %s9499_s16  ;;  %9723 = sst [smem:[#allocation43_spill]] %s5976_s29  ;;  %s6008_s29 = sld [smem:[#allocation7 + $0x37]]  ;;  %v6027_v25 = vstv %s9725_s12  ;;  %9770 = vst [vmem:[#allocation66_spill] sm:$0xff] %v6128_v52 }
  0x9d   : > { %v6020_v24 = vstv %s9724_s6  ;;  %s6022_s1 = sld [smem:[#allocation7 + $0x38]]  ;;  %s9736_s2 = sld [smem:[#allocation35_spill]]  ;;  %v6033_v27 = vstv %s9727_s9 }
  0x9e   : > { %2400 = vrot.lane.b32.xlu0 %v278_v2, %s9499_s16  ;;  %9728 = sst [smem:[#allocation26_spill]] %s5992_s13  ;;  %s6024_s13 = sld [smem:[#allocation7 + $0x39]]  ;;  %v6043_v29 = vstv %s9729_s7  ;;  %v6168_v2 = vsub.s32 1, %v6112_v48 }
  0x9f   : > { %s9737_s22 = sld [smem:[#allocation36_spill]]  ;;  %s9738_s21 = sld [smem:[#allocation37_spill]]  ;;  %9741 = vst [vmem:[#allocation44_spill] sm:$0xff] %v6043_v29  ;;  %v6046_v30 = vstv %s9730_s28  ;;  %v6049_v31 = vstv %s9731_s30 }
  0xa0   : > { %2402 = vrot.lane.b32.xlu1 %v5797_v0, %s9499_s16  ;;  %s5864_s16 = sld [smem:[#allocation7 + $0xa]]  ;;  %v5966_v10 = vstv %s5858_s15  ;;  %s5990_s15 = sld [smem:[#allocation7 + $0x34]]  ;;  %v6030_v26 = vstv %s9726_s11  ;;  %9742 = vst [vmem:[#allocation45_spill] sm:$0xff] %v6046_v30  ;;  %9743 = vst [vmem:[#allocation46_spill] sm:$0xff] %v6049_v31 }
  0xa1   : > { %s6038_s17 = sld [smem:[#allocation7 + $0x3a]]  ;;  %s9739_s6 = sld [smem:[#allocation38_spill]]  ;;  %v6056_v33 = vstv %s9733_s25  ;;  %v6059_v34 = vstv %s9734_s0  ;;  %9782 = vst [vmem:[#allocation78_spill] sm:$0xff] %v6168_v2 }
  0xa2   : > { %9732 = sst [smem:[#allocation27_spill]] %s6008_s29  ;;  %s6040_s29 = sld [smem:[#allocation7 + $0x3b]]  ;;  %9746 = vst [vmem:[#allocation47_spill] sm:$0xff] %v6056_v33  ;;  %9747 = vst [vmem:[#allocation48_spill] sm:$0xff] %v6059_v34 }
  0xa3   : > { %9735 = sst [smem:[#allocation28_spill]] %s6022_s1  ;;  %s9740_s1 = sld [smem:[#allocation39_spill]]  ;;  %v6062_v35 = vstv %s9736_s2 }
  0xa4   : > { %s9744_s12 = sld [smem:[#allocation40_spill]]  ;;  %s6051_s11 = sld [smem:[#allocation7 + $0x3c]]  ;;  %9748 = vst [vmem:[#allocation49_spill] sm:$0xff] %v6062_v35  ;;  %v6162_v62 = vstv %s6024_s13 }
  0xa5   : > { %s6053_s9 = sld [smem:[#allocation7 + $0x3d]]  ;;  %s9745_s5 = sld [smem:[#allocation41_spill]]  ;;  %v6072_v37 = vstv %s9737_s22  ;;  %v6075_v38 = vstv %s9738_s21  ;;  %9780 = vst [vmem:[#allocation76_spill] sm:$0xff] %v6162_v62 }
  0xa6   : > { %v5979_v13 = vstv %s5864_s16  ;;  %s6006_s16 = sld [smem:[#allocation7 + $0x36]]  ;;  %s9749_s7 = sld [smem:[#allocation42_spill]]  ;;  %9751 = vst [vmem:[#allocation51_spill] sm:$0xff] %v6072_v37  ;;  %9752 = vst [vmem:[#allocation52_spill] sm:$0xff] %v6075_v38  ;;  %v6147_v57 = vstv %s5990_s15 }
  0xa7   : > { %s6067_s28 = sld [smem:[#allocation7 + $0x40]]  ;;  %s6069_s30 = sld [smem:[#allocation7 + $0x41]]  ;;  %v6078_v39 = vstv %s9739_s6  ;;  %9775 = vst [vmem:[#allocation71_spill] sm:$0xff] %v6147_v57  ;;  %v6171_v32 = vstv %s6038_s17 }
  0xa8   : > { %9753 = vst [vmem:[#allocation53_spill] sm:$0xff] %v6078_v39  ;;  %s6083_s25 = sld [smem:[#allocation7 + $0x42]]  ;;  %s6085_s23 = sld [smem:[#allocation7 + $0x43]]  ;;  %9783 = vst [vmem:[#allocation79_spill] sm:$0xff] %v6171_v32 }
  0xa9   : > { %v6081_v40 = vstv %s9740_s1  ;;  %s9759_s0 = sld [smem:[#allocation43_spill]]  ;;  %s6101_s2 = sld [smem:[#allocation7 + $0x45]] }
  0xaa   : > { %9754 = vst [vmem:[#allocation54_spill] sm:$0xff] %v6081_v40  ;;  %v6088_v41 = vstv %s9744_s12  ;;  %s6099_s1 = sld [smem:[#allocation7 + $0x44]]  ;;  %s9762_s22 = sld [smem:[#allocation26_spill]] }
  0xab   : > { %9755 = vst [vmem:[#allocation55_spill] sm:$0xff] %v6088_v41  ;;  %v6097_v44 = vstv %s9745_s5  ;;  %s9765_s10 = sld [smem:[#allocation27_spill]]  ;;  %s6114_s14 = sld [smem:[#allocation7 + $0x46]] }
  0xac   : > { %9758 = vst [vmem:[#allocation58_spill] sm:$0xff] %v6097_v44  ;;  %v6104_v45 = vstv %s9749_s7  ;;  %s9766_s21 = sld [smem:[#allocation28_spill]]  ;;  %s6116_s6 = sld [smem:[#allocation7 + $0x47]]  ;;  %v6153_v59 = vstv %s6006_s16 }
  0xad   : > { %9760 = vst [vmem:[#allocation59_spill] sm:$0xff] %v6104_v45  ;;  %s6142_s20 = sld [smem:[#allocation7 + $0x3e]]  ;;  %s6144_s4 = sld [smem:[#allocation7 + $0x3f]]  ;;  %9777 = vst [vmem:[#allocation73_spill] sm:$0xff] %v6153_v59  ;;  %v6174_v59 = vstv %s6040_s29  ;;  %v1265_v62 = vstv %s6067_s28 }
  0xae   : > { %9784 = vst [vmem:[#allocation80_spill] sm:$0xff] %v6174_v59  ;;  %v1313_v57 = vstv %s6083_s25  ;;  %v6187_v55 = vmul.f32 %v1265_v62, %v5800_v1  ;;  %v6225_v44 = vmul.f32 %v1265_v62, %v5797_v0  ;;  %s6774_s3 = sld [smem:[#allocation7 + $0x48]]  ;;  %s6782_s26 = sld [smem:[#allocation7 + $0x49]] }
  0xaf   : > { %v6140_v56 = vstv %s9759_s0  ;;  %v6193_v59 = vmul.f32 %v1313_v57, %v5800_v1  ;;  %v1385_v32 = vstv %s6101_s2  ;;  %v6236_v41 = vmul.f32 %v1313_v57, %v5797_v0  ;;  %s6784_s18 = sld [smem:[#allocation7 + $0x4a]]  ;;  %s6786_s8 = sld [smem:[#allocation7 + $0x4b]] }
  0xb0   : > { %9774 = vst [vmem:[#allocation70_spill] sm:$0xff] %v6140_v56  ;;  %v6150_v58 = vstv %s9762_s22  ;;  %v1337_v56 = vstv %s6085_s23  ;;  %9787 = vst [vmem:[#allocation83_spill] sm:$0xff] %v6187_v55  ;;  %v6206_v50 = vmul.f32 %v1385_v32, %v5800_v1  ;;  %s6788_s27 = sld [smem:[#allocation7 + $0x4c]]  ;;  %s6792_s19 = sld [smem:[#allocation7 + $0x4d]] }
  0xb1   : > { %9776 = vst [vmem:[#allocation72_spill] sm:$0xff] %v6150_v58  ;;  %v6156_v60 = vstv %s9765_s10  ;;  %v1289_v58 = vstv %s6069_s30  ;;  %9789 = vst [vmem:[#allocation85_spill] sm:$0xff] %v6193_v59  ;;  %v9548_v53 = vstv %s6114_s14  ;;  %s6794_s24 = sld [smem:[#allocation7 + $0x4e]]  ;;  %s6820_s29 = sld [smem:[#allocation7 + $0x4f]] }
  0xb2   : > { %9778 = vst [vmem:[#allocation74_spill] sm:$0xff] %v6156_v60  ;;  %v6159_v61 = vstv %s9766_s21  ;;  %v6177_v60 = vstv %s6051_s11  ;;  %v6190_v54 = vmul.f32 %v1289_v58, %v5800_v1  ;;  %v9550_v52 = vstv %s6116_s6  ;;  %9792 = vst [vmem:[#allocation88_spill] sm:$0xff] %v6206_v50  ;;  %s9871_s15 = sld [smem:[#allocation25_spill]]  ;;  %s6852_s13 = sld [smem:[#allocation7 + $0x50]] }
  0xb3   : > { %9779 = vst [vmem:[#allocation75_spill] sm:$0xff] %v6159_v61  ;;  %9785 = vst [vmem:[#allocation81_spill] sm:$0xff] %v6177_v60  ;;  %v6180_v61 = vstv %s6053_s9  ;;  %v6196_v60 = vmul.f32 %v1337_v56, %v5800_v1  ;;  %v6211_v49 = vmul.f32 %v9548_v53, %v5800_v1  ;;  %v6216_v47 = vmul.f32 %v9550_v52, %v5800_v1  ;;  %s6854_s16 = sld [smem:[#allocation7 + $0x51]]  ;;  %s6866_s17 = sld [smem:[#allocation7 + $0x52]] }
  0xb4   : > { %9786 = vst [vmem:[#allocation82_spill] sm:$0xff] %v6180_v61  ;;  %9788 = vst [vmem:[#allocation84_spill] sm:$0xff] %v6190_v54  ;;  %v1361_v61 = vstv %s6099_s1  ;;  %v6219_v46 = vstv %s6142_s20  ;;  %v6222_v45 = vstv %s6144_s4  ;;  %v6233_v53 = vmul.f32 %v1289_v58, %v5797_v0  ;;  %s6868_s12 = sld [smem:[#allocation7 + $0x53]]  ;;  %s6878_s11 = sld [smem:[#allocation7 + $0x54]] }
  0xb5   : > { %9790 = vst [vmem:[#allocation86_spill] sm:$0xff] %v6196_v60  ;;  %v6203_v51 = vmul.f32 %v1361_v61, %v5800_v1  ;;  %9793 = vst [vmem:[#allocation89_spill] sm:$0xff] %v6211_v49  ;;  %v6239_v1 = vmul.f32 %v1337_v56, %v5797_v0  ;;  %v6248_v42 = vmul.f32 %v1361_v61, %v5797_v0  ;;  %s6880_s9 = sld [smem:[#allocation7 + $0x55]]  ;;  %s6893_s5 = sld [smem:[#allocation7 + $0x56]] }
  0xb6   : > { %9794 = vst [vmem:[#allocation90_spill] sm:$0xff] %v6216_v47  ;;  %9795 = vst [vmem:[#allocation91_spill] sm:$0xff] %v6219_v46  ;;  %v6279_v46 = vsub.s32 5, %v6112_v48  ;;  %v6284_v56 = vmul.f32 %v1385_v32, %v5797_v0  ;;  %s6895_s7 = sld [smem:[#allocation7 + $0x57]]  ;;  %s6904_s28 = sld [smem:[#allocation7 + $0x58]] }
  0xb7   : > { %9791 = vst [vmem:[#allocation87_spill] sm:$0xff] %v6203_v51  ;;  %9796 = vst [vmem:[#allocation92_spill] sm:$0xff] %v6222_v45  ;;  %s6918_s30 = sld [smem:[#allocation7 + $0x59]]  ;;  %s6923_s25 = sld [smem:[#allocation7 + $0x5a]] }
  0xb8   : > { %9797 = vst [vmem:[#allocation93_spill] sm:$0xff] %v6225_v44  ;;  %9799 = vst [vmem:[#allocation95_spill] sm:$0xff] %v6233_v53  ;;  %s6935_s23 = sld [smem:[#allocation7 + $0x5b]]  ;;  %s6957_s0 = sld [smem:[#allocation7 + $0x5c]] }
  0xb9   : > { %9800 = vst [vmem:[#allocation96_spill] sm:$0xff] %v6236_v41  ;;  %9801 = vst [vmem:[#allocation97_spill] sm:$0xff] %v6239_v1  ;;  %s6968_s1 = sld [smem:[#allocation7 + $0x5d]]  ;;  %s6970_s2 = sld [smem:[#allocation7 + $0x5e]] }
  0xba   : > { %9802 = vst [vmem:[#allocation98_spill] sm:$0xff] %v6248_v42  ;;  %9803 = vst [vmem:[#allocation99_spill] sm:$0xff] %v6284_v56  ;;  %s6982_s22 = sld [smem:[#allocation7 + $0x5f]]  ;;  %s7106_s10 = sld [smem:[#allocation7 + $0x60]] }
  0xbb   : > { %s7116_s21 = sld [smem:[#allocation7 + $0x62]]  ;;  %s7124_s20 = sld [smem:[#allocation7 + $0x64]] }
  0xbc   : > { %s7126_s4 = sld [smem:[#allocation7 + $0x65]] }
  0xe4   : > { %v6250_v58 = vpop.permute.xlu0 %274 }
  0xe6   : > { %v282_v40 = vpop.permute.xlu1 %281 }
  0xe7   : > { %v285_v61 = vsel %vm283_vm0, %v282_v40, %v6250_v58 }
  0xe8   : > { %v294_v52 = vmul.f32 %v5937_v3, %v285_v61  ;;  %v299_v62 = vmul.f32 %v5940_v4, %v285_v61  ;;  %v304_v41 = vmul.f32 %v5947_v5, %v285_v61  ;;  %v309_v45 = vmul.f32 %v5950_v6, %v285_v61  ;;  %v280_v57 = vpop.permute.xlu0 %279 }
  0xe9   : > { %v314_v1 = vmul.f32 %v5953_v7, %v285_v61  ;;  %v331_v53 = vmul.f32 %v5956_v8, %v285_v61  ;;  %v348_v48 = vmul.f32 %v5963_v9, %v285_v61  ;;  %v365_v44 = vmul.f32 %v5966_v10, %v285_v61 }
  0xea   : > { %v382_v32 = vmul.f32 %v5969_v11, %v285_v61  ;;  %v399_v42 = vmul.f32 %v5972_v12, %v285_v61  ;;  %v416_v43 = vmul.f32 %v5979_v13, %v285_v61  ;;  %v433_v47 = vmul.f32 %v5982_v14, %v285_v61  ;;  %v6298_v49 = vpop.permute.xlu1 %514 }
  0xeb   : > { %v320_v60 = vrot.slane %v314_v1, 1  ;;  %v337_v59 = vrot.slane %v331_v53, 1  ;;  %v354_v54 = vrot.slane %v348_v48, 1  ;;  %v371_v63 = vrot.slane %v365_v44, 1 }
  0xec   : > { %v388_v55 = vrot.slane %v382_v32, 2  ;;  %v405_v39 = vrot.slane %v399_v42, 2  ;;  %v422_v38 = vrot.slane %v416_v43, 2  ;;  %v439_v37 = vrot.slane %v433_v47, 2  ;;  %v518_v32 = vpop.permute.xlu0 %517 }
  0xed   : > { %v326_v36 = vadd.f32 %v320_v60, %v294_v52  ;;  %v343_v35 = vadd.f32 %v337_v59, %v299_v62  ;;  %v360_v34 = vadd.f32 %v354_v54, %v304_v41  ;;  %v377_v33 = vadd.f32 %v371_v63, %v309_v45 }
  0xee   : > { %v450_v31 = vmul.f32 %v5985_v15, %v285_v61  ;;  %v467_v30 = vmul.f32 %v5988_v16, %v285_v61  ;;  %v484_v29 = vmul.f32 %v5995_v17, %v285_v61  ;;  %v501_v53 = vmul.f32 %v5998_v18, %v285_v61  ;;  %v6309_v41 = vpop.permute.xlu1 %519 }
  0xef   : > { %v394_v48 = vadd.f32 %v388_v55, %v326_v36  ;;  %v411_v44 = vadd.f32 %v405_v39, %v343_v35  ;;  %v428_v1 = vadd.f32 %v422_v38, %v360_v34  ;;  %v9804_v42 = vstv %s6114_s14  ;;  %s7114_s14 = sld [smem:[#allocation7 + $0x61]] }
  0xf0   : > { %v6307_v43 = vmul.f32 %v9804_v42, %v5797_v0  ;;  %v445_v47 = vadd.f32 %v439_v37, %v377_v33  ;;  %v456_v52 = vrot.slane %v450_v31, 3  ;;  %v9806_v54 = vstv %s6116_s6  ;;  %s7122_s6 = sld [smem:[#allocation7 + $0x63]] }
  0xf1   : > { %v6316_v59 = vmul.f32 %v9806_v54, %v5797_v0  ;;  %v473_v60 = vrot.slane %v467_v30, 3  ;;  %v490_v36 = vrot.slane %v484_v29, 3  ;;  %v6319_v34 = vsel %vm283_vm0, %v280_v57, %v282_v40 }
  0xf2   : > { %9805 = vst [vmem:[#allocation100_spill] sm:$0xff] %v6307_v43  ;;  %v6323_v35 = vsel %vm283_vm0, %v6250_v58, %v280_v57  ;;  %v507_v33 = vrot.slane %v501_v53, 3  ;;  %v6327_v31 = vsel %vm521_vm1, %v6298_v49, %v518_v32  ;;  %v6333_v30 = vadd.f32 %v456_v52, %v394_v48 }
  0xf3   : > { %9807 = vst [vmem:[#allocation101_spill] sm:$0xff] %v6316_v59  ;;  %v6335_v29 = vadd.f32 %v473_v60, %v411_v44  ;;  %v6337_v38 = vadd.f32 %v490_v36, %v428_v1  ;;  %v6341_v39 = vsel %vm521_vm1, %v518_v32, %v6309_v41  ;;  %v292_v55 = vmul.f32 %v5937_v3, %v6323_v35 }
  0xf4   : > { %v6343_v40 = vadd.f32 %v507_v33, %v445_v47  ;;  %v293_v63 = vmul.f32 %v5937_v3, %v6319_v34  ;;  %v297_v62 = vmul.f32 %v5940_v4, %v6323_v35  ;;  %v312_v58 = vmul.f32 %v5953_v7, %v6323_v35 }
  0xf5   : > { %v313_v57 = vmul.f32 %v5953_v7, %v6319_v34  ;;  %v329_v61 = vmul.f32 %v5956_v8, %v6323_v35  ;;  %v330_v53 = vmul.f32 %v5956_v8, %v6319_v34  ;;  %v346_v48 = vmul.f32 %v5963_v9, %v6323_v35 }
  0xf6   : > { %v347_v3 = vmul.f32 %v5963_v9, %v6319_v34  ;;  %v363_v44 = vmul.f32 %v5966_v10, %v6323_v35  ;;  %v364_v1 = vmul.f32 %v5966_v10, %v6319_v34  ;;  %v298_v7 = vmul.f32 %v5940_v4, %v6319_v34 }
  0xf7   : > { %v302_v32 = vmul.f32 %v5947_v5, %v6323_v35  ;;  %v318_v42 = vrot.slane %v312_v58, 1  ;;  %v335_v8 = vrot.slane %v329_v61, 1  ;;  %v303_v47 = vmul.f32 %v5947_v5, %v6319_v34 }
  0xf8   : > { %v307_v9 = vmul.f32 %v5950_v6, %v6323_v35  ;;  %v308_v52 = vmul.f32 %v5950_v6, %v6319_v34  ;;  %v352_v54 = vrot.slane %v346_v48, 1  ;;  %v319_v60 = vrot.slane %v313_v57, 1 }
  0xf9   : > { %v336_v10 = vrot.slane %v330_v53, 1  ;;  %v353_v36 = vrot.slane %v347_v3, 1  ;;  %v369_v33 = vrot.slane %v363_v44, 1  ;;  %v324_v4 = vadd.f32 %v318_v42, %v292_v55 }
  0xfa   : > { %v341_v0 = vadd.f32 %v335_v8, %v297_v62  ;;  %v358_v37 = vadd.f32 %v352_v54, %v302_v32  ;;  %v370_v45 = vrot.slane %v364_v1, 1  ;;  %v380_v58 = vmul.f32 %v5969_v11, %v6323_v35 }
  0xfb   : > { %v381_v5 = vmul.f32 %v5969_v11, %v6319_v34  ;;  %v397_v61 = vmul.f32 %v5972_v12, %v6323_v35  ;;  %v398_v6 = vmul.f32 %v5972_v12, %v6319_v34  ;;  %v414_v57 = vmul.f32 %v5979_v13, %v6323_v35 }
  0xfc   : > { %v415_v55 = vmul.f32 %v5979_v13, %v6319_v34  ;;  %v431_v62 = vmul.f32 %v5982_v14, %v6323_v35  ;;  %v432_v53 = vmul.f32 %v5982_v14, %v6319_v34  ;;  %v325_v48 = vadd.f32 %v319_v60, %v293_v63 }
  0xfd   : > { %v342_v11 = vadd.f32 %v336_v10, %v298_v7  ;;  %v359_v3 = vadd.f32 %v353_v36, %v303_v47  ;;  %v375_v44 = vadd.f32 %v369_v33, %v307_v9  ;;  %v376_v1 = vadd.f32 %v370_v45, %v308_v52 }
  0xfe   : > { %v386_v32 = vrot.slane %v380_v58, 2  ;;  %v403_v42 = vrot.slane %v397_v61, 2  ;;  %v420_v12 = vrot.slane %v414_v57, 2  ;;  %v387_v8 = vrot.slane %v381_v5, 2 }
  0xff   : > { %v404_v54 = vrot.slane %v398_v6, 2  ;;  %v421_v56 = vrot.slane %v415_v55, 2  ;;  %v437_v59 = vrot.slane %v431_v62, 2  ;;  %v438_v43 = vrot.slane %v432_v53, 2 }
 0x100   : > { %v392_v50 = vadd.f32 %v386_v32, %v324_v4  ;;  %v409_v13 = vadd.f32 %v403_v42, %v341_v0  ;;  %v426_v51 = vadd.f32 %v420_v12, %v358_v37  ;;  %v448_v14 = vmul.f32 %v5985_v15, %v6323_v35  ;;  %v9808_v12 = vld [vmem:[#allocation44_spill] sm:$0xff] }
 0x101   : > { %v443_v2 = vadd.f32 %v437_v59, %v375_v44  ;;  %v449_v63 = vmul.f32 %v5985_v15, %v6319_v34  ;;  %v465_v45 = vmul.f32 %v5988_v16, %v6323_v35  ;;  %v466_v7 = vmul.f32 %v5988_v16, %v6319_v34 }
 0x102   : > { %v482_v47 = vmul.f32 %v5995_v17, %v6323_v35  ;;  %v483_v37 = vmul.f32 %v5995_v17, %v6319_v34  ;;  %v499_v59 = vmul.f32 %v5998_v18, %v6323_v35  ;;  %v393_v0 = vadd.f32 %v387_v8, %v325_v48 }
 0x103   : > { %v410_v9 = vadd.f32 %v404_v54, %v342_v11  ;;  %v454_v52 = vrot.slane %v448_v14, 3  ;;  %v471_v60 = vrot.slane %v465_v45, 3  ;;  %v427_v15 = vadd.f32 %v421_v56, %v359_v3  ;;  %v9809_v54 = vld [vmem:[#allocation45_spill] sm:$0xff] }
 0x104   : > { %v444_v10 = vadd.f32 %v438_v43, %v376_v1  ;;  %v488_v36 = vrot.slane %v482_v47, 3  ;;  %v505_v33 = vrot.slane %v499_v59, 3  ;;  %v455_v4 = vrot.slane %v449_v63, 3 }
 0x105   : > { %v460_v58 = vadd.f32 %v454_v52, %v392_v50  ;;  %v477_v16 = vadd.f32 %v471_v60, %v409_v13  ;;  %v500_v5 = vmul.f32 %v5998_v18, %v6319_v34  ;;  %v472_v61 = vrot.slane %v466_v7, 3  ;;  %v9810_v60 = vld [vmem:[#allocation46_spill] sm:$0xff] }
 0x106   : > { %v489_v6 = vrot.slane %v483_v37, 3  ;;  %v494_v17 = vadd.f32 %v488_v36, %v426_v51  ;;  %v511_v57 = vadd.f32 %v505_v33, %v443_v2  ;;  %v530_v35 = vmul.f32 %v6001_v19, %v6327_v31  ;;  %v9811_v33 = vld [vmem:[#allocation47_spill] sm:$0xff] }
 0x107   : > { %v538_v55 = vmul.f32 %v6004_v20, %v6327_v31  ;;  %v546_v56 = vmul.f32 %v6011_v21, %v6327_v31  ;;  %v554_v50 = vmul.f32 %v6014_v22, %v6327_v31  ;;  %v562_v43 = vmul.f32 %v6017_v23, %v6327_v31 }
 0x108   : > { %v579_v18 = vmul.f32 %v6020_v24, %v6327_v31  ;;  %v596_v51 = vmul.f32 %v6027_v25, %v6327_v31  ;;  %v613_v2 = vmul.f32 %v6030_v26, %v6327_v31  ;;  %v533_v34 = vadd.f32 %v530_v35, %v460_v58 }
 0x109   : > { %v541_v62 = vadd.f32 %v538_v55, %v477_v16  ;;  %v549_v53 = vadd.f32 %v546_v56, %v494_v17  ;;  %v557_v48 = vadd.f32 %v554_v50, %v511_v57  ;;  %v568_v11 = vrot.slane %v562_v43, 1  ;;  %v9812_v16 = vld [vmem:[#allocation48_spill] sm:$0xff]  ;;  %v9813_v57 = vld [vmem:[#allocation49_spill] sm:$0xff] }
 0x10a   : > { %v585_v3 = vrot.slane %v579_v18, 1  ;;  %v602_v44 = vrot.slane %v596_v51, 1  ;;  %v619_v1 = vrot.slane %v613_v2, 1  ;;  %v630_v32 = vmul.f32 %v6033_v27, %v6327_v31 }
 0x10b   : > { %v647_v42 = vmul.f32 %v6036_v28, %v6327_v31  ;;  %v664_v8 = vmul.f32 %v9808_v12, %v6327_v31  ;;  %v681_v13 = vmul.f32 %v9809_v54, %v6327_v31  ;;  %v574_v14 = vadd.f32 %v568_v11, %v533_v34 }
 0x10c   : > { %v591_v63 = vadd.f32 %v585_v3, %v541_v62  ;;  %v608_v45 = vadd.f32 %v602_v44, %v549_v53  ;;  %v625_v7 = vadd.f32 %v619_v1, %v557_v48  ;;  %v636_v47 = vrot.slane %v630_v32, 2 }
 0x10d   : > { %v653_v37 = vrot.slane %v647_v42, 2  ;;  %v670_v59 = vrot.slane %v664_v8, 2  ;;  %v687_v52 = vrot.slane %v681_v13, 2  ;;  %v698_v36 = vmul.f32 %v9810_v60, %v6327_v31 }
 0x10e   : > { %v715_v58 = vmul.f32 %v9811_v33, %v6327_v31  ;;  %v732_v17 = vmul.f32 %v9812_v16, %v6327_v31  ;;  %v749_v35 = vmul.f32 %v9813_v57, %v6327_v31  ;;  %v461_v55 = vadd.f32 %v455_v4, %v393_v0 }
 0x10f   : > { %v506_v56 = vrot.slane %v500_v5, 3  ;;  %v642_v50 = vadd.f32 %v636_v47, %v574_v14  ;;  %v659_v43 = vadd.f32 %v653_v37, %v591_v63  ;;  %v478_v18 = vadd.f32 %v472_v61, %v410_v9 }
 0x110   : > { %v495_v51 = vadd.f32 %v489_v6, %v427_v15  ;;  %v676_v2 = vadd.f32 %v670_v59, %v608_v45  ;;  %v693_v34 = vadd.f32 %v687_v52, %v625_v7  ;;  %v704_v53 = vrot.slane %v698_v36, 3 }
 0x111   : > { %v512_v62 = vadd.f32 %v506_v56, %v444_v10  ;;  %v721_v48 = vrot.slane %v715_v58, 3  ;;  %v6444_v11 = vsel %vm521_vm1, %v6309_v41, %v6298_v49  ;;  %v738_v3 = vrot.slane %v732_v17, 3 }
 0x112   : > { %v755_v44 = vrot.slane %v749_v35, 3  ;;  %v531_v31 = vmul.f32 %v6001_v19, %v6341_v39  ;;  %v539_v0 = vmul.f32 %v6004_v20, %v6341_v39  ;;  %v6450_v9 = vadd.f32 %v704_v53, %v642_v50 }
 0x113   : > { %v6452_v15 = vadd.f32 %v721_v48, %v659_v43  ;;  %v532_v10 = vmul.f32 %v6001_v19, %v6444_v11  ;;  %v547_v4 = vmul.f32 %v6011_v21, %v6341_v39  ;;  %v6458_v49 = vadd.f32 %v738_v3, %v676_v2 }
 0x114   : > { %v6460_v41 = vadd.f32 %v755_v44, %v693_v34  ;;  %v534_v5 = vadd.f32 %v531_v31, %v461_v55  ;;  %v540_v61 = vmul.f32 %v6004_v20, %v6444_v11  ;;  %v542_v6 = vadd.f32 %v539_v0, %v478_v18 }
 0x115   : > { %v548_v1 = vmul.f32 %v6011_v21, %v6444_v11  ;;  %v563_v32 = vmul.f32 %v6017_v23, %v6341_v39  ;;  %v564_v19 = vmul.f32 %v6017_v23, %v6444_v11  ;;  %v535_v42 = vadd.f32 %v532_v10, %v6333_v30 }
 0x116   : > { %v550_v8 = vadd.f32 %v547_v4, %v495_v51  ;;  %v556_v13 = vmul.f32 %v6014_v22, %v6444_v11  ;;  %v580_v14 = vmul.f32 %v6020_v24, %v6341_v39  ;;  %v555_v20 = vmul.f32 %v6014_v22, %v6341_v39 }
 0x117   : > { %v570_v63 = vrot.slane %v564_v19, 1  ;;  %v581_v21 = vmul.f32 %v6020_v24, %v6444_v11  ;;  %v597_v45 = vmul.f32 %v6027_v25, %v6341_v39  ;;  %v569_v23 = vrot.slane %v563_v32, 1 }
 0x118   : > { %v598_v30 = vmul.f32 %v6027_v25, %v6444_v11  ;;  %v614_v7 = vmul.f32 %v6030_v26, %v6341_v39  ;;  %v615_v47 = vmul.f32 %v6030_v26, %v6444_v11  ;;  %v543_v37 = vadd.f32 %v540_v61, %v6335_v29 }
 0x119   : > { %v551_v22 = vadd.f32 %v548_v1, %v6337_v38  ;;  %v558_v59 = vadd.f32 %v555_v20, %v512_v62  ;;  %v587_v52 = vrot.slane %v581_v21, 1  ;;  %v559_v24 = vadd.f32 %v556_v13, %v6343_v40  ;;  %v768_v21 = vpop.permute.xlu1 %767 }
 0x11a   : > { %v575_v36 = vadd.f32 %v569_v23, %v534_v5  ;;  %v576_v58 = vadd.f32 %v570_v63, %v535_v42  ;;  %v586_v17 = vrot.slane %v580_v14, 1  ;;  %v603_v35 = vrot.slane %v597_v45, 1 }
 0x11b   : > { %v604_v55 = vrot.slane %v598_v30, 1  ;;  %v631_v25 = vmul.f32 %v6033_v27, %v6341_v39  ;;  %v632_v56 = vmul.f32 %v6033_v27, %v6444_v11  ;;  %v620_v50 = vrot.slane %v614_v7, 1 }
 0x11c   : > { %v592_v26 = vadd.f32 %v586_v17, %v542_v6  ;;  %v621_v29 = vrot.slane %v615_v47, 1  ;;  %v648_v38 = vmul.f32 %v6036_v28, %v6341_v39  ;;  %v593_v43 = vadd.f32 %v587_v52, %v543_v37 }
 0x11d   : > { %v637_v40 = vrot.slane %v631_v25, 2  ;;  %v649_v18 = vmul.f32 %v6036_v28, %v6444_v11  ;;  %v665_v51 = vmul.f32 %v9808_v12, %v6341_v39  ;;  %v638_v2 = vrot.slane %v632_v56, 2  ;;  %v9816_v25 = vld [vmem:[#allocation52_spill] sm:$0xff] }
 0x11e   : > { %v666_v34 = vmul.f32 %v9808_v12, %v6444_v11  ;;  %v682_v27 = vmul.f32 %v9809_v54, %v6341_v39  ;;  %v683_v62 = vmul.f32 %v9809_v54, %v6444_v11  ;;  %v609_v53 = vadd.f32 %v603_v35, %v550_v8  ;;  %v9815_v35 = vld [vmem:[#allocation51_spill] sm:$0xff] }
 0x11f   : > { %v610_v48 = vadd.f32 %v604_v55, %v551_v22  ;;  %v626_v3 = vadd.f32 %v620_v50, %v558_v59  ;;  %v654_v44 = vrot.slane %v648_v38, 2  ;;  %v627_v31 = vadd.f32 %v621_v29, %v559_v24  ;;  %v765_v59 = vpop.permute.xlu0 %764  ;;  %v9818_v29 = vld [vmem:[#allocation54_spill] sm:$0xff] }
 0x120   : > { %v643_v0 = vadd.f32 %v637_v40, %v575_v36  ;;  %v644_v28 = vadd.f32 %v638_v2, %v576_v58  ;;  %v655_v10 = vrot.slane %v649_v18, 2  ;;  %v671_v5 = vrot.slane %v665_v51, 2  ;;  %v9814_v58 = vld [vmem:[#allocation50_spill] sm:$0xff]  ;;  %v9819_v40 = vld [vmem:[#allocation55_spill] sm:$0xff]  ;;  %v9820_v51 = vld [vmem:[#allocation56_spill] sm:$0xff] }
 0x121   : > { %v660_v4 = vadd.f32 %v654_v44, %v592_v26  ;;  %v699_v61 = vmul.f32 %v9810_v60, %v6341_v39  ;;  %v700_v12 = vmul.f32 %v9810_v60, %v6444_v11  ;;  %v672_v6 = vrot.slane %v666_v34, 2  ;;  %v9817_v26 = vld [vmem:[#allocation53_spill] sm:$0xff] }
 0x122   : > { %v688_v1 = vrot.slane %v682_v27, 2  ;;  %v689_v32 = vrot.slane %v683_v62, 2  ;;  %v716_v54 = vmul.f32 %v9811_v33, %v6341_v39  ;;  %v661_v19 = vadd.f32 %v655_v10, %v593_v43  ;;  %v9821_v34 = vld [vmem:[#allocation57_spill] sm:$0xff] }
 0x123   : > { %v705_v42 = vrot.slane %v699_v61, 3  ;;  %v717_v8 = vmul.f32 %v9811_v33, %v6444_v11  ;;  %v733_v13 = vmul.f32 %v9812_v16, %v6341_v39  ;;  %v706_v14 = vrot.slane %v700_v12, 3  ;;  %v9824_v61 = vld [vmem:[#allocation60_spill] sm:$0xff] }
 0x124   : > { %v734_v20 = vmul.f32 %v9812_v16, %v6444_v11  ;;  %v750_v60 = vmul.f32 %v9813_v57, %v6341_v39  ;;  %v6522_v63 = vmul.f32 %v9813_v57, %v6444_v11  ;;  %v677_v45 = vadd.f32 %v671_v5, %v609_v53 }
 0x125   : > { %v678_v23 = vadd.f32 %v672_v6, %v610_v48  ;;  %v694_v30 = vadd.f32 %v688_v1, %v626_v3  ;;  %v722_v7 = vrot.slane %v716_v54, 3  ;;  %v695_v33 = vadd.f32 %v689_v32, %v627_v31  ;;  %v9825_v6 = vld [vmem:[#allocation61_spill] sm:$0xff] }
 0x126   : > { %v6524_v47 = vadd.f32 %v705_v42, %v643_v0  ;;  %v6526_v37 = vadd.f32 %v706_v14, %v644_v28  ;;  %v723_v22 = vrot.slane %v717_v8, 3  ;;  %v739_v52 = vrot.slane %v733_v13, 3  ;;  %v9822_v28 = vld [vmem:[#allocation58_spill] sm:$0xff]  ;;  %v9826_v8 = vld [vmem:[#allocation63_spill] sm:$0xff]  ;;  %v770_v14 = vpop.permute.xlu0 %769 }
 0x127   : > { %v6528_v16 = vadd.f32 %v722_v7, %v660_v4  ;;  %v740_v39 = vrot.slane %v734_v20, 3  ;;  %v777_v24 = vsel %vm771_vm2, %v765_v59, %v768_v21  ;;  %v756_v11 = vrot.slane %v750_v60, 3  ;;  %v9827_v20 = vld [vmem:[#allocation64_spill] sm:$0xff] }
 0x128   : > { %v6531_v57 = vadd.f32 %v723_v22, %v661_v19  ;;  %v757_v36 = vrot.slane %v6522_v63, 3  ;;  %v780_v17 = vmul.f32 %v9814_v58, %v777_v24  ;;  %v788_v55 = vmul.f32 %v9815_v35, %v777_v24  ;;  %v9828_v63 = vld [vmem:[#allocation65_spill] sm:$0xff]  ;;  %v9829_v22 = vld [vmem:[#allocation66_spill] sm:$0xff] }
 0x129   : > { %v796_v56 = vmul.f32 %v9816_v25, %v777_v24  ;;  %v804_v50 = vmul.f32 %v9817_v26, %v777_v24  ;;  %v812_v38 = vmul.f32 %v9818_v29, %v777_v24  ;;  %v829_v18 = vmul.f32 %v9819_v40, %v777_v24 }
 0x12a   : > { %v783_v43 = vadd.f32 %v780_v17, %v6450_v9  ;;  %v846_v2 = vmul.f32 %v9820_v51, %v777_v24  ;;  %v863_v27 = vmul.f32 %v9821_v34, %v777_v24  ;;  %v791_v62 = vadd.f32 %v788_v55, %v6452_v15  ;;  %v9823_v9 = vld [vmem:[#allocation59_spill] sm:$0xff] }
 0x12b   : > { %v799_v53 = vadd.f32 %v796_v56, %v6458_v49  ;;  %v807_v48 = vadd.f32 %v804_v50, %v6460_v41  ;;  %v818_v3 = vrot.slane %v812_v38, 1  ;;  %v835_v44 = vrot.slane %v829_v18, 1 }
 0x12c   : > { %v852_v31 = vrot.slane %v846_v2, 1  ;;  %v869_v0 = vrot.slane %v863_v27, 1  ;;  %v880_v10 = vmul.f32 %v9822_v28, %v777_v24  ;;  %v897_v5 = vmul.f32 %v9823_v9, %v777_v24 }
 0x12d   : > { %v824_v4 = vadd.f32 %v818_v3, %v783_v43  ;;  %v914_v12 = vmul.f32 %v9824_v61, %v777_v24  ;;  %v931_v1 = vmul.f32 %v9825_v6, %v777_v24  ;;  %v841_v32 = vadd.f32 %v835_v44, %v791_v62 }
 0x12e   : > { %v858_v54 = vadd.f32 %v852_v31, %v799_v53  ;;  %v875_v15 = vadd.f32 %v869_v0, %v807_v48  ;;  %v886_v19 = vrot.slane %v880_v10, 2  ;;  %v903_v49 = vrot.slane %v897_v5, 2 }
 0x12f   : > { %v920_v42 = vrot.slane %v914_v12, 2  ;;  %v937_v41 = vrot.slane %v931_v1, 2  ;;  %v948_v13 = vmul.f32 %v9826_v8, %v777_v24  ;;  %v965_v60 = vmul.f32 %v9827_v20, %v777_v24 }
 0x130   : > { %v982_v7 = vmul.f32 %v9828_v63, %v777_v24  ;;  %v999_v17 = vmul.f32 %v9829_v22, %v777_v24  ;;  %v6555_v55 = vsel %vm771_vm2, %v768_v21, %v770_v14  ;;  %v892_v56 = vadd.f32 %v886_v19, %v824_v4 }
 0x131   : > { %v909_v50 = vadd.f32 %v903_v49, %v841_v32  ;;  %v926_v38 = vadd.f32 %v920_v42, %v858_v54  ;;  %v943_v43 = vadd.f32 %v937_v41, %v875_v15  ;;  %v745_v18 = vadd.f32 %v739_v52, %v677_v45 }
 0x132   : > { %v746_v2 = vadd.f32 %v740_v39, %v678_v23  ;;  %v762_v27 = vadd.f32 %v756_v11, %v694_v30  ;;  %v6558_v62 = vsel %vm771_vm2, %v770_v14, %v765_v59  ;;  %v954_v53 = vrot.slane %v948_v13, 3 }
 0x133   : > { %v971_v48 = vrot.slane %v965_v60, 3  ;;  %v988_v3 = vrot.slane %v982_v7, 3  ;;  %v1005_v44 = vrot.slane %v999_v17, 3  ;;  %v763_v31 = vadd.f32 %v757_v36, %v695_v33 }
 0x134   : > { %v781_v24 = vmul.f32 %v9814_v58, %v6555_v55  ;;  %v782_v21 = vmul.f32 %v9814_v58, %v6558_v62  ;;  %v789_v0 = vmul.f32 %v9815_v35, %v6555_v55  ;;  %v6566_v45 = vadd.f32 %v954_v53, %v892_v56 }
 0x135   : > { %v6568_v23 = vadd.f32 %v971_v48, %v909_v50  ;;  %v6570_v30 = vadd.f32 %v988_v3, %v926_v38  ;;  %v6572_v59 = vadd.f32 %v1005_v44, %v943_v43  ;;  %v790_v39 = vmul.f32 %v9815_v35, %v6558_v62 }
 0x136   : > { %v784_v52 = vadd.f32 %v781_v24, %v6524_v47  ;;  %v785_v33 = vadd.f32 %v782_v21, %v6526_v37  ;;  %v792_v11 = vadd.f32 %v789_v0, %v6528_v16  ;;  %v797_v36 = vmul.f32 %v9816_v25, %v6555_v55  ;;  %v1015_v24 = vpop.permute.xlu1 %1014 }
 0x137   : > { %v813_v58 = vmul.f32 %v9818_v29, %v6555_v55  ;;  %v814_v10 = vmul.f32 %v9818_v29, %v6558_v62  ;;  %v830_v4 = vmul.f32 %v9819_v40, %v6555_v55  ;;  %v793_v47 = vadd.f32 %v790_v39, %v6531_v57 }
 0x138   : > { %v798_v37 = vmul.f32 %v9816_v25, %v6558_v62  ;;  %v805_v16 = vmul.f32 %v9817_v26, %v6555_v55  ;;  %v831_v35 = vmul.f32 %v9819_v40, %v6558_v62  ;;  %v800_v5 = vadd.f32 %v797_v36, %v745_v18 }
 0x139   : > { %v806_v12 = vmul.f32 %v9817_v26, %v6558_v62  ;;  %v819_v1 = vrot.slane %v813_v58, 1  ;;  %v847_v29 = vmul.f32 %v9820_v51, %v6555_v55  ;;  %v820_v32 = vrot.slane %v814_v10, 1 }
 0x13a   : > { %v836_v54 = vrot.slane %v830_v4, 1  ;;  %v848_v57 = vmul.f32 %v9820_v51, %v6558_v62  ;;  %v864_v25 = vmul.f32 %v9821_v34, %v6555_v55  ;;  %v801_v15 = vadd.f32 %v798_v37, %v746_v2 }
 0x13b   : > { %v808_v19 = vadd.f32 %v805_v16, %v762_v27  ;;  %v809_v49 = vadd.f32 %v806_v12, %v763_v31  ;;  %v865_v40 = vmul.f32 %v9821_v34, %v6558_v62  ;;  %v825_v42 = vadd.f32 %v819_v1, %v784_v52 }
 0x13c   : > { %v826_v26 = vadd.f32 %v820_v32, %v785_v33  ;;  %v837_v41 = vrot.slane %v831_v35, 1  ;;  %v842_v13 = vadd.f32 %v836_v54, %v792_v11  ;;  %v853_v14 = vrot.slane %v847_v29, 1  ;;  %v1018_v29 = vpop.permute.xlu0 %1017 }
 0x13d   : > { %v881_v60 = vmul.f32 %v9822_v28, %v6555_v55  ;;  %v882_v51 = vmul.f32 %v9822_v28, %v6558_v62  ;;  %v898_v7 = vmul.f32 %v9823_v9, %v6555_v55  ;;  %v854_v56 = vrot.slane %v848_v57, 1 }
 0x13e   : > { %v843_v17 = vadd.f32 %v837_v41, %v793_v47  ;;  %v870_v50 = vrot.slane %v864_v25, 1  ;;  %v899_v34 = vmul.f32 %v9823_v9, %v6558_v62  ;;  %v859_v38 = vadd.f32 %v853_v14, %v800_v5  ;;  %v1020_v25 = vpop.permute.xlu1 %1019 }
 0x13f   : > { %v871_v43 = vrot.slane %v865_v40, 1  ;;  %v887_v18 = vrot.slane %v881_v60, 2  ;;  %v915_v2 = vmul.f32 %v9824_v61, %v6555_v55  ;;  %v888_v27 = vrot.slane %v882_v51, 2 }
 0x140   : > { %v904_v53 = vrot.slane %v898_v7, 2  ;;  %v916_v28 = vmul.f32 %v9824_v61, %v6558_v62  ;;  %v932_v48 = vmul.f32 %v9825_v6, %v6555_v55  ;;  %v860_v3 = vadd.f32 %v854_v56, %v801_v15  ;;  %v9831_v7 = vld [vmem:[#allocation68_spill] sm:$0xff]  ;;  %v9833_v56 = vld [vmem:[#allocation70_spill] sm:$0xff] }
 0x141   : > { %v876_v44 = vadd.f32 %v870_v50, %v808_v19  ;;  %v877_v31 = vadd.f32 %v871_v43, %v809_v49  ;;  %v933_v9 = vmul.f32 %v9825_v6, %v6558_v62  ;;  %v893_v21 = vadd.f32 %v887_v18, %v825_v42  ;;  %v9835_v18 = vld [vmem:[#allocation72_spill] sm:$0xff] }
 0x142   : > { %v894_v0 = vadd.f32 %v888_v27, %v826_v26  ;;  %v905_v52 = vrot.slane %v899_v34, 2  ;;  %v910_v33 = vadd.f32 %v904_v53, %v842_v13  ;;  %v921_v39 = vrot.slane %v915_v2, 2  ;;  %v9830_v13 = vld [vmem:[#allocation67_spill] sm:$0xff]  ;;  %v9836_v27 = vld [vmem:[#allocation73_spill] sm:$0xff] }
 0x143   : > { %v949_v11 = vmul.f32 %v9826_v8, %v6555_v55  ;;  %v950_v61 = vmul.f32 %v9826_v8, %v6558_v62  ;;  %v966_v36 = vmul.f32 %v9827_v20, %v6555_v55  ;;  %v922_v10 = vrot.slane %v916_v28, 2  ;;  %v9834_v34 = vld [vmem:[#allocation71_spill] sm:$0xff]  ;;  %v9837_v28 = vld [vmem:[#allocation74_spill] sm:$0xff] }
 0x144   : > { %v911_v58 = vadd.f32 %v905_v52, %v843_v17  ;;  %v938_v4 = vrot.slane %v932_v48, 2  ;;  %v967_v6 = vmul.f32 %v9827_v20, %v6558_v62  ;;  %v6628_v47 = vadd.f32 %v921_v39, %v859_v38  ;;  %v9838_v52 = vld [vmem:[#allocation75_spill] sm:$0xff] }
 0x145   : > { %v939_v37 = vrot.slane %v933_v9, 2  ;;  %v955_v16 = vrot.slane %v949_v11, 3  ;;  %v6632_v35 = vmul.f32 %v9828_v63, %v6555_v55  ;;  %v956_v5 = vrot.slane %v950_v61, 3  ;;  %v9840_v61 = vld [vmem:[#allocation79_spill] sm:$0xff] }
 0x146   : > { %v972_v12 = vrot.slane %v966_v36, 3  ;;  %v6636_v8 = vmul.f32 %v9828_v63, %v6558_v62  ;;  %v6640_v1 = vmul.f32 %v9829_v22, %v6555_v55  ;;  %v6642_v20 = vadd.f32 %v922_v10, %v860_v3 }
 0x147   : > { %v6644_v32 = vadd.f32 %v938_v4, %v876_v44  ;;  %v6646_v54 = vadd.f32 %v939_v37, %v877_v31  ;;  %v973_v57 = vrot.slane %v967_v6, 3  ;;  %v6648_v15 = vadd.f32 %v955_v16, %v893_v21 }
 0x148   : > { %v6650_v19 = vadd.f32 %v956_v5, %v894_v0  ;;  %v6652_v49 = vadd.f32 %v972_v12, %v910_v33  ;;  %v1001_v63 = vmul.f32 %v9829_v22, %v6558_v62  ;;  %v989_v40 = vrot.slane %v6632_v35, 3  ;;  %v9832_v62 = vld [vmem:[#allocation69_spill] sm:$0xff] }
 0x149   : > { %v6656_v55 = vadd.f32 %v973_v57, %v911_v58  ;;  %v990_v42 = vrot.slane %v6636_v8, 3  ;;  %v1027_v26 = vsel %vm1021_vm3, %v1015_v24, %v1018_v29  ;;  %v1006_v41 = vrot.slane %v6640_v1, 3  ;;  %v9841_v58 = vld [vmem:[#allocation80_spill] sm:$0xff]  ;;  %v9842_v35 = vld [vmem:[#allocation81_spill] sm:$0xff]  ;;  %v9843_v8 = vld [vmem:[#allocation82_spill] sm:$0xff] }
 0x14a   : > { %v1030_v14 = vmul.f32 %v9830_v13, %v1027_v26  ;;  %v6664_v60 = vsel %vm1021_vm3, %v1018_v29, %v1020_v25  ;;  %v6667_v51 = vsel %vm1021_vm3, %v1020_v25, %v1015_v24  ;;  %v1038_v22 = vmul.f32 %v9831_v7, %v1027_v26  ;;  %v9844_v29 = vld [vmem:[#allocation91_spill] sm:$0xff]  ;;  %v9845_v25 = vld [vmem:[#allocation92_spill] sm:$0xff] }
 0x14b   : > { %v1046_v17 = vmul.f32 %v9832_v62, %v1027_v26  ;;  %v1054_v50 = vmul.f32 %v9833_v56, %v1027_v26  ;;  %v1062_v38 = vmul.f32 %v9834_v34, %v1027_v26  ;;  %v1079_v2 = vmul.f32 %v9835_v18, %v1027_v26 }
 0x14c   : > { %v1033_v43 = vadd.f32 %v1030_v14, %v6566_v45  ;;  %v1096_v53 = vmul.f32 %v9836_v27, %v1027_v26  ;;  %v1113_v48 = vmul.f32 %v9837_v28, %v1027_v26  ;;  %v1041_v3 = vadd.f32 %v1038_v22, %v6568_v23  ;;  %v9839_v45 = vld [vmem:[#allocation76_spill] sm:$0xff] }
 0x14d   : > { %v1049_v44 = vadd.f32 %v1046_v17, %v6570_v30  ;;  %v1057_v31 = vadd.f32 %v1054_v50, %v6572_v59  ;;  %v1068_v9 = vrot.slane %v1062_v38, 1  ;;  %v1085_v24 = vrot.slane %v1079_v2, 1 }
 0x14e   : > { %v1102_v21 = vrot.slane %v1096_v53, 1  ;;  %v1119_v0 = vrot.slane %v1113_v48, 1  ;;  %v1130_v33 = vmul.f32 %v9838_v52, %v1027_v26  ;;  %v1147_v11 = vmul.f32 %v9839_v45, %v1027_v26 }
 0x14f   : > { %v1074_v39 = vadd.f32 %v1068_v9, %v1033_v43  ;;  %v1164_v36 = vmul.f32 %v9840_v61, %v1027_v26  ;;  %v1181_v10 = vmul.f32 %v9841_v58, %v1027_v26  ;;  %v1091_v4 = vadd.f32 %v1085_v24, %v1041_v3 }
 0x150   : > { %v1108_v6 = vadd.f32 %v1102_v21, %v1049_v44  ;;  %v1125_v23 = vadd.f32 %v1119_v0, %v1057_v31  ;;  %v1136_v37 = vrot.slane %v1130_v33, 2  ;;  %v1153_v30 = vrot.slane %v1147_v11, 2  ;;  %v9847_v11 = vld [vmem:[#allocation77_spill] sm:$0xff] }
 0x151   : > { %v1170_v16 = vrot.slane %v1164_v36, 2  ;;  %v1187_v59 = vrot.slane %v1181_v10, 2  ;;  %v1198_v5 = vmul.f32 %v9842_v35, %v1027_v26  ;;  %v1215_v1 = vmul.f32 %v9843_v8, %v1027_v26 }
 0x152   : > { %v1142_v12 = vadd.f32 %v1136_v37, %v1074_v39  ;;  %v1232_v57 = vmul.f32 %v9844_v29, %v1027_v26  ;;  %v1249_v14 = vmul.f32 %v9845_v25, %v1027_v26  ;;  %v1159_v22 = vadd.f32 %v1153_v30, %v1091_v4 }
 0x153   : > { %v1176_v17 = vadd.f32 %v1170_v16, %v1108_v6  ;;  %v1193_v50 = vadd.f32 %v1187_v59, %v1125_v23  ;;  %v1204_v38 = vrot.slane %v1198_v5, 3  ;;  %v1007_v43 = vrot.slane %v1001_v63, 3 }
 0x154   : > { %v1221_v2 = vrot.slane %v1215_v1, 3  ;;  %v1238_v53 = vrot.slane %v1232_v57, 3  ;;  %v1255_v48 = vrot.slane %v1249_v14, 3  ;;  %v995_v3 = vadd.f32 %v989_v40, %v6628_v47  ;;  %v9846_v40 = vld [vmem:[#allocation83_spill] sm:$0xff] }
 0x155   : > { %v1210_v44 = vadd.f32 %v1204_v38, %v1142_v12  ;;  %v1031_v31 = vmul.f32 %v9830_v13, %v6664_v60  ;;  %v1032_v9 = vmul.f32 %v9830_v13, %v6667_v51  ;;  %v1039_v0 = vmul.f32 %v9831_v7, %v6664_v60 }
 0x156   : > { %v1227_v24 = vadd.f32 %v1221_v2, %v1159_v22  ;;  %v1244_v21 = vadd.f32 %v1238_v53, %v1176_v17  ;;  %v1261_v26 = vadd.f32 %v1255_v48, %v1193_v50  ;;  %v996_v63 = vadd.f32 %v990_v42, %v6642_v20 }
 0x157   : > { %v1012_v33 = vadd.f32 %v1006_v41, %v6644_v32  ;;  %v1013_v39 = vadd.f32 %v1007_v43, %v6646_v54  ;;  %v1040_v47 = vmul.f32 %v9831_v7, %v6667_v51  ;;  %v9848_v36 = vrot.slane %v9846_v40, %v9847_v11  ;;  %v9849_v41 = vld [vmem:[#allocation84_spill] sm:$0xff] }
 0x158   : > { %v1034_v13 = vadd.f32 %v1031_v31, %v6648_v15  ;;  %v1035_v4 = vadd.f32 %v1032_v9, %v6650_v19  ;;  %v1042_v6 = vadd.f32 %v1039_v0, %v6652_v49  ;;  %v1047_v32 = vmul.f32 %v9832_v62, %v6664_v60  ;;  %v9851_v15 = vld [vmem:[#allocation85_spill] sm:$0xff] }
 0x159   : > { %v6703_v10 = vadd.f32 %v9848_v36, %v1210_v44  ;;  %v1043_v20 = vadd.f32 %v1040_v47, %v6656_v55  ;;  %v1048_v54 = vmul.f32 %v9832_v62, %v6667_v51  ;;  %v1055_v42 = vmul.f32 %v9833_v56, %v6664_v60  ;;  %v9853_v55 = vld [vmem:[#allocation86_spill] sm:$0xff] }
 0x15a   : > { %v9850_v7 = vrot.slane %v9849_v41, %v9847_v11  ;;  %v9852_v19 = vrot.slane %v9851_v15, %v9847_v11  ;;  %v9854_v37 = vrot.slane %v9853_v55, %v9847_v11  ;;  %v1056_v62 = vmul.f32 %v9833_v56, %v6667_v51 }
 0x15b   : > { %v1050_v16 = vadd.f32 %v1047_v32, %v995_v3  ;;  %v1051_v59 = vadd.f32 %v1048_v54, %v996_v63  ;;  %v1058_v5 = vadd.f32 %v1055_v42, %v1012_v33  ;;  %v1063_v12 = vmul.f32 %v9834_v34, %v6664_v60 }
 0x15c   : > { %v6718_v23 = vadd.f32 %v9850_v7, %v1227_v24  ;;  %v6723_v49 = vadd.f32 %v9852_v19, %v1244_v21  ;;  %v6728_v30 = vadd.f32 %v9854_v37, %v1261_v26  ;;  %v1064_v1 = vmul.f32 %v9834_v34, %v6667_v51 }
 0x15d   : > { %v1080_v57 = vmul.f32 %v9835_v18, %v6664_v60  ;;  %v1081_v14 = vmul.f32 %v9835_v18, %v6667_v51  ;;  %v1097_v22 = vmul.f32 %v9836_v27, %v6664_v60  ;;  %v1069_v17 = vrot.slane %v1063_v12, 1 }
 0x15e   : > { %v1098_v56 = vmul.f32 %v9836_v27, %v6667_v51  ;;  %v1114_v50 = vmul.f32 %v9837_v28, %v6664_v60  ;;  %v1115_v38 = vmul.f32 %v9837_v28, %v6667_v51  ;;  %v1059_v34 = vadd.f32 %v1056_v62, %v1013_v39 }
 0x15f   : > { %v1070_v43 = vrot.slane %v1064_v1, 1  ;;  %v1086_v2 = vrot.slane %v1080_v57, 1  ;;  %v1087_v53 = vrot.slane %v1081_v14, 1  ;;  %v1075_v48 = vadd.f32 %v1069_v17, %v1034_v13 }
 0x160   : > { %v1103_v3 = vrot.slane %v1097_v22, 1  ;;  %v1104_v18 = vrot.slane %v1098_v56, 1  ;;  %v1120_v44 = vrot.slane %v1114_v50, 1  ;;  %v1121_v21 = vrot.slane %v1115_v38, 1 }
 0x161   : > { %v1076_v31 = vadd.f32 %v1070_v43, %v1035_v4  ;;  %v1092_v9 = vadd.f32 %v1086_v2, %v1042_v6  ;;  %v1093_v24 = vadd.f32 %v1087_v53, %v1043_v20  ;;  %v1131_v63 = vmul.f32 %v9838_v52, %v6664_v60 }
 0x162   : > { %v1109_v26 = vadd.f32 %v1103_v3, %v1050_v16  ;;  %v1110_v27 = vadd.f32 %v1104_v18, %v1051_v59  ;;  %v1126_v0 = vadd.f32 %v1120_v44, %v1058_v5  ;;  %v1132_v28 = vmul.f32 %v9838_v52, %v6667_v51 }
 0x163   : > { %v1148_v33 = vmul.f32 %v9839_v45, %v6664_v60  ;;  %v1149_v39 = vmul.f32 %v9839_v45, %v6667_v51  ;;  %v1165_v47 = vmul.f32 %v9840_v61, %v6664_v60  ;;  %v1137_v36 = vrot.slane %v1131_v63, 2 }
 0x164   : > { %v1166_v13 = vmul.f32 %v9840_v61, %v6667_v51  ;;  %v1182_v4 = vmul.f32 %v9841_v58, %v6664_v60  ;;  %v1183_v6 = vmul.f32 %v9841_v58, %v6667_v51  ;;  %v1127_v52 = vadd.f32 %v1121_v21, %v1059_v34  ;;  %v9856_v21 = vld [vmem:[#allocation78_spill] sm:$0xff] }
 0x165   : > { %v1138_v20 = vrot.slane %v1132_v28, 2  ;;  %v1154_v32 = vrot.slane %v1148_v33, 2  ;;  %v1155_v54 = vrot.slane %v1149_v39, 2  ;;  %v1143_v42 = vadd.f32 %v1137_v36, %v1075_v48  ;;  %v9859_v33 = vld [vmem:[#allocation94_spill] sm:$0xff]  ;;  %v9861_v36 = vld [vmem:[#allocation87_spill] sm:$0xff] }
 0x166   : > { %v1171_v7 = vrot.slane %v1165_v47, 2  ;;  %v1172_v45 = vrot.slane %v1166_v13, 2  ;;  %v1188_v19 = vrot.slane %v1182_v4, 2  ;;  %v1189_v59 = vrot.slane %v1183_v6, 2  ;;  %v9863_v6 = vld [vmem:[#allocation88_spill] sm:$0xff] }
 0x167   : > { %v1144_v37 = vadd.f32 %v1138_v20, %v1076_v31  ;;  %v1160_v62 = vadd.f32 %v1154_v32, %v1092_v9  ;;  %v1161_v16 = vadd.f32 %v1155_v54, %v1093_v24  ;;  %v1199_v1 = vmul.f32 %v9842_v35, %v6664_v60  ;;  %v9865_v32 = vld [vmem:[#allocation101_spill] sm:$0xff] }
 0x168   : > { %v1177_v5 = vadd.f32 %v1171_v7, %v1109_v26  ;;  %v1178_v61 = vadd.f32 %v1172_v45, %v1110_v27  ;;  %v1194_v12 = vadd.f32 %v1188_v19, %v1126_v0  ;;  %v1200_v58 = vmul.f32 %v9842_v35, %v6667_v51  ;;  %v9857_v26 = vld [vmem:[#allocation100_spill] sm:$0xff]  ;;  %v9858_v0 = vld [vmem:[#allocation90_spill] sm:$0xff] }
 0x169   : > { %v1216_v57 = vmul.f32 %v9843_v8, %v6664_v60  ;;  %v1217_v14 = vmul.f32 %v9843_v8, %v6667_v51  ;;  %v1233_v22 = vmul.f32 %v9844_v29, %v6664_v60  ;;  %v1205_v17 = vrot.slane %v1199_v1, 3 }
 0x16a   : > { %v1234_v56 = vmul.f32 %v9844_v29, %v6667_v51  ;;  %v1250_v50 = vmul.f32 %v9845_v25, %v6664_v60  ;;  %v1251_v35 = vmul.f32 %v9845_v25, %v6667_v51  ;;  %v1195_v8 = vadd.f32 %v1189_v59, %v1127_v52  ;;  %v9855_v25 = vld [vmem:[#allocation89_spill] sm:$0xff] }
 0x16b   : > { %v1206_v38 = vrot.slane %v1200_v58, 3  ;;  %v1222_v34 = vrot.slane %v1216_v57, 3  ;;  %v1223_v43 = vrot.slane %v1217_v14, 3  ;;  %v1211_v2 = vadd.f32 %v1205_v17, %v1143_v42  ;;  %v9866_v42 = vld [vmem:[#allocation93_spill] sm:$0xff] }
 0x16c   : > { %v1239_v53 = vrot.slane %v1233_v22, 3  ;;  %v1240_v48 = vrot.slane %v1234_v56, 3  ;;  %v1256_v29 = vrot.slane %v1250_v50, 3  ;;  %v1257_v51 = vrot.slane %v1251_v35, 3  ;;  %v9878_v14 = vld [vmem:[#allocation97_spill] sm:$0xff]  ;;  %v9881_v35 = vld [vmem:[#allocation98_spill] sm:$0xff] }
 0x16d   : > { %v1212_v60 = vadd.f32 %v1206_v38, %v1144_v37  ;;  %v1228_v3 = vadd.f32 %v1222_v34, %v1160_v62  ;;  %v1229_v18 = vadd.f32 %v1223_v43, %v1161_v16  ;;  %v1421_v44 = vrot.slane %v9855_v25, %v6279_v46  ;;  %v9872_v16 = vld [vmem:[#allocation95_spill] sm:$0xff] }
 0x16e   : > { %v1245_v31 = vadd.f32 %v1239_v53, %v1177_v5  ;;  %v1246_v9 = vadd.f32 %v1240_v48, %v1178_v61  ;;  %v1262_v24 = vadd.f32 %v1256_v29, %v1194_v12  ;;  %v1425_v27 = vrot.slane %v9857_v26, %v9856_v21  ;;  %v9875_v12 = vld [vmem:[#allocation96_spill] sm:$0xff]  ;;  %v5466_v34 = vld [vmem:[%s9871_s15 + $0x8] sm:$0xf]  ;;  %v6882_v48 = vpop.permute.xlu0 %1648  ;;  %v9883_v29 = vld [vmem:[#allocation62_spill] sm:$0xff] }
 0x16f   : > { %v1445_v63 = vrot.slane %v9858_v0, %v6279_v46  ;;  %v1263_v28 = vadd.f32 %v1257_v51, %v1195_v8  ;;  %v9860_v39 = vrot.slane %v9846_v40, %v9859_v33  ;;  %v9862_v13 = vrot.slane %v9861_v36, %v9856_v21 }
 0x170   : > { %v9864_v52 = vrot.slane %v9863_v6, %v9856_v21  ;;  %v1449_v54 = vrot.slane %v9865_v32, %v9856_v21  ;;  %v9867_v40 = vrot.slane %v9866_v42, %v9847_v11  ;;  %v9870_v37 = vrot.slane %v9849_v41, %v9859_v33 }
 0x171   : > { %v1286_v47 = vadd.f32 %v9860_v39, %v1211_v2  ;;  %v6807_v4 = vadd.f32 %v9862_v13, %v6703_v10  ;;  %v9868_v10 = vrot.slane %v9855_v25, %v9856_v21  ;;  %v9873_v59 = vrot.slane %v9872_v16, %v9847_v11 }
 0x172   : > { %v6813_v20 = vadd.f32 %v9864_v52, %v6718_v23  ;;  %v1287_v7 = vadd.f32 %v9867_v40, %v1212_v60  ;;  %v9869_v23 = vrot.slane %v9858_v0, %v9856_v21  ;;  %v1310_v62 = vadd.f32 %v9870_v37, %v1228_v3 }
 0x173   : > { %v6826_v45 = vadd.f32 %v9868_v10, %v6723_v49  ;;  %v1311_v5 = vadd.f32 %v9873_v59, %v1229_v18  ;;  %v9874_v49 = vrot.slane %v9851_v15, %v9859_v33  ;;  %v9876_v1 = vrot.slane %v9875_v12, %v9847_v11 }
 0x174   : > { %v6832_v19 = vadd.f32 %v9869_v23, %v6728_v30  ;;  %v9877_v41 = vrot.slane %v9853_v55, %v9859_v33  ;;  %v1457_v57 = vstv %s6774_s3  ;;  %v9879_v15 = vrot.slane %v9878_v14, %v9847_v11  ;;  %v9885_v33 = vld [vmem:[#allocation99_spill] sm:$0xff]  ;;  %s7128_s3 = sld [smem:[#allocation7 + $0x66]] }
 0x175   : > { %v1334_v61 = vadd.f32 %v9874_v49, %v1245_v31  ;;  %v1335_v30 = vadd.f32 %v9876_v1, %v1246_v9  ;;  %v9880_v17 = vrot.slane %v9861_v36, %v6279_v46  ;;  %v1481_v55 = vstv %s6782_s26  ;;  %s7130_s26 = sld [smem:[#allocation7 + $0x67]] }
 0x176   : > { %v6849_v58 = vadd.f32 %v9877_v41, %v1262_v24  ;;  %v1359_v22 = vadd.f32 %v9879_v15, %v1263_v28  ;;  %v1505_v50 = vstv %s6784_s18  ;;  %v9882_v8 = vrot.slane %v9881_v35, %v9856_v21  ;;  %s7132_s18 = sld [smem:[#allocation7 + $0x68]] }
 0x177   : > { %v6862_v56 = vadd.f32 %v9880_v17, %v1286_v47  ;;  %v1459_v43 = vmul.f32 %v5466_v34, %v1457_v57  ;;  %v1529_v2 = vstv %s6786_s8  ;;  %v1553_v53 = vstv %s6788_s27  ;;  %s7136_s8 = sld [smem:[#allocation7 + $0x69]]  ;;  %s7140_s27 = sld [smem:[#allocation7 + $0x6a]] }
 0x178   : > { %v1383_v38 = vadd.f32 %v9882_v8, %v1287_v7  ;;  %v6885_v60 = vsub.s32 2, %v9883_v29  ;;  %v1483_v3 = vmul.f32 %v5466_v34, %v1481_v55  ;;  %v1507_v18 = vmul.f32 %v5466_v34, %v1505_v50 }
 0x179   : > { %v1531_v51 = vmul.f32 %v5466_v34, %v1529_v2  ;;  %v1555_v25 = vmul.f32 %v5466_v34, %v1553_v53  ;;  %v6900_v31 = vsub.s32 3, %v9883_v29  ;;  %v1577_v9 = vstv %s6792_s19  ;;  %s7142_s19 = sld [smem:[#allocation7 + $0x6b]] }
 0x17a   : > { %v1601_v24 = vstv %s6794_s24  ;;  %v9884_v26 = vrot.slane %v9863_v6, %v6279_v46  ;;  %v9886_v39 = vrot.slane %v9885_v33, %v9856_v21  ;;  %v1579_v36 = vmul.f32 %v5466_v34, %v1577_v9  ;;  %s7156_s24 = sld [smem:[#allocation7 + $0x6c]] }
 0x17b   : > { %v1603_v13 = vmul.f32 %v5466_v34, %v1601_v24  ;;  %v6920_v52 = vadd.f32 %v1421_v44, %v1334_v61  ;;  %v1431_v32 = vadd.f32 %v1425_v27, %v1335_v30  ;;  %v1455_v42 = vadd.f32 %v1449_v54, %v1359_v22 }
 0x17c   : > { %v6909_v28 = vadd.f32 %v9884_v26, %v1310_v62  ;;  %v1407_v47 = vadd.f32 %v9886_v39, %v1311_v5  ;;  %v9594_v6 = vstv %s6820_s29  ;;  %v1473_v40 = vrot.slane %v1459_v43, %v6885_v60  ;;  %v6945_v5 = vpop.permute.xlu0 %1652 }
 0x17d   : > { %v1497_v7 = vrot.slane %v1483_v3, %v6885_v60  ;;  %v1521_v10 = vrot.slane %v1507_v18, %v6885_v60  ;;  %v1627_v23 = vmul.f32 %v5466_v34, %v9594_v6  ;;  %v1545_v44 = vrot.slane %v1531_v51, %v6885_v60 }
 0x17e   : > { %v1569_v27 = vrot.slane %v1555_v25, %v6900_v31  ;;  %v6933_v54 = vstv %s6852_s13  ;;  %v1593_v37 = vrot.slane %v1579_v36, %v6900_v31  ;;  %v1617_v62 = vrot.slane %v1603_v13, %v6900_v31  ;;  %s7164_s13 = sld [smem:[#allocation7 + $0x6e]] }
 0x17f   : > { %v6940_v16 = vstv %s6854_s16  ;;  %v6943_v59 = vstv %s6866_s17  ;;  %v1641_v49 = vrot.slane %v1627_v23, %v6900_v31  ;;  %v6949_v61 = vstv %s6868_s12  ;;  %s7166_s16 = sld [smem:[#allocation7 + $0x6f]]  ;;  %s7315_s17 = sld [smem:[#allocation7 + $0x70]] }
 0x180   : > { %v6952_v12 = vstv %s6878_s11  ;;  %v6955_v1 = vstv %s6880_s9  ;;  %v6960_v30 = vstv %s6893_s5  ;;  %v6963_v41 = vstv %s6895_s7  ;;  %s7317_s12 = sld [smem:[#allocation7 + $0x71]]  ;;  %s7323_s11 = sld [smem:[#allocation7 + $0x72]] }
 0x181   : > { %v1479_v14 = vadd.f32 %v1473_v40, %v1383_v38  ;;  %v1503_v15 = vadd.f32 %v1497_v7, %v1407_v47  ;;  %v6966_v22 = vstv %s6904_s28  ;;  %v1527_v17 = vadd.f32 %v1521_v10, %v1431_v32  ;;  %s7325_s9 = sld [smem:[#allocation7 + $0x73]]  ;;  %s7331_s5 = sld [smem:[#allocation7 + $0x74]] }
 0x182   : > { %v1551_v35 = vadd.f32 %v1545_v44, %v1455_v42  ;;  %v1661_v8 = vsel %vm1654_vm4, %v6945_v5, %v6882_v48  ;;  %v6976_v34 = vstv %s6918_s30  ;;  %v6980_v18 = vstv %s6923_s25  ;;  %s7333_s7 = sld [smem:[#allocation7 + $0x75]]  ;;  %s7335_s28 = sld [smem:[#allocation7 + $0x76]] }
 0x183   : > { %v1575_v43 = vadd.f32 %v1569_v27, %v1479_v14  ;;  %v1599_v3 = vadd.f32 %v1593_v37, %v1503_v15  ;;  %v1666_v38 = vmul.f32 %v6933_v54, %v1661_v8  ;;  %v1623_v51 = vadd.f32 %v1617_v62, %v1527_v17  ;;  %s7337_s30 = sld [smem:[#allocation7 + $0x77]]  ;;  %s7343_s25 = sld [smem:[#allocation7 + $0x78]] }
 0x184   : > { %v1647_v25 = vadd.f32 %v1641_v49, %v1551_v35  ;;  %v1674_v26 = vmul.f32 %v6940_v16, %v1661_v8  ;;  %v1682_v39 = vmul.f32 %v6943_v59, %v1661_v8  ;;  %v1698_v47 = vmul.f32 %v6952_v12, %v1661_v8 }
 0x185   : > { %v1669_v33 = vadd.f32 %v1666_v38, %v1575_v43  ;;  %v1715_v36 = vmul.f32 %v6955_v1, %v1661_v8  ;;  %v6989_v13 = vstv %s6935_s23  ;;  %v1690_v32 = vmul.f32 %v6949_v61, %v1661_v8  ;;  %s7345_s23 = sld [smem:[#allocation7 + $0x79]] }
 0x186   : > { %v1732_v42 = vmul.f32 %v6960_v30, %v1661_v8  ;;  %v1749_v40 = vmul.f32 %v6963_v41, %v1661_v8  ;;  %v1677_v7 = vadd.f32 %v1674_v26, %v1599_v3  ;;  %v1685_v10 = vadd.f32 %v1682_v39, %v1623_v51  ;;  %v5467_v39 = vld [vmem:[%s9871_s15] sm:$0xff]  ;;  %s8093_s15 = sld [smem:[#allocation8 + $0x2b]] }
 0x187   : > { %v1704_v23 = vrot.slane %v1698_v47, 1  ;;  %v1766_v44 = vmul.f32 %v6966_v22, %v1661_v8  ;;  %v6996_v27 = vstv %s6957_s0  ;;  %v1693_v37 = vadd.f32 %v1690_v32, %v1647_v25  ;;  %s7353_s0 = sld [smem:[#allocation7 + $0x7a]] }
 0x188   : > { %v1721_v62 = vrot.slane %v1715_v36, 1  ;;  %v1783_v49 = vmul.f32 %v6976_v34, %v1661_v8  ;;  %v1738_v15 = vrot.slane %v1732_v42, 1  ;;  %v1800_v17 = vmul.f32 %v6980_v18, %v1661_v8 }
 0x189   : > { %v1710_v14 = vadd.f32 %v1704_v23, %v1669_v33  ;;  %v1817_v35 = vmul.f32 %v6989_v13, %v1661_v8  ;;  %v1454_v43 = vadd.f32 %v1445_v63, %v6849_v58  ;;  %v7006_v3 = vstv %s6968_s1  ;;  %s7355_s1 = sld [smem:[#allocation7 + $0x7b]] }
 0x18a   : > { %v7009_v38 = vstv %s6970_s2  ;;  %v1755_v51 = vrot.slane %v1749_v40, 1  ;;  %v1727_v25 = vadd.f32 %v1721_v62, %v1677_v7  ;;  %v1744_v26 = vadd.f32 %v1738_v15, %v1685_v10  ;;  %s7361_s2 = sld [smem:[#allocation7 + $0x7c]] }
 0x18b   : > { %v1772_v33 = vrot.slane %v1766_v44, 2  ;;  %v1458_v47 = vmul.f32 %v5467_v39, %v1457_v57  ;;  %v7015_v36 = vstv %s6982_s22  ;;  %v1789_v42 = vrot.slane %v1783_v49, 2  ;;  %s7363_s22 = sld [smem:[#allocation7 + $0x7d]] }
 0x18c   : > { %v1761_v32 = vadd.f32 %v1755_v51, %v1693_v37  ;;  %v1834_v46 = vmul.f32 %v6996_v27, %v1661_v8  ;;  %v1806_v63 = vrot.slane %v1800_v17, 2  ;;  %v1823_v58 = vrot.slane %v1817_v35, 2 }
 0x18d   : > { %v1778_v0 = vadd.f32 %v1772_v33, %v1710_v14  ;;  %v1468_v23 = vsub.s32 6, %v9883_v29  ;;  %v1851_v40 = vmul.f32 %v7006_v3, %v1661_v8  ;;  %v1868_v7 = vmul.f32 %v7009_v38, %v1661_v8 }
 0x18e   : > { %v1482_v10 = vmul.f32 %v5467_v39, %v1481_v55  ;;  %v1506_v57 = vmul.f32 %v5467_v39, %v1505_v50  ;;  %v1795_v44 = vadd.f32 %v1789_v42, %v1727_v25  ;;  %v1812_v37 = vadd.f32 %v1806_v63, %v1744_v26  ;;  %v1651_v63 = vpop.permute.xlu1 %1650 }
 0x18f   : > { %v1465_v62 = vrot.slane %v1458_v47, %v6885_v60  ;;  %v1469_v49 = vrot.slane %v1458_v47, %v1468_v23  ;;  %v1829_v14 = vadd.f32 %v1823_v58, %v1761_v32  ;;  %v1840_v15 = vrot.slane %v1834_v46, 3 }
 0x190   : > { %v1885_v17 = vmul.f32 %v7015_v36, %v1661_v8  ;;  %v1489_v35 = vrot.slane %v1482_v10, %v6885_v60  ;;  %v1493_v51 = vrot.slane %v1482_v10, %v1468_v23  ;;  %v1513_v33 = vrot.slane %v1506_v57, %v6885_v60 }
 0x191   : > { %v1517_v55 = vrot.slane %v1506_v57, %v1468_v23  ;;  %v1530_v6 = vmul.f32 %v5467_v39, %v1529_v2  ;;  %v1857_v50 = vrot.slane %v1851_v40, 3  ;;  %v1874_v25 = vrot.slane %v1868_v7, 3 }
 0x192   : > { %v1554_v26 = vmul.f32 %v5467_v39, %v1553_v53  ;;  %v1564_v47 = vsub.s32 7, %v9883_v29  ;;  %v1477_v32 = vadd.f32 %v1465_v62, %v6807_v4  ;;  %v1478_v8 = vadd.f32 %v1469_v49, %v6862_v56 }
 0x193   : > { %v1501_v42 = vadd.f32 %v1489_v35, %v6813_v20  ;;  %v1537_v46 = vrot.slane %v1530_v6, %v6885_v60  ;;  %v1541_v58 = vrot.slane %v1530_v6, %v1468_v23  ;;  %v1578_v2 = vmul.f32 %v5467_v39, %v1577_v9 }
 0x194   : > { %v1561_v10 = vrot.slane %v1554_v26, %v6900_v31  ;;  %v1602_v40 = vmul.f32 %v5467_v39, %v1601_v24  ;;  %v1502_v53 = vadd.f32 %v1493_v51, %v6909_v28  ;;  %v1525_v29 = vadd.f32 %v1513_v33, %v6826_v45 }
 0x195   : > { %v1526_v4 = vadd.f32 %v1517_v55, %v6920_v52  ;;  %v9887_v7 = vstv %s6820_s29  ;;  %v1549_v20 = vadd.f32 %v1537_v46, %v6832_v19  ;;  %v1565_v57 = vrot.slane %v1554_v26, %v1564_v47  ;;  %s7158_s29 = sld [smem:[#allocation7 + $0x6d]] }
 0x196   : > { %v1626_v56 = vmul.f32 %v5467_v39, %v9887_v7  ;;  %v1585_v62 = vrot.slane %v1578_v2, %v6900_v31  ;;  %v7052_v6 = vsel %vm1654_vm4, %v6882_v48, %v1651_v63  ;;  %v1589_v9 = vrot.slane %v1578_v2, %v1564_v47 }
 0x197   : > { %v1609_v24 = vrot.slane %v1602_v40, %v6900_v31  ;;  %v1613_v23 = vrot.slane %v1602_v40, %v1564_v47  ;;  %v1891_v45 = vrot.slane %v1885_v17, 3  ;;  %v1550_v49 = vadd.f32 %v1541_v58, %v1454_v43 }
 0x198   : > { %v1633_v28 = vrot.slane %v1626_v56, %v6900_v31  ;;  %v1573_v52 = vadd.f32 %v1561_v10, %v1477_v32  ;;  %v1637_v35 = vrot.slane %v1626_v56, %v1564_v47  ;;  %v7056_v39 = vadd.f32 %v1840_v15, %v1778_v0 }
 0x199   : > { %v7058_v19 = vadd.f32 %v1857_v50, %v1795_v44  ;;  %v7060_v51 = vadd.f32 %v1874_v25, %v1812_v37  ;;  %v7064_v48 = vsel %vm1654_vm4, %v1651_v63, %v6945_v5  ;;  %v7066_v33 = vadd.f32 %v1891_v45, %v1829_v14 }
 0x19a   : > { %v1574_v55 = vadd.f32 %v1565_v57, %v1478_v8  ;;  %v1597_v26 = vadd.f32 %v1585_v62, %v1501_v42  ;;  %v1664_v31 = vmul.f32 %v6933_v54, %v7052_v6  ;;  %v1598_v43 = vadd.f32 %v1589_v9, %v1502_v53 }
 0x19b   : > { %v1621_v17 = vadd.f32 %v1609_v24, %v1525_v29  ;;  %v1622_v47 = vadd.f32 %v1613_v23, %v1526_v4  ;;  %v1645_v0 = vadd.f32 %v1633_v28, %v1549_v20  ;;  %v1646_v15 = vadd.f32 %v1637_v35, %v1550_v49 }
 0x19c   : > { %v1665_v44 = vmul.f32 %v6933_v54, %v7064_v48  ;;  %v1667_v37 = vadd.f32 %v1664_v31, %v1573_v52  ;;  %v1696_v5 = vmul.f32 %v6952_v12, %v7052_v6  ;;  %v1672_v14 = vmul.f32 %v6940_v16, %v7052_v6 }
 0x19d   : > { %v1673_v50 = vmul.f32 %v6940_v16, %v7064_v48  ;;  %v1680_v25 = vmul.f32 %v6943_v59, %v7052_v6  ;;  %v1681_v32 = vmul.f32 %v6943_v59, %v7064_v48  ;;  %v1688_v54 = vmul.f32 %v6949_v61, %v7052_v6 }
 0x19e   : > { %v1668_v8 = vadd.f32 %v1665_v44, %v1574_v55  ;;  %v1689_v42 = vmul.f32 %v6949_v61, %v7064_v48  ;;  %v1697_v46 = vmul.f32 %v6952_v12, %v7064_v48  ;;  %v1713_v63 = vmul.f32 %v6955_v1, %v7052_v6 }
 0x19f   : > { %v1714_v16 = vmul.f32 %v6955_v1, %v7064_v48  ;;  %v1730_v58 = vmul.f32 %v6960_v30, %v7052_v6  ;;  %v1731_v59 = vmul.f32 %v6960_v30, %v7064_v48  ;;  %v1675_v10 = vadd.f32 %v1672_v14, %v1597_v26 }
 0x1a0   : > { %v1702_v2 = vrot.slane %v1696_v5, 1  ;;  %v1747_v61 = vmul.f32 %v6963_v41, %v7052_v6  ;;  %v1748_v12 = vmul.f32 %v6963_v41, %v7064_v48  ;;  %v1676_v40 = vadd.f32 %v1673_v50, %v1598_v43 }
 0x1a1   : > { %v1683_v53 = vadd.f32 %v1680_v25, %v1621_v17  ;;  %v1684_v29 = vadd.f32 %v1681_v32, %v1622_v47  ;;  %v1691_v4 = vadd.f32 %v1688_v54, %v1645_v0  ;;  %v1692_v7 = vadd.f32 %v1689_v42, %v1646_v15 }
 0x1a2   : > { %v1703_v1 = vrot.slane %v1697_v46, 1  ;;  %v1708_v56 = vadd.f32 %v1702_v2, %v1667_v37  ;;  %v1764_v20 = vmul.f32 %v6966_v22, %v7052_v6  ;;  %v1719_v57 = vrot.slane %v1713_v63, 1 }
 0x1a3   : > { %v1720_v30 = vrot.slane %v1714_v16, 1  ;;  %v1736_v62 = vrot.slane %v1730_v58, 1  ;;  %v1737_v9 = vrot.slane %v1731_v59, 1  ;;  %v1753_v24 = vrot.slane %v1747_v61, 1 }
 0x1a4   : > { %v1754_v23 = vrot.slane %v1748_v12, 1  ;;  %v1765_v28 = vmul.f32 %v6966_v22, %v7064_v48  ;;  %v1781_v41 = vmul.f32 %v6976_v34, %v7052_v6  ;;  %v1709_v45 = vadd.f32 %v1703_v1, %v1668_v8 }
 0x1a5   : > { %v1782_v49 = vmul.f32 %v6976_v34, %v7064_v48  ;;  %v1798_v52 = vmul.f32 %v6980_v18, %v7052_v6  ;;  %v1799_v35 = vmul.f32 %v6980_v18, %v7064_v48  ;;  %v1725_v22 = vadd.f32 %v1719_v57, %v1675_v10 }
 0x1a6   : > { %v1770_v55 = vrot.slane %v1764_v20, 2  ;;  %v1815_v26 = vmul.f32 %v6989_v13, %v7052_v6  ;;  %v1816_v31 = vmul.f32 %v6989_v13, %v7064_v48  ;;  %v1726_v34 = vadd.f32 %v1720_v30, %v1676_v40 }
 0x1a7   : > { %v1742_v43 = vadd.f32 %v1736_v62, %v1683_v53  ;;  %v1743_v17 = vadd.f32 %v1737_v9, %v1684_v29  ;;  %v1759_v18 = vadd.f32 %v1753_v24, %v1691_v4  ;;  %v1760_v47 = vadd.f32 %v1754_v23, %v1692_v7  ;;  %v1901_v62 = vpop.permute.xlu0 %1900 }
 0x1a8   : > { %v1771_v0 = vrot.slane %v1765_v28, 2  ;;  %v1776_v15 = vadd.f32 %v1770_v55, %v1708_v56  ;;  %v1787_v44 = vrot.slane %v1781_v41, 2  ;;  %v1788_v13 = vrot.slane %v1782_v49, 2  ;;  %v1899_v41 = vpop.permute.xlu1 %1898 }
 0x1a9   : > { %v1804_v37 = vrot.slane %v1798_v52, 2  ;;  %v1805_v5 = vrot.slane %v1799_v35, 2  ;;  %v1832_v14 = vmul.f32 %v6996_v27, %v7052_v6  ;;  %v1821_v25 = vrot.slane %v1815_v26, 2 }
 0x1aa   : > { %v1793_v50 = vadd.f32 %v1787_v44, %v1725_v22  ;;  %v1822_v32 = vrot.slane %v1816_v31, 2  ;;  %v1849_v8 = vmul.f32 %v7006_v3, %v7052_v6  ;;  %v7146_v54 = vmul.f32 %v6996_v27, %v7064_v48 }
 0x1ab   : > { %v7150_v42 = vmul.f32 %v7006_v3, %v7064_v48  ;;  %v1866_v46 = vmul.f32 %v7009_v38, %v7052_v6  ;;  %v1883_v63 = vmul.f32 %v7015_v36, %v7052_v6  ;;  %v7160_v16 = vadd.f32 %v1771_v0, %v1709_v45 }
 0x1ac   : > { %v7162_v58 = vadd.f32 %v1788_v13, %v1726_v34  ;;  %v1810_v27 = vadd.f32 %v1804_v37, %v1742_v43  ;;  %v1827_v59 = vadd.f32 %v1821_v25, %v1759_v18  ;;  %v7168_v3 = vadd.f32 %v1805_v5, %v1743_v17 }
 0x1ad   : > { %v7170_v10 = vadd.f32 %v1822_v32, %v1760_v47  ;;  %v1838_v6 = vrot.slane %v1832_v14, 3  ;;  %v1855_v2 = vrot.slane %v1849_v8, 3  ;;  %v7174_v61 = vmul.f32 %v7009_v38, %v7064_v48 }
 0x1ae   : > { %v1872_v12 = vrot.slane %v1866_v46, 3  ;;  %v7178_v40 = vmul.f32 %v7015_v36, %v7064_v48  ;;  %v1889_v53 = vrot.slane %v1883_v63, 3  ;;  %v1839_v29 = vrot.slane %v7146_v54, 3 }
 0x1af   : > { %v1844_v4 = vadd.f32 %v1838_v6, %v1776_v15  ;;  %v1856_v7 = vrot.slane %v7150_v42, 3  ;;  %v1861_v1 = vadd.f32 %v1855_v2, %v1793_v50  ;;  %v7183_v36 = vstv %s7106_s10  ;;  %s7371_s10 = sld [smem:[#allocation7 + $0x7e]] }
 0x1b0   : > { %v1878_v38 = vadd.f32 %v1872_v12, %v1810_v27  ;;  %v1895_v56 = vadd.f32 %v1889_v53, %v1827_v59  ;;  %v7186_v48 = vstv %s7114_s14  ;;  %v7189_v20 = vstv %s7116_s21  ;;  %s7373_s14 = sld [smem:[#allocation7 + $0x7f]]  ;;  %s7521_s21 = sld [smem:[#allocation7 + $0x80]] }
 0x1b1   : > { %v7192_v57 = vstv %s7122_s6  ;;  %v7195_v30 = vstv %s7124_s20  ;;  %v7198_v9 = vstv %s7126_s4  ;;  %v7201_v24 = vstv %s7128_s3  ;;  %s7523_s6 = sld [smem:[#allocation7 + $0x81]]  ;;  %s7525_s20 = sld [smem:[#allocation7 + $0x82]] }
 0x1b2   : > { %v7204_v23 = vstv %s7130_s26  ;;  %v7207_v28 = vstv %s7132_s18  ;;  %v7210_v45 = vstv %s7136_s8  ;;  %v7213_v49 = vstv %s7140_s27  ;;  %s7529_s4 = sld [smem:[#allocation7 + $0x83]]  ;;  %s7531_s3 = sld [smem:[#allocation7 + $0x84]] }
 0x1b3   : > { %v7216_v52 = vstv %s7142_s19  ;;  %v7219_v35 = vstv %s7156_s24  ;;  %v7222_v22 = vstv %s7158_s29  ;;  %v7225_v55 = vstv %s7164_s13  ;;  %s7539_s26 = sld [smem:[#allocation7 + $0x85]]  ;;  %s7541_s18 = sld [smem:[#allocation7 + $0x86]] }
 0x1b4   : > { %v7228_v26 = vstv %s7166_s16  ;;  %v1905_v31 = vsel %vm1904_vm5, %v1899_v41, %v1901_v62  ;;  %s7543_s8 = sld [smem:[#allocation7 + $0x87]]  ;;  %s7553_s27 = sld [smem:[#allocation7 + $0x88]] }
 0x1b5   : > { %v1914_v34 = vmul.f32 %v7183_v36, %v1905_v31  ;;  %v1922_v43 = vmul.f32 %v7186_v48, %v1905_v31  ;;  %v1930_v17 = vmul.f32 %v7189_v20, %v1905_v31  ;;  %v1938_v18 = vmul.f32 %v7192_v57, %v1905_v31  ;;  %s7555_s19 = sld [smem:[#allocation7 + $0x89]]  ;;  %s7557_s24 = sld [smem:[#allocation7 + $0x8a]] }
 0x1b6   : > { %v1946_v47 = vmul.f32 %v7195_v30, %v1905_v31  ;;  %v1963_v0 = vmul.f32 %v7198_v9, %v1905_v31  ;;  %v1980_v15 = vmul.f32 %v7201_v24, %v1905_v31  ;;  %v1997_v44 = vmul.f32 %v7204_v23, %v1905_v31  ;;  %s7559_s29 = sld [smem:[#allocation7 + $0x8b]]  ;;  %s7561_s13 = sld [smem:[#allocation7 + $0x8c]] }
 0x1b7   : > { %v1917_v13 = vadd.f32 %v1914_v34, %v1844_v4  ;;  %v1925_v37 = vadd.f32 %v1922_v43, %v1861_v1  ;;  %v1933_v5 = vadd.f32 %v1930_v17, %v1878_v38  ;;  %v1941_v14 = vadd.f32 %v1938_v18, %v1895_v56  ;;  %v1903_v4 = vpop.permute.xlu1 %1902  ;;  %s7571_s16 = sld [smem:[#allocation7 + $0x8d]] }
 0x1b8   : > { %v1952_v50 = vrot.slane %v1946_v47, 1  ;;  %v1969_v25 = vrot.slane %v1963_v0, 1  ;;  %v1986_v32 = vrot.slane %v1980_v15, 1  ;;  %v2003_v8 = vrot.slane %v1997_v44, 1 }
 0x1b9   : > { %v2014_v46 = vmul.f32 %v7207_v28, %v1905_v31  ;;  %v2031_v63 = vmul.f32 %v7210_v45, %v1905_v31  ;;  %v2048_v27 = vmul.f32 %v7213_v49, %v1905_v31  ;;  %v2065_v59 = vmul.f32 %v7216_v52, %v1905_v31 }
 0x1ba   : > { %v1958_v6 = vadd.f32 %v1952_v50, %v1917_v13  ;;  %v1975_v2 = vadd.f32 %v1969_v25, %v1925_v37  ;;  %v1992_v12 = vadd.f32 %v1986_v32, %v1933_v5  ;;  %v2009_v53 = vadd.f32 %v2003_v8, %v1941_v14 }
 0x1bb   : > { %v2020_v1 = vrot.slane %v2014_v46, 2  ;;  %v2037_v38 = vrot.slane %v2031_v63, 2  ;;  %v2054_v56 = vrot.slane %v2048_v27, 2  ;;  %v2071_v34 = vrot.slane %v2065_v59, 2 }
 0x1bc   : > { %v2082_v43 = vmul.f32 %v7219_v35, %v1905_v31  ;;  %v2099_v17 = vmul.f32 %v7222_v22, %v1905_v31  ;;  %v2116_v18 = vmul.f32 %v7225_v55, %v1905_v31  ;;  %v2133_v47 = vmul.f32 %v7228_v26, %v1905_v31 }
 0x1bd   : > { %v1873_v0 = vrot.slane %v7174_v61, 3  ;;  %v1890_v15 = vrot.slane %v7178_v40, 3  ;;  %v7250_v44 = vsel %vm1904_vm5, %v1901_v62, %v1903_v4  ;;  %v7253_v13 = vsel %vm1904_vm5, %v1903_v4, %v1899_v41 }
 0x1be   : > { %v2026_v37 = vadd.f32 %v2020_v1, %v1958_v6  ;;  %v2043_v5 = vadd.f32 %v2037_v38, %v1975_v2  ;;  %v2060_v14 = vadd.f32 %v2054_v56, %v1992_v12  ;;  %v2077_v50 = vadd.f32 %v2071_v34, %v2009_v53 }
 0x1bf   : > { %v1845_v25 = vadd.f32 %v1839_v29, %v7160_v16  ;;  %v1862_v61 = vadd.f32 %v1856_v7, %v7162_v58  ;;  %v1879_v40 = vadd.f32 %v1873_v0, %v7168_v3  ;;  %v1896_v62 = vadd.f32 %v1890_v15, %v7170_v10 }
 0x1c0   : > { %v2088_v31 = vrot.slane %v2082_v43, 3  ;;  %v2105_v32 = vrot.slane %v2099_v17, 3  ;;  %v2122_v41 = vrot.slane %v2116_v18, 3  ;;  %v2139_v8 = vrot.slane %v2133_v47, 3 }
 0x1c1   : > { %v1915_v46 = vmul.f32 %v7183_v36, %v7250_v44  ;;  %v1916_v63 = vmul.f32 %v7183_v36, %v7253_v13  ;;  %v1923_v54 = vmul.f32 %v7186_v48, %v7250_v44  ;;  %v1924_v42 = vmul.f32 %v7186_v48, %v7253_v13 }
 0x1c2   : > { %v7271_v16 = vadd.f32 %v2088_v31, %v2026_v37  ;;  %v7273_v58 = vadd.f32 %v2105_v32, %v2043_v5  ;;  %v7275_v3 = vadd.f32 %v2122_v41, %v2060_v14  ;;  %v7277_v10 = vadd.f32 %v2139_v8, %v2077_v50 }
 0x1c3   : > { %v1918_v29 = vadd.f32 %v1915_v46, %v1845_v25  ;;  %v1919_v7 = vadd.f32 %v1916_v63, %v7056_v39  ;;  %v1947_v36 = vmul.f32 %v7195_v30, %v7250_v44  ;;  %v1948_v27 = vmul.f32 %v7195_v30, %v7253_v13 }
 0x1c4   : > { %v1931_v48 = vmul.f32 %v7189_v20, %v7250_v44  ;;  %v1932_v59 = vmul.f32 %v7189_v20, %v7253_v13  ;;  %v1964_v6 = vmul.f32 %v7198_v9, %v7250_v44  ;;  %v1965_v2 = vmul.f32 %v7198_v9, %v7253_v13 }
 0x1c5   : > { %v1926_v12 = vadd.f32 %v1923_v54, %v1862_v61  ;;  %v1927_v39 = vadd.f32 %v1924_v42, %v7058_v19  ;;  %v1939_v53 = vmul.f32 %v7192_v57, %v7250_v44  ;;  %v1940_v30 = vmul.f32 %v7192_v57, %v7253_v13 }
 0x1c6   : > { %v1934_v4 = vadd.f32 %v1931_v48, %v1879_v40  ;;  %v1935_v1 = vadd.f32 %v1932_v59, %v7060_v51  ;;  %v1981_v20 = vmul.f32 %v7201_v24, %v7250_v44  ;;  %v1982_v38 = vmul.f32 %v7201_v24, %v7253_v13 }
 0x1c7   : > { %v1953_v56 = vrot.slane %v1947_v36, 1  ;;  %v1954_v9 = vrot.slane %v1948_v27, 1  ;;  %v1998_v19 = vmul.f32 %v7204_v23, %v7250_v44  ;;  %v1999_v34 = vmul.f32 %v7204_v23, %v7253_v13 }
 0x1c8   : > { %v1942_v43 = vadd.f32 %v1939_v53, %v1896_v62  ;;  %v1943_v57 = vadd.f32 %v1940_v30, %v7066_v33  ;;  %v1970_v17 = vrot.slane %v1964_v6, 1  ;;  %v1971_v18 = vrot.slane %v1965_v2, 1 }
 0x1c9   : > { %v1959_v51 = vadd.f32 %v1953_v56, %v1918_v29  ;;  %v1960_v47 = vadd.f32 %v1954_v9, %v1919_v7  ;;  %v2015_v0 = vmul.f32 %v7207_v28, %v7250_v44  ;;  %v2016_v24 = vmul.f32 %v7207_v28, %v7253_v13 }
 0x1ca   : > { %v1987_v15 = vrot.slane %v1981_v20, 1  ;;  %v1988_v37 = vrot.slane %v1982_v38, 1  ;;  %v2032_v5 = vmul.f32 %v7210_v45, %v7250_v44  ;;  %v2033_v23 = vmul.f32 %v7210_v45, %v7253_v13 }
 0x1cb   : > { %v1976_v14 = vadd.f32 %v1970_v17, %v1926_v12  ;;  %v1977_v33 = vadd.f32 %v1971_v18, %v1927_v39  ;;  %v2004_v50 = vrot.slane %v1998_v19, 1  ;;  %v2005_v25 = vrot.slane %v1999_v34, 1  ;;  %v7359_v12 = vpop.permute.xlu0 %2148 }
 0x1cc   : > { %v1993_v61 = vadd.f32 %v1987_v15, %v1934_v4  ;;  %v1994_v40 = vadd.f32 %v1988_v37, %v1935_v1  ;;  %v2049_v28 = vmul.f32 %v7213_v49, %v7250_v44  ;;  %v2050_v62 = vmul.f32 %v7213_v49, %v7253_v13 }
 0x1cd   : > { %v2021_v45 = vrot.slane %v2015_v0, 2  ;;  %v2022_v31 = vrot.slane %v2016_v24, 2  ;;  %v2066_v32 = vmul.f32 %v7216_v52, %v7250_v44  ;;  %v2067_v41 = vmul.f32 %v7216_v52, %v7253_v13 }
 0x1ce   : > { %v2010_v8 = vadd.f32 %v2004_v50, %v1942_v43  ;;  %v2011_v46 = vadd.f32 %v2005_v25, %v1943_v57  ;;  %v2038_v63 = vrot.slane %v2032_v5, 2  ;;  %v2039_v49 = vrot.slane %v2033_v23, 2 }
 0x1cf   : > { %v2027_v54 = vadd.f32 %v2021_v45, %v1959_v51  ;;  %v2028_v42 = vadd.f32 %v2022_v31, %v1960_v47  ;;  %v2083_v29 = vmul.f32 %v7219_v35, %v7250_v44  ;;  %v2084_v52 = vmul.f32 %v7219_v35, %v7253_v13  ;;  %v2153_v15 = vpop.permute.xlu0 %2152 }
 0x1d0   : > { %v2055_v7 = vrot.slane %v2049_v28, 2  ;;  %v2056_v36 = vrot.slane %v2050_v62, 2  ;;  %v7349_v27 = vmul.f32 %v7222_v22, %v7250_v44  ;;  %v2101_v48 = vmul.f32 %v7222_v22, %v7253_v13 }
 0x1d1   : > { %v7357_v59 = vadd.f32 %v2038_v63, %v1976_v14  ;;  %v2045_v35 = vadd.f32 %v2039_v49, %v1977_v33  ;;  %v2072_v6 = vrot.slane %v2066_v32, 2  ;;  %v2073_v2 = vrot.slane %v2067_v41, 2 }
 0x1d2   : > { %v7365_v39 = vadd.f32 %v2055_v7, %v1993_v61  ;;  %v2062_v53 = vadd.f32 %v2056_v36, %v1994_v40  ;;  %v2118_v22 = vmul.f32 %v7225_v55, %v7253_v13  ;;  %v2135_v30 = vmul.f32 %v7228_v26, %v7253_v13 }
 0x1d3   : > { %v7375_v4 = vadd.f32 %v2072_v6, %v2010_v8  ;;  %v2079_v1 = vadd.f32 %v2073_v2, %v2011_v46  ;;  %v2089_v20 = vrot.slane %v2083_v29, 3  ;;  %v2090_v38 = vrot.slane %v2084_v52, 3 }
 0x1d4   : > { %v2106_v56 = vrot.slane %v7349_v27, 3  ;;  %v2107_v9 = vrot.slane %v2101_v48, 3  ;;  %v7380_v13 = vmul.f32 %v7225_v55, %v7250_v44  ;;  %v7384_v19 = vmul.f32 %v7228_v26, %v7250_v44 }
 0x1d5   : > { %v7386_v34 = vadd.f32 %v2089_v20, %v2027_v54  ;;  %v2096_v43 = vadd.f32 %v2090_v38, %v2028_v42  ;;  %v2124_v57 = vrot.slane %v2118_v22, 3  ;;  %v2141_v17 = vrot.slane %v2135_v30, 3 }
 0x1d6   : > { %v2113_v18 = vadd.f32 %v2107_v9, %v2045_v35  ;;  %v7389_v51 = vstv %s7315_s17  ;;  %v7392_v55 = vstv %s7317_s12  ;;  %v7395_v26 = vstv %s7323_s11  ;;  %s7573_s17 = sld [smem:[#allocation7 + $0x8e]]  ;;  %s7575_s12 = sld [smem:[#allocation7 + $0x8f]] }
 0x1d7   : > { %v2130_v44 = vadd.f32 %v2124_v57, %v2062_v53  ;;  %v2147_v47 = vadd.f32 %v2141_v17, %v2079_v1  ;;  %v7398_v0 = vstv %s7325_s9  ;;  %v7401_v24 = vstv %s7331_s5  ;;  %s7642_s11 = sld [smem:[#allocation2]]  ;;  %s7812_s9 = sld [smem:[#allocation8 + $0xd]] }
 0x1d8   : > { %v7404_v37 = vstv %s7333_s7  ;;  %v7407_v5 = vstv %s7335_s28  ;;  %v7410_v23 = vstv %s7337_s30  ;;  %v7413_v14 = vstv %s7343_s25  ;;  %s9888_s7 = sld [smem:[#allocation131_spill]]  ;;  %s9889_s28 = smov 19  }
 0x1d9   : > { %v7416_v33 = vstv %s7345_s23  ;;  %v7419_v50 = vstv %s7353_s0  ;;  %v7422_v25 = vstv %s7355_s1  ;;  %v7425_v61 = vstv %s7361_s2  ;;  %s9890_s30 = smov 18   ;;  %s9891_s25 = smov 17  }
 0x1da   : > { %v7428_v40 = vstv %s7363_s22  ;;  %v7431_v28 = vstv %s7371_s10  ;;  %v7434_v62 = vstv %s7373_s14  ;;  %v2161_v45 = vsel %vm2154_vm6, %v2153_v15, %v7359_v12  ;;  %s9892_s23 = smov 1   ;;  %s9893_s0 = smov 127  }
 0x1db   : > { %v2166_v31 = vmul.f32 %v7389_v51, %v2161_v45  ;;  %v2174_v32 = vmul.f32 %v7392_v55, %v2161_v45  ;;  %v2182_v41 = vmul.f32 %v7395_v26, %v2161_v45  ;;  %v2190_v8 = vmul.f32 %v7398_v0, %v2161_v45  ;;  %s9894_s1 = smov 111   ;;  %s9895_s2 = smov 110  }
 0x1dc   : > { %v2198_v46 = vmul.f32 %v7401_v24, %v2161_v45  ;;  %v2215_v63 = vmul.f32 %v7404_v37, %v2161_v45  ;;  %v2232_v49 = vmul.f32 %v7407_v5, %v2161_v45  ;;  %v2249_v54 = vmul.f32 %v7410_v23, %v2161_v45  ;;  %s9896_s22 = smov 109   ;;  %s5303_s10 = sld [smem:[#allocation8 + $0x40]] }
 0x1dd   : > { %v2169_v42 = vadd.f32 %v2166_v31, %v2096_v43  ;;  %v2177_v29 = vadd.f32 %v2174_v32, %v2113_v18  ;;  %v2185_v52 = vadd.f32 %v2182_v41, %v2130_v44  ;;  %v2193_v7 = vadd.f32 %v2190_v8, %v2147_v47  ;;  %v2151_v43 = vpop.permute.xlu1 %2150  ;;  %s5304_s14 = sld [smem:[#allocation8 + $0x41]]  ;;  %s7814_s5 = sld [smem:[#allocation8 + $0xe]] }
 0x1de   : > { %v2204_v36 = vrot.slane %v2198_v46, 1  ;;  %v2221_v48 = vrot.slane %v2215_v63, 1  ;;  %v2238_v35 = vrot.slane %v2232_v49, 1  ;;  %v2255_v6 = vrot.slane %v2249_v54, 1 }
 0x1df   : > { %v2266_v2 = vmul.f32 %v7413_v14, %v2161_v45  ;;  %v2283_v53 = vmul.f32 %v7416_v33, %v2161_v45  ;;  %v2300_v22 = vmul.f32 %v7419_v50, %v2161_v45  ;;  %v2317_v30 = vmul.f32 %v7422_v25, %v2161_v45 }
 0x1e0   : > { %v2210_v1 = vadd.f32 %v2204_v36, %v2169_v42  ;;  %v2227_v20 = vadd.f32 %v2221_v48, %v2177_v29  ;;  %v2244_v38 = vadd.f32 %v2238_v35, %v2185_v52  ;;  %v2261_v9 = vadd.f32 %v2255_v6, %v2193_v7 }
 0x1e1   : > { %v2272_v57 = vrot.slane %v2266_v2, 2  ;;  %v2289_v17 = vrot.slane %v2283_v53, 2  ;;  %v2306_v18 = vrot.slane %v2300_v22, 2  ;;  %v2323_v44 = vrot.slane %v2317_v30, 2 }
 0x1e2   : > { %v2334_v47 = vmul.f32 %v7425_v61, %v2161_v45  ;;  %v2351_v31 = vmul.f32 %v7428_v40, %v2161_v45  ;;  %v2368_v32 = vmul.f32 %v7431_v28, %v2161_v45  ;;  %v2385_v41 = vmul.f32 %v7434_v62, %v2161_v45 }
 0x1e3   : > { %v2123_v8 = vrot.slane %v7380_v13, 3  ;;  %v2140_v46 = vrot.slane %v7384_v19, 3  ;;  %v2278_v63 = vadd.f32 %v2272_v57, %v2210_v1  ;;  %v7458_v49 = vsel %vm2154_vm6, %v7359_v12, %v2151_v43 }
 0x1e4   : > { %v2295_v54 = vadd.f32 %v2289_v17, %v2227_v20  ;;  %v2312_v42 = vadd.f32 %v2306_v18, %v2244_v38  ;;  %v2329_v29 = vadd.f32 %v2323_v44, %v2261_v9  ;;  %v7461_v52 = vsel %vm2154_vm6, %v2151_v43, %v2153_v15 }
 0x1e5   : > { %v2112_v7 = vadd.f32 %v2106_v56, %v7357_v59  ;;  %v2129_v45 = vadd.f32 %v2123_v8, %v7365_v39  ;;  %v2146_v13 = vadd.f32 %v2140_v46, %v7375_v4  ;;  %v2340_v19 = vrot.slane %v2334_v47, 3 }
 0x1e6   : > { %v2357_v36 = vrot.slane %v2351_v31, 3  ;;  %v2374_v48 = vrot.slane %v2368_v32, 3  ;;  %v2391_v35 = vrot.slane %v2385_v41, 3  ;;  %v2164_v12 = vmul.f32 %v7389_v51, %v7458_v49 }
 0x1e7   : > { %v7470_v6 = vadd.f32 %v2340_v19, %v2278_v63  ;;  %v2165_v15 = vmul.f32 %v7389_v51, %v7461_v52  ;;  %v2172_v27 = vmul.f32 %v7392_v55, %v7458_v49  ;;  %v2173_v59 = vmul.f32 %v7392_v55, %v7461_v52 }
 0x1e8   : > { %v7478_v39 = vadd.f32 %v2357_v36, %v2295_v54  ;;  %v7480_v4 = vadd.f32 %v2374_v48, %v2312_v42  ;;  %v7482_v56 = vadd.f32 %v2391_v35, %v2329_v29  ;;  %v2167_v2 = vadd.f32 %v2164_v12, %v7271_v16 }
 0x1e9   : > { %v2168_v53 = vadd.f32 %v2165_v15, %v7386_v34  ;;  %v2180_v22 = vmul.f32 %v7395_v26, %v7458_v49  ;;  %v2196_v51 = vmul.f32 %v7401_v24, %v7458_v49  ;;  %v2197_v30 = vmul.f32 %v7401_v24, %v7461_v52 }
 0x1ea   : > { %v2175_v55 = vadd.f32 %v2172_v27, %v7273_v58  ;;  %v2176_v1 = vadd.f32 %v2173_v59, %v2112_v7  ;;  %v2213_v20 = vmul.f32 %v7404_v37, %v7458_v49  ;;  %v2214_v16 = vmul.f32 %v7404_v37, %v7461_v52 }
 0x1eb   : > { %v2181_v34 = vmul.f32 %v7395_v26, %v7461_v52  ;;  %v2183_v38 = vadd.f32 %v2180_v22, %v7275_v3  ;;  %v2188_v9 = vmul.f32 %v7398_v0, %v7458_v49  ;;  %v2189_v24 = vmul.f32 %v7398_v0, %v7461_v52 }
 0x1ec   : > { %v2202_v43 = vrot.slane %v2196_v51, 1  ;;  %v2230_v58 = vmul.f32 %v7407_v5, %v7458_v49  ;;  %v2231_v57 = vmul.f32 %v7407_v5, %v7461_v52  ;;  %v2247_v37 = vmul.f32 %v7410_v23, %v7458_v49 }
 0x1ed   : > { %v2184_v17 = vadd.f32 %v2181_v34, %v2129_v45  ;;  %v2191_v26 = vadd.f32 %v2188_v9, %v7277_v10  ;;  %v2203_v3 = vrot.slane %v2197_v30, 1  ;;  %v2248_v18 = vmul.f32 %v7410_v23, %v7461_v52 }
 0x1ee   : > { %v2192_v44 = vadd.f32 %v2189_v24, %v2146_v13  ;;  %v2208_v47 = vadd.f32 %v2202_v43, %v2167_v2  ;;  %v2219_v0 = vrot.slane %v2213_v20, 1  ;;  %v2220_v31 = vrot.slane %v2214_v16, 1 }
 0x1ef   : > { %v2209_v32 = vadd.f32 %v2203_v3, %v2168_v53  ;;  %v2236_v41 = vrot.slane %v2230_v58, 1  ;;  %v2237_v8 = vrot.slane %v2231_v57, 1  ;;  %v2264_v5 = vmul.f32 %v7413_v14, %v7458_v49 }
 0x1f0   : > { %v2253_v46 = vrot.slane %v2247_v37, 1  ;;  %v2265_v63 = vmul.f32 %v7413_v14, %v7461_v52  ;;  %v2281_v10 = vmul.f32 %v7416_v33, %v7458_v49  ;;  %v2282_v23 = vmul.f32 %v7416_v33, %v7461_v52 }
 0x1f1   : > { %v2225_v54 = vadd.f32 %v2219_v0, %v2175_v55  ;;  %v2226_v42 = vadd.f32 %v2220_v31, %v2176_v1  ;;  %v2242_v29 = vadd.f32 %v2236_v41, %v2183_v38  ;;  %v2254_v7 = vrot.slane %v2248_v18, 1 }
 0x1f2   : > { %v2243_v45 = vadd.f32 %v2237_v8, %v2184_v17  ;;  %v2259_v13 = vadd.f32 %v2253_v46, %v2191_v26  ;;  %v2270_v19 = vrot.slane %v2264_v5, 2  ;;  %v2298_v14 = vmul.f32 %v7419_v50, %v7458_v49 }
 0x1f3   : > { %v2260_v33 = vadd.f32 %v2254_v7, %v2192_v44  ;;  %v2299_v36 = vmul.f32 %v7419_v50, %v7461_v52  ;;  %v2315_v48 = vmul.f32 %v7422_v25, %v7458_v49  ;;  %v2316_v35 = vmul.f32 %v7422_v25, %v7461_v52 }
 0x1f4   : > { %v2271_v12 = vrot.slane %v2265_v63, 2  ;;  %v2276_v15 = vadd.f32 %v2270_v19, %v2208_v47  ;;  %v2287_v27 = vrot.slane %v2281_v10, 2  ;;  %v2288_v59 = vrot.slane %v2282_v23, 2  ;;  %v2401_v23 = vpop.permute.xlu0 %2400 }
 0x1f5   : > { %v2332_v2 = vmul.f32 %v7425_v61, %v7458_v49  ;;  %v2333_v50 = vmul.f32 %v7425_v61, %v7461_v52  ;;  %v2349_v53 = vmul.f32 %v7428_v40, %v7458_v49  ;;  %v2350_v25 = vmul.f32 %v7428_v40, %v7461_v52 }
 0x1f6   : > { %v2277_v22 = vadd.f32 %v2271_v12, %v2209_v32  ;;  %v2293_v51 = vadd.f32 %v2287_v27, %v2225_v54  ;;  %v2294_v30 = vadd.f32 %v2288_v59, %v2226_v42  ;;  %v2304_v55 = vrot.slane %v2298_v14, 2 }
 0x1f7   : > { %v2305_v61 = vrot.slane %v2299_v36, 2  ;;  %v2321_v1 = vrot.slane %v2315_v48, 2  ;;  %v2322_v20 = vrot.slane %v2316_v35, 2  ;;  %v2338_v16 = vrot.slane %v2332_v2, 3 }
 0x1f8   : > { %v2366_v40 = vmul.f32 %v7431_v28, %v7458_v49  ;;  %v2367_v34 = vmul.f32 %v7431_v28, %v7461_v52  ;;  %v2383_v38 = vmul.f32 %v7434_v62, %v7458_v49  ;;  %v2384_v9 = vmul.f32 %v7434_v62, %v7461_v52 }
 0x1f9   : > { %v2310_v24 = vadd.f32 %v2304_v55, %v2242_v29  ;;  %v2339_v43 = vrot.slane %v2333_v50, 3  ;;  %v2355_v58 = vrot.slane %v2349_v53, 3  ;;  %v2356_v57 = vrot.slane %v2350_v25, 3 }
 0x1fa   : > { %v2311_v28 = vadd.f32 %v2305_v61, %v2243_v45  ;;  %v2327_v37 = vadd.f32 %v2321_v1, %v2259_v13  ;;  %v2328_v49 = vadd.f32 %v2322_v20, %v2260_v33  ;;  %v2344_v17 = vadd.f32 %v2338_v16, %v2276_v15  ;;  %v2399_v45 = vpop.permute.xlu1 %2398 }
 0x1fb   : > { %v7577_v62 = vadd.f32 %v2339_v43, %v2277_v22  ;;  %v2361_v52 = vadd.f32 %v2355_v58, %v2293_v51  ;;  %v7579_v26 = vadd.f32 %v2356_v57, %v2294_v30  ;;  %v2372_v3 = vrot.slane %v2366_v40, 3 }
 0x1fc   : > { %v2373_v18 = vrot.slane %v2367_v34, 3  ;;  %v2389_v44 = vrot.slane %v2383_v38, 3  ;;  %v2390_v47 = vrot.slane %v2384_v9, 3  ;;  %v7582_v0 = vstv %s7521_s21  ;;  %s5305_s21 = sld [smem:[#allocation8 + $0x42]] }
 0x1fd   : > { %v2378_v31 = vadd.f32 %v2372_v3, %v2310_v24  ;;  %v7585_v32 = vstv %s7523_s6  ;;  %v7588_v41 = vstv %s7525_s20  ;;  %v7591_v8 = vstv %s7529_s4  ;;  %s5306_s6 = sld [smem:[#allocation8 + $0x43]]  ;;  %s5307_s20 = sld [smem:[#allocation8 + $0x44]] }
 0x1fe   : > { %v7593_v5 = vadd.f32 %v2373_v18, %v2311_v28  ;;  %v2395_v46 = vadd.f32 %v2389_v44, %v2327_v37  ;;  %v7595_v63 = vadd.f32 %v2390_v47, %v2328_v49  ;;  %v7598_v10 = vstv %s7531_s3  ;;  %s2732_s4 = sld [smem:[#allocation8]]  ;;  %s7810_s3 = sld [smem:[#allocation8 + $0x45]] }
 0x1ff   : > { %v7601_v54 = vstv %s7539_s26  ;;  %v7604_v42 = vstv %s7541_s18  ;;  %v7607_v29 = vstv %s7543_s8  ;;  %v7610_v7 = vstv %s7553_s27  ;;  %s5240_s26 = sld [smem:[#allocation8 + $0x1]]  ;;  %s5241_s18 = sld [smem:[#allocation8 + $0x2]] }
 0x200   : > { %v7613_v13 = vstv %s7555_s19  ;;  %v7616_v19 = vstv %s7557_s24  ;;  %v7619_v14 = vstv %s7559_s29  ;;  %v7622_v33 = vstv %s7561_s13  ;;  %s5242_s8 = sld [smem:[#allocation8 + $0x3]]  ;;  %s5243_s27 = sld [smem:[#allocation8 + $0x4]] }
 0x201   : > { %v7625_v36 = vstv %s7571_s16  ;;  %v7628_v48 = vstv %s7573_s17  ;;  %v7631_v35 = vstv %s7575_s12  ;;  %v2405_v12 = vsel %vm2404_vm7, %v2399_v45, %v2401_v23  ;;  %s5244_s19 = sld [smem:[#allocation8 + $0x5]]  ;;  %s5245_s24 = sld [smem:[#allocation8 + $0x6]] }
 0x202   : > { %v2414_v15 = vmul.f32 %v7582_v0, %v2405_v12  ;;  %v2422_v27 = vmul.f32 %v7585_v32, %v2405_v12  ;;  %v2430_v59 = vmul.f32 %v7588_v41, %v2405_v12  ;;  %v2438_v2 = vmul.f32 %v7591_v8, %v2405_v12  ;;  %s5246_s29 = sld [smem:[#allocation8 + $0x7]]  ;;  %s5247_s13 = sld [smem:[#allocation8 + $0x8]] }
 0x203   : > { %v2446_v50 = vmul.f32 %v7598_v10, %v2405_v12  ;;  %v2463_v53 = vmul.f32 %v7601_v54, %v2405_v12  ;;  %v2480_v25 = vmul.f32 %v7604_v42, %v2405_v12  ;;  %v2497_v22 = vmul.f32 %v7607_v29, %v2405_v12  ;;  %s5248_s16 = sld [smem:[#allocation8 + $0x9]]  ;;  %s5249_s17 = sld [smem:[#allocation8 + $0xa]] }
 0x204   : > { %v2417_v51 = vadd.f32 %v2414_v15, %v2344_v17  ;;  %v2425_v30 = vadd.f32 %v2422_v27, %v2361_v52  ;;  %v2433_v55 = vadd.f32 %v2430_v59, %v2378_v31  ;;  %v2441_v61 = vadd.f32 %v2438_v2, %v2395_v46  ;;  %v2403_v31 = vpop.permute.xlu1 %2402  ;;  %s5250_s12 = sld [smem:[#allocation8 + $0xb]] }
 0x205   : > { %v2452_v1 = vrot.slane %v2446_v50, 1  ;;  %v2469_v20 = vrot.slane %v2463_v53, 1  ;;  %v2486_v16 = vrot.slane %v2480_v25, 1  ;;  %v2503_v40 = vrot.slane %v2497_v22, 1 }
 0x206   : > { %v2514_v34 = vmul.f32 %v7610_v7, %v2405_v12  ;;  %v2531_v38 = vmul.f32 %v7613_v13, %v2405_v12  ;;  %v2548_v9 = vmul.f32 %v7616_v19, %v2405_v12  ;;  %v2565_v24 = vmul.f32 %v7619_v14, %v2405_v12 }
 0x207   : > { %v2458_v43 = vadd.f32 %v2452_v1, %v2417_v51  ;;  %v2475_v58 = vadd.f32 %v2469_v20, %v2425_v30  ;;  %v2492_v57 = vadd.f32 %v2486_v16, %v2433_v55  ;;  %v2509_v28 = vadd.f32 %v2503_v40, %v2441_v61 }
 0x208   : > { %v2520_v37 = vrot.slane %v2514_v34, 2  ;;  %v2537_v49 = vrot.slane %v2531_v38, 2  ;;  %v2554_v17 = vrot.slane %v2548_v9, 2  ;;  %v2571_v52 = vrot.slane %v2565_v24, 2 }
 0x209   : > { %v2582_v3 = vmul.f32 %v7622_v33, %v2405_v12  ;;  %v2599_v18 = vmul.f32 %v7625_v36, %v2405_v12  ;;  %v2616_v44 = vmul.f32 %v7628_v48, %v2405_v12  ;;  %v2633_v47 = vmul.f32 %v7631_v35, %v2405_v12 }
 0x20a   : > { %v2526_v46 = vadd.f32 %v2520_v37, %v2458_v43  ;;  %v2543_v15 = vadd.f32 %v2537_v49, %v2475_v58  ;;  %v2560_v27 = vadd.f32 %v2554_v17, %v2492_v57  ;;  %v2577_v59 = vadd.f32 %v2571_v52, %v2509_v28 }
 0x20b   : > { %v2605_v2 = vrot.slane %v2599_v18, 3  ;;  %v2622_v50 = vrot.slane %v2616_v44, 3  ;;  %v2639_v53 = vrot.slane %v2633_v47, 3  ;;  %v2588_v25 = vrot.slane %v2582_v3, 3 }
 0x20c   : > { %v7653_v22 = vsel %vm2404_vm7, %v2401_v23, %v2403_v31  ;;  %v7656_v51 = vsel %vm2404_vm7, %v2403_v31, %v2399_v45  ;;  %v7659_v61 = vstv %s7642_s11  ;;  %v7668_v23 = vld [vmem:[%s9888_s7] sm:$0x7]  ;;  %s5251_s11 = sld [smem:[#allocation8 + $0xc]]  ;;  %s7816_s7 = sld [smem:[#allocation8 + $0x46]] }
 0x20d   : > { %v2611_v12 = vadd.f32 %v2605_v2, %v2543_v15  ;;  %v2628_v30 = vadd.f32 %v2622_v50, %v2560_v27  ;;  %v2645_v55 = vadd.f32 %v2639_v53, %v2577_v59  ;;  %v2594_v1 = vadd.f32 %v2588_v25, %v2526_v46 }
 0x20e   : > { %v2415_v20 = vmul.f32 %v7582_v0, %v7653_v22  ;;  %v2416_v16 = vmul.f32 %v7582_v0, %v7656_v51  ;;  %v2423_v34 = vmul.f32 %v7585_v32, %v7653_v22  ;;  %v2424_v38 = vmul.f32 %v7585_v32, %v7656_v51 }
 0x20f   : > { %v2651_v45 = vrot.slane %v2611_v12, 7  ;;  %v2660_v40 = vrot.slane %v2628_v30, 6  ;;  %v2701_v9 = vrot.slane %v7668_v23, %v9847_v11  ;;  %v2669_v24 = vrot.slane %v2645_v55, 5 }
 0x210   : > { %v2418_v43 = vadd.f32 %v2415_v20, %v7577_v62  ;;  %v2431_v0 = vmul.f32 %v7588_v41, %v7653_v22  ;;  %v2419_v57 = vadd.f32 %v2416_v16, %v7470_v6  ;;  %v2426_v28 = vadd.f32 %v2423_v34, %v7579_v26 }
 0x211   : > { %v2676_v58 = vsel %vm2675_vm8, %v2594_v1, %v2651_v45  ;;  %v2427_v37 = vadd.f32 %v2424_v38, %v7478_v39  ;;  %v2432_v32 = vmul.f32 %v7588_v41, %v7656_v51  ;;  %v2447_v11 = vmul.f32 %v7598_v10, %v7653_v22 }
 0x212   : > { %v2680_v49 = vsel %vm2679_vm9, %v2676_v58, %v2660_v40  ;;  %v2448_v62 = vmul.f32 %v7598_v10, %v7656_v51  ;;  %v2434_v52 = vadd.f32 %v2431_v0, %v7593_v5  ;;  %v2439_v6 = vmul.f32 %v7591_v8, %v7653_v22 }
 0x213   : > { %v2684_v17 = vsel %vm2683_vm10, %v2680_v49, %v2669_v24  ;;  %v2464_v39 = vmul.f32 %v7601_v54, %v7653_v22  ;;  %v2435_v41 = vadd.f32 %v2432_v32, %v7480_v4  ;;  %v2440_v3 = vmul.f32 %v7591_v8, %v7656_v51 }
 0x214   : > { %vm2687_vm11 = vcmp.gt.f32.partialorder %v2684_v17, 0.0  ;;  %v2691_v26 = vmul.f32 %v7659_v61, %v2684_v17  ;;  %v2442_v10 = vadd.f32 %v2439_v6, %v7595_v63  ;;  %v2453_v18 = vrot.slane %v2447_v11, 1 }
 0x215   : > { %v2465_v5 = vmul.f32 %v7601_v54, %v7656_v51  ;;  %v2481_v44 = vmul.f32 %v7604_v42, %v7653_v22  ;;  %v2454_v31 = vrot.slane %v2448_v62, 1  ;;  %v2482_v46 = vmul.f32 %v7604_v42, %v7656_v51 }
 0x216   : > { %v2694_v47 = vsel %vm2687_vm11, %v2684_v17, %v2691_v26  ;;  %v2498_v4 = vmul.f32 %v7607_v29, %v7653_v22  ;;  %v2443_v8 = vadd.f32 %v2440_v3, %v7482_v56  ;;  %v2459_v63 = vadd.f32 %v2453_v18, %v2418_v43 }
 0x217   : > { %v7709_v15 = vmul.f32 %v2701_v9, %v2694_v47  ;;  %v2470_v27 = vrot.slane %v2464_v39, 1  ;;  %v2460_v59 = vadd.f32 %v2454_v31, %v2419_v57  ;;  %v2471_v2 = vrot.slane %v2465_v5, 1 }
 0x218   : > { %v2487_v54 = vrot.slane %v2481_v44, 1  ;;  %v2499_v50 = vmul.f32 %v7607_v29, %v7656_v51  ;;  %v2488_v53 = vrot.slane %v2482_v46, 1  ;;  %v2515_v25 = vmul.f32 %v7610_v7, %v7653_v22 }
 0x219   : > { %v2516_v42 = vmul.f32 %v7610_v7, %v7656_v51  ;;  %v2532_v12 = vmul.f32 %v7613_v13, %v7653_v22  ;;  %2722 = vrot.lane.b32.xlu1 %v7709_v15, %s9889_s28  ;;  %v2476_v56 = vadd.f32 %v2470_v27, %v2426_v28  ;;  %v2477_v30 = vadd.f32 %v2471_v2, %v2427_v37 }
 0x21a   : > { %v2493_v55 = vadd.f32 %v2487_v54, %v2434_v52  ;;  %v2504_v1 = vrot.slane %v2498_v4, 1  ;;  %v2494_v20 = vadd.f32 %v2488_v53, %v2435_v41  ;;  %v2505_v16 = vrot.slane %v2499_v50, 1 }
 0x21b   : > { %v2521_v29 = vrot.slane %v2515_v25, 2  ;;  %v2533_v45 = vmul.f32 %v7613_v13, %v7656_v51  ;;  %v2522_v40 = vrot.slane %v2516_v42, 2  ;;  %v2549_v7 = vmul.f32 %v7616_v19, %v7653_v22 }
 0x21c   : > { %v2550_v34 = vmul.f32 %v7616_v19, %v7656_v51  ;;  %v2566_v38 = vmul.f32 %v7619_v14, %v7653_v22  ;;  %v2510_v9 = vadd.f32 %v2504_v1, %v2442_v10  ;;  %v2511_v24 = vadd.f32 %v2505_v16, %v2443_v8 }
 0x21d   : > { %v2527_v43 = vadd.f32 %v2521_v29, %v2459_v63  ;;  %v2538_v0 = vrot.slane %v2532_v12, 2  ;;  %v2528_v58 = vadd.f32 %v2522_v40, %v2460_v59  ;;  %v2539_v57 = vrot.slane %v2533_v45, 2 }
 0x21e   : > { %v2555_v28 = vrot.slane %v2549_v7, 2  ;;  %v2567_v13 = vmul.f32 %v7619_v14, %v7656_v51  ;;  %v2556_v49 = vrot.slane %v2550_v34, 2  ;;  %v2583_v32 = vmul.f32 %v7622_v33, %v7653_v22 }
 0x21f   : > { %v2544_v37 = vadd.f32 %v2538_v0, %v2476_v56  ;;  %v2600_v19 = vmul.f32 %v7625_v36, %v7653_v22  ;;  %v2545_v11 = vadd.f32 %v2539_v57, %v2477_v30  ;;  %v2572_v17 = vrot.slane %v2566_v38, 2 }
 0x220   : > { %v2561_v62 = vadd.f32 %v2555_v28, %v2493_v55  ;;  %v2584_v52 = vmul.f32 %v7622_v33, %v7656_v51  ;;  %v2562_v6 = vadd.f32 %v2556_v49, %v2494_v20  ;;  %v2573_v39 = vrot.slane %v2567_v13, 2 }
 0x221   : > { %v2601_v26 = vmul.f32 %v7625_v36, %v7656_v51  ;;  %v2606_v14 = vrot.slane %v2600_v19, 3  ;;  %v2578_v41 = vadd.f32 %v2572_v17, %v2510_v9  ;;  %v2617_v3 = vmul.f32 %v7628_v48, %v7653_v22 }
 0x222   : > { %v2618_v10 = vmul.f32 %v7628_v48, %v7656_v51  ;;  %v2634_v18 = vmul.f32 %v7631_v35, %v7653_v22  ;;  %v2579_v5 = vadd.f32 %v2573_v39, %v2511_v24  ;;  %v2589_v44 = vrot.slane %v2583_v32, 3 }
 0x223   : > { %v2607_v47 = vrot.slane %v2601_v26, 3  ;;  %v2612_v33 = vadd.f32 %v2606_v14, %v2544_v37  ;;  %v2623_v31 = vrot.slane %v2617_v3, 3  ;;  %v2635_v36 = vmul.f32 %v7631_v35, %v7656_v51 }
 0x224   : > { %v2624_v46 = vrot.slane %v2618_v10, 3  ;;  %v2640_v4 = vrot.slane %v2634_v18, 3  ;;  %v2590_v8 = vrot.slane %v2584_v52, 3  ;;  %v2595_v63 = vadd.f32 %v2589_v44, %v2527_v43 }
 0x225   : > { %v2613_v27 = vadd.f32 %v2607_v47, %v2545_v11  ;;  %v2652_v59 = vrot.slane %v2612_v33, 7  ;;  %v2629_v2 = vadd.f32 %v2623_v31, %v2561_v62  ;;  %v2641_v48 = vrot.slane %v2635_v36, 3 }
 0x226   : > { %v2630_v54 = vadd.f32 %v2624_v46, %v2562_v6  ;;  %v2646_v50 = vadd.f32 %v2640_v4, %v2578_v41  ;;  %v2596_v53 = vadd.f32 %v2590_v8, %v2528_v58  ;;  %v2709_v16 = vrot.slane %v7668_v23, %v6885_v60 }
 0x227   : > { %v2653_v22 = vrot.slane %v2613_v27, 7  ;;  %v2677_v25 = vsel %vm2675_vm8, %v2595_v63, %v2652_v59  ;;  %v2647_v42 = vadd.f32 %v2641_v48, %v2579_v5  ;;  %v2661_v12 = vrot.slane %v2629_v2, 6 }
 0x228   : > { %v2662_v56 = vrot.slane %v2630_v54, 6  ;;  %v2670_v30 = vrot.slane %v2646_v50, 5  ;;  %v2705_v34 = vrot.slane %v7668_v23, %v9856_v21  ;;  %v3704_v21 = vstv %s5303_s10  ;;  %s7917_s10 = sld [smem:[#allocation8 + $0x4e]] }
 0x229   : > { %v2678_v55 = vsel %vm2675_vm8, %v2596_v53, %v2653_v22  ;;  %v2671_v35 = vrot.slane %v2647_v42, 5  ;;  %v2681_v51 = vsel %vm2679_vm9, %v2677_v25, %v2661_v12  ;;  %v7821_v23 = vmul.f32 %v3704_v21, %v7709_v15 }
 0x22a   : > { %v2682_v1 = vsel %vm2679_vm9, %v2678_v55, %v2662_v56  ;;  %v2685_v20 = vsel %vm2683_vm10, %v2681_v51, %v2670_v30  ;;  %v7826_v43 = vstv %s5305_s21  ;;  %v7828_v0 = vstv %s2732_s4  ;;  %s7929_s21 = sld [smem:[#allocation8 + $0x4f]]  ;;  %s7943_s4 = sld [smem:[#allocation8 + $0x13]] }
 0x22b   : > { %v2686_v29 = vsel %vm2683_vm10, %v2682_v1, %v2671_v35  ;;  %v2692_v45 = vmul.f32 %v7659_v61, %v2685_v20  ;;  %vm2688_vm13 = vcmp.gt.f32.partialorder %v2685_v20, 0.0  ;;  %9897 = vst [vmem:[#allocation44_spill] sm:$0xff] %v7821_v23  ;;  %v7830_v58 = vstv %s5240_s26  ;;  %s7955_s26 = sld [smem:[#allocation8 + $0x15]] }
 0x22c   : > { %vm2689_vm12 = vcmp.gt.f32.partialorder %v2686_v29, 0.0  ;;  %v2693_v40 = vmul.f32 %v7659_v61, %v2686_v29  ;;  %v3712_v61 = vstv %s5304_s14  ;;  %v7832_v57 = vstv %s5306_s6  ;;  %s7919_s14 = sld [smem:[#allocation8 + $0x10]]  ;;  %s7931_s6 = sld [smem:[#allocation8 + $0x11]] }
 0x22d   : > { %v2695_v9 = vsel %vm2688_vm13, %v2685_v20, %v2692_v45  ;;  %v7824_v24 = vmul.f32 %v3712_v61, %v7709_v15  ;;  %v3736_v28 = vstv %s5307_s20  ;;  %v7836_v13 = vstv %s5241_s18  ;;  %s7933_s20 = sld [smem:[#allocation8 + $0x12]]  ;;  %s7957_s18 = sld [smem:[#allocation8 + $0x16]] }
 0x22e   : > { %v2696_v7 = vsel %vm2689_vm12, %v2686_v29, %v2693_v40  ;;  %v7766_v60 = vmul.f32 %v2705_v34, %v2695_v9  ;;  %v7838_v37 = vstv %s5242_s8  ;;  %v7840_v49 = vstv %s5243_s27  ;;  %s7967_s8 = sld [smem:[#allocation8 + $0x17]]  ;;  %s7969_s27 = sld [smem:[#allocation8 + $0x18]] }
 0x22f   : > { %v7760_v38 = vmul.f32 %v2709_v16, %v2696_v7  ;;  %9898 = vst [vmem:[#allocation45_spill] sm:$0xff] %v7824_v24  ;;  %v7844_v32 = vmul.f32 %v7826_v43, %v7709_v15  ;;  %v7848_v19 = vstv %s5244_s19  ;;  %v7850_v11 = vstv %s5245_s24  ;;  %s7979_s19 = sld [smem:[#allocation8 + $0x19]]  ;;  %s7981_s24 = sld [smem:[#allocation8 + $0x1a]] }
 0x230   : > { %v7852_v62 = vstv %s5246_s29  ;;  %v7856_v17 = vmul.f32 %v7832_v57, %v7709_v15  ;;  %v7858_v52 = vstv %s5247_s13  ;;  %v7860_v6 = vstv %s5248_s16  ;;  %s7989_s29 = sld [smem:[#allocation8 + $0x1b]]  ;;  %s7991_s13 = sld [smem:[#allocation8 + $0x1c]] }
 0x231   : > { %2717 = vrot.lane.b32.xlu0 %v7760_v38, %s9889_s28  ;;  %2956 = vrot.lane.b32.xlu1 %v7760_v38, %s9890_s30  ;;  %9899 = vst [vmem:[#allocation46_spill] sm:$0xff] %v7844_v32  ;;  %v7862_v39 = vstv %s5249_s17  ;;  %v7865_v26 = vmul.f32 %v3736_v28, %v7709_v15  ;;  %v7869_v14 = vstv %s5250_s12  ;;  %v7874_v3 = vmul.f32 %v3736_v28, %v7766_v60  ;;  %s8001_s16 = sld [smem:[#allocation8 + $0x1d]]  ;;  %s8003_s17 = sld [smem:[#allocation8 + $0x1e]] }
 0x232   : > { %9900 = vst [vmem:[#allocation47_spill] sm:$0xff] %v7856_v17  ;;  %v7871_v41 = vstv %s5251_s11  ;;  %v3753_v10 = vstv %s7810_s3  ;;  %v7878_v18 = vstv %s7812_s9  ;;  %v7881_v5 = vmul.f32 %v3704_v21, %v7766_v60  ;;  %s7945_s3 = sld [smem:[#allocation8 + $0x14]]  ;;  %s8013_s12 = sld [smem:[#allocation8 + $0x1f]] }
 0x233   : > { %9901 = vst [vmem:[#allocation48_spill] sm:$0xff] %v7865_v26  ;;  %9902 = vst [vmem:[#allocation49_spill] sm:$0xff] %v7874_v3  ;;  %v7884_v44 = vmul.f32 %v3712_v61, %v7766_v60  ;;  %v7887_v47 = vmul.f32 %v3736_v28, %v7760_v38  ;;  %v7892_v33 = vstv %s7814_s5  ;;  %v7895_v31 = vmul.f32 %v3753_v10, %v7709_v15  ;;  %s8015_s11 = sld [smem:[#allocation8 + $0x20]]  ;;  %s8025_s9 = sld [smem:[#allocation8 + $0x21]] }
 0x234   : > { %9903 = vst [vmem:[#allocation50_spill] sm:$0xff] %v7881_v5  ;;  %v7898_v46 = vmul.f32 %v3753_v10, %v7766_v60  ;;  %v3770_v36 = vstv %s7816_s7  ;;  %v7909_v8 = vmul.f32 %v3704_v21, %v7760_v38  ;;  %v7913_v27 = vmul.f32 %v3753_v10, %v7760_v38  ;;  %s8027_s5 = sld [smem:[#allocation8 + $0x22]]  ;;  %s8037_s7 = sld [smem:[#allocation8 + $0x23]] }
 0x235   : > { %2724 = vrot.lane.b32.xlu0 %v7766_v60, %s9889_s28  ;;  %2961 = vrot.lane.b32.xlu1 %v7766_v60, %s9890_s30  ;;  %s7818_s28 = sld [smem:[#allocation8 + $0xf]]  ;;  %9904 = vst [vmem:[#allocation51_spill] sm:$0xff] %v7884_v44  ;;  %9905 = vst [vmem:[#allocation52_spill] sm:$0xff] %v7887_v47  ;;  %v7923_v2 = vmul.f32 %v3770_v36, %v7709_v15  ;;  %v7926_v54 = vmul.f32 %v3770_v36, %v7766_v60  ;;  %v8091_v50 = vstv %s7931_s6  ;;  %s8118_s6 = sld [smem:[#allocation8 + $0x30]] }
 0x236   : > { %9906 = vst [vmem:[#allocation53_spill] sm:$0xff] %v7895_v31  ;;  %9907 = vst [vmem:[#allocation54_spill] sm:$0xff] %v7898_v46  ;;  %v7937_v53 = vmul.f32 %v3770_v36, %v7760_v38  ;;  %v7948_v42 = vmul.f32 %v3712_v61, %v7760_v38  ;;  %v8069_v12 = vmul.f32 %v7832_v57, %v7766_v60  ;;  %v8102_v59 = vstv %s7933_s20  ;;  %s8131_s20 = sld [smem:[#allocation8 + $0x31]] }
 0x237   : > { %9908 = vst [vmem:[#allocation55_spill] sm:$0xff] %v7909_v8  ;;  %9909 = vst [vmem:[#allocation56_spill] sm:$0xff] %v7913_v27  ;;  %v8082_v7 = vmul.f32 %v7832_v57, %v7760_v38  ;;  %v8129_v63 = vstv %s7955_s26  ;;  %s8160_s26 = sld [smem:[#allocation8 + $0x38]] }
 0x238   : > { %9910 = vst [vmem:[#allocation57_spill] sm:$0xff] %v7923_v2  ;;  %9911 = vst [vmem:[#allocation58_spill] sm:$0xff] %v7926_v54  ;;  %v8252_v54 = vstv %s8093_s15  ;;  %s8976_s15 = sld [smem:[#allocation8 + $0x50]] }
 0x239   : > { %2959 = vrot.lane.b32.xlu0 %v7709_v15, %s9890_s30  ;;  %3208 = vrot.lane.b32.xlu1 %v7709_v15, %s9891_s25  ;;  %s7834_s30 = sld [smem:[#allocation8 + $0x47]]  ;;  %9912 = vst [vmem:[#allocation59_spill] sm:$0xff] %v7937_v53  ;;  %9914 = vst [vmem:[#allocation61_spill] sm:$0xff] %v7948_v42 }
 0x23a   : > { %9933 = vst [vmem:[#allocation91_spill] sm:$0xff] %v8069_v12  ;;  %9937 = vst [vmem:[#allocation83_spill] sm:$0xff] %v8082_v7 }
 0x23b   : > { %v7906_v4 = vstv %s7818_s28  ;;  %s8039_s28 = sld [smem:[#allocation8 + $0x24]]  ;;  %9963 = vst [vmem:[#allocation104_spill] sm:$0xff] %v8252_v54  ;;  %v8267_v7 = vstv %s8118_s6  ;;  %s9098_s6 = sld [smem:[#allocation8 + $0x5d]] }
 0x23c   : > { %9968 = vst [vmem:[#allocation109_spill] sm:$0xff] %v8267_v7  ;;  %v8270_v12 = vstv %s8131_s20  ;;  %s9110_s20 = sld [smem:[#allocation8 + $0x5e]] }
 0x23d   : > { %3205 = vrot.lane.b32.xlu0 %v7760_v38, %s9891_s25  ;;  %3454 = vrot.lane.b32.xlu1 %v7760_v38, %s9892_s23  ;;  %9945 = sst [smem:[#allocation31_spill]] %s8160_s26  ;;  %s8189_s26 = sld [smem:[#allocation8 + $0x37]]  ;;  %9969 = vst [vmem:[#allocation110_spill] sm:$0xff] %v8270_v12 }
 0x23f   : > { %v3787_v48 = vstv %s7834_s30  ;;  %s8050_s30 = sld [smem:[#allocation8 + $0x25]] }
 0x240   : > { %v7940_v22 = vmul.f32 %v3787_v48, %v7709_v15  ;;  %v7953_v30 = vmul.f32 %v3787_v48, %v7766_v60  ;;  %v7961_v35 = vmul.f32 %v3787_v48, %v7760_v38 }
 0x241   : > { %3210 = vrot.lane.b32.xlu0 %v7766_v60, %s9891_s25  ;;  %3459 = vrot.lane.b32.xlu1 %v7766_v60, %s9892_s23  ;;  %s7846_s25 = sld [smem:[#allocation8 + $0x48]] }
 0x242   : > { %9913 = vst [vmem:[#allocation60_spill] sm:$0xff] %v7940_v22  ;;  %9915 = vst [vmem:[#allocation63_spill] sm:$0xff] %v7953_v30 }
 0x243   : > { %9916 = vst [vmem:[#allocation64_spill] sm:$0xff] %v7961_v35  ;;  %v8294_v44 = vstv %s8189_s26  ;;  %s9138_s26 = sld [smem:[#allocation8 + $0x63]] }
 0x244   : > { %9977 = vst [vmem:[#allocation118_spill] sm:$0xff] %v8294_v44 }
 0x245   : > { %3457 = vrot.lane.b32.xlu0 %v7709_v15, %s9892_s23  ;;  %3941 = vrot.lane.b32.xlu1 %v7766_v60, %s9893_s0  ;;  %s7867_s23 = sld [smem:[#allocation8 + $0x49]]  ;;  %v8232_v30 = vstv %s8050_s30  ;;  %s9049_s30 = sld [smem:[#allocation8 + $0x55]] }
 0x246   : > { %9956 = vst [vmem:[#allocation97_spill] sm:$0xff] %v8232_v30 }
 0x247   : > { %v3804_v25 = vstv %s7846_s25  ;;  %s8052_s25 = sld [smem:[#allocation8 + $0x26]] }
 0x248   : > { %v7964_v51 = vmul.f32 %v3804_v25, %v7709_v15  ;;  %v7974_v29 = vmul.f32 %v3804_v25, %v7766_v60  ;;  %v7977_v45 = vmul.f32 %v3804_v25, %v7760_v38 }
 0x249   : > { %3939 = vrot.lane.b32.xlu0 %v7709_v15, %s9893_s0  ;;  %4188 = vrot.lane.b32.xlu1 %v7709_v15, %s9894_s1 }
 0x24a   : > { %9917 = vst [vmem:[#allocation65_spill] sm:$0xff] %v7964_v51  ;;  %9918 = vst [vmem:[#allocation66_spill] sm:$0xff] %v7974_v29  ;;  %v8196_v51 = vstv %s8001_s16  ;;  %s8213_s16 = sld [smem:[#allocation8 + $0x3d]] }
 0x24b   : > { %v3821_v1 = vstv %s7867_s23  ;;  %9919 = vst [vmem:[#allocation67_spill] sm:$0xff] %v7977_v45  ;;  %s8063_s23 = sld [smem:[#allocation8 + $0x27]]  ;;  %v8199_v45 = vstv %s8003_s17  ;;  %s8215_s17 = sld [smem:[#allocation8 + $0x3e]] }
 0x24c   : > { %v7986_v34 = vmul.f32 %v3821_v1, %v7709_v15  ;;  %v7995_v61 = vmul.f32 %v3821_v1, %v7766_v60  ;;  %v7998_v28 = vmul.f32 %v3821_v1, %v7760_v38 }
 0x24d   : > { %3943 = vrot.lane.b32.xlu0 %v7760_v38, %s9893_s0  ;;  %4192 = vrot.lane.b32.xlu1 %v7760_v38, %s9894_s1  ;;  %s7889_s0 = sld [smem:[#allocation8 + $0x4a]] }
 0x24e   : > { %9920 = vst [vmem:[#allocation68_spill] sm:$0xff] %v7986_v34  ;;  %9921 = vst [vmem:[#allocation69_spill] sm:$0xff] %v7995_v61  ;;  %v8156_v34 = vstv %s7967_s8  ;;  %s8180_s8 = sld [smem:[#allocation8 + $0x33]] }
 0x24f   : > { %9922 = vst [vmem:[#allocation70_spill] sm:$0xff] %v7998_v28 }
 0x251   : > { %4190 = vrot.lane.b32.xlu0 %v7766_v60, %s9894_s1  ;;  %4439 = vrot.lane.b32.xlu1 %v7766_v60, %s9895_s2  ;;  %s7901_s1 = sld [smem:[#allocation8 + $0x4b]]  ;;  %v8238_v35 = vstv %s8063_s23  ;;  %s9061_s23 = sld [smem:[#allocation8 + $0x57]] }
 0x252   : > { %9958 = vst [vmem:[#allocation62_spill] sm:$0xff] %v8238_v35 }
 0x253   : > { %v3838_v9 = vstv %s7889_s0  ;;  %s8065_s0 = sld [smem:[#allocation8 + $0x28]] }
 0x254   : > { %v8008_v25 = vmul.f32 %v3838_v9, %v7709_v15  ;;  %v8011_v21 = vmul.f32 %v3838_v9, %v7766_v60  ;;  %v8020_v40 = vmul.f32 %v3838_v9, %v7760_v38  ;;  %v8043_v9 = vmul.f32 %v7826_v43, %v7766_v60 }
 0x255   : > { %4437 = vrot.lane.b32.xlu0 %v7709_v15, %s9895_s2  ;;  %4686 = vrot.lane.b32.xlu1 %v7709_v15, %s9896_s22  ;;  %v8291_v32 = vstv %s8180_s8  ;;  %s9147_s8 = sld [smem:[#allocation8 + $0x65]] }
 0x256   : > { %9923 = vst [vmem:[#allocation71_spill] sm:$0xff] %v8008_v25  ;;  %9924 = vst [vmem:[#allocation72_spill] sm:$0xff] %v8011_v21  ;;  %v3923_v21 = vstv %s7929_s21  ;;  %v8126_v25 = vstv %s7945_s3  ;;  %s8144_s21 = sld [smem:[#allocation8 + $0x34]]  ;;  %s8158_s3 = sld [smem:[#allocation8 + $0x36]] }
 0x257   : > { %v3855_v10 = vstv %s7901_s1  ;;  %9925 = vst [vmem:[#allocation73_spill] sm:$0xff] %v8020_v40  ;;  %9929 = vst [vmem:[#allocation79_spill] sm:$0xff] %v8043_v9  ;;  %s8076_s1 = sld [smem:[#allocation8 + $0x29]]  ;;  %v8088_v40 = vstv %s7919_s14  ;;  %s8116_s14 = sld [smem:[#allocation8 + $0x2f]]  ;;  %v8153_v61 = vmul.f32 %v3923_v21, %v7709_v15  ;;  %v8164_v29 = vmul.f32 %v3923_v21, %v7766_v60 }
 0x258   : > { %v8023_v36 = vmul.f32 %v3855_v10, %v7709_v15  ;;  %v8031_v16 = vmul.f32 %v3855_v10, %v7766_v60  ;;  %v8034_v20 = vmul.f32 %v3855_v10, %v7760_v38  ;;  %v8056_v10 = vmul.f32 %v7826_v43, %v7760_v38  ;;  %9976 = vst [vmem:[#allocation117_spill] sm:$0xff] %v8291_v32 }
 0x259   : > { %4441 = vrot.lane.b32.xlu0 %v7760_v38, %s9895_s2  ;;  %4690 = vrot.lane.b32.xlu1 %v7760_v38, %s9896_s22  ;;  %s7903_s2 = sld [smem:[#allocation8 + $0x4c]]  ;;  %9944 = vst [vmem:[#allocation100_spill] sm:$0xff] %v8153_v61  ;;  %9946 = vst [vmem:[#allocation90_spill] sm:$0xff] %v8164_v29  ;;  %v8226_v61 = vstv %s8037_s7  ;;  %s9022_s7 = sld [smem:[#allocation8 + $0x53]] }
 0x25a   : > { %9926 = vst [vmem:[#allocation74_spill] sm:$0xff] %v8023_v36  ;;  %9927 = vst [vmem:[#allocation75_spill] sm:$0xff] %v8031_v16  ;;  %v3906_v16 = vstv %s7917_s10  ;;  %v8114_v36 = vstv %s7943_s4  ;;  %s8133_s10 = sld [smem:[#allocation8 + $0x32]]  ;;  %s8146_s4 = sld [smem:[#allocation8 + $0x35]] }
 0x25b   : > { %9928 = vst [vmem:[#allocation76_spill] sm:$0xff] %v8034_v20  ;;  %9931 = vst [vmem:[#allocation81_spill] sm:$0xff] %v8056_v10  ;;  %v8139_v57 = vmul.f32 %v3906_v16, %v7766_v60  ;;  %v8150_v28 = vmul.f32 %v3906_v16, %v7760_v38 }
 0x25c   : > { %9954 = vst [vmem:[#allocation95_spill] sm:$0xff] %v8226_v61  ;;  %v8276_v3 = vstv %s8144_s21  ;;  %v8282_v17 = vstv %s8158_s3  ;;  %s9119_s21 = sld [smem:[#allocation8 + $0x60]]  ;;  %s9130_s3 = sld [smem:[#allocation8 + $0x62]] }
 0x25d   : > { %4688 = vrot.lane.b32.xlu0 %v7766_v60, %s9896_s22  ;;  %s7915_s22 = sld [smem:[#allocation8 + $0x4d]]  ;;  %9935 = sst [smem:[#allocation29_spill]] %s8076_s1  ;;  %9942 = vst [vmem:[#allocation89_spill] sm:$0xff] %v8139_v57  ;;  %9943 = vst [vmem:[#allocation78_spill] sm:$0xff] %v8150_v28  ;;  %v8229_v28 = vstv %s8039_s28  ;;  %v8235_v57 = vstv %s8052_s25  ;;  %v8264_v31 = vstv %s8116_s14 }
 0x25e   : > { %s8104_s1 = sld [smem:[#allocation8 + $0x2d]]  ;;  %9955 = vst [vmem:[#allocation96_spill] sm:$0xff] %v8229_v28  ;;  %9957 = vst [vmem:[#allocation98_spill] sm:$0xff] %v8235_v57  ;;  %s9024_s28 = sld [smem:[#allocation8 + $0x54]] }
 0x25f   : > { %v3872_v1 = vstv %s7903_s2  ;;  %s8078_s2 = sld [smem:[#allocation8 + $0x2a]]  ;;  %9967 = vst [vmem:[#allocation108_spill] sm:$0xff] %v8264_v31  ;;  %9971 = vst [vmem:[#allocation112_spill] sm:$0xff] %v8276_v3  ;;  %s9059_s25 = sld [smem:[#allocation8 + $0x56]] }
 0x260   : > { %v8048_v48 = vmul.f32 %v3872_v1, %v7709_v15  ;;  %v8061_v55 = vmul.f32 %v3872_v1, %v7766_v60  ;;  %v8074_v56 = vmul.f32 %v3872_v1, %v7760_v38  ;;  %v8273_v47 = vstv %s8133_s10  ;;  %9973 = vst [vmem:[#allocation114_spill] sm:$0xff] %v8282_v17  ;;  %s9096_s14 = sld [smem:[#allocation8 + $0x5c]]  ;;  %s9117_s10 = sld [smem:[#allocation8 + $0x5f]] }
 0x261   : > { %9970 = vst [vmem:[#allocation111_spill] sm:$0xff] %v8273_v47  ;;  %v8279_v26 = vstv %s8146_s4  ;;  %v8311_v17 = vstv %s8215_s17  ;;  %s9128_s4 = sld [smem:[#allocation8 + $0x61]]  ;;  %s9190_s17 = sld [smem:[#allocation8 + $0x6c]] }
 0x262   : > { %9930 = vst [vmem:[#allocation80_spill] sm:$0xff] %v8048_v48  ;;  %9932 = vst [vmem:[#allocation82_spill] sm:$0xff] %v8061_v55  ;;  %v8136_v55 = vmul.f32 %v3906_v16, %v7709_v15  ;;  %v8170_v16 = vstv %s7969_s27  ;;  %s8191_s27 = sld [smem:[#allocation8 + $0x3a]] }
 0x263   : > { %9934 = vst [vmem:[#allocation92_spill] sm:$0xff] %v8074_v56  ;;  %v3889_v43 = vstv %s7915_s22  ;;  %s8106_s22 = sld [smem:[#allocation8 + $0x2e]]  ;;  %v8167_v56 = vmul.f32 %v3923_v21, %v7760_v38  ;;  %v8211_v21 = vstv %s8015_s11  ;;  %s5302_s11 = sld [smem:[#allocation8 + $0x3f]]  ;;  %9972 = vst [vmem:[#allocation113_spill] sm:$0xff] %v8279_v26  ;;  %v8308_v26 = vstv %s8213_s16 }
 0x264   : > { %v8099_v1 = vmul.f32 %v3889_v43, %v7709_v15  ;;  %v8110_v20 = vmul.f32 %v3889_v43, %v7766_v60  ;;  %v8122_v48 = vmul.f32 %v3889_v43, %v7760_v38  ;;  %9941 = vst [vmem:[#allocation86_spill] sm:$0xff] %v8136_v55  ;;  %v8142_v43 = vstv %s7957_s18  ;;  %s8178_s18 = sld [smem:[#allocation8 + $0x39]]  ;;  %9950 = vst [vmem:[#allocation88_spill] sm:$0xff] %v8211_v21  ;;  %s9188_s16 = sld [smem:[#allocation8 + $0x6b]] }
 0x265   : > { %9936 = sst [smem:[#allocation30_spill]] %s8078_s2  ;;  %s8095_s2 = sld [smem:[#allocation8 + $0x2c]]  ;;  %9947 = vst [vmem:[#allocation94_spill] sm:$0xff] %v8167_v56  ;;  %v8173_v15 = vstv %s7979_s19  ;;  %v8187_v60 = vstv %s7991_s13  ;;  %v8208_v55 = vstv %s8013_s12  ;;  %v8223_v38 = vstv %s8027_s5  ;;  %9981 = vst [vmem:[#allocation122_spill] sm:$0xff] %v8308_v26 }
 0x266   : > { %9938 = vst [vmem:[#allocation77_spill] sm:$0xff] %v8099_v1  ;;  %9939 = vst [vmem:[#allocation84_spill] sm:$0xff] %v8110_v20  ;;  %v8176_v1 = vstv %s7981_s24  ;;  %v8184_v20 = vstv %s7989_s29  ;;  %s8201_s19 = sld [smem:[#allocation8 + $0x3b]]  ;;  %s8203_s24 = sld [smem:[#allocation8 + $0x3c]]  ;;  %v8241_v56 = vstv %s8065_s0  ;;  %v8258_v27 = vstv %s8104_s1 }
 0x267   : > { %9940 = vst [vmem:[#allocation85_spill] sm:$0xff] %v8122_v48  ;;  %9948 = vst [vmem:[#allocation87_spill] sm:$0xff] %v8208_v55  ;;  %s9949_s29 = sld [smem:[#allocation29_spill]]  ;;  %s9951_s13 = sld [smem:[#allocation30_spill]]  ;;  %v8220_v48 = vstv %s8025_s9 }
 0x268   : > { %9952 = vst [vmem:[#allocation101_spill] sm:$0xff] %v8220_v48  ;;  %9953 = vst [vmem:[#allocation93_spill] sm:$0xff] %v8223_v38  ;;  %s9960_s12 = sld [smem:[#allocation31_spill]]  ;;  %v8297_v24 = vstv %s8191_s27  ;;  %s8986_s9 = sld [smem:[#allocation8 + $0x51]] }
 0x269   : > { %9959 = vst [vmem:[#allocation99_spill] sm:$0xff] %v8241_v56  ;;  %9965 = vst [vmem:[#allocation106_spill] sm:$0xff] %v8258_v27  ;;  %v8261_v46 = vstv %s8106_s22  ;;  %s8996_s5 = sld [smem:[#allocation8 + $0x52]]  ;;  %s9075_s0 = sld [smem:[#allocation8 + $0x58]] }
 0x26a   : > { %9966 = vst [vmem:[#allocation107_spill] sm:$0xff] %v8261_v46  ;;  %v8288_v9 = vstv %s8178_s18  ;;  %9978 = vst [vmem:[#allocation119_spill] sm:$0xff] %v8297_v24  ;;  %s9077_s1 = sld [smem:[#allocation8 + $0x59]]  ;;  %s9092_s22 = sld [smem:[#allocation8 + $0x5b]] }
 0x26b   : > { %v8255_v2 = vstv %s8095_s2  ;;  %9975 = vst [vmem:[#allocation116_spill] sm:$0xff] %v8288_v9  ;;  %9982 = vst [vmem:[#allocation123_spill] sm:$0xff] %v8311_v17  ;;  %s9084_s2 = sld [smem:[#allocation8 + $0x5a]]  ;;  %s9140_s18 = sld [smem:[#allocation8 + $0x64]] }
 0x26c   : > { %9964 = vst [vmem:[#allocation105_spill] sm:$0xff] %v8255_v2  ;;  %v8300_v8 = vstv %s8201_s19  ;;  %v8303_v5 = vstv %s8203_s24  ;;  %s9150_s27 = sld [smem:[#allocation8 + $0x66]]  ;;  %s9162_s19 = sld [smem:[#allocation8 + $0x67]] }
 0x26d   : > { %v8246_v22 = vstv %s9949_s29  ;;  %v8249_v53 = vstv %s9951_s13  ;;  %9979 = vst [vmem:[#allocation120_spill] sm:$0xff] %v8300_v8  ;;  %9980 = vst [vmem:[#allocation121_spill] sm:$0xff] %v8303_v5  ;;  %s9164_s24 = sld [smem:[#allocation8 + $0x68]]  ;;  %s9174_s29 = sld [smem:[#allocation8 + $0x69]] }
 0x26e   : > { %9961 = vst [vmem:[#allocation102_spill] sm:$0xff] %v8246_v22  ;;  %9962 = vst [vmem:[#allocation103_spill] sm:$0xff] %v8249_v53  ;;  %v8285_v10 = vstv %s9960_s12  ;;  %s9184_s13 = sld [smem:[#allocation8 + $0x6a]]  ;;  %s9200_s12 = sld [smem:[#allocation8 + $0x6d]] }
 0x26f   : > { %9974 = vst [vmem:[#allocation115_spill] sm:$0xff] %v8285_v10  ;;  %v8313_v10 = vstv %s5302_s11  ;;  %s9202_s11 = sld [smem:[#allocation8 + $0x6e]] }
 0x270   : > { %9983 = vst [vmem:[#allocation124_spill] sm:$0xff] %v8313_v10 }
 0x28b   : > { %v8243_v29 = vpop.permute.xlu1 %2722 }
 0x2a3   : > { %v2718_v42 = vpop.permute.xlu0 %2717  ;;  %v8319_v8 = vpop.permute.xlu1 %2956 }
 0x2a4   : > { %v2731_v23 = vsel %vm283_vm0, %v2718_v42, %v8243_v29  ;;  %9984 = vst [vmem:[#allocation125_spill] sm:$0xff] %v8319_v8 }
 0x2a5   : > { %v2734_v32 = vmul.f32 %v7828_v0, %v2731_v23  ;;  %v2739_v9 = vmul.f32 %v7830_v58, %v2731_v23  ;;  %v2744_v44 = vmul.f32 %v7836_v13, %v2731_v23  ;;  %v2749_v24 = vmul.f32 %v7838_v37, %v2731_v23 }
 0x2a6   : > { %v2754_v5 = vmul.f32 %v7840_v49, %v2731_v23  ;;  %v2771_v3 = vmul.f32 %v7848_v19, %v2731_v23  ;;  %v2788_v26 = vmul.f32 %v7850_v11, %v2731_v23  ;;  %v2805_v17 = vmul.f32 %v7852_v62, %v2731_v23 }
 0x2a7   : > { %v2822_v10 = vmul.f32 %v7858_v52, %v2731_v23  ;;  %v2839_v47 = vmul.f32 %v7860_v6, %v2731_v23  ;;  %v2856_v12 = vmul.f32 %v7862_v39, %v2731_v23  ;;  %v2873_v7 = vmul.f32 %v7869_v14, %v2731_v23  ;;  %v2725_v31 = vpop.permute.xlu0 %2724 }
 0x2a8   : > { %v2760_v46 = vrot.slane %v2754_v5, 1  ;;  %v2777_v27 = vrot.slane %v2771_v3, 1  ;;  %v2794_v2 = vrot.slane %v2788_v26, 1  ;;  %v2811_v54 = vrot.slane %v2805_v17, 1  ;;  %v8333_v3 = vpop.permute.xlu1 %2961 }
 0x2a9   : > { %v2828_v53 = vrot.slane %v2822_v10, 2  ;;  %v2845_v22 = vrot.slane %v2839_v47, 2  ;;  %v2862_v56 = vrot.slane %v2856_v12, 2  ;;  %v2879_v35 = vrot.slane %v2873_v7, 2  ;;  %9985 = vst [vmem:[#allocation126_spill] sm:$0xff] %v8333_v3 }
 0x2aa   : > { %v2766_v57 = vadd.f32 %v2760_v46, %v2734_v32  ;;  %v2783_v30 = vadd.f32 %v2777_v27, %v2739_v9  ;;  %v2800_v28 = vadd.f32 %v2794_v2, %v2744_v44  ;;  %v2817_v61 = vadd.f32 %v2811_v54, %v2749_v24 }
 0x2ab   : > { %v2890_v38 = vmul.f32 %v7871_v41, %v2731_v23  ;;  %v2907_v48 = vmul.f32 %v7878_v18, %v2731_v23  ;;  %v2924_v21 = vmul.f32 %v7892_v33, %v2731_v23  ;;  %v2941_v55 = vmul.f32 %v7906_v4, %v2731_v23  ;;  %v2960_v5 = vpop.permute.xlu0 %2959 }
 0x2ac   : > { %v2834_v17 = vadd.f32 %v2828_v53, %v2766_v57  ;;  %v2851_v26 = vadd.f32 %v2845_v22, %v2783_v30  ;;  %v2868_v47 = vadd.f32 %v2862_v56, %v2800_v28  ;;  %v2885_v12 = vadd.f32 %v2879_v35, %v2817_v61 }
 0x2ad   : > { %v2896_v7 = vrot.slane %v2890_v38, 3  ;;  %v2913_v32 = vrot.slane %v2907_v48, 3  ;;  %v2930_v46 = vrot.slane %v2924_v21, 3  ;;  %v2947_v44 = vrot.slane %v2941_v55, 3 }
 0x2ae   : > { %v8337_v24 = vsel %vm283_vm0, %v8243_v29, %v2725_v31  ;;  %v8340_v27 = vsel %vm283_vm0, %v2725_v31, %v2718_v42  ;;  %v8344_v23 = vsel %vm521_vm1, %v8319_v8, %v2960_v5  ;;  %v8348_v2 = vsel %vm521_vm1, %v2960_v5, %v8333_v3 }
 0x2af   : > { %9986 = vst [vmem:[#allocation127_spill] sm:$0xff] %v8348_v2  ;;  %v8350_v54 = vadd.f32 %v2896_v7, %v2834_v17  ;;  %v8352_v53 = vadd.f32 %v2913_v32, %v2851_v26  ;;  %v8354_v22 = vadd.f32 %v2930_v46, %v2868_v47  ;;  %v8356_v56 = vadd.f32 %v2947_v44, %v2885_v12 }
 0x2b0   : > { %v2735_v31 = vmul.f32 %v7828_v0, %v8337_v24  ;;  %v2736_v42 = vmul.f32 %v7828_v0, %v8340_v27  ;;  %v2740_v30 = vmul.f32 %v7830_v58, %v8337_v24  ;;  %v2741_v55 = vmul.f32 %v7830_v58, %v8340_v27 }
 0x2b1   : > { %v2745_v35 = vmul.f32 %v7836_v13, %v8337_v24  ;;  %v2746_v29 = vmul.f32 %v7836_v13, %v8340_v27  ;;  %v2750_v61 = vmul.f32 %v7838_v37, %v8337_v24  ;;  %v2751_v28 = vmul.f32 %v7838_v37, %v8340_v27 }
 0x2b2   : > { %v2755_v0 = vmul.f32 %v7840_v49, %v8337_v24  ;;  %v2756_v48 = vmul.f32 %v7840_v49, %v8340_v27  ;;  %v2772_v58 = vmul.f32 %v7848_v19, %v8337_v24  ;;  %v2773_v9 = vmul.f32 %v7848_v19, %v8340_v27 }
 0x2b3   : > { %v2789_v13 = vmul.f32 %v7850_v11, %v8337_v24  ;;  %v2790_v10 = vmul.f32 %v7850_v11, %v8340_v27  ;;  %v2806_v37 = vmul.f32 %v7852_v62, %v8337_v24  ;;  %v2807_v57 = vmul.f32 %v7852_v62, %v8340_v27 }
 0x2b4   : > { %v2761_v38 = vrot.slane %v2755_v0, 1  ;;  %v2762_v49 = vrot.slane %v2756_v48, 1  ;;  %v2778_v21 = vrot.slane %v2772_v58, 1  ;;  %v2779_v5 = vrot.slane %v2773_v9, 1 }
 0x2b5   : > { %v2795_v17 = vrot.slane %v2789_v13, 1  ;;  %v2796_v26 = vrot.slane %v2790_v10, 1  ;;  %v2812_v47 = vrot.slane %v2806_v37, 1  ;;  %v2813_v19 = vrot.slane %v2807_v57, 1 }
 0x2b6   : > { %v2767_v12 = vadd.f32 %v2761_v38, %v2735_v31  ;;  %v2768_v7 = vadd.f32 %v2762_v49, %v2736_v42  ;;  %v2784_v32 = vadd.f32 %v2778_v21, %v2740_v30  ;;  %v2785_v46 = vadd.f32 %v2779_v5, %v2741_v55 }
 0x2b7   : > { %v2801_v44 = vadd.f32 %v2795_v17, %v2745_v35  ;;  %v2802_v11 = vadd.f32 %v2796_v26, %v2746_v29  ;;  %v2818_v2 = vadd.f32 %v2812_v47, %v2750_v61  ;;  %v2819_v3 = vadd.f32 %v2813_v19, %v2751_v28 }
 0x2b8   : > { %v2823_v8 = vmul.f32 %v7858_v52, %v8337_v24  ;;  %v2824_v62 = vmul.f32 %v7858_v52, %v8340_v27  ;;  %v2840_v0 = vmul.f32 %v7860_v6, %v8337_v24  ;;  %v2841_v48 = vmul.f32 %v7860_v6, %v8340_v27 }
 0x2b9   : > { %v2857_v31 = vmul.f32 %v7862_v39, %v8337_v24  ;;  %v2858_v42 = vmul.f32 %v7862_v39, %v8340_v27  ;;  %v2874_v30 = vmul.f32 %v7869_v14, %v8337_v24  ;;  %v2875_v55 = vmul.f32 %v7869_v14, %v8340_v27 }
 0x2ba   : > { %v2829_v35 = vrot.slane %v2823_v8, 2  ;;  %v2830_v52 = vrot.slane %v2824_v62, 2  ;;  %v2846_v29 = vrot.slane %v2840_v0, 2  ;;  %v2847_v61 = vrot.slane %v2841_v48, 2 }
 0x2bb   : > { %v2863_v28 = vrot.slane %v2857_v31, 2  ;;  %v2864_v58 = vrot.slane %v2858_v42, 2  ;;  %v2880_v9 = vrot.slane %v2874_v30, 2  ;;  %v2881_v6 = vrot.slane %v2875_v55, 2 }
 0x2bc   : > { %v2835_v13 = vadd.f32 %v2829_v35, %v2767_v12  ;;  %v2836_v10 = vadd.f32 %v2830_v52, %v2768_v7  ;;  %v2852_v37 = vadd.f32 %v2846_v29, %v2784_v32  ;;  %v2853_v57 = vadd.f32 %v2847_v61, %v2785_v46 }
 0x2bd   : > { %v2869_v38 = vadd.f32 %v2863_v28, %v2801_v44  ;;  %v2870_v39 = vadd.f32 %v2864_v58, %v2802_v11  ;;  %v2886_v49 = vadd.f32 %v2880_v9, %v2818_v2  ;;  %v2887_v21 = vadd.f32 %v2881_v6, %v2819_v3 }
 0x2be   : > { %v2891_v5 = vmul.f32 %v7871_v41, %v8337_v24  ;;  %v2892_v14 = vmul.f32 %v7871_v41, %v8340_v27  ;;  %v2908_v8 = vmul.f32 %v7878_v18, %v8337_v24  ;;  %v2909_v17 = vmul.f32 %v7878_v18, %v8340_v27 }
 0x2bf   : > { %v2925_v26 = vmul.f32 %v7892_v33, %v8337_v24  ;;  %v2926_v47 = vmul.f32 %v7892_v33, %v8340_v27  ;;  %v2942_v3 = vmul.f32 %v7906_v4, %v8337_v24  ;;  %v2943_v2 = vmul.f32 %v7906_v4, %v8340_v27 }
 0x2c0   : > { %v2897_v19 = vrot.slane %v2891_v5, 3  ;;  %v2898_v41 = vrot.slane %v2892_v14, 3  ;;  %v2914_v12 = vrot.slane %v2908_v8, 3  ;;  %v2915_v7 = vrot.slane %v2909_v17, 3 }
 0x2c1   : > { %v2931_v32 = vrot.slane %v2925_v26, 3  ;;  %v2932_v46 = vrot.slane %v2926_v47, 3  ;;  %v2948_v44 = vrot.slane %v2942_v3, 3  ;;  %v2949_v18 = vrot.slane %v2943_v2, 3  ;;  %v9987_v2 = vld [vmem:[#allocation87_spill] sm:$0xff] }
 0x2c2   : > { %v2903_v11 = vadd.f32 %v2897_v19, %v2835_v13  ;;  %v8422_v62 = vadd.f32 %v2898_v41, %v2836_v10  ;;  %v2920_v0 = vadd.f32 %v2914_v12, %v2852_v37  ;;  %v2921_v48 = vadd.f32 %v2915_v7, %v2853_v57 }
 0x2c3   : > { %v2937_v33 = vadd.f32 %v2931_v32, %v2869_v38  ;;  %v8424_v31 = vadd.f32 %v2932_v46, %v2870_v39  ;;  %v8426_v24 = vadd.f32 %v2948_v44, %v2886_v49  ;;  %v8428_v42 = vadd.f32 %v2949_v18, %v2887_v21 }
 0x2c4   : > { %v2971_v4 = vmul.f32 %v8088_v40, %v8344_v23  ;;  %v2979_v27 = vmul.f32 %v8091_v50, %v8344_v23  ;;  %v2987_v30 = vmul.f32 %v8102_v59, %v8344_v23  ;;  %v2995_v55 = vmul.f32 %v8114_v36, %v8344_v23 }
 0x2c5   : > { %v3003_v35 = vmul.f32 %v8126_v25, %v8344_v23  ;;  %v3020_v52 = vmul.f32 %v8129_v63, %v8344_v23  ;;  %v3037_v29 = vmul.f32 %v8142_v43, %v8344_v23  ;;  %v3054_v61 = vmul.f32 %v8156_v34, %v8344_v23 }
 0x2c6   : > { %v2974_v28 = vadd.f32 %v2971_v4, %v8350_v54  ;;  %v2982_v58 = vadd.f32 %v2979_v27, %v8352_v53  ;;  %v2990_v9 = vadd.f32 %v2987_v30, %v8354_v22  ;;  %v2998_v6 = vadd.f32 %v2995_v55, %v8356_v56  ;;  %v9988_v27 = vld [vmem:[#allocation125_spill] sm:$0xff]  ;;  %v9989_v30 = vld [vmem:[#allocation126_spill] sm:$0xff] }
 0x2c7   : > { %v3009_v13 = vrot.slane %v3003_v35, 1  ;;  %v3026_v10 = vrot.slane %v3020_v52, 1  ;;  %v3043_v37 = vrot.slane %v3037_v29, 1  ;;  %v3060_v57 = vrot.slane %v3054_v61, 1  ;;  %v9990_v35 = vld [vmem:[#allocation127_spill] sm:$0xff] }
 0x2c8   : > { %v3071_v38 = vmul.f32 %v8170_v16, %v8344_v23  ;;  %v3088_v39 = vmul.f32 %v8173_v15, %v8344_v23  ;;  %v3105_v49 = vmul.f32 %v8176_v1, %v8344_v23  ;;  %v3122_v54 = vmul.f32 %v8184_v20, %v8344_v23 }
 0x2c9   : > { %v3015_v53 = vadd.f32 %v3009_v13, %v2974_v28  ;;  %v3032_v22 = vadd.f32 %v3026_v10, %v2982_v58  ;;  %v3049_v21 = vadd.f32 %v3043_v37, %v2990_v9  ;;  %v3066_v56 = vadd.f32 %v3060_v57, %v2998_v6 }
 0x2ca   : > { %v3077_v5 = vrot.slane %v3071_v38, 2  ;;  %v3094_v14 = vrot.slane %v3088_v39, 2  ;;  %v3111_v8 = vrot.slane %v3105_v49, 2  ;;  %v3128_v17 = vrot.slane %v3122_v54, 2 }
 0x2cb   : > { %v3139_v26 = vmul.f32 %v8187_v60, %v8344_v23  ;;  %v3156_v47 = vmul.f32 %v8196_v51, %v8344_v23  ;;  %v3173_v3 = vmul.f32 %v8199_v45, %v8344_v23  ;;  %v3190_v19 = vmul.f32 %v9987_v2, %v8344_v23 }
 0x2cc   : > { %v3083_v41 = vadd.f32 %v3077_v5, %v3015_v53  ;;  %v3100_v12 = vadd.f32 %v3094_v14, %v3032_v22  ;;  %v3117_v7 = vadd.f32 %v3111_v8, %v3049_v21  ;;  %v3134_v32 = vadd.f32 %v3128_v17, %v3066_v56 }
 0x2cd   : > { %v3145_v46 = vrot.slane %v3139_v26, 3  ;;  %v3162_v44 = vrot.slane %v3156_v47, 3  ;;  %v3179_v18 = vrot.slane %v3173_v3, 3  ;;  %v3196_v4 = vrot.slane %v3190_v19, 3 }
 0x2ce   : > { %v8469_v55 = vsel %vm521_vm1, %v9989_v30, %v9988_v27  ;;  %v2972_v52 = vmul.f32 %v8088_v40, %v9990_v35  ;;  %v2980_v29 = vmul.f32 %v8091_v50, %v9990_v35  ;;  %v2988_v23 = vmul.f32 %v8102_v59, %v9990_v35  ;;  %v3209_v27 = vpop.permute.xlu1 %3208 }
 0x2cf   : > { %v8477_v61 = vadd.f32 %v3145_v46, %v3083_v41  ;;  %v8479_v28 = vadd.f32 %v3162_v44, %v3100_v12  ;;  %v8481_v58 = vadd.f32 %v3179_v18, %v3117_v7  ;;  %v8483_v9 = vadd.f32 %v3196_v4, %v3134_v32  ;;  %v8525_v4 = vpop.permute.xlu0 %3205 }
 0x2d0   : > { %v2973_v6 = vmul.f32 %v8088_v40, %v8469_v55  ;;  %v2975_v13 = vadd.f32 %v2972_v52, %v2903_v11  ;;  %v2981_v10 = vmul.f32 %v8091_v50, %v8469_v55  ;;  %v2983_v37 = vadd.f32 %v2980_v29, %v2920_v0 }
 0x2d1   : > { %v2989_v57 = vmul.f32 %v8102_v59, %v8469_v55  ;;  %v2991_v38 = vadd.f32 %v2988_v23, %v2937_v33  ;;  %v2996_v39 = vmul.f32 %v8114_v36, %v9990_v35  ;;  %v2997_v49 = vmul.f32 %v8114_v36, %v8469_v55 }
 0x2d2   : > { %v2976_v54 = vadd.f32 %v2973_v6, %v8422_v62  ;;  %v2984_v53 = vadd.f32 %v2981_v10, %v2921_v48  ;;  %v3004_v40 = vmul.f32 %v8126_v25, %v9990_v35  ;;  %v3005_v50 = vmul.f32 %v8126_v25, %v8469_v55 }
 0x2d3   : > { %v2992_v11 = vadd.f32 %v2989_v57, %v8424_v31  ;;  %v2999_v59 = vadd.f32 %v2996_v39, %v8426_v24  ;;  %v3000_v0 = vadd.f32 %v2997_v49, %v8428_v42  ;;  %v3021_v33 = vmul.f32 %v8129_v63, %v9990_v35 }
 0x2d4   : > { %v3010_v22 = vrot.slane %v3004_v40, 1  ;;  %v3011_v36 = vrot.slane %v3005_v50, 1  ;;  %v3022_v62 = vmul.f32 %v8129_v63, %v8469_v55  ;;  %v3038_v48 = vmul.f32 %v8142_v43, %v9990_v35 }
 0x2d5   : > { %v3027_v21 = vrot.slane %v3021_v33, 1  ;;  %v3039_v25 = vmul.f32 %v8142_v43, %v8469_v55  ;;  %v3055_v31 = vmul.f32 %v8156_v34, %v9990_v35  ;;  %v3056_v24 = vmul.f32 %v8156_v34, %v8469_v55 }
 0x2d6   : > { %v3016_v42 = vadd.f32 %v3010_v22, %v2975_v13  ;;  %v3017_v56 = vadd.f32 %v3011_v36, %v2976_v54  ;;  %v3028_v5 = vrot.slane %v3022_v62, 1  ;;  %v3044_v14 = vrot.slane %v3038_v48, 1  ;;  %v3211_v22 = vpop.permute.xlu0 %3210  ;;  %v8543_v36 = vpop.permute.xlu1 %3454 }
 0x2d7   : > { %v3033_v8 = vadd.f32 %v3027_v21, %v2983_v37  ;;  %v3045_v17 = vrot.slane %v3039_v25, 1  ;;  %v3061_v63 = vrot.slane %v3055_v31, 1  ;;  %v3062_v26 = vrot.slane %v3056_v24, 1 }
 0x2d8   : > { %v3034_v47 = vadd.f32 %v3028_v5, %v2984_v53  ;;  %v3050_v3 = vadd.f32 %v3044_v14, %v2991_v38  ;;  %v3072_v19 = vmul.f32 %v8170_v16, %v9990_v35  ;;  %v3073_v43 = vmul.f32 %v8170_v16, %v8469_v55 }
 0x2d9   : > { %v3051_v41 = vadd.f32 %v3045_v17, %v2992_v11  ;;  %v3067_v12 = vadd.f32 %v3061_v63, %v2999_v59  ;;  %v3068_v7 = vadd.f32 %v3062_v26, %v3000_v0  ;;  %v3089_v34 = vmul.f32 %v8173_v15, %v9990_v35  ;;  %v9991_v26 = vld [vmem:[#allocation88_spill] sm:$0xff] }
 0x2da   : > { %v3078_v32 = vrot.slane %v3072_v19, 2  ;;  %v3079_v46 = vrot.slane %v3073_v43, 2  ;;  %v3090_v44 = vmul.f32 %v8173_v15, %v8469_v55  ;;  %v3106_v18 = vmul.f32 %v8176_v1, %v9990_v35  ;;  %v9993_v43 = vld [vmem:[#allocation93_spill] sm:$0xff] }
 0x2db   : > { %v3095_v30 = vrot.slane %v3089_v34, 2  ;;  %v3107_v16 = vmul.f32 %v8176_v1, %v8469_v55  ;;  %v3123_v52 = vmul.f32 %v8184_v20, %v9990_v35  ;;  %v3124_v29 = vmul.f32 %v8184_v20, %v8469_v55  ;;  %v9995_v34 = vld [vmem:[#allocation96_spill] sm:$0xff] }
 0x2dc   : > { %v3084_v23 = vadd.f32 %v3078_v32, %v3016_v42  ;;  %v3085_v6 = vadd.f32 %v3079_v46, %v3017_v56  ;;  %v3096_v13 = vrot.slane %v3090_v44, 2  ;;  %v3112_v15 = vrot.slane %v3106_v18, 2  ;;  %v8575_v46 = vpop.permute.xlu0 %3457  ;;  %v8577_v44 = vpop.permute.xlu1 %3459 }
 0x2dd   : > { %v3101_v10 = vadd.f32 %v3095_v30, %v3033_v8  ;;  %v3113_v37 = vrot.slane %v3107_v16, 2  ;;  %v3129_v57 = vrot.slane %v3123_v52, 2  ;;  %v3130_v38 = vrot.slane %v3124_v29, 2  ;;  %v9997_v16 = vld [vmem:[#allocation98_spill] sm:$0xff] }
 0x2de   : > { %v3102_v39 = vadd.f32 %v3096_v13, %v3034_v47  ;;  %v3118_v49 = vadd.f32 %v3112_v15, %v3050_v3  ;;  %v3140_v54 = vmul.f32 %v8187_v60, %v9990_v35  ;;  %v3141_v1 = vmul.f32 %v8187_v60, %v8469_v55  ;;  %v9992_v3 = vld [vmem:[#allocation101_spill] sm:$0xff]  ;;  %v9998_v29 = vld [vmem:[#allocation62_spill] sm:$0xff] }
 0x2df   : > { %v3119_v53 = vadd.f32 %v3113_v37, %v3051_v41  ;;  %v3135_v40 = vadd.f32 %v3129_v57, %v3067_v12  ;;  %v3136_v50 = vadd.f32 %v3130_v38, %v3068_v7  ;;  %v3157_v20 = vmul.f32 %v8196_v51, %v9990_v35  ;;  %v9994_v12 = vld [vmem:[#allocation95_spill] sm:$0xff] }
 0x2e0   : > { %v3146_v11 = vrot.slane %v3140_v54, 3  ;;  %v3147_v59 = vrot.slane %v3141_v1, 3  ;;  %v3158_v0 = vmul.f32 %v8196_v51, %v8469_v55  ;;  %v3174_v33 = vmul.f32 %v8199_v45, %v9990_v35 }
 0x2e1   : > { %v3163_v62 = vrot.slane %v3157_v20, 3  ;;  %v3175_v60 = vmul.f32 %v8199_v45, %v8469_v55  ;;  %v3191_v48 = vmul.f32 %v9987_v2, %v9990_v35  ;;  %v3192_v21 = vmul.f32 %v9987_v2, %v8469_v55 }
 0x2e2   : > { %v8551_v25 = vadd.f32 %v3146_v11, %v3084_v23  ;;  %v8553_v31 = vadd.f32 %v3147_v59, %v3085_v6  ;;  %v3164_v51 = vrot.slane %v3158_v0, 3  ;;  %v3180_v24 = vrot.slane %v3174_v33, 3 }
 0x2e3   : > { %v8555_v42 = vadd.f32 %v3163_v62, %v3101_v10  ;;  %v3181_v56 = vrot.slane %v3175_v60, 3  ;;  %v3197_v5 = vrot.slane %v3191_v48, 3  ;;  %v3198_v14 = vrot.slane %v3192_v21, 3  ;;  %v10003_v62 = vld [vmem:[#allocation105_spill] sm:$0xff]  ;;  %v8596_v48 = vpop.permute.xlu0 %3939  ;;  %v8598_v21 = vpop.permute.xlu1 %3941 }
 0x2e4   : > { %v3170_v8 = vadd.f32 %v3164_v51, %v3102_v39  ;;  %v8557_v17 = vadd.f32 %v3180_v24, %v3118_v49  ;;  %v3217_v45 = vsel %vm771_vm2, %v8525_v4, %v3209_v27  ;;  %v8562_v35 = vsel %vm771_vm2, %v3209_v27, %v3211_v22  ;;  %v9996_v27 = vld [vmem:[#allocation97_spill] sm:$0xff]  ;;  %v9999_v39 = vld [vmem:[#allocation99_spill] sm:$0xff]  ;;  %v10004_v24 = vld [vmem:[#allocation106_spill] sm:$0xff] }
 0x2e5   : > { %v8564_v2 = vadd.f32 %v3181_v56, %v3119_v53  ;;  %v8566_v55 = vadd.f32 %v3197_v5, %v3135_v40  ;;  %v8568_v63 = vadd.f32 %v3198_v14, %v3136_v50  ;;  %v3220_v47 = vmul.f32 %v9991_v26, %v3217_v45  ;;  %v10001_v53 = vld [vmem:[#allocation103_spill] sm:$0xff]  ;;  %v10002_v50 = vld [vmem:[#allocation104_spill] sm:$0xff] }
 0x2e6   : > { %v3228_v19 = vmul.f32 %v9992_v3, %v3217_v45  ;;  %v3236_v41 = vmul.f32 %v9993_v43, %v3217_v45  ;;  %v3244_v7 = vmul.f32 %v9994_v12, %v3217_v45  ;;  %v3252_v32 = vmul.f32 %v9995_v34, %v3217_v45  ;;  %v10005_v5 = vld [vmem:[#allocation107_spill] sm:$0xff] }
 0x2e7   : > { %v3223_v18 = vadd.f32 %v3220_v47, %v8477_v61  ;;  %v3269_v30 = vmul.f32 %v9996_v27, %v3217_v45  ;;  %v3286_v52 = vmul.f32 %v9997_v16, %v3217_v45  ;;  %v3303_v23 = vmul.f32 %v9998_v29, %v3217_v45  ;;  %v10000_v61 = vld [vmem:[#allocation102_spill] sm:$0xff]  ;;  %v10006_v47 = vld [vmem:[#allocation108_spill] sm:$0xff] }
 0x2e8   : > { %v3231_v6 = vadd.f32 %v3228_v19, %v8479_v28  ;;  %v3239_v13 = vadd.f32 %v3236_v41, %v8481_v58  ;;  %v3247_v15 = vadd.f32 %v3244_v7, %v8483_v9  ;;  %v3258_v10 = vrot.slane %v3252_v32, 1 }
 0x2e9   : > { %v3275_v37 = vrot.slane %v3269_v30, 1  ;;  %v3292_v57 = vrot.slane %v3286_v52, 1  ;;  %v3309_v38 = vrot.slane %v3303_v23, 1  ;;  %v3320_v49 = vmul.f32 %v9999_v39, %v3217_v45 }
 0x2ea   : > { %v3264_v54 = vadd.f32 %v3258_v10, %v3223_v18  ;;  %v3337_v1 = vmul.f32 %v10000_v61, %v3217_v45  ;;  %v3354_v40 = vmul.f32 %v10001_v53, %v3217_v45  ;;  %v8590_v20 = vmul.f32 %v10002_v50, %v3217_v45 }
 0x2eb   : > { %v3281_v11 = vadd.f32 %v3275_v37, %v3231_v6  ;;  %v3298_v28 = vadd.f32 %v3292_v57, %v3239_v13  ;;  %v8592_v59 = vadd.f32 %v3309_v38, %v3247_v15  ;;  %v3326_v58 = vrot.slane %v3320_v49, 2 }
 0x2ec   : > { %v3343_v9 = vrot.slane %v3337_v1, 2  ;;  %v3360_v0 = vrot.slane %v3354_v40, 2  ;;  %v3388_v60 = vmul.f32 %v10003_v62, %v3217_v45  ;;  %v3405_v56 = vmul.f32 %v10004_v24, %v3217_v45  ;;  %v8636_v1 = vpop.permute.xlu0 %3943 }
 0x2ed   : > { %v3332_v51 = vadd.f32 %v3326_v58, %v3264_v54  ;;  %v8602_v14 = vmul.f32 %v10005_v5, %v3217_v45  ;;  %v8605_v19 = vmul.f32 %v10006_v47, %v3217_v45  ;;  %v8611_v18 = vsel %vm771_vm2, %v3211_v22, %v8525_v4 }
 0x2ee   : > { %v3349_v41 = vadd.f32 %v3343_v9, %v3281_v11  ;;  %v8607_v7 = vadd.f32 %v3360_v0, %v3298_v28  ;;  %v3394_v32 = vrot.slane %v3388_v60, 3  ;;  %v3411_v30 = vrot.slane %v3405_v56, 3 }
 0x2ef   : > { %v3221_v6 = vmul.f32 %v9991_v26, %v8562_v35  ;;  %v3222_v45 = vmul.f32 %v9991_v26, %v8611_v18  ;;  %v3229_v15 = vmul.f32 %v9992_v3, %v8562_v35  ;;  %v3230_v4 = vmul.f32 %v9992_v3, %v8611_v18  ;;  %v8638_v3 = vpop.permute.xlu1 %4188 }
 0x2f0   : > { %v8617_v13 = vadd.f32 %v3394_v32, %v3332_v51  ;;  %v8625_v22 = vadd.f32 %v3411_v30, %v3349_v41  ;;  %v3237_v37 = vmul.f32 %v9993_v43, %v8562_v35  ;;  %v3238_v57 = vmul.f32 %v9993_v43, %v8611_v18 }
 0x2f1   : > { %v3224_v10 = vadd.f32 %v3221_v6, %v8551_v25  ;;  %v3225_v38 = vadd.f32 %v3222_v45, %v8553_v31  ;;  %v3232_v26 = vadd.f32 %v3229_v15, %v8555_v42  ;;  %v3233_v49 = vadd.f32 %v3230_v4, %v3170_v8  ;;  %v8666_v6 = vpop.permute.xlu0 %4190 }
 0x2f2   : > { %v3245_v54 = vmul.f32 %v9994_v12, %v8562_v35  ;;  %v3240_v25 = vadd.f32 %v3237_v37, %v8557_v17  ;;  %v3241_v40 = vadd.f32 %v3238_v57, %v8564_v2  ;;  %v3246_v11 = vmul.f32 %v9994_v12, %v8611_v18 }
 0x2f3   : > { %v3253_v31 = vmul.f32 %v9995_v34, %v8562_v35  ;;  %v3254_v8 = vmul.f32 %v9995_v34, %v8611_v18  ;;  %v3270_v43 = vmul.f32 %v9996_v27, %v8562_v35  ;;  %v3271_v28 = vmul.f32 %v9996_v27, %v8611_v18 }
 0x2f4   : > { %v3248_v42 = vadd.f32 %v3245_v54, %v8566_v55  ;;  %v8654_v17 = vadd.f32 %v3246_v11, %v8568_v63  ;;  %v3287_v12 = vmul.f32 %v9997_v16, %v8562_v35  ;;  %v3288_v58 = vmul.f32 %v9997_v16, %v8611_v18  ;;  %v8668_v16 = vpop.permute.xlu1 %4192 }
 0x2f5   : > { %v3259_v2 = vrot.slane %v3253_v31, 1  ;;  %v3260_v55 = vrot.slane %v3254_v8, 1  ;;  %v3276_v9 = vrot.slane %v3270_v43, 1  ;;  %v3277_v0 = vrot.slane %v3271_v28, 1 }
 0x2f6   : > { %v3304_v34 = vmul.f32 %v9998_v29, %v8562_v35  ;;  %v3293_v51 = vrot.slane %v3287_v12, 1  ;;  %v3294_v56 = vrot.slane %v3288_v58, 1  ;;  %v8664_v63 = vmul.f32 %v9998_v29, %v8611_v18  ;;  %v8704_v58 = vpop.permute.xlu0 %4437 }
 0x2f7   : > { %v3265_v60 = vadd.f32 %v3259_v2, %v3224_v10  ;;  %v3266_v27 = vadd.f32 %v3260_v55, %v3225_v38  ;;  %v3282_v41 = vadd.f32 %v3276_v9, %v3232_v26  ;;  %v3283_v32 = vadd.f32 %v3277_v0, %v3233_v49 }
 0x2f8   : > { %v3310_v30 = vrot.slane %v3304_v34, 1  ;;  %v3299_v45 = vadd.f32 %v3293_v51, %v3240_v25  ;;  %v8670_v15 = vadd.f32 %v3294_v56, %v3241_v40  ;;  %v3321_v10 = vmul.f32 %v9999_v39, %v8562_v35  ;;  %v4440_v55 = vpop.permute.xlu1 %4439 }
 0x2f9   : > { %v3322_v29 = vmul.f32 %v9999_v39, %v8611_v18  ;;  %v3338_v57 = vmul.f32 %v10000_v61, %v8562_v35  ;;  %v3339_v38 = vmul.f32 %v10000_v61, %v8611_v18  ;;  %v3355_v49 = vmul.f32 %v10001_v53, %v8562_v35 }
 0x2fa   : > { %v8675_v37 = vadd.f32 %v3310_v30, %v3248_v42  ;;  %v3327_v26 = vrot.slane %v3321_v10, 2  ;;  %v8687_v54 = vmul.f32 %v10001_v53, %v8611_v18  ;;  %v8691_v25 = vmul.f32 %v10002_v50, %v8562_v35 }
 0x2fb   : > { %v3328_v40 = vrot.slane %v3322_v29, 2  ;;  %v3344_v39 = vrot.slane %v3338_v57, 2  ;;  %v3345_v11 = vrot.slane %v3339_v38, 2  ;;  %v8695_v31 = vmul.f32 %v10002_v50, %v8611_v18 }
 0x2fc   : > { %v3333_v61 = vadd.f32 %v3327_v26, %v3265_v60  ;;  %v3361_v42 = vrot.slane %v3355_v49, 2  ;;  %v3389_v50 = vmul.f32 %v10003_v62, %v8562_v35  ;;  %v8712_v0 = vmul.f32 %v10003_v62, %v8611_v18  ;;  %v10008_v26 = vld [vmem:[#allocation110_spill] sm:$0xff] }
 0x2fd   : > { %v8699_v28 = vadd.f32 %v3328_v40, %v3266_v27  ;;  %v3350_v53 = vadd.f32 %v3344_v39, %v3282_v41  ;;  %v8701_v2 = vadd.f32 %v3345_v11, %v3283_v32  ;;  %v3406_v34 = vmul.f32 %v10004_v24, %v8562_v35  ;;  %v10009_v40 = vld [vmem:[#allocation111_spill] sm:$0xff]  ;;  %v10010_v11 = vld [vmem:[#allocation112_spill] sm:$0xff] }
 0x2fe   : > { %v8706_v9 = vadd.f32 %v3361_v42, %v3299_v45  ;;  %v8718_v60 = vmul.f32 %v10004_v24, %v8611_v18  ;;  %v8722_v51 = vmul.f32 %v10005_v5, %v8562_v35  ;;  %v8726_v56 = vmul.f32 %v10005_v5, %v8611_v18  ;;  %v4442_v42 = vpop.permute.xlu0 %4441 }
 0x2ff   : > { %v8730_v27 = vmul.f32 %v10006_v47, %v8562_v35  ;;  %v3395_v62 = vrot.slane %v3389_v50, 3  ;;  %v3396_v41 = vrot.slane %v8712_v0, 3  ;;  %v3412_v32 = vrot.slane %v3406_v34, 3  ;;  %v10011_v50 = vld [vmem:[#allocation113_spill] sm:$0xff] }
 0x300   : > { %v8735_v24 = vmul.f32 %v10006_v47, %v8611_v18  ;;  %v3413_v30 = vrot.slane %v8718_v60, 3  ;;  %v3429_v45 = vrot.slane %v8722_v51, 3  ;;  %v3430_v10 = vrot.slane %v8726_v56, 3  ;;  %v10007_v18 = vld [vmem:[#allocation109_spill] sm:$0xff]  ;;  %v10013_v60 = vld [vmem:[#allocation115_spill] sm:$0xff]  ;;  %v10014_v56 = vld [vmem:[#allocation116_spill] sm:$0xff] }
 0x301   : > { %v3446_v5 = vrot.slane %v8730_v27, 3  ;;  %v3401_v29 = vadd.f32 %v3395_v62, %v3333_v61  ;;  %v3418_v57 = vadd.f32 %v3412_v32, %v3350_v53  ;;  %v8744_v35 = vsel %vm1021_vm3, %v8543_v36, %v8575_v46  ;;  %v4687_v53 = vpop.permute.xlu1 %4686 }
 0x302   : > { %v8749_v47 = vsel %vm1021_vm3, %v8575_v46, %v8577_v44  ;;  %v3469_v38 = vmul.f32 %v10007_v18, %v8744_v35  ;;  %v3477_v49 = vmul.f32 %v10008_v26, %v8744_v35  ;;  %v3485_v39 = vmul.f32 %v10009_v40, %v8744_v35  ;;  %v10012_v46 = vld [vmem:[#allocation114_spill] sm:$0xff] }
 0x303   : > { %v8759_v61 = vmul.f32 %v10010_v11, %v8744_v35  ;;  %v8763_v0 = vmul.f32 %v10011_v50, %v8744_v35  ;;  %v8767_v34 = vmul.f32 %v10012_v46, %v8744_v35  ;;  %v8771_v51 = vmul.f32 %v10013_v60, %v8744_v35 }
 0x304   : > { %v8775_v27 = vmul.f32 %v10014_v56, %v8744_v35  ;;  %v8778_v62 = vadd.f32 %v3477_v49, %v8625_v22  ;;  %v8784_v23 = vsel %vm1021_vm3, %v8577_v44, %v8543_v36  ;;  %v3470_v12 = vmul.f32 %v10007_v18, %v8749_v47 }
 0x305   : > { %v3507_v32 = vrot.slane %v8759_v61, 1  ;;  %v3524_v52 = vrot.slane %v8763_v0, 1  ;;  %v3471_v43 = vmul.f32 %v10007_v18, %v8784_v23  ;;  %v3478_v33 = vmul.f32 %v10008_v26, %v8749_v47 }
 0x306   : > { %10015 = vst [vmem:[#allocation87_spill] sm:$0xff] %v8775_v27  ;;  %v3479_v22 = vmul.f32 %v10008_v26, %v8784_v23  ;;  %v3486_v49 = vmul.f32 %v10009_v40, %v8749_v47  ;;  %v3487_v36 = vmul.f32 %v10009_v40, %v8784_v23  ;;  %v3502_v44 = vmul.f32 %v10010_v11, %v8749_v47 }
 0x307   : > { %v3503_v61 = vmul.f32 %v10010_v11, %v8784_v23  ;;  %v3481_v0 = vadd.f32 %v3478_v33, %v3418_v57  ;;  %v3519_v18 = vmul.f32 %v10011_v50, %v8749_v47  ;;  %v3520_v8 = vmul.f32 %v10011_v50, %v8784_v23  ;;  %v4689_v57 = vpop.permute.xlu0 %4688  ;;  %v4691_v11 = vpop.permute.xlu1 %4690 }
 0x308   : > { %v8809_v26 = vmul.f32 %v10012_v46, %v8749_v47  ;;  %v3508_v4 = vrot.slane %v3502_v44, 1  ;;  %v8813_v40 = vmul.f32 %v10013_v60, %v8749_v47  ;;  %v8817_v27 = vmul.f32 %v10014_v56, %v8749_v47 }
 0x309   : > { %v8822_v33 = vsel %vm1654_vm4, %v8596_v48, %v8598_v21  ;;  %v3525_v50 = vrot.slane %v3519_v18, 1  ;;  %v8827_v44 = vsel %vm1654_vm4, %v8598_v21, %v8636_v1  ;;  %v8847_v21 = vsel %vm1904_vm5, %v8668_v16, %v8638_v3 }
 0x30a   : > { %10016 = vst [vmem:[#allocation125_spill] sm:$0xff] %v8813_v40  ;;  %10017 = vst [vmem:[#allocation126_spill] sm:$0xff] %v8817_v27  ;;  %v8832_v40 = vsel %vm1654_vm4, %v8636_v1, %v8596_v48  ;;  %v8837_v27 = vsel %vm1904_vm5, %v8638_v3, %v8666_v6  ;;  %v8851_v18 = vsel %vm2154_vm6, %v8704_v58, %v4440_v55 }
 0x30b   : > { %10018 = vst [vmem:[#allocation127_spill] sm:$0xff] %v8822_v33  ;;  %10019 = vst [vmem:[#allocation88_spill] sm:$0xff] %v8837_v27  ;;  %v8842_v33 = vsel %vm1904_vm5, %v8666_v6, %v8668_v16  ;;  %v8854_v48 = vsel %vm2154_vm6, %v4440_v55, %v4442_v42  ;;  %v8858_v1 = vsel %vm2154_vm6, %v4442_v42, %v8704_v58  ;;  %v10024_v16 = vrot.slane %v8664_v63, 1 }
 0x30c   : > { %10020 = vst [vmem:[#allocation101_spill] sm:$0xff] %v8851_v18  ;;  %10021 = vst [vmem:[#allocation93_spill] sm:$0xff] %v8854_v48  ;;  %v8861_v27 = vsel %vm2404_vm7, %v4687_v53, %v4689_v57  ;;  %v8864_v6 = vsel %vm2404_vm7, %v4689_v57, %v4691_v11  ;;  %v8867_v3 = vsel %vm2404_vm7, %v4691_v11, %v4687_v53  ;;  %v10025_v55 = vrot.slane %v8687_v54, 2 }
 0x30d   : > { %10022 = vst [vmem:[#allocation95_spill] sm:$0xff] %v8861_v27  ;;  %10023 = vst [vmem:[#allocation96_spill] sm:$0xff] %v8864_v6  ;;  %v3317_v18 = vadd.f32 %v10024_v16, %v8654_v17  ;;  %v10026_v58 = vrot.slane %v8590_v20, 2  ;;  %v10027_v27 = vrot.slane %v8691_v25, 2  ;;  %v3402_v6 = vadd.f32 %v3396_v41, %v8699_v28 }
 0x30e   : > { %v3368_v48 = vadd.f32 %v10025_v55, %v8670_v15  ;;  %v3419_v53 = vadd.f32 %v3413_v30, %v8701_v2  ;;  %v10028_v63 = vrot.slane %v8602_v14, 3  ;;  %v3435_v11 = vadd.f32 %v3429_v45, %v8706_v9  ;;  %v10031_v9 = vld [vmem:[#allocation117_spill] sm:$0xff] }
 0x30f   : > { %v3383_v42 = vadd.f32 %v10026_v58, %v8592_v59  ;;  %v3384_v57 = vadd.f32 %v10027_v27, %v8675_v37  ;;  %v10029_v15 = vrot.slane %v8695_v31, 2  ;;  %v3447_v20 = vrot.slane %v8735_v24, 3 }
 0x310   : > { %v3434_v17 = vadd.f32 %v10028_v63, %v8607_v7  ;;  %v3436_v16 = vadd.f32 %v3430_v10, %v3368_v48  ;;  %v10030_v59 = vrot.slane %v8605_v19, 3  ;;  %v3472_v28 = vadd.f32 %v3469_v38, %v8617_v13 }
 0x311   : > { %v3385_v54 = vadd.f32 %v10029_v15, %v3317_v18  ;;  %v3452_v37 = vadd.f32 %v3446_v5, %v3384_v57  ;;  %v3473_v41 = vadd.f32 %v3470_v12, %v3401_v29  ;;  %v3474_v2 = vadd.f32 %v3471_v43, %v3402_v6 }
 0x312   : > { %v3451_v25 = vadd.f32 %v10030_v59, %v3383_v42  ;;  %v3482_v27 = vadd.f32 %v3479_v22, %v3419_v53  ;;  %v3488_v14 = vadd.f32 %v3485_v39, %v3434_v17  ;;  %v3489_v7 = vadd.f32 %v3486_v49, %v3435_v11  ;;  %v10033_v42 = vld [vmem:[#allocation125_spill] sm:$0xff]  ;;  %v10035_v59 = vld [vmem:[#allocation126_spill] sm:$0xff] }
 0x313   : > { %v3453_v30 = vadd.f32 %v3447_v20, %v3385_v54  ;;  %v3490_v55 = vadd.f32 %v3487_v36, %v3436_v16  ;;  %v3493_v31 = vmul.f32 %v10031_v9, %v8744_v35  ;;  %v3494_v45 = vmul.f32 %v10031_v9, %v8749_v47  ;;  %v10034_v20 = vld [vmem:[#allocation87_spill] sm:$0xff] }
 0x314   : > { %v3495_v19 = vmul.f32 %v10031_v9, %v8784_v23  ;;  %v3509_v24 = vrot.slane %v3503_v61, 1  ;;  %v3513_v10 = vadd.f32 %v3507_v32, %v3472_v28  ;;  %v3514_v5 = vadd.f32 %v3508_v4, %v3473_v41  ;;  %v10032_v61 = vld [vmem:[#allocation118_spill] sm:$0xff]  ;;  %v10036_v28 = vld [vmem:[#allocation119_spill] sm:$0xff] }
 0x315   : > { %v3526_v13 = vrot.slane %v3520_v8, 1  ;;  %v3496_v12 = vadd.f32 %v3493_v31, %v3451_v25  ;;  %v3497_v43 = vadd.f32 %v3494_v45, %v3452_v37  ;;  %v3530_v38 = vadd.f32 %v3524_v52, %v8778_v62 }
 0x316   : > { %v3498_v29 = vadd.f32 %v3495_v19, %v3453_v30  ;;  %v3515_v39 = vadd.f32 %v3509_v24, %v3474_v2  ;;  %v3531_v22 = vadd.f32 %v3525_v50, %v3481_v0  ;;  %v3537_v36 = vmul.f32 %v10012_v46, %v8784_v23 }
 0x317   : > { %v3532_v49 = vadd.f32 %v3526_v13, %v3482_v27  ;;  %v3541_v18 = vrot.slane %v8767_v34, 1  ;;  %v3542_v48 = vrot.slane %v8809_v26, 1  ;;  %v3552_v32 = vmul.f32 %v10032_v61, %v8744_v35 }
 0x318   : > { %v3553_v4 = vmul.f32 %v10032_v61, %v8749_v47  ;;  %v3543_v8 = vrot.slane %v3537_v36, 1  ;;  %v3554_v52 = vmul.f32 %v10032_v61, %v8784_v23  ;;  %v3571_v62 = vmul.f32 %v10013_v60, %v8784_v23 }
 0x319   : > { %v3575_v0 = vrot.slane %v8771_v51, 2  ;;  %v3547_v46 = vadd.f32 %v3541_v18, %v3488_v14  ;;  %v3548_v50 = vadd.f32 %v3542_v48, %v3489_v7  ;;  %v3558_v34 = vrot.slane %v3552_v32, 1  ;;  %v10039_v32 = vld [vmem:[#allocation122_spill] sm:$0xff] }
 0x31a   : > { %v3559_v6 = vrot.slane %v3553_v4, 1  ;;  %v3549_v26 = vadd.f32 %v3543_v8, %v3490_v55  ;;  %v3560_v58 = vrot.slane %v3554_v52, 1  ;;  %v3576_v57 = vrot.slane %v10033_v42, 2 }
 0x31b   : > { %v3577_v53 = vrot.slane %v3571_v62, 2  ;;  %v3564_v63 = vadd.f32 %v3558_v34, %v3496_v12  ;;  %v3581_v11 = vadd.f32 %v3575_v0, %v3513_v10  ;;  %v3588_v15 = vmul.f32 %v10014_v56, %v8784_v23  ;;  %v10037_v56 = vld [vmem:[#allocation120_spill] sm:$0xff]  ;;  %v10040_v0 = vld [vmem:[#allocation123_spill] sm:$0xff] }
 0x31c   : > { %v3565_v17 = vadd.f32 %v3559_v6, %v3497_v43  ;;  %v3566_v54 = vadd.f32 %v3560_v58, %v3498_v29  ;;  %v3582_v16 = vadd.f32 %v3576_v57, %v3514_v5  ;;  %v3592_v51 = vrot.slane %v10034_v20, 2  ;;  %v10038_v43 = vld [vmem:[#allocation121_spill] sm:$0xff] }
 0x31d   : > { %v3583_v60 = vadd.f32 %v3577_v53, %v3515_v39  ;;  %v3593_v25 = vrot.slane %v10035_v59, 2  ;;  %v3594_v37 = vrot.slane %v3588_v15, 2  ;;  %v3603_v41 = vmul.f32 %v10036_v28, %v8744_v35 }
 0x31e   : > { %v3604_v2 = vmul.f32 %v10036_v28, %v8749_v47  ;;  %v3598_v30 = vadd.f32 %v3592_v51, %v3530_v38  ;;  %v3605_v27 = vmul.f32 %v10036_v28, %v8784_v23  ;;  %v3620_v14 = vmul.f32 %v10037_v56, %v8744_v35 }
 0x31f   : > { %v3621_v7 = vmul.f32 %v10037_v56, %v8749_v47  ;;  %v3599_v55 = vadd.f32 %v3593_v25, %v3531_v22  ;;  %v3600_v9 = vadd.f32 %v3594_v37, %v3532_v49  ;;  %v3609_v31 = vrot.slane %v3603_v41, 2 }
 0x320   : > { %v3610_v45 = vrot.slane %v3604_v2, 2  ;;  %v3611_v19 = vrot.slane %v3605_v27, 2  ;;  %v3622_v24 = vmul.f32 %v10037_v56, %v8784_v23  ;;  %v3626_v10 = vrot.slane %v3620_v14, 2  ;;  %v10043_v56 = vld [vmem:[#allocation50_spill] sm:$0xff] }
 0x321   : > { %v3627_v5 = vrot.slane %v3621_v7, 2  ;;  %v3615_v13 = vadd.f32 %v3609_v31, %v3547_v46  ;;  %v3637_v29 = vmul.f32 %v10038_v43, %v8744_v35  ;;  %v3638_v38 = vmul.f32 %v10038_v43, %v8749_v47 }
 0x322   : > { %v3616_v12 = vadd.f32 %v3610_v45, %v3548_v50  ;;  %v3617_v39 = vadd.f32 %v3611_v19, %v3549_v26  ;;  %v3628_v36 = vrot.slane %v3622_v24, 2  ;;  %v3632_v22 = vadd.f32 %v3626_v10, %v3564_v63  ;;  %v10045_v45 = vld [vmem:[#allocation45_spill] sm:$0xff]  ;;  %v10046_v24 = vld [vmem:[#allocation51_spill] sm:$0xff] }
 0x323   : > { %v3633_v49 = vadd.f32 %v3627_v5, %v3565_v17  ;;  %v3639_v18 = vmul.f32 %v10038_v43, %v8784_v23  ;;  %v3643_v48 = vrot.slane %v3637_v29, 3  ;;  %v3644_v61 = vrot.slane %v3638_v38, 3  ;;  %v10049_v29 = vld [vmem:[#allocation79_spill] sm:$0xff] }
 0x324   : > { %v3654_v4 = vmul.f32 %v10039_v32, %v8744_v35  ;;  %v3634_v8 = vadd.f32 %v3628_v36, %v3566_v54  ;;  %v3655_v52 = vmul.f32 %v10039_v32, %v8749_v47  ;;  %v3656_v62 = vmul.f32 %v10039_v32, %v8784_v23  ;;  %v10041_v54 = vld [vmem:[#allocation124_spill] sm:$0xff] }
 0x325   : > { %v3671_v46 = vmul.f32 %v10040_v0, %v8744_v35  ;;  %v3645_v50 = vrot.slane %v3639_v18, 3  ;;  %v3649_v34 = vadd.f32 %v3643_v48, %v3581_v11  ;;  %v3650_v6 = vadd.f32 %v3644_v61, %v3582_v16  ;;  %v10051_v18 = vld [vmem:[#allocation47_spill] sm:$0xff]  ;;  %v10052_v61 = vld [vmem:[#allocation48_spill] sm:$0xff] }
 0x326   : > { %v3660_v26 = vrot.slane %v3654_v4, 3  ;;  %v3661_v58 = vrot.slane %v3655_v52, 3  ;;  %v3662_v42 = vrot.slane %v3656_v62, 3  ;;  %v3672_v57 = vmul.f32 %v10040_v0, %v8749_v47  ;;  %v10054_v4 = vld [vmem:[#allocation49_spill] sm:$0xff] }
 0x327   : > { %v3673_v53 = vmul.f32 %v10040_v0, %v8784_v23  ;;  %v3651_v63 = vadd.f32 %v3645_v50, %v3583_v60  ;;  %v3677_v15 = vrot.slane %v3671_v46, 3  ;;  %v3688_v20 = vmul.f32 %v10041_v54, %v8744_v35  ;;  %v10042_v60 = vld [vmem:[#allocation44_spill] sm:$0xff] }
 0x328   : > { %v3666_v17 = vadd.f32 %v3660_v26, %v3598_v30  ;;  %v3667_v51 = vadd.f32 %v3661_v58, %v3599_v55  ;;  %v3668_v59 = vadd.f32 %v3662_v42, %v3600_v9  ;;  %v3678_v25 = vrot.slane %v3672_v57, 3  ;;  %v10044_v9 = vld [vmem:[#allocation55_spill] sm:$0xff]  ;;  %v10056_v0 = vld [vmem:[#allocation52_spill] sm:$0xff]  ;;  %v10062_v57 = vld [vmem:[#allocation54_spill] sm:$0xff] }
 0x329   : > { %v3679_v11 = vrot.slane %v3673_v53, 3  ;;  %v3683_v16 = vadd.f32 %v3677_v15, %v3615_v13  ;;  %v3689_v37 = vmul.f32 %v10041_v54, %v8749_v47  ;;  %v3690_v28 = vmul.f32 %v10041_v54, %v8784_v23  ;;  %v10047_v47 = vld [vmem:[#allocation61_spill] sm:$0xff]  ;;  %v10048_v13 = vld [vmem:[#allocation46_spill] sm:$0xff]  ;;  %v10059_v26 = vld [vmem:[#allocation83_spill] sm:$0xff] }
 0x32a   : > { %v3694_v41 = vrot.slane %v3688_v20, 3  ;;  %v3684_v2 = vadd.f32 %v3678_v25, %v3616_v12  ;;  %v3708_v30 = vadd.f32 %v10042_v60, %v3649_v34  ;;  %v3709_v14 = vadd.f32 %v10043_v56, %v3650_v6  ;;  %v10058_v34 = vld [vmem:[#allocation91_spill] sm:$0xff]  ;;  %v10066_v20 = vld [vmem:[#allocation57_spill] sm:$0xff]  ;;  %v10068_v25 = vld [vmem:[#allocation58_spill] sm:$0xff] }
 0x32b   : > { %v3685_v27 = vadd.f32 %v3679_v11, %v3617_v39  ;;  %v3695_v7 = vrot.slane %v3689_v37, 3  ;;  %v3696_v35 = vrot.slane %v3690_v28, 3  ;;  %v3710_v31 = vadd.f32 %v10044_v9, %v3651_v63  ;;  %v10050_v39 = vld [vmem:[#allocation81_spill] sm:$0xff]  ;;  %v10070_v37 = vld [vmem:[#allocation59_spill] sm:$0xff] }
 0x32c   : > { %v3700_v55 = vadd.f32 %v3694_v41, %v3632_v22  ;;  %v3716_v19 = vadd.f32 %v10045_v45, %v3666_v17  ;;  %v3717_v10 = vadd.f32 %v10046_v24, %v3667_v51  ;;  %v3718_v5 = vadd.f32 %v10047_v47, %v3668_v59  ;;  %v10064_v17 = vld [vmem:[#allocation56_spill] sm:$0xff]  ;;  %v10078_v9 = vld [vmem:[#allocation65_spill] sm:$0xff]  ;;  %v10082_v47 = vld [vmem:[#allocation67_spill] sm:$0xff] }
 0x32d   : > { %v3724_v23 = vadd.f32 %v10048_v13, %v3683_v16  ;;  %v3701_v43 = vadd.f32 %v3695_v7, %v3633_v49  ;;  %v3702_v12 = vadd.f32 %v3696_v35, %v3634_v8  ;;  %v3725_v38 = vadd.f32 %v10049_v29, %v3684_v2  ;;  %v10060_v8 = vld [vmem:[#allocation53_spill] sm:$0xff]  ;;  %v10072_v2 = vld [vmem:[#allocation60_spill] sm:$0xff] }
 0x32e   : > { %v3726_v36 = vadd.f32 %v10050_v39, %v3685_v27  ;;  %v3732_v48 = vadd.f32 %v10051_v18, %v3700_v55  ;;  %v10053_v22 = vrot.slane %v10052_v61, 1  ;;  %v10055_v52 = vrot.slane %v10054_v4, 1  ;;  %v10076_v7 = vld [vmem:[#allocation64_spill] sm:$0xff]  ;;  %v10086_v29 = vld [vmem:[#allocation69_spill] sm:$0xff]  ;;  %v10090_v61 = vld [vmem:[#allocation71_spill] sm:$0xff] }
 0x32f   : > { %v10057_v46 = vrot.slane %v10056_v0, 1  ;;  %v3733_v6 = vadd.f32 %v10058_v34, %v3701_v43  ;;  %v3734_v49 = vadd.f32 %v10059_v26, %v3702_v12  ;;  %v10061_v58 = vrot.slane %v10060_v8, 1  ;;  %v10092_v4 = vld [vmem:[#allocation72_spill] sm:$0xff] }
 0x330   : > { %v3749_v32 = vadd.f32 %v10053_v22, %v3708_v30  ;;  %v3750_v62 = vadd.f32 %v10055_v52, %v3709_v14  ;;  %v10063_v53 = vrot.slane %v10062_v57, 1  ;;  %v10065_v15 = vrot.slane %v10064_v17, 1  ;;  %v10074_v30 = vld [vmem:[#allocation63_spill] sm:$0xff] }
 0x331   : > { %v3751_v50 = vadd.f32 %v10057_v46, %v3710_v31  ;;  %v3766_v42 = vadd.f32 %v10061_v58, %v3716_v19  ;;  %v10067_v51 = vrot.slane %v10066_v20, 1  ;;  %v10069_v11 = vrot.slane %v10068_v25, 1  ;;  %v10080_v19 = vld [vmem:[#allocation66_spill] sm:$0xff]  ;;  %v10094_v46 = vld [vmem:[#allocation73_spill] sm:$0xff] }
 0x332   : > { %v3767_v63 = vadd.f32 %v10063_v53, %v3717_v10  ;;  %v3768_v54 = vadd.f32 %v10065_v15, %v3718_v5  ;;  %v10071_v28 = vrot.slane %v10070_v37, 1  ;;  %v10073_v27 = vrot.slane %v10072_v2, 1 }
 0x333   : > { %v3783_v59 = vadd.f32 %v10067_v51, %v3724_v23  ;;  %v3784_v16 = vadd.f32 %v10069_v11, %v3725_v38  ;;  %v10075_v56 = vrot.slane %v10074_v30, 1  ;;  %v10077_v35 = vrot.slane %v10076_v7, 1  ;;  %v10084_v23 = vld [vmem:[#allocation68_spill] sm:$0xff] }
 0x334   : > { %v3785_v41 = vadd.f32 %v10071_v28, %v3726_v36  ;;  %v3800_v60 = vadd.f32 %v10073_v27, %v3732_v48  ;;  %v10079_v31 = vrot.slane %v10078_v9, 2  ;;  %v10081_v24 = vrot.slane %v10080_v19, 2  ;;  %v10088_v36 = vld [vmem:[#allocation70_spill] sm:$0xff] }
 0x335   : > { %v3801_v14 = vadd.f32 %v10075_v56, %v3733_v6  ;;  %v3802_v55 = vadd.f32 %v10077_v35, %v3734_v49  ;;  %v10083_v5 = vrot.slane %v10082_v47, 2  ;;  %v10085_v43 = vrot.slane %v10084_v23, 2  ;;  %v10096_v6 = vld [vmem:[#allocation74_spill] sm:$0xff]  ;;  %v10098_v49 = vld [vmem:[#allocation75_spill] sm:$0xff] }
 0x336   : > { %v3817_v45 = vadd.f32 %v10079_v31, %v3749_v32  ;;  %v3818_v10 = vadd.f32 %v10081_v24, %v3750_v62  ;;  %v10087_v38 = vrot.slane %v10086_v29, 2  ;;  %v10089_v18 = vrot.slane %v10088_v36, 2  ;;  %v10126_v36 = vld [vmem:[#allocation127_spill] sm:$0xff] }
 0x337   : > { %v3819_v13 = vadd.f32 %v10083_v5, %v3751_v50  ;;  %v3834_v12 = vadd.f32 %v10085_v43, %v3766_v42  ;;  %v10091_v22 = vrot.slane %v10090_v61, 2  ;;  %v10093_v52 = vrot.slane %v10092_v4, 2  ;;  %v10100_v42 = vld [vmem:[#allocation76_spill] sm:$0xff] }
 0x338   : > { %v3835_v39 = vadd.f32 %v10087_v38, %v3767_v63  ;;  %v3836_v48 = vadd.f32 %v10089_v18, %v3768_v54  ;;  %v10095_v62 = vrot.slane %v10094_v46, 2  ;;  %v10097_v50 = vrot.slane %v10096_v6, 2  ;;  %v10102_v63 = vld [vmem:[#allocation80_spill] sm:$0xff]  ;;  %v10104_v54 = vld [vmem:[#allocation82_spill] sm:$0xff] }
 0x339   : > { %v3851_v32 = vadd.f32 %v10091_v22, %v3783_v59  ;;  %v3852_v0 = vadd.f32 %v10093_v52, %v3784_v16  ;;  %v10099_v8 = vrot.slane %v10098_v49, 2  ;;  %v10101_v57 = vrot.slane %v10100_v42, 2  ;;  %v10106_v59 = vld [vmem:[#allocation92_spill] sm:$0xff]  ;;  %v10108_v16 = vld [vmem:[#allocation77_spill] sm:$0xff] }
 0x33a   : > { %v3853_v34 = vadd.f32 %v10095_v62, %v3785_v41  ;;  %v3868_v26 = vadd.f32 %v10097_v50, %v3800_v60  ;;  %v10103_v17 = vrot.slane %v10102_v63, 3  ;;  %v10105_v20 = vrot.slane %v10104_v54, 3  ;;  %v10110_v41 = vld [vmem:[#allocation84_spill] sm:$0xff]  ;;  %v10112_v60 = vld [vmem:[#allocation85_spill] sm:$0xff] }
 0x33b   : > { %v3869_v58 = vadd.f32 %v10099_v8, %v3801_v14  ;;  %v3870_v53 = vadd.f32 %v10101_v57, %v3802_v55  ;;  %v10107_v25 = vrot.slane %v10106_v59, 3  ;;  %v10109_v37 = vrot.slane %v10108_v16, 3  ;;  %v10114_v14 = vld [vmem:[#allocation86_spill] sm:$0xff]  ;;  %v10116_v55 = vld [vmem:[#allocation89_spill] sm:$0xff] }
 0x33c   : > { %v3885_v15 = vadd.f32 %v10103_v17, %v3817_v45  ;;  %v3886_v51 = vadd.f32 %v10105_v20, %v3818_v10  ;;  %v10111_v2 = vrot.slane %v10110_v41, 3  ;;  %v10113_v30 = vrot.slane %v10112_v60, 3  ;;  %v10118_v45 = vld [vmem:[#allocation78_spill] sm:$0xff]  ;;  %v10120_v10 = vld [vmem:[#allocation100_spill] sm:$0xff] }
 0x33d   : > { %v3887_v11 = vadd.f32 %v10107_v25, %v3819_v13  ;;  %v3902_v28 = vadd.f32 %v10109_v37, %v3834_v12  ;;  %v10115_v7 = vrot.slane %v10114_v14, 3  ;;  %v10117_v9 = vrot.slane %v10116_v55, 3  ;;  %v10122_v13 = vld [vmem:[#allocation90_spill] sm:$0xff] }
 0x33e   : > { %v3903_v27 = vadd.f32 %v10111_v2, %v3835_v39  ;;  %v3904_v56 = vadd.f32 %v10113_v30, %v3836_v48  ;;  %v10119_v19 = vrot.slane %v10118_v45, 3  ;;  %v10121_v47 = vrot.slane %v10120_v10, 3  ;;  %v10124_v12 = vld [vmem:[#allocation94_spill] sm:$0xff] }
 0x33f   : > { %v3919_v35 = vadd.f32 %v10115_v7, %v3851_v32  ;;  %v3920_v31 = vadd.f32 %v10117_v9, %v3852_v0  ;;  %v10123_v23 = vrot.slane %v10122_v13, 3  ;;  %v10125_v29 = vrot.slane %v10124_v12, 3 }
 0x340   : > { %v3921_v24 = vadd.f32 %v10119_v19, %v3853_v34  ;;  %v3936_v5 = vadd.f32 %v10121_v47, %v3868_v26  ;;  %v3953_v39 = vstv %s8976_s15  ;;  %v3961_v22 = vstv %s8986_s9  ;;  %s9210_s15 = sld [smem:[#allocation8 + $0x6f]]  ;;  %s9220_s9 = sld [smem:[#allocation8 + $0x70]] }
 0x341   : > { %v3937_v43 = vadd.f32 %v10123_v23, %v3869_v58  ;;  %v3938_v38 = vadd.f32 %v10125_v29, %v3870_v53  ;;  %v3954_v18 = vmul.f32 %v3953_v39, %v10126_v36  ;;  %v3955_v48 = vmul.f32 %v3953_v39, %v8827_v44 }
 0x342   : > { %v3956_v61 = vmul.f32 %v3953_v39, %v8832_v40  ;;  %v3962_v32 = vmul.f32 %v3961_v22, %v10126_v36  ;;  %v3963_v4 = vmul.f32 %v3961_v22, %v8827_v44  ;;  %v3964_v52 = vmul.f32 %v3961_v22, %v8832_v40 }
 0x343   : > { %v3969_v0 = vstv %s8996_s5  ;;  %v3957_v46 = vadd.f32 %v3954_v18, %v3885_v15  ;;  %v3958_v62 = vadd.f32 %v3955_v48, %v3886_v51  ;;  %v3977_v57 = vstv %s9022_s7  ;;  %s9224_s5 = sld [smem:[#allocation8 + $0x71]]  ;;  %s9226_s7 = sld [smem:[#allocation8 + $0x72]] }
 0x344   : > { %v3959_v34 = vadd.f32 %v3956_v61, %v3887_v11  ;;  %v3970_v6 = vmul.f32 %v3969_v0, %v10126_v36  ;;  %v3965_v50 = vadd.f32 %v3962_v32, %v3902_v28  ;;  %v3966_v26 = vadd.f32 %v3963_v4, %v3903_v27 }
 0x345   : > { %v3967_v49 = vadd.f32 %v3964_v52, %v3904_v56  ;;  %v3971_v8 = vmul.f32 %v3969_v0, %v8827_v44  ;;  %v3972_v58 = vmul.f32 %v3969_v0, %v8832_v40  ;;  %v3985_v53 = vstv %s9024_s28  ;;  %s9233_s28 = sld [smem:[#allocation8 + $0x73]] }
 0x346   : > { %v3973_v42 = vadd.f32 %v3970_v6, %v3919_v35  ;;  %v3978_v17 = vmul.f32 %v3977_v57, %v10126_v36  ;;  %v3979_v15 = vmul.f32 %v3977_v57, %v8827_v44  ;;  %v3980_v54 = vmul.f32 %v3977_v57, %v8832_v40 }
 0x347   : > { %v3974_v63 = vadd.f32 %v3971_v8, %v3920_v31  ;;  %v3975_v20 = vadd.f32 %v3972_v58, %v3921_v24  ;;  %v3986_v51 = vmul.f32 %v3985_v53, %v10126_v36  ;;  %v3987_v59 = vmul.f32 %v3985_v53, %v8827_v44 }
 0x348   : > { %v3988_v25 = vmul.f32 %v3985_v53, %v8832_v40  ;;  %v3981_v11 = vadd.f32 %v3978_v17, %v3936_v5  ;;  %v3982_v16 = vadd.f32 %v3979_v15, %v3937_v43  ;;  %v3983_v37 = vadd.f32 %v3980_v54, %v3938_v38 }
 0x349   : > { %v4002_v28 = vstv %s9049_s30  ;;  %v3992_v41 = vrot.slane %v3986_v51, 1  ;;  %v3993_v2 = vrot.slane %v3987_v59, 1  ;;  %v4019_v14 = vstv %s9059_s25  ;;  %s9236_s30 = sld [smem:[#allocation8 + $0x74]]  ;;  %s9244_s25 = sld [smem:[#allocation8 + $0x75]] }
 0x34a   : > { %v3994_v27 = vrot.slane %v3988_v25, 1  ;;  %v4003_v60 = vmul.f32 %v4002_v28, %v10126_v36  ;;  %v4004_v30 = vmul.f32 %v4002_v28, %v8827_v44  ;;  %v4005_v56 = vmul.f32 %v4002_v28, %v8832_v40 }
 0x34b   : > { %v4036_v7 = vstv %s9061_s23  ;;  %v3998_v35 = vadd.f32 %v3992_v41, %v3957_v46  ;;  %v3999_v55 = vadd.f32 %v3993_v2, %v3958_v62  ;;  %v4020_v24 = vmul.f32 %v4019_v14, %v10126_v36  ;;  %s9246_s23 = sld [smem:[#allocation8 + $0x76]] }
 0x34c   : > { %v4000_v9 = vadd.f32 %v3994_v27, %v3959_v34  ;;  %v4009_v31 = vrot.slane %v4003_v60, 1  ;;  %v4010_v45 = vrot.slane %v4004_v30, 1  ;;  %v4011_v19 = vrot.slane %v4005_v56, 1 }
 0x34d   : > { %v4021_v10 = vmul.f32 %v4019_v14, %v8827_v44  ;;  %v4022_v5 = vmul.f32 %v4019_v14, %v8832_v40  ;;  %v4037_v13 = vmul.f32 %v4036_v7, %v10126_v36  ;;  %v4038_v23 = vmul.f32 %v4036_v7, %v8827_v44 }
 0x34e   : > { %v4015_v47 = vadd.f32 %v4009_v31, %v3965_v50  ;;  %v4016_v43 = vadd.f32 %v4010_v45, %v3966_v26  ;;  %v4017_v12 = vadd.f32 %v4011_v19, %v3967_v49  ;;  %v4026_v29 = vrot.slane %v4020_v24, 1 }
 0x34f   : > { %v4027_v38 = vrot.slane %v4021_v10, 1  ;;  %v4028_v39 = vrot.slane %v4022_v5, 1  ;;  %v4039_v18 = vmul.f32 %v4036_v7, %v8832_v40  ;;  %v4043_v48 = vrot.slane %v4037_v13, 1 }
 0x350   : > { %v4044_v61 = vrot.slane %v4038_v23, 1  ;;  %v4032_v22 = vadd.f32 %v4026_v29, %v3973_v42  ;;  %v4053_v4 = vstv %s9075_s0  ;;  %v4070_v52 = vstv %s9077_s1  ;;  %s9258_s0 = sld [smem:[#allocation8 + $0x77]]  ;;  %s9260_s1 = sld [smem:[#allocation8 + $0x78]] }
 0x351   : > { %v4033_v32 = vadd.f32 %v4027_v38, %v3974_v63  ;;  %v4034_v0 = vadd.f32 %v4028_v39, %v3975_v20  ;;  %v4045_v46 = vrot.slane %v4039_v18, 1  ;;  %v4049_v62 = vadd.f32 %v4043_v48, %v3981_v11 }
 0x352   : > { %v4050_v34 = vadd.f32 %v4044_v61, %v3982_v16  ;;  %v4054_v6 = vmul.f32 %v4053_v4, %v10126_v36  ;;  %v4055_v50 = vmul.f32 %v4053_v4, %v8827_v44  ;;  %v4056_v26 = vmul.f32 %v4053_v4, %v8832_v40 }
 0x353   : > { %v4071_v49 = vmul.f32 %v4070_v52, %v10126_v36  ;;  %v4051_v8 = vadd.f32 %v4045_v46, %v3983_v37  ;;  %v4072_v58 = vmul.f32 %v4070_v52, %v8827_v44  ;;  %v4073_v42 = vmul.f32 %v4070_v52, %v8832_v40 }
 0x354   : > { %v4087_v57 = vstv %s9084_s2  ;;  %v4060_v53 = vrot.slane %v4054_v6, 2  ;;  %v4061_v63 = vrot.slane %v4055_v50, 2  ;;  %v4062_v17 = vrot.slane %v4056_v26, 2  ;;  %s9270_s2 = sld [smem:[#allocation8 + $0x79]] }
 0x355   : > { %v4077_v15 = vrot.slane %v4071_v49, 2  ;;  %v4078_v54 = vrot.slane %v4072_v58, 2  ;;  %v4079_v20 = vrot.slane %v4073_v42, 2  ;;  %v4088_v51 = vmul.f32 %v4087_v57, %v10126_v36 }
 0x356   : > { %v4089_v59 = vmul.f32 %v4087_v57, %v8827_v44  ;;  %v4066_v25 = vadd.f32 %v4060_v53, %v3998_v35  ;;  %v4067_v11 = vadd.f32 %v4061_v63, %v3999_v55  ;;  %v4068_v16 = vadd.f32 %v4062_v17, %v4000_v9 }
 0x357   : > { %v4083_v37 = vadd.f32 %v4077_v15, %v4015_v47  ;;  %v4084_v28 = vadd.f32 %v4078_v54, %v4016_v43  ;;  %v4085_v41 = vadd.f32 %v4079_v20, %v4017_v12  ;;  %v4090_v2 = vmul.f32 %v4087_v57, %v8832_v40 }
 0x358   : > { %v4094_v27 = vrot.slane %v4088_v51, 2  ;;  %v4095_v60 = vrot.slane %v4089_v59, 2  ;;  %v4104_v30 = vstv %s9092_s22  ;;  %v4121_v56 = vstv %s9096_s14  ;;  %v10127_v51 = vld [vmem:[#allocation88_spill] sm:$0xff]  ;;  %s9280_s22 = sld [smem:[#allocation8 + $0x7a]]  ;;  %s9284_s14 = sld [smem:[#allocation8 + $0x7b]] }
 0x359   : > { %v4138_v14 = vstv %s9098_s6  ;;  %v4096_v7 = vrot.slane %v4090_v2, 2  ;;  %v4105_v45 = vmul.f32 %v4104_v30, %v10126_v36  ;;  %v4106_v35 = vmul.f32 %v4104_v30, %v8827_v44  ;;  %s9286_s6 = sld [smem:[#allocation8 + $0x7c]] }
 0x35a   : > { %v4100_v31 = vadd.f32 %v4094_v27, %v4032_v22  ;;  %v4101_v55 = vadd.f32 %v4095_v60, %v4033_v32  ;;  %v4107_v9 = vmul.f32 %v4104_v30, %v8832_v40  ;;  %v4122_v19 = vmul.f32 %v4121_v56, %v10126_v36 }
 0x35b   : > { %v4123_v24 = vmul.f32 %v4121_v56, %v8827_v44  ;;  %v4102_v10 = vadd.f32 %v4096_v7, %v4034_v0  ;;  %v4111_v47 = vrot.slane %v4105_v45, 2  ;;  %v4112_v5 = vrot.slane %v4106_v35, 2 }
 0x35c   : > { %v4124_v13 = vmul.f32 %v4121_v56, %v8832_v40  ;;  %v4113_v23 = vrot.slane %v4107_v9, 2  ;;  %v4128_v43 = vrot.slane %v4122_v19, 3  ;;  %v4139_v29 = vmul.f32 %v4138_v14, %v10126_v36 }
 0x35d   : > { %v4129_v12 = vrot.slane %v4123_v24, 3  ;;  %v4117_v38 = vadd.f32 %v4111_v47, %v4049_v62  ;;  %v4118_v39 = vadd.f32 %v4112_v5, %v4050_v34  ;;  %v4140_v48 = vmul.f32 %v4138_v14, %v8827_v44 }
 0x35e   : > { %v4130_v18 = vrot.slane %v4124_v13, 3  ;;  %v4119_v61 = vadd.f32 %v4113_v23, %v4051_v8  ;;  %v4134_v22 = vadd.f32 %v4128_v43, %v4066_v25  ;;  %v4141_v4 = vmul.f32 %v4138_v14, %v8832_v40 }
 0x35f   : > { %v4135_v32 = vadd.f32 %v4129_v12, %v4067_v11  ;;  %v4145_v0 = vrot.slane %v4139_v29, 3  ;;  %v4146_v46 = vrot.slane %v4140_v48, 3  ;;  %v4155_v6 = vstv %s9110_s20  ;;  %s9296_s20 = sld [smem:[#allocation8 + $0x7d]] }
 0x360   : > { %v4136_v52 = vadd.f32 %v4130_v18, %v4068_v16  ;;  %v4147_v62 = vrot.slane %v4141_v4, 3  ;;  %v4156_v34 = vmul.f32 %v4155_v6, %v10126_v36  ;;  %v4157_v50 = vmul.f32 %v4155_v6, %v8827_v44 }
 0x361   : > { %v4158_v26 = vmul.f32 %v4155_v6, %v8832_v40  ;;  %v4151_v49 = vadd.f32 %v4145_v0, %v4083_v37  ;;  %v4152_v8 = vadd.f32 %v4146_v46, %v4084_v28  ;;  %v4172_v58 = vstv %s9117_s10  ;;  %s9298_s10 = sld [smem:[#allocation8 + $0x7e]] }
 0x362   : > { %v4202_v42 = vstv %s9119_s21  ;;  %v4153_v57 = vadd.f32 %v4147_v62, %v4085_v41  ;;  %v4162_v53 = vrot.slane %v4156_v34, 3  ;;  %v4163_v63 = vrot.slane %v4157_v50, 3  ;;  %s9306_s21 = sld [smem:[#allocation8 + $0x7f]] }
 0x363   : > { %v4164_v17 = vrot.slane %v4158_v26, 3  ;;  %v4173_v15 = vmul.f32 %v4172_v58, %v10126_v36  ;;  %v4174_v54 = vmul.f32 %v4172_v58, %v8827_v44  ;;  %v4175_v20 = vmul.f32 %v4172_v58, %v8832_v40 }
 0x364   : > { %v4203_v59 = vmul.f32 %v4202_v42, %v10127_v51  ;;  %v4168_v25 = vadd.f32 %v4162_v53, %v4100_v31  ;;  %v4169_v11 = vadd.f32 %v4163_v63, %v4101_v55  ;;  %v4204_v37 = vmul.f32 %v4202_v42, %v8842_v33 }
 0x365   : > { %v4170_v16 = vadd.f32 %v4164_v17, %v4102_v10  ;;  %v4179_v28 = vrot.slane %v4173_v15, 3  ;;  %v4180_v41 = vrot.slane %v4174_v54, 3  ;;  %v4181_v2 = vrot.slane %v4175_v20, 3 }
 0x366   : > { %v4205_v36 = vmul.f32 %v4202_v42, %v8847_v21  ;;  %v4206_v44 = vadd.f32 %v4203_v59, %v4134_v22  ;;  %v4207_v40 = vadd.f32 %v4204_v37, %v4135_v32  ;;  %v4210_v27 = vstv %s9128_s4  ;;  %s9316_s4 = sld [smem:[#allocation8 + $0x80]] }
 0x367   : > { %v4218_v60 = vstv %s9130_s3  ;;  %v4185_v30 = vadd.f32 %v4179_v28, %v4117_v38  ;;  %v4186_v56 = vadd.f32 %v4180_v41, %v4118_v39  ;;  %v4187_v14 = vadd.f32 %v4181_v2, %v4119_v61  ;;  %s9320_s3 = sld [smem:[#allocation8 + $0x81]] }
 0x368   : > { %v4208_v7 = vadd.f32 %v4205_v36, %v4136_v52  ;;  %v4211_v31 = vmul.f32 %v4210_v27, %v10127_v51  ;;  %v4212_v45 = vmul.f32 %v4210_v27, %v8842_v33  ;;  %v4213_v35 = vmul.f32 %v4210_v27, %v8847_v21 }
 0x369   : > { %v4219_v55 = vmul.f32 %v4218_v60, %v10127_v51  ;;  %v4220_v9 = vmul.f32 %v4218_v60, %v8842_v33  ;;  %v4221_v19 = vmul.f32 %v4218_v60, %v8847_v21  ;;  %v4226_v24 = vstv %s9138_s26  ;;  %s9322_s26 = sld [smem:[#allocation8 + $0x82]] }
 0x36a   : > { %v4234_v10 = vstv %s9140_s18  ;;  %v4214_v47 = vadd.f32 %v4211_v31, %v4151_v49  ;;  %v4215_v5 = vadd.f32 %v4212_v45, %v4152_v8  ;;  %v4216_v13 = vadd.f32 %v4213_v35, %v4153_v57  ;;  %s9329_s18 = sld [smem:[#allocation8 + $0x83]] }
 0x36b   : > { %v4222_v23 = vadd.f32 %v4219_v55, %v4168_v25  ;;  %v4223_v43 = vadd.f32 %v4220_v9, %v4169_v11  ;;  %v4224_v12 = vadd.f32 %v4221_v19, %v4170_v16  ;;  %v4227_v29 = vmul.f32 %v4226_v24, %v10127_v51 }
 0x36c   : > { %v4228_v38 = vmul.f32 %v4226_v24, %v8842_v33  ;;  %v4229_v39 = vmul.f32 %v4226_v24, %v8847_v21  ;;  %v4235_v18 = vmul.f32 %v4234_v10, %v10127_v51  ;;  %v4236_v48 = vmul.f32 %v4234_v10, %v8842_v33 }
 0x36d   : > { %v4237_v61 = vmul.f32 %v4234_v10, %v8847_v21  ;;  %v4230_v22 = vadd.f32 %v4227_v29, %v4185_v30  ;;  %v4251_v4 = vstv %s9147_s8  ;;  %v4268_v52 = vstv %s9150_s27  ;;  %s9332_s8 = sld [smem:[#allocation8 + $0x84]]  ;;  %s9340_s27 = sld [smem:[#allocation8 + $0x85]] }
 0x36e   : > { %v4231_v32 = vadd.f32 %v4228_v38, %v4186_v56  ;;  %v4232_v0 = vadd.f32 %v4229_v39, %v4187_v14  ;;  %v4241_v46 = vrot.slane %v4235_v18, 1  ;;  %v4242_v6 = vrot.slane %v4236_v48, 1 }
 0x36f   : > { %v4243_v62 = vrot.slane %v4237_v61, 1  ;;  %v4252_v34 = vmul.f32 %v4251_v4, %v10127_v51  ;;  %v4253_v50 = vmul.f32 %v4251_v4, %v8842_v33  ;;  %v4254_v26 = vmul.f32 %v4251_v4, %v8847_v21 }
 0x370   : > { %v4269_v49 = vmul.f32 %v4268_v52, %v10127_v51  ;;  %v4247_v8 = vadd.f32 %v4241_v46, %v4206_v44  ;;  %v4248_v58 = vadd.f32 %v4242_v6, %v4207_v40  ;;  %v4270_v57 = vmul.f32 %v4268_v52, %v8842_v33 }
 0x371   : > { %v4249_v42 = vadd.f32 %v4243_v62, %v4208_v7  ;;  %v4258_v53 = vrot.slane %v4252_v34, 1  ;;  %v4259_v63 = vrot.slane %v4253_v50, 1  ;;  %v4260_v17 = vrot.slane %v4254_v26, 1 }
 0x372   : > { %v4271_v15 = vmul.f32 %v4268_v52, %v8847_v21  ;;  %v4275_v54 = vrot.slane %v4269_v49, 1  ;;  %v4276_v20 = vrot.slane %v4270_v57, 1  ;;  %v4285_v59 = vstv %s9162_s19  ;;  %s9342_s19 = sld [smem:[#allocation8 + $0x86]] }
 0x373   : > { %v4302_v25 = vstv %s9164_s24  ;;  %v4264_v11 = vadd.f32 %v4258_v53, %v4214_v47  ;;  %v4265_v16 = vadd.f32 %v4259_v63, %v4215_v5  ;;  %v4266_v37 = vadd.f32 %v4260_v17, %v4216_v13  ;;  %s9354_s24 = sld [smem:[#allocation8 + $0x87]] }
 0x374   : > { %v4277_v28 = vrot.slane %v4271_v15, 1  ;;  %v4281_v41 = vadd.f32 %v4275_v54, %v4222_v23  ;;  %v4282_v2 = vadd.f32 %v4276_v20, %v4223_v43  ;;  %v4286_v36 = vmul.f32 %v4285_v59, %v10127_v51 }
 0x375   : > { %v4287_v44 = vmul.f32 %v4285_v59, %v8842_v33  ;;  %v4288_v27 = vmul.f32 %v4285_v59, %v8847_v21  ;;  %v4303_v60 = vmul.f32 %v4302_v25, %v10127_v51  ;;  %v4304_v30 = vmul.f32 %v4302_v25, %v8842_v33 }
 0x376   : > { %v4283_v40 = vadd.f32 %v4277_v28, %v4224_v12  ;;  %v4292_v56 = vrot.slane %v4286_v36, 1  ;;  %v4305_v7 = vmul.f32 %v4302_v25, %v8847_v21  ;;  %v4319_v31 = vstv %s9174_s29  ;;  %s9356_s29 = sld [smem:[#allocation8 + $0x88]] }
 0x377   : > { %v4293_v14 = vrot.slane %v4287_v44, 1  ;;  %v4294_v45 = vrot.slane %v4288_v27, 1  ;;  %v4309_v35 = vrot.slane %v4303_v60, 2  ;;  %v4310_v55 = vrot.slane %v4304_v30, 2 }
 0x378   : > { %v4320_v9 = vmul.f32 %v4319_v31, %v10127_v51  ;;  %v4298_v19 = vadd.f32 %v4292_v56, %v4230_v22  ;;  %v4311_v10 = vrot.slane %v4305_v7, 2  ;;  %v4321_v47 = vmul.f32 %v4319_v31, %v8842_v33 }
 0x379   : > { %v4299_v24 = vadd.f32 %v4293_v14, %v4231_v32  ;;  %v4300_v5 = vadd.f32 %v4294_v45, %v4232_v0  ;;  %v4315_v13 = vadd.f32 %v4309_v35, %v4247_v8  ;;  %v4316_v23 = vadd.f32 %v4310_v55, %v4248_v58 }
 0x37a   : > { %v4322_v43 = vmul.f32 %v4319_v31, %v8847_v21  ;;  %v4317_v12 = vadd.f32 %v4311_v10, %v4249_v42  ;;  %v4326_v29 = vrot.slane %v4320_v9, 2  ;;  %v4327_v38 = vrot.slane %v4321_v47, 2 }
 0x37b   : > { %v4336_v39 = vstv %s9184_s13  ;;  %v4353_v52 = vstv %s9188_s16  ;;  %v4370_v0 = vstv %s9190_s17  ;;  %v4387_v25 = vstv %s9200_s12  ;;  %s9366_s13 = sld [smem:[#allocation8 + $0x89]]  ;;  %s9376_s16 = sld [smem:[#allocation8 + $0x8a]] }
 0x37c   : > { %v4328_v18 = vrot.slane %v4322_v43, 2  ;;  %v4337_v48 = vmul.f32 %v4336_v39, %v10127_v51  ;;  %v4338_v61 = vmul.f32 %v4336_v39, %v8842_v33  ;;  %v4339_v22 = vmul.f32 %v4336_v39, %v8847_v21  ;;  %s9380_s17 = sld [smem:[#allocation8 + $0x8b]]  ;;  %s9382_s12 = sld [smem:[#allocation8 + $0x8c]] }
 0x37d   : > { %v4332_v32 = vadd.f32 %v4326_v29, %v4264_v11  ;;  %v4333_v4 = vadd.f32 %v4327_v38, %v4265_v16  ;;  %v4354_v50 = vmul.f32 %v4353_v52, %v10127_v51  ;;  %v4355_v26 = vmul.f32 %v4353_v52, %v8842_v33 }
 0x37e   : > { %v4334_v46 = vadd.f32 %v4328_v18, %v4266_v37  ;;  %v4343_v6 = vrot.slane %v4337_v48, 2  ;;  %v4344_v62 = vrot.slane %v4338_v61, 2  ;;  %v4345_v34 = vrot.slane %v4339_v22, 2  ;;  %v10129_v22 = vld [vmem:[#allocation93_spill] sm:$0xff] }
 0x37f   : > { %v4356_v49 = vmul.f32 %v4353_v52, %v8847_v21  ;;  %v4371_v8 = vmul.f32 %v4370_v0, %v10127_v51  ;;  %v4372_v53 = vmul.f32 %v4370_v0, %v8842_v33  ;;  %v4360_v63 = vrot.slane %v4354_v50, 2 }
 0x380   : > { %v4349_v58 = vadd.f32 %v4343_v6, %v4281_v41  ;;  %v4350_v42 = vadd.f32 %v4344_v62, %v4282_v2  ;;  %v4351_v57 = vadd.f32 %v4345_v34, %v4283_v40  ;;  %v4361_v17 = vrot.slane %v4355_v26, 2 }
 0x381   : > { %v4362_v15 = vrot.slane %v4356_v49, 2  ;;  %v4373_v54 = vmul.f32 %v4370_v0, %v8847_v21  ;;  %v4377_v20 = vrot.slane %v4371_v8, 3  ;;  %v4378_v59 = vrot.slane %v4372_v53, 3 }
 0x382   : > { %v4404_v11 = vstv %s9202_s11  ;;  %v4366_v16 = vadd.f32 %v4360_v63, %v4298_v19  ;;  %v4367_v37 = vadd.f32 %v4361_v17, %v4299_v24  ;;  %v4388_v44 = vmul.f32 %v4387_v25, %v10127_v51  ;;  %s9392_s11 = sld [smem:[#allocation8 + $0x8d]] }
 0x383   : > { %v4368_v28 = vadd.f32 %v4362_v15, %v4300_v5  ;;  %v4379_v41 = vrot.slane %v4373_v54, 3  ;;  %v4383_v2 = vadd.f32 %v4377_v20, %v4315_v13  ;;  %v4384_v36 = vadd.f32 %v4378_v59, %v4316_v23 }
 0x384   : > { %v4389_v40 = vmul.f32 %v4387_v25, %v8842_v33  ;;  %v4390_v60 = vmul.f32 %v4387_v25, %v8847_v21  ;;  %v4405_v30 = vmul.f32 %v4404_v11, %v10127_v51  ;;  %v4406_v56 = vmul.f32 %v4404_v11, %v8842_v33 }
 0x385   : > { %v4385_v27 = vadd.f32 %v4379_v41, %v4317_v12  ;;  %v4394_v14 = vrot.slane %v4388_v44, 3  ;;  %v4407_v31 = vmul.f32 %v4404_v11, %v8847_v21  ;;  %v4421_v45 = vstv %s9210_s15  ;;  %s9394_s15 = sld [smem:[#allocation8 + $0x8e]] }
 0x386   : > { %v4395_v7 = vrot.slane %v4389_v40, 3  ;;  %v4396_v35 = vrot.slane %v4390_v60, 3  ;;  %v4411_v55 = vrot.slane %v4405_v30, 3  ;;  %v4412_v9 = vrot.slane %v4406_v56, 3 }
 0x387   : > { %v4422_v19 = vmul.f32 %v4421_v45, %v10127_v51  ;;  %v4400_v24 = vadd.f32 %v4394_v14, %v4332_v32  ;;  %v4413_v47 = vrot.slane %v4407_v31, 3  ;;  %v4423_v5 = vmul.f32 %v4421_v45, %v8842_v33  ;;  %v10128_v51 = vld [vmem:[#allocation101_spill] sm:$0xff] }
 0x388   : > { %v4401_v10 = vadd.f32 %v4395_v7, %v4333_v4  ;;  %v4402_v13 = vadd.f32 %v4396_v35, %v4334_v46  ;;  %v4417_v23 = vadd.f32 %v4411_v55, %v4349_v58  ;;  %v4418_v43 = vadd.f32 %v4412_v9, %v4350_v42 }
 0x389   : > { %v4424_v12 = vmul.f32 %v4421_v45, %v8847_v21  ;;  %v4419_v29 = vadd.f32 %v4413_v47, %v4351_v57  ;;  %v4428_v38 = vrot.slane %v4422_v19, 3  ;;  %v4429_v39 = vrot.slane %v4423_v5, 3 }
 0x38a   : > { %v4451_v18 = vstv %s9220_s9  ;;  %v4459_v21 = vstv %s9224_s5  ;;  %v4467_v0 = vstv %s9226_s7  ;;  %v4475_v57 = vstv %s9233_s28  ;;  %s9402_s9 = sld [smem:[#allocation8 + $0x8f]]  ;;  %s10132_s5 = sld [smem:[#allocation19_spill]] }
 0x38b   : > { %v4430_v48 = vrot.slane %v4424_v12, 3  ;;  %v4452_v61 = vmul.f32 %v4451_v18, %v10128_v51  ;;  %v4453_v32 = vmul.f32 %v4451_v18, %v10129_v22  ;;  %v4454_v4 = vmul.f32 %v4451_v18, %v8858_v1  ;;  %s10133_s7 = sld [smem:[#allocation25_spill]]  ;;  %s10134_s28 = sld [smem:[#allocation24_spill]] }
 0x38c   : > { %v4434_v33 = vadd.f32 %v4428_v38, %v4366_v16  ;;  %v4435_v52 = vadd.f32 %v4429_v39, %v4367_v37  ;;  %v4460_v50 = vmul.f32 %v4459_v21, %v10128_v51  ;;  %v4461_v26 = vmul.f32 %v4459_v21, %v10129_v22 }
 0x38d   : > { %v4436_v46 = vadd.f32 %v4430_v48, %v4368_v28  ;;  %v4455_v6 = vadd.f32 %v4452_v61, %v4383_v2  ;;  %v4456_v62 = vadd.f32 %v4453_v32, %v4384_v36  ;;  %v4457_v34 = vadd.f32 %v4454_v4, %v4385_v27 }
 0x38e   : > { %v4462_v49 = vmul.f32 %v4459_v21, %v8858_v1  ;;  %v4468_v8 = vmul.f32 %v4467_v0, %v10128_v51  ;;  %v4469_v58 = vmul.f32 %v4467_v0, %v10129_v22  ;;  %v4470_v42 = vmul.f32 %v4467_v0, %v8858_v1 }
 0x38f   : > { %v4483_v53 = vstv %s9236_s30  ;;  %v4463_v63 = vadd.f32 %v4460_v50, %v4400_v24  ;;  %v4464_v17 = vadd.f32 %v4461_v26, %v4401_v10  ;;  %v4476_v25 = vmul.f32 %v4475_v57, %v10128_v51 }
 0x390   : > { %v4465_v15 = vadd.f32 %v4462_v49, %v4402_v13  ;;  %v4471_v54 = vadd.f32 %v4468_v8, %v4417_v23  ;;  %v4472_v20 = vadd.f32 %v4469_v58, %v4418_v43  ;;  %v4473_v59 = vadd.f32 %v4470_v42, %v4419_v29  ;;  %s5389_s30 = smul.u32 192, %s10132_s5 }
 0x391   : > { %v4477_v11 = vmul.f32 %v4475_v57, %v10129_v22  ;;  %v4478_v16 = vmul.f32 %v4475_v57, %v8858_v1  ;;  %v4484_v37 = vmul.f32 %v4483_v53, %v10128_v51  ;;  %v4485_v28 = vmul.f32 %v4483_v53, %v10129_v22 }
 0x392   : > { %v4486_v41 = vmul.f32 %v4483_v53, %v8858_v1  ;;  %v4479_v2 = vadd.f32 %v4476_v25, %v4434_v33  ;;  %v4500_v44 = vstv %s9244_s25  ;;  %v4517_v40 = vstv %s9246_s23  ;;  %s10136_s23 = smul.u32 12, %s10134_s28 }
 0x393   : > { %v4480_v36 = vadd.f32 %v4477_v11, %v4435_v52  ;;  %v4481_v27 = vadd.f32 %v4478_v16, %v4436_v46  ;;  %v4490_v60 = vrot.slane %v4484_v37, 1  ;;  %v4491_v30 = vrot.slane %v4485_v28, 1 }
 0x394   : > { %v4492_v56 = vrot.slane %v4486_v41, 1  ;;  %v4501_v14 = vmul.f32 %v4500_v44, %v10128_v51  ;;  %v4502_v7 = vmul.f32 %v4500_v44, %v10129_v22  ;;  %v4503_v31 = vmul.f32 %v4500_v44, %v8858_v1 }
 0x395   : > { %v4518_v45 = vmul.f32 %v4517_v40, %v10128_v51  ;;  %v4496_v35 = vadd.f32 %v4490_v60, %v4455_v6  ;;  %v4497_v55 = vadd.f32 %v4491_v30, %v4456_v62  ;;  %v4519_v19 = vmul.f32 %v4517_v40, %v10129_v22 }
 0x396   : > { %v4498_v9 = vadd.f32 %v4492_v56, %v4457_v34  ;;  %v4507_v24 = vrot.slane %v4501_v14, 1  ;;  %v4508_v10 = vrot.slane %v4502_v7, 1  ;;  %v4509_v47 = vrot.slane %v4503_v31, 1 }
 0x397   : > { %v4520_v5 = vmul.f32 %v4517_v40, %v8858_v1  ;;  %v4524_v13 = vrot.slane %v4518_v45, 1  ;;  %v4525_v23 = vrot.slane %v4519_v19, 1  ;;  %v4534_v43 = vstv %s9258_s0  ;;  %s268_s0 = scalar_lea.vmem [#allocation10], %s10136_s23 }
 0x398   : > { %v4551_v12 = vstv %s9260_s1  ;;  %v4513_v29 = vadd.f32 %v4507_v24, %v4463_v63  ;;  %v4514_v38 = vadd.f32 %v4508_v10, %v4464_v17  ;;  %v4515_v39 = vadd.f32 %v4509_v47, %v4465_v15  ;;  %s4996_s1 = sshll.u32 %s268_s0, 4  ;;  %s9441_s1 = int_to_ptr.vmem [resolvable:$true] %s4996_s1 }
 0x399   : > { %v4526_v18 = vrot.slane %v4520_v5, 1  ;;  %v4530_v48 = vadd.f32 %v4524_v13, %v4471_v54  ;;  %v4531_v61 = vadd.f32 %v4525_v23, %v4472_v20  ;;  %v4535_v32 = vmul.f32 %v4534_v43, %v10128_v51 }
 0x39a   : > { %v4536_v4 = vmul.f32 %v4534_v43, %v10129_v22  ;;  %v4537_v52 = vmul.f32 %v4534_v43, %v8858_v1  ;;  %v4552_v21 = vmul.f32 %v4551_v12, %v10128_v51  ;;  %v4553_v0 = vmul.f32 %v4551_v12, %v10129_v22 }
 0x39b   : > { %v4532_v33 = vadd.f32 %v4526_v18, %v4473_v59  ;;  %v4541_v46 = vrot.slane %v4535_v32, 1  ;;  %v4554_v62 = vmul.f32 %v4551_v12, %v8858_v1  ;;  %v4568_v34 = vstv %s9270_s2 }
 0x39c   : > { %v4542_v6 = vrot.slane %v4536_v4, 1  ;;  %v4543_v50 = vrot.slane %v4537_v52, 1  ;;  %v4558_v26 = vrot.slane %v4552_v21, 2  ;;  %v4559_v49 = vrot.slane %v4553_v0, 2 }
 0x39d   : > { %v4569_v8 = vmul.f32 %v4568_v34, %v10128_v51  ;;  %v4547_v58 = vadd.f32 %v4541_v46, %v4479_v2  ;;  %v4560_v57 = vrot.slane %v4554_v62, 2  ;;  %v4570_v53 = vmul.f32 %v4568_v34, %v10129_v22 }
 0x39e   : > { %v4548_v42 = vadd.f32 %v4542_v6, %v4480_v36  ;;  %v4549_v63 = vadd.f32 %v4543_v50, %v4481_v27  ;;  %v4564_v17 = vadd.f32 %v4558_v26, %v4496_v35  ;;  %v4565_v15 = vadd.f32 %v4559_v49, %v4497_v55 }
 0x39f   : > { %v4571_v54 = vmul.f32 %v4568_v34, %v8858_v1  ;;  %v4566_v20 = vadd.f32 %v4560_v57, %v4498_v9  ;;  %v4575_v59 = vrot.slane %v4569_v8, 2  ;;  %v4576_v25 = vrot.slane %v4570_v53, 2 }
 0x3a0   : > { %v4585_v11 = vstv %s9280_s22  ;;  %v4602_v44 = vstv %s9284_s14  ;;  %v4619_v40 = vstv %s9286_s6  ;;  %v4636_v43 = vstv %s9296_s20  ;;  %s10137_s14 = sld [smem:[#allocation132_spill]]  ;;  %s4982_s20 = scalar_lea.sflag [#allocation5], %s10134_s28 }
 0x3a1   : > { %v4577_v16 = vrot.slane %v4571_v54, 2  ;;  %v4586_v37 = vmul.f32 %v4585_v11, %v10128_v51  ;;  %v4587_v28 = vmul.f32 %v4585_v11, %v10129_v22  ;;  %v4588_v41 = vmul.f32 %v4585_v11, %v8858_v1 }
 0x3a2   : > { %v4581_v2 = vadd.f32 %v4575_v59, %v4513_v29  ;;  %v4582_v36 = vadd.f32 %v4576_v25, %v4514_v38  ;;  %v4603_v14 = vmul.f32 %v4602_v44, %v10128_v51  ;;  %v4604_v7 = vmul.f32 %v4602_v44, %v10129_v22 }
 0x3a3   : > { %v4583_v27 = vadd.f32 %v4577_v16, %v4515_v39  ;;  %v4592_v60 = vrot.slane %v4586_v37, 2  ;;  %v4593_v30 = vrot.slane %v4587_v28, 2  ;;  %v4594_v56 = vrot.slane %v4588_v41, 2  ;;  %v10131_v28 = vld [vmem:[#allocation96_spill] sm:$0xff] }
 0x3a4   : > { %v4605_v31 = vmul.f32 %v4602_v44, %v8858_v1  ;;  %v4620_v45 = vmul.f32 %v4619_v40, %v10128_v51  ;;  %v4621_v19 = vmul.f32 %v4619_v40, %v10129_v22  ;;  %v4609_v24 = vrot.slane %v4603_v14, 2 }
 0x3a5   : > { %v4598_v35 = vadd.f32 %v4592_v60, %v4530_v48  ;;  %v4599_v55 = vadd.f32 %v4593_v30, %v4531_v61  ;;  %v4600_v9 = vadd.f32 %v4594_v56, %v4532_v33  ;;  %v4610_v10 = vrot.slane %v4604_v7, 2 }
 0x3a6   : > { %v4611_v47 = vrot.slane %v4605_v31, 2  ;;  %v4622_v5 = vmul.f32 %v4619_v40, %v8858_v1  ;;  %v4626_v13 = vrot.slane %v4620_v45, 3  ;;  %v4627_v23 = vrot.slane %v4621_v19, 3  ;;  %s9439_s6 = scalar_lea.hbm %s10137_s14, %s5389_s30 }
 0x3a7   : > { %v4653_v12 = vstv %s9298_s10  ;;  %v4615_v29 = vadd.f32 %v4609_v24, %v4547_v58  ;;  %v4616_v38 = vadd.f32 %v4610_v10, %v4548_v42  ;;  %v4637_v32 = vmul.f32 %v4636_v43, %v10128_v51  ;;  %s5530_s10 = scalar_lea.vmem %s9441_s1, 192 }
 0x3a8   : > { %v4617_v39 = vadd.f32 %v4611_v47, %v4549_v63  ;;  %v4628_v18 = vrot.slane %v4622_v5, 3  ;;  %v4632_v48 = vadd.f32 %v4626_v13, %v4564_v17  ;;  %v4633_v61 = vadd.f32 %v4627_v23, %v4565_v15  ;;  %p5531_p6 = scmp.ne.s32.totalorder %s9441_s1, %s5530_s10 }
 0x3a9   : > { %v4638_v4 = vmul.f32 %v4636_v43, %v10129_v22  ;;  %v4639_v52 = vmul.f32 %v4636_v43, %v8858_v1  ;;  %v4654_v21 = vmul.f32 %v4653_v12, %v10128_v51  ;;  %v4655_v0 = vmul.f32 %v4653_v12, %v10129_v22 }
 0x3aa   : > { %v4634_v33 = vadd.f32 %v4628_v18, %v4566_v20  ;;  %v4643_v46 = vrot.slane %v4637_v32, 3  ;;  %v4656_v62 = vmul.f32 %v4653_v12, %v8858_v1  ;;  %v4670_v34 = vstv %s9306_s21  ;;  %p5532_p13 = pnand %p5531_p6, %p5730_p8  ;;  %s5617_s21 = smov [#allocation10]  }
 0x3ab   : > { %v4644_v6 = vrot.slane %v4638_v4, 3  ;;  %v4645_v50 = vrot.slane %v4639_v52, 3  ;;  %v4660_v26 = vrot.slane %v4654_v21, 3  ;;  %v4661_v49 = vrot.slane %v4655_v0, 3 }
 0x3ac   : > { %v4671_v8 = vmul.f32 %v4670_v34, %v10128_v51  ;;  %v4649_v58 = vadd.f32 %v4643_v46, %v4581_v2  ;;  %v4662_v57 = vrot.slane %v4656_v62, 3  ;;  %v4672_v53 = vmul.f32 %v4670_v34, %v10129_v22  ;;  %v10130_v51 = vld [vmem:[#allocation95_spill] sm:$0xff]  ;;  %p5533_p11 = pneg %p5532_p13 }
 0x3ad   : > { %v4650_v42 = vadd.f32 %v4644_v6, %v4582_v36  ;;  %v4651_v63 = vadd.f32 %v4645_v50, %v4583_v27  ;;  %v4666_v17 = vadd.f32 %v4660_v26, %v4598_v35  ;;  %v4667_v15 = vadd.f32 %v4661_v49, %v4599_v55 }
 0x3ae   : > { %v4673_v54 = vmul.f32 %v4670_v34, %v8858_v1  ;;  %v4668_v20 = vadd.f32 %v4662_v57, %v4600_v9  ;;  %v4677_v59 = vrot.slane %v4671_v8, 3  ;;  %v4678_v25 = vrot.slane %v4672_v53, 3 }
 0x3af   : > { %v4700_v11 = vstv %s9316_s4  ;;  %v4708_v1 = vstv %s9320_s3  ;;  %v4716_v44 = vstv %s9322_s26  ;;  %v4724_v55 = vstv %s9329_s18  ;;  %s5534_s4 = sshll.u32 %s5617_s21, 4  ;;  %s5535_s4 = int_to_ptr.vmem [resolvable:$false] %s5534_s4 }
 0x3b0   : > { %v4679_v16 = vrot.slane %v4673_v54, 3  ;;  %v4701_v37 = vmul.f32 %v4700_v11, %v10130_v51  ;;  %v4702_v41 = vmul.f32 %v4700_v11, %v10131_v28  ;;  %v4703_v2 = vmul.f32 %v4700_v11, %v8867_v3  ;;  %s5536_s3 = scalar_lea.vmem %s5535_s4, 384  ;;  %p5537_p7 = scmp.lt.s32.totalorder %s9441_s1, %s5535_s4 }
 0x3b1   : > { %v4683_v22 = vadd.f32 %v4677_v59, %v4615_v29  ;;  %v4684_v36 = vadd.f32 %v4678_v25, %v4616_v38  ;;  %v4709_v56 = vmul.f32 %v4708_v1, %v10130_v51  ;;  %v4710_v14 = vmul.f32 %v4708_v1, %v10131_v28  ;;  %p5538_p12 = scmp.lt.s32.totalorder %s5536_s3, %s5530_s10 }
 0x3b2   : > { %v4685_v40 = vadd.f32 %v4679_v16, %v4617_v39  ;;  %v4704_v27 = vadd.f32 %v4701_v37, %v4632_v48  ;;  %v4705_v60 = vadd.f32 %v4702_v41, %v4633_v61  ;;  %v4706_v30 = vadd.f32 %v4703_v2, %v4634_v33 }
 0x3b3   : > { %v4711_v7 = vmul.f32 %v4708_v1, %v8867_v3  ;;  %v4717_v31 = vmul.f32 %v4716_v44, %v10130_v51  ;;  %v4718_v45 = vmul.f32 %v4716_v44, %v10131_v28  ;;  %v4719_v35 = vmul.f32 %v4716_v44, %v8867_v3  ;;  %p5539_p0 = por %p5538_p12, %p5537_p7 }
 0x3b4   : > { %v4732_v9 = vstv %s9332_s8  ;;  %v4712_v19 = vadd.f32 %v4709_v56, %v4649_v58  ;;  %v4713_v24 = vadd.f32 %v4710_v14, %v4650_v42  ;;  %v4725_v23 = vmul.f32 %v4724_v55, %v10130_v51 }
 0x3b5   : > { %v4714_v10 = vadd.f32 %v4711_v7, %v4651_v63  ;;  %v4720_v47 = vadd.f32 %v4717_v31, %v4666_v17  ;;  %v4721_v5 = vadd.f32 %v4718_v45, %v4667_v15  ;;  %v4722_v13 = vadd.f32 %v4719_v35, %v4668_v20  ;;  %p5540_p2 = pnand %p5539_p0, %p5533_p11 }
 0x3b6   : > { %v4726_v43 = vmul.f32 %v4724_v55, %v10131_v28  ;;  %v4727_v12 = vmul.f32 %v4724_v55, %v8867_v3  ;;  %v4733_v29 = vmul.f32 %v4732_v9, %v10130_v51  ;;  %v4734_v38 = vmul.f32 %v4732_v9, %v10131_v28 }
 0x3b7   : > { %v4735_v39 = vmul.f32 %v4732_v9, %v8867_v3  ;;  %v4728_v18 = vadd.f32 %v4725_v23, %v4683_v22  ;;  %v4749_v61 = vstv %s9340_s27  ;;  %v4766_v32 = vstv %s9342_s19 }
 0x3b8   : > { %v4729_v48 = vadd.f32 %v4726_v43, %v4684_v36  ;;  %v4730_v4 = vadd.f32 %v4727_v12, %v4685_v40  ;;  %v4739_v33 = vrot.slane %v4733_v29, 1  ;;  %v4740_v52 = vrot.slane %v4734_v38, 1 }
 0x3b9   : > { %v4741_v21 = vrot.slane %v4735_v39, 1  ;;  %v4750_v0 = vmul.f32 %v4749_v61, %v10130_v51  ;;  %v4751_v46 = vmul.f32 %v4749_v61, %v10131_v28  ;;  %v4752_v6 = vmul.f32 %v4749_v61, %v8867_v3 }
 0x3ba   : > { %v4767_v62 = vmul.f32 %v4766_v32, %v10130_v51  ;;  %v4745_v34 = vadd.f32 %v4739_v33, %v4704_v27  ;;  %v4746_v50 = vadd.f32 %v4740_v52, %v4705_v60  ;;  %v4768_v49 = vmul.f32 %v4766_v32, %v10131_v28 }
 0x3bb   : > { %v4747_v26 = vadd.f32 %v4741_v21, %v4706_v30  ;;  %v4756_v8 = vrot.slane %v4750_v0, 1  ;;  %v4757_v58 = vrot.slane %v4751_v46, 1  ;;  %v4758_v42 = vrot.slane %v4752_v6, 1 }
 0x3bc   : > { %v4769_v57 = vmul.f32 %v4766_v32, %v8867_v3  ;;  %v4773_v53 = vrot.slane %v4767_v62, 1  ;;  %v4774_v63 = vrot.slane %v4768_v49, 1  ;;  %v4783_v17 = vstv %s9354_s24 }
 0x3bd   : > { %v4800_v15 = vstv %s9356_s29  ;;  %v4762_v54 = vadd.f32 %v4756_v8, %v4712_v19  ;;  %v4763_v20 = vadd.f32 %v4757_v58, %v4713_v24  ;;  %v4764_v59 = vadd.f32 %v4758_v42, %v4714_v10 }
 0x3be   : > { %v4775_v25 = vrot.slane %v4769_v57, 1  ;;  %v4779_v11 = vadd.f32 %v4773_v53, %v4720_v47  ;;  %v4780_v16 = vadd.f32 %v4774_v63, %v4721_v5  ;;  %v4784_v37 = vmul.f32 %v4783_v17, %v10130_v51 }
 0x3bf   : > { %v4785_v41 = vmul.f32 %v4783_v17, %v10131_v28  ;;  %v4786_v22 = vmul.f32 %v4783_v17, %v8867_v3  ;;  %v4801_v36 = vmul.f32 %v4800_v15, %v10130_v51  ;;  %v4802_v1 = vmul.f32 %v4800_v15, %v10131_v28 }
 0x3c0   : > { %v4781_v2 = vadd.f32 %v4775_v25, %v4722_v13  ;;  %v4790_v44 = vrot.slane %v4784_v37, 1  ;;  %v4803_v27 = vmul.f32 %v4800_v15, %v8867_v3  ;;  %v4817_v60 = vstv %s9366_s13 }
 0x3c1   : > { %v4791_v40 = vrot.slane %v4785_v41, 1  ;;  %v4792_v30 = vrot.slane %v4786_v22, 1  ;;  %v4807_v56 = vrot.slane %v4801_v36, 2  ;;  %v4808_v14 = vrot.slane %v4802_v1, 2 }
 0x3c2   : > { %v4818_v7 = vmul.f32 %v4817_v60, %v10130_v51  ;;  %v4796_v31 = vadd.f32 %v4790_v44, %v4728_v18  ;;  %v4809_v35 = vrot.slane %v4803_v27, 2  ;;  %v4819_v55 = vmul.f32 %v4817_v60, %v10131_v28 }
 0x3c3   : > { %v4797_v45 = vadd.f32 %v4791_v40, %v4729_v48  ;;  %v4798_v9 = vadd.f32 %v4792_v30, %v4730_v4  ;;  %v4813_v19 = vadd.f32 %v4807_v56, %v4745_v34  ;;  %v4814_v24 = vadd.f32 %v4808_v14, %v4746_v50 }
 0x3c4   : > { %v4820_v10 = vmul.f32 %v4817_v60, %v8867_v3  ;;  %v4815_v47 = vadd.f32 %v4809_v35, %v4747_v26  ;;  %v4824_v5 = vrot.slane %v4818_v7, 2  ;;  %v4825_v13 = vrot.slane %v4819_v55, 2 }
 0x3c5   : > { %v4834_v23 = vstv %s9376_s16  ;;  %v4851_v48 = vstv %s9380_s17  ;;  %v4868_v61 = vstv %s9382_s12  ;;  %v4885_v63 = vstv %s9392_s11 }
 0x3c6   : > { %v4826_v43 = vrot.slane %v4820_v10, 2  ;;  %v4835_v12 = vmul.f32 %v4834_v23, %v10130_v51  ;;  %v4836_v29 = vmul.f32 %v4834_v23, %v10131_v28  ;;  %v4837_v38 = vmul.f32 %v4834_v23, %v8867_v3 }
 0x3c7   : > { %v4830_v39 = vadd.f32 %v4824_v5, %v4762_v54  ;;  %v4831_v18 = vadd.f32 %v4825_v13, %v4763_v20  ;;  %v4852_v21 = vmul.f32 %v4851_v48, %v10130_v51  ;;  %v4853_v0 = vmul.f32 %v4851_v48, %v10131_v28 }
 0x3c8   : > { %v4832_v32 = vadd.f32 %v4826_v43, %v4764_v59  ;;  %v4841_v4 = vrot.slane %v4835_v12, 2  ;;  %v4842_v33 = vrot.slane %v4836_v29, 2  ;;  %v4843_v52 = vrot.slane %v4837_v38, 2 }
 0x3c9   : > { %v4854_v46 = vmul.f32 %v4851_v48, %v8867_v3  ;;  %v4869_v6 = vmul.f32 %v4868_v61, %v10130_v51  ;;  %v4870_v26 = vmul.f32 %v4868_v61, %v10131_v28  ;;  %v4858_v49 = vrot.slane %v4852_v21, 2 }
 0x3ca   : > { %v4847_v62 = vadd.f32 %v4841_v4, %v4779_v11  ;;  %v4848_v34 = vadd.f32 %v4842_v33, %v4780_v16  ;;  %v4849_v50 = vadd.f32 %v4843_v52, %v4781_v2  ;;  %v4859_v8 = vrot.slane %v4853_v0, 2 }
 0x3cb   : > { %v4860_v58 = vrot.slane %v4854_v46, 2  ;;  %v4871_v42 = vmul.f32 %v4868_v61, %v8867_v3  ;;  %v4875_v57 = vrot.slane %v4869_v6, 3  ;;  %v4876_v53 = vrot.slane %v4870_v26, 3 }
 0x3cc   : > { %v4902_v17 = vstv %s9394_s15  ;;  %v4864_v15 = vadd.f32 %v4858_v49, %v4796_v31  ;;  %v4865_v54 = vadd.f32 %v4859_v8, %v4797_v45  ;;  %v4886_v16 = vmul.f32 %v4885_v63, %v10130_v51  ;;  %v5469_v49 = vld [vmem:[%s10133_s7] sm:$0xff] }
 0x3cd   : > { %v4866_v20 = vadd.f32 %v4860_v58, %v4798_v9  ;;  %v4877_v59 = vrot.slane %v4871_v42, 3  ;;  %v4881_v25 = vadd.f32 %v4875_v57, %v4813_v19  ;;  %v4882_v11 = vadd.f32 %v4876_v53, %v4814_v24 }
 0x3ce   : > { %v4887_v37 = vmul.f32 %v4885_v63, %v10131_v28  ;;  %v4888_v2 = vmul.f32 %v4885_v63, %v8867_v3  ;;  %v4903_v22 = vmul.f32 %v4902_v17, %v10130_v51  ;;  %v4904_v36 = vmul.f32 %v4902_v17, %v10131_v28 }
 0x3cf   : > { %v4883_v41 = vadd.f32 %v4877_v59, %v4815_v47  ;;  %v4892_v1 = vrot.slane %v4886_v16, 3  ;;  %v4905_v40 = vmul.f32 %v4902_v17, %v8867_v3  ;;  %v4919_v27 = vstv %s9402_s9 }
 0x3d0   : > { %v4893_v44 = vrot.slane %v4887_v37, 3  ;;  %v4894_v60 = vrot.slane %v4888_v2, 3  ;;  %v4909_v30 = vrot.slane %v4903_v22, 3  ;;  %v4910_v56 = vrot.slane %v4904_v36, 3 }
 0x3d1   : > { %v4920_v14 = vmul.f32 %v4919_v27, %v10130_v51  ;;  %v4898_v7 = vadd.f32 %v4892_v1, %v4830_v39  ;;  %v4911_v45 = vrot.slane %v4905_v40, 3  ;;  %v4921_v35 = vmul.f32 %v4919_v27, %v10131_v28 }
 0x3d2   : > { %v4899_v31 = vadd.f32 %v4893_v44, %v4831_v18  ;;  %v4900_v55 = vadd.f32 %v4894_v60, %v4832_v32  ;;  %v4915_v9 = vadd.f32 %v4909_v30, %v4847_v62  ;;  %v4916_v19 = vadd.f32 %v4910_v56, %v4848_v34 }
 0x3d3   : > { %v4922_v24 = vmul.f32 %v4919_v27, %v8867_v3  ;;  %v4917_v10 = vadd.f32 %v4911_v45, %v4849_v50  ;;  %v4926_v47 = vrot.slane %v4920_v14, 3  ;;  %v4927_v5 = vrot.slane %v4921_v35, 3  ;;  %v5468_v50 = vld [vmem:[%s10133_s7 + $0x8] sm:$0xf] }
 0x3d4   : > { %v4938_v13 = vrot.slane %v4898_v7, 7  ;;  %v4939_v43 = vrot.slane %v4899_v31, 7  ;;  %v4940_v12 = vrot.slane %v4900_v55, 7  ;;  %v4947_v29 = vrot.slane %v4915_v9, 6 }
 0x3d5   : > { %v4928_v23 = vrot.slane %v4922_v24, 3  ;;  %v4932_v38 = vadd.f32 %v4926_v47, %v4864_v15  ;;  %v4933_v51 = vadd.f32 %v4927_v5, %v4865_v54  ;;  %v4948_v39 = vrot.slane %v4916_v19, 6 }
 0x3d6   : > { %v4949_v18 = vrot.slane %v4917_v10, 6  ;;  %v4962_v48 = vsel %vm2675_vm8, %v4881_v25, %v4938_v13  ;;  %v4963_v3 = vsel %vm2675_vm8, %v4882_v11, %v4939_v43  ;;  %v4964_v61 = vsel %vm2675_vm8, %v4883_v41, %v4940_v12 }
 0x3d7   : > { %v4934_v28 = vadd.f32 %v4928_v23, %v4866_v20  ;;  %v4956_v32 = vrot.slane %v4932_v38, 5  ;;  %v4957_v4 = vrot.slane %v4933_v51, 5  ;;  %v4965_v33 = vsel %vm2679_vm9, %v4962_v48, %v4947_v29 }
 0x3d8   : > { %v4966_v52 = vsel %vm2679_vm9, %v4963_v3, %v4948_v39  ;;  %v4967_v0 = vsel %vm2679_vm9, %v4964_v61, %v4949_v18 }
 0x3d9   : > { %v4958_v21 = vrot.slane %v4934_v28, 5  ;;  %v4968_v46 = vsel %vm2683_vm10, %v4965_v33, %v4956_v32  ;;  %v4969_v6 = vsel %vm2683_vm10, %v4966_v52, %v4957_v4 }
 0x3da   : > { %v4973_v34 = vcombine.low %v4968_v46, %v4969_v6 }
 0x3db   : > { %v4970_v62 = vsel %vm2683_vm10, %v4967_v0, %v4958_v21 }
 0x3dc   : > { %v4976_v26 = vadd.f32 %v5468_v50, %v4970_v62  ;;  %v4975_v8 = vadd.f32 %v5469_v49, %v4973_v34 }
 0x3de   : > { %v4978_v58 = vmul.f32 %v5468_v50, %v4976_v26  ;;  %v4977_v42 = vmul.f32 %v5469_v49, %v4975_v8 }
 0x3e0   : > { %4980 = vst [vmem:[%s268_s0 + $0x8] sm:$0xf] %v4978_v58  ;;  %4979 = vst [vmem:[%s268_s0] sm:$0xff] %v4977_v42 }
 0x3e1   : > { %5543 = shalt.err (!%p5540_p2)
}
 0x3e2   : > { %s5544_s26 = scalar_lea.hbm %s9439_s6, 192  ;;  %s5548_s27 = scalar_lea.hbm %s10137_s14, 384 }
 0x3e3   : > { %p5545_p10 = scmp.ne.s32.totalorder %s9439_s6, %s5544_s26  ;;  %p5549_p1 = scmp.lt.u32.totalorder %s9439_s6, %s10137_s14 }
 0x3e4   : > { %p5550_p9 = scmp.lt.u32.totalorder %s5548_s27, %s5544_s26  ;;  %p5552_p6 = scmp.lt.u32.totalorder %s5544_s26, %s9439_s6 }
 0x3e5   : > { %p5546_p5 = pnand %p5545_p10, %p5730_p8 }
 0x3e6   : > { %p5551_p4 = por %p5550_p9, %p5549_p1 }
 0x3e7   : > { %p5547_p3 = pneg %p5546_p5 }
 0x3e8   : > { %p5553_p13 = por %p5552_p6, %p5551_p4 }
 0x3ea   : > { %p5554_p11 = pnand %p5553_p13, %p5547_p3 }
 0x3ec   : > { %5557 = shalt.err (!%p5554_p11)
}
 0x3ed   : > { %5400 = dma.vmem_to_hbm [thread:$0]  (%p5730_p8), %s9441_s1, 192, %s9439_s6, %s4982_s20  }
 0x3ee PF: > { %s10138_s29 = sld [smem:[#allocation15_spill]]  ;;  %s10139_s13 = sld [smem:[#allocation20_spill]] }
 0x3ef   : > { %s10140_s16 = sld [smem:[#allocation18_spill]] }
 0x3f4   : > { %s5008_s17 = sand.u32 1, %s10138_s29   ;;  %p10141_p7 = scmp.ne.s32.totalorder %s10139_s13, 0 }
 0x3f5   : > { %p10142_p12 = scmp.ge.s32.totalorder %s10140_s16, 2  ;;  %s5009_s12 = scalar_lea.sflag [#allocation5], %s5008_s17 }
 0x3f7   : > { %p5414_p0 = pnand %p10142_p12, %p10141_p7 }
 0x3f9   : > { %5587 = dma.done.wait (!%p5414_p0), %s5009_s12, 192  }
 0x3fa   : > { %5589 = vsyncadd (!%p5414_p0), %s5009_s12, 4294967104  ;;  %s10143_s23 = sld [smem:[#allocation21_spill]]  ;;  %s10144_s20 = sld [smem:[#allocation16_spill]] }
 0x3fb   : > { %s10145_s21 = sld [smem:[#allocation17_spill]]  ;;  %s10146_s22 = sld [smem:[#allocation22_spill]] }
 0x400   : > { %p21_p2 = scmp.ge.s32.totalorder %s10143_s23, 4  }
 0x402   :  { %23 = sbr.rel (!%p21_p2) target bundleno = 14 (0xe), region = 94 }
 0x409   :  { %5014 = vsyncpa [#allocation4], 1 }
 0x40a   :  { %5016 = vsyncpa [#allocation4 + $0x1], 1 }
 0x40b   :  { %5017 = vsyncpa [#allocation5], 1 }
 0x40c   :  { %5019 = vsyncpa [#allocation5 + $0x1], 1 }
 0x40d   :  { %5020 = vsyncpa [#allocation6], 1 }
 0x40e   :  { %5022 = vsyncpa [#allocation6 + $0x1], 1 }
 0x40f   :  { %5023 = vsyncpa [#allocation9], 1 }

</bundles_post_ra>
